<compile_context>
chip_gen: v5e
topology: v5e:2x2
jax: 0.10.0
libtpu: 0.0.40
codegen_flags: <defaults>
</compile_context>

<pallas_src>
import numpy as np
import jax
import jax.numpy as jnp
from jax.experimental import pallas as pl
from jax.experimental.pallas import tpu as pltpu

NUM_GRIDS = 20
NUM_SLOTS = 6               # NUM_SLOTS_FOR_PREDICTION
CONV_OC = 4                 # Conv2d(1 -> 4)
H = W = 16                  # input grid spatial size
POOL = 4                    # AdaptiveAvgPool2d((4, 4))
LIN_OUT = 8                 # Linear(4*4*4 -> 8)
HIDDEN = 8                  # LSTM hidden size
HW = H * W                  # 256 (lane-dense spatial)
CONV_COLS = CONV_OC * HW    # 1024 conv-output columns per slot
GRP = CONV_OC * POOL * POOL  # 64 pooled features per slot (= Linear input dim)
GATES = 4 * HIDDEN          # 32
TB_MAX = 512                # batch-tile cap (v7x VMEM budget)


def _sigmoid(z):
    # exp rides the EUP slot; exact reciprocal (review: approx error would compound
    # over the 6-step recurrence and exact 1/x is still cheap off the VALU).
    return pl.reciprocal(1.0 + jnp.exp(-z), approx=False)


def lstm_cnn_kernel(x_ref, convmat_ref, convb_ref, w1_ref, lin_b_ref,
                    w2_ref, b_lstm_ref, w_hh_t_ref, out_w_t_ref, out_b_ref,
                    out_ref):
    f32 = jnp.float32
    mxu_dtype = convmat_ref.dtype

    # ---- per-slot conv(3x3,1->4,pad=1) as one MXU matmul + bias + ReLU,
    #      then the 16:1 average pool as 3 aligned lane-fold adds (VPU) ----
    pooled = []
    for s in range(NUM_SLOTS):
        img = x_ref[:, s * HW:(s + 1) * HW].astype(mxu_dtype)            # (TB, 256)
        conv = jnp.dot(img, convmat_ref[s],
                       preferred_element_type=f32)                       # (TB, 1024)
        conv = jnp.maximum(conv + convb_ref[s:s + 1, :], 0.0)            # bias + ReLU
        # columns ordered c = p*64 + g (p = pool-window pixel, g = oc*16+py*4+px):
        # folding in half 3x leaves, at lane a*64+g (a in {0,1}), the sum over the
        # pool-window pixels p == a (mod 2); W1 rows finish the sum and apply /16.
        t = conv[:, :512] + conv[:, 512:]
        t = t[:, :256] + t[:, 256:]
        pooled.append((t[:, :128] + t[:, 128:]).astype(mxu_dtype))       # (TB, 128)

    pooled_all = jnp.concatenate(pooled, axis=-1)                        # (TB, 768)

    # ---- pool scaling + Linear(64->8) for all 6 slots: one block-diagonal matmul ----
    feats = jnp.maximum(
        jnp.dot(pooled_all, w1_ref[...], preferred_element_type=f32)
        + lin_b_ref[...], 0.0)                                           # (TB, 48)

    # ---- LSTM input projection, lane-stacked over the 6 time steps ----
    gates_in = (jnp.dot(feats, w2_ref[...], preferred_element_type=f32)
                + b_lstm_ref[...])                                       # (TB, 192)

    # ---- LSTM recurrence (hidden=8, PyTorch gate order i,f,g,o, h0=c0=0) ----
    w_hh = w_hh_t_ref[...]                                               # (8, 32)
    h = None
    c = None
    for s in range(NUM_SLOTS):
        gate = gates_in[:, s * GATES:(s + 1) * GATES]                    # (TB, 32)
        if s > 0:
            # h @ w_hh^T as 8 broadcast FMAs on the VPU (keeps the MXU off the
            # serial critical path).
            for k in range(HIDDEN):
                gate = gate + h[:, k:k + 1] * w_hh[k:k + 1, :]
        i_g = _sigmoid(gate[:, 0:HIDDEN])
        f_g = _sigmoid(gate[:, HIDDEN:2 * HIDDEN])
        g_g = jnp.tanh(gate[:, 2 * HIDDEN:3 * HIDDEN])
        o_g = _sigmoid(gate[:, 3 * HIDDEN:4 * HIDDEN])
        c = i_g * g_g if s == 0 else f_g * c + i_g * g_g
        h = o_g * jnp.tanh(c)

    # ---- self.output(torch.squeeze(hn)) : Linear(8 -> 20) on the final hidden ----
    out_ref[...] = (jnp.dot(h, out_w_t_ref[...], preferred_element_type=f32)
                    + out_b_ref[...])


def prepare_params(params):
    """One-time parameter re-layout (conv-as-matmul, pool/linear/LSTM block-diagonals)."""
    f32 = jnp.float32
    cdt = jnp.bfloat16

    # ---- conv-as-matmul matrix (pure weight re-layout, data independent) ----
    IY = np.arange(H).reshape(H, 1, 1, 1)
    IX = np.arange(W).reshape(1, W, 1, 1)
    OY = np.arange(H).reshape(1, 1, H, 1)
    OX = np.arange(W).reshape(1, 1, 1, W)
    KY = IY - OY + 1
    KX = IX - OX + 1
    valid = (KY >= 0) & (KY < 3) & (KX >= 0) & (KX < 3)
    kidx = np.where(valid, KY * 3 + KX, 0).reshape(HW, HW)               # static index map
    vmask = valid.reshape(HW, HW).astype(np.float32)

    w9 = params["conv_w"].reshape(NUM_SLOTS, CONV_OC, 9).astype(f32)
    convmat = w9[:, :, kidx] * jnp.asarray(vmask)[None, None]            # (6,4,256,256)
    convmat = convmat.transpose(0, 2, 1, 3).reshape(NUM_SLOTS, HW, CONV_COLS)
    # reorder output columns to c = p*64 + g with g = oc*16 + py*4 + px (pool group)
    # and p = wy*4 + wx (pixel within the 4x4 pool window):
    c = np.arange(CONV_COLS)
    p, g = c // GRP, c % GRP
    oc, py, px = g // 16, (g % 16) // 4, g % 4
    wy, wx = p // 4, p % 4
    old_col = oc * HW + (py * POOL + wy) * W + (px * POOL + wx)
    convmat = convmat[:, :, old_col].astype(cdt)                         # (6, 256, 1024)
    convb = params["conv_b"].astype(f32)[:, oc]                          # (6, 1024)

    eye = jnp.eye(NUM_SLOTS, dtype=f32)

    # ---- pool(/16) + Linear(64->8), all slots: block-diagonal W1 (768, 48) ----
    blk = jnp.transpose(params["lin_w"].astype(f32), (0, 2, 1)) / 16.0   # (6, 64, 8)
    blk = jnp.concatenate([blk, blk], axis=1)                            # (6, 128, 8): rows a*64+g
    W1 = (blk[:, :, None, :] * eye[:, None, :, None]).reshape(
        NUM_SLOTS * 2 * GRP, NUM_SLOTS * LIN_OUT).astype(cdt)            # (768, 48)
    lin_b = params["lin_b"].astype(f32).reshape(1, NUM_SLOTS * LIN_OUT)  # (1, 48)

    # ---- LSTM input projection, all steps: block-diagonal W2 (48, 192), f32 ----
    w_ih_t = params["w_ih"].T.astype(f32)                                # (8, 32)
    W2 = (w_ih_t[None, :, None, :] * eye[:, None, :, None]).reshape(
        NUM_SLOTS * LIN_OUT, NUM_SLOTS * GATES)                          # (48, 192)
    b_lstm = jnp.tile((params["b_ih"] + params["b_hh"]).astype(f32),
                      NUM_SLOTS).reshape(1, NUM_SLOTS * GATES)           # (1, 192)

    return dict(
        convmat=convmat, convb=convb, W1=W1, lin_b=lin_b, W2=W2, b_lstm=b_lstm,
        w_hh_t=params["w_hh"].T.astype(f32),                             # (8, 32)
        out_w_t=params["out_w"].T.astype(f32),                           # (8, 20)
        out_b=params["out_b"].astype(f32).reshape(1, NUM_GRIDS),         # (1, 20)
    )


def lstm_cnn_forward(x, prepped):
    """x: (B, SEQ>=6, H, W) float.  Returns (B, NUM_GRIDS) float32."""
    f32 = jnp.float32
    B = x.shape[0]

    # (B, SEQ, H, W) -> (B, 6*256): lane-dense, pure reshape (no host transpose);
    # the bf16 cast happens inside the kernel.
    xs = x[:, :NUM_SLOTS].reshape(B, NUM_SLOTS * HW).astype(f32)

    # Batch tile: pick the tile count first (minimal padding waste), cap TB at
    # TB_MAX for the v7x VMEM budget, and keep >= 2 grid steps once B is large
    # enough that both v7x TensorCores should get work.
    n_tiles = max(pl.cdiv(B, TB_MAX), 2 if B >= 256 else 1)
    TB = ((pl.cdiv(B, n_tiles) + 7) // 8) * 8
    B_pad = TB * n_tiles
    if B_pad != B:
        xs = jnp.pad(xs, ((0, B_pad - B), (0, 0)))

    in_specs = [
        pl.BlockSpec((TB, NUM_SLOTS * HW), lambda i: (i, 0)),                     # x (batch-tiled)
        pl.BlockSpec((NUM_SLOTS, HW, CONV_COLS), lambda i: (0, 0, 0)),            # convmat
        pl.BlockSpec((NUM_SLOTS, CONV_COLS), lambda i: (0, 0)),                   # convb
        pl.BlockSpec((NUM_SLOTS * 2 * GRP, NUM_SLOTS * LIN_OUT), lambda i: (0, 0)),  # W1
        pl.BlockSpec((1, NUM_SLOTS * LIN_OUT), lambda i: (0, 0)),                 # lin_b
        pl.BlockSpec((NUM_SLOTS * LIN_OUT, NUM_SLOTS * GATES), lambda i: (0, 0)),  # W2
        pl.BlockSpec((1, NUM_SLOTS * GATES), lambda i: (0, 0)),                   # b_lstm
        pl.BlockSpec((HIDDEN, GATES), lambda i: (0, 0)),                          # w_hh_t
        pl.BlockSpec((HIDDEN, NUM_GRIDS), lambda i: (0, 0)),                      # out_w_t
        pl.BlockSpec((1, NUM_GRIDS), lambda i: (0, 0)),                           # out_b
    ]
    out = pl.pallas_call(
        lstm_cnn_kernel,
        out_shape=jax.ShapeDtypeStruct((B_pad, NUM_GRIDS), f32),
        grid=(n_tiles,),
        in_specs=in_specs,
        out_specs=pl.BlockSpec((TB, NUM_GRIDS), lambda i: (i, 0)),
        compiler_params=pltpu.CompilerParams(
            dimension_semantics=("parallel",),
            vmem_limit_bytes=48 * 1024 * 1024),
    )(xs, prepped["convmat"], prepped["convb"], prepped["W1"], prepped["lin_b"],
      prepped["W2"], prepped["b_lstm"], prepped["w_hh_t"], prepped["out_w_t"],
      prepped["out_b"])
    return out[:B]


def reference_forward(x, params):
    """Pure-JAX reference mirroring the PyTorch forward exactly (f32)."""
    B = x.shape[0]
    feats = []
    for s in range(NUM_SLOTS):
        img = x[:, s][:, None, :, :].astype(jnp.float32)                 # (B,1,H,W)
        conv = jax.lax.conv_general_dilated(
            img, params["conv_w"][s], window_strides=(1, 1),
            padding=((1, 1), (1, 1)),
            dimension_numbers=("NCHW", "OIHW", "NCHW"))
        conv = jax.nn.relu(conv + params["conv_b"][s][None, :, None, None])
        pooled = conv.reshape(B, CONV_OC, POOL, H // POOL, POOL, W // POOL).mean(axis=(3, 5))
        flat = pooled.reshape(B, CONV_OC * POOL * POOL)
        feats.append(jax.nn.relu(flat @ params["lin_w"][s].T + params["lin_b"][s]))
    h = jnp.zeros((B, HIDDEN), jnp.float32)
    c = jnp.zeros((B, HIDDEN), jnp.float32)
    for s in range(NUM_SLOTS):
        g = (feats[s] @ params["w_ih"].T + params["b_ih"]
             + h @ params["w_hh"].T + params["b_hh"])
        i_g = jax.nn.sigmoid(g[:, 0:HIDDEN])
        f_g = jax.nn.sigmoid(g[:, HIDDEN:2 * HIDDEN])
        g_g = jnp.tanh(g[:, 2 * HIDDEN:3 * HIDDEN])
        o_g = jax.nn.sigmoid(g[:, 3 * HIDDEN:4 * HIDDEN])
        c = f_g * c + i_g * g_g
        h = o_g * jnp.tanh(c)
    return h @ params["out_w"].T + params["out_b"]


if __name__ == "__main__":
    key = jax.random.PRNGKey(0)
    ks = jax.random.split(key, 11)

    def init(k, shape, scale=0.1):
        return scale * jax.random.normal(k, shape, dtype=jnp.float32)

    params = {
        "conv_w": init(ks[0], (NUM_SLOTS, CONV_OC, 1, 3, 3)),
        "conv_b": init(ks[1], (NUM_SLOTS, CONV_OC)),
        "lin_w": init(ks[2], (NUM_SLOTS, LIN_OUT, CONV_OC * POOL * POOL)),
        "lin_b": init(ks[3], (NUM_SLOTS, LIN_OUT)),
        "w_ih": init(ks[4], (4 * HIDDEN, LIN_OUT)),
        "w_hh": init(ks[5], (4 * HIDDEN, HIDDEN)),
        "b_ih": init(ks[6], (4 * HIDDEN,)),
        "b_hh": init(ks[7], (4 * HIDDEN,)),
        "out_w": init(ks[8], (NUM_GRIDS, HIDDEN)),
        "out_b": init(ks[9], (NUM_GRIDS,)),
    }

    x = jax.random.normal(ks[10], (2, NUM_SLOTS, H, W), dtype=jnp.float32)

    prepped = prepare_params(params)           # one-time parameter re-layout
    out = jax.jit(lstm_cnn_forward)(x, prepped)
    out = jax.block_until_ready(out)

    ref = reference_forward(x, params)
    assert out.shape == (2, NUM_GRIDS), out.shape
    # bf16 MXU operands for the conv / pool-linear matmuls => loosened tolerance.
    assert bool(jnp.allclose(out, ref, atol=2e-2, rtol=2e-2)), "mismatch vs reference"
    print("KERNEL_OK")
</pallas_src>

<mosaic_0001>
module attributes {stable_mosaic.version = 11 : i64} {
  func.func @lstm_cnn_kernel(%arg0: i32, %arg1: memref<8x1536xf32, #tpu.memory_space<vmem>>, %arg2: memref<6x256x1024xbf16, #tpu.memory_space<vmem>>, %arg3: memref<6x1024xf32, #tpu.memory_space<vmem>>, %arg4: memref<768x48xbf16, #tpu.memory_space<vmem>>, %arg5: memref<1x48xf32, #tpu.memory_space<vmem>>, %arg6: memref<48x192xf32, #tpu.memory_space<vmem>>, %arg7: memref<1x192xf32, #tpu.memory_space<vmem>>, %arg8: memref<8x32xf32, #tpu.memory_space<vmem>>, %arg9: memref<8x20xf32, #tpu.memory_space<vmem>>, %arg10: memref<1x20xf32, #tpu.memory_space<vmem>>, %arg11: memref<8x20xf32, #tpu.memory_space<vmem>>) attributes {dimension_semantics = [#tpu.dimension_semantics<parallel>], iteration_bounds = array<i64: 1>, scalar_prefetch = 0 : i64, scratch_operands = 0 : i64, tpu.core_type = #tpu.core_type<tc>, window_params = [{transform_indices = @transform_0, window_bounds = array<i64: 8, 1536>}, {pipeline_mode = #tpu.pipeline_mode<synchronous>, transform_indices = @transform_1, window_bounds = array<i64: 6, 256, 1024>}, {pipeline_mode = #tpu.pipeline_mode<synchronous>, transform_indices = @transform_2, window_bounds = array<i64: 6, 1024>}, {pipeline_mode = #tpu.pipeline_mode<synchronous>, transform_indices = @transform_3, window_bounds = array<i64: 768, 48>}, {pipeline_mode = #tpu.pipeline_mode<synchronous>, transform_indices = @transform_4, window_bounds = array<i64: 1, 48>}, {pipeline_mode = #tpu.pipeline_mode<synchronous>, transform_indices = @transform_5, window_bounds = array<i64: 48, 192>}, {pipeline_mode = #tpu.pipeline_mode<synchronous>, transform_indices = @transform_6, window_bounds = array<i64: 1, 192>}, {pipeline_mode = #tpu.pipeline_mode<synchronous>, transform_indices = @transform_7, window_bounds = array<i64: 8, 32>}, {pipeline_mode = #tpu.pipeline_mode<synchronous>, transform_indices = @transform_8, window_bounds = array<i64: 8, 20>}, {pipeline_mode = #tpu.pipeline_mode<synchronous>, transform_indices = @transform_9, window_bounds = array<i64: 1, 20>}, {transform_indices = @transform_10, window_bounds = array<i64: 8, 20>}]} {
    %c0 = arith.constant 0 : index
    %c0_0 = arith.constant 0 : index
    %0 = vector.load %arg1[%c0, %c0_0] : memref<8x1536xf32, #tpu.memory_space<vmem>>, vector<8x256xf32>
    %1 = arith.truncf %0 : vector<8x256xf32> to vector<8x256xbf16>
    %c0_1 = arith.constant 0 : index
    %c0_2 = arith.constant 0 : index
    %c0_3 = arith.constant 0 : index
    %2 = vector.load %arg2[%c0_1, %c0_2, %c0_3] : memref<6x256x1024xbf16, #tpu.memory_space<vmem>>, vector<1x256x1024xbf16>
    %3 = vector.shape_cast %2 : vector<1x256x1024xbf16> to vector<256x1024xbf16>
    %cst = arith.constant dense<0.000000e+00> : vector<8x1024xf32>
    %4 = tpu.matmul %1, %3, %cst {dimension_numbers = #tpu.dot_dimension_numbers<[1], [0], [0], [1], [0, 0, 1, 1], [], []>} : vector<8x256xbf16>, vector<256x1024xbf16>, vector<8x1024xf32> -> vector<8x1024xf32>
    %c0_4 = arith.constant 0 : index
    %c0_5 = arith.constant 0 : index
    %5 = vector.load %arg3[%c0_4, %c0_5] : memref<6x1024xf32, #tpu.memory_space<vmem>>, vector<1x1024xf32>
    %6 = vector.broadcast %5 : vector<1x1024xf32> to vector<8x1024xf32>
    %7 = arith.addf %4, %6 : vector<8x1024xf32>
    %cst_6 = arith.constant 0.000000e+00 : f32
    %8 = vector.broadcast %cst_6 : f32 to vector<8x1024xf32>
    %9 = arith.maximumf %7, %8 : vector<8x1024xf32>
    %10 = vector.extract_strided_slice %9 {offsets = [0, 0], sizes = [8, 512], strides = [1, 1]} : vector<8x1024xf32> to vector<8x512xf32>
    %11 = vector.extract_strided_slice %9 {offsets = [0, 512], sizes = [8, 512], strides = [1, 1]} : vector<8x1024xf32> to vector<8x512xf32>
    %12 = arith.addf %10, %11 : vector<8x512xf32>
    %13 = vector.extract_strided_slice %12 {offsets = [0, 0], sizes = [8, 256], strides = [1, 1]} : vector<8x512xf32> to vector<8x256xf32>
    %14 = vector.extract_strided_slice %12 {offsets = [0, 256], sizes = [8, 256], strides = [1, 1]} : vector<8x512xf32> to vector<8x256xf32>
    %15 = arith.addf %13, %14 : vector<8x256xf32>
    %16 = vector.extract_strided_slice %15 {offsets = [0, 0], sizes = [8, 128], strides = [1, 1]} : vector<8x256xf32> to vector<8x128xf32>
    %17 = vector.extract_strided_slice %15 {offsets = [0, 128], sizes = [8, 128], strides = [1, 1]} : vector<8x256xf32> to vector<8x128xf32>
    %18 = arith.addf %16, %17 : vector<8x128xf32>
    %19 = arith.truncf %18 : vector<8x128xf32> to vector<8x128xbf16>
    %c0_7 = arith.constant 0 : index
    %c256 = arith.constant 256 : index
    %20 = vector.load %arg1[%c0_7, %c256] : memref<8x1536xf32, #tpu.memory_space<vmem>>, vector<8x256xf32>
    %21 = arith.truncf %20 : vector<8x256xf32> to vector<8x256xbf16>
    %c1 = arith.constant 1 : index
    %c0_8 = arith.constant 0 : index
    %c0_9 = arith.constant 0 : index
    %22 = vector.load %arg2[%c1, %c0_8, %c0_9] : memref<6x256x1024xbf16, #tpu.memory_space<vmem>>, vector<1x256x1024xbf16>
    %23 = vector.shape_cast %22 : vector<1x256x1024xbf16> to vector<256x1024xbf16>
    %cst_10 = arith.constant dense<0.000000e+00> : vector<8x1024xf32>
    %24 = tpu.matmul %21, %23, %cst_10 {dimension_numbers = #tpu.dot_dimension_numbers<[1], [0], [0], [1], [0, 0, 1, 1], [], []>} : vector<8x256xbf16>, vector<256x1024xbf16>, vector<8x1024xf32> -> vector<8x1024xf32>
    %c1_11 = arith.constant 1 : index
    %c0_12 = arith.constant 0 : index
    %25 = vector.load %arg3[%c1_11, %c0_12] : memref<6x1024xf32, #tpu.memory_space<vmem>>, vector<1x1024xf32>
    %26 = vector.broadcast %25 : vector<1x1024xf32> to vector<8x1024xf32>
    %27 = arith.addf %24, %26 : vector<8x1024xf32>
    %cst_13 = arith.constant 0.000000e+00 : f32
    %28 = vector.broadcast %cst_13 : f32 to vector<8x1024xf32>
    %29 = arith.maximumf %27, %28 : vector<8x1024xf32>
    %30 = vector.extract_strided_slice %29 {offsets = [0, 0], sizes = [8, 512], strides = [1, 1]} : vector<8x1024xf32> to vector<8x512xf32>
    %31 = vector.extract_strided_slice %29 {offsets = [0, 512], sizes = [8, 512], strides = [1, 1]} : vector<8x1024xf32> to vector<8x512xf32>
    %32 = arith.addf %30, %31 : vector<8x512xf32>
    %33 = vector.extract_strided_slice %32 {offsets = [0, 0], sizes = [8, 256], strides = [1, 1]} : vector<8x512xf32> to vector<8x256xf32>
    %34 = vector.extract_strided_slice %32 {offsets = [0, 256], sizes = [8, 256], strides = [1, 1]} : vector<8x512xf32> to vector<8x256xf32>
    %35 = arith.addf %33, %34 : vector<8x256xf32>
    %36 = vector.extract_strided_slice %35 {offsets = [0, 0], sizes = [8, 128], strides = [1, 1]} : vector<8x256xf32> to vector<8x128xf32>
    %37 = vector.extract_strided_slice %35 {offsets = [0, 128], sizes = [8, 128], strides = [1, 1]} : vector<8x256xf32> to vector<8x128xf32>
    %38 = arith.addf %36, %37 : vector<8x128xf32>
    %39 = arith.truncf %38 : vector<8x128xf32> to vector<8x128xbf16>
    %c0_14 = arith.constant 0 : index
    %c512 = arith.constant 512 : index
    %40 = vector.load %arg1[%c0_14, %c512] : memref<8x1536xf32, #tpu.memory_space<vmem>>, vector<8x256xf32>
    %41 = arith.truncf %40 : vector<8x256xf32> to vector<8x256xbf16>
    %c2 = arith.constant 2 : index
    %c0_15 = arith.constant 0 : index
    %c0_16 = arith.constant 0 : index
    %42 = vector.load %arg2[%c2, %c0_15, %c0_16] : memref<6x256x1024xbf16, #tpu.memory_space<vmem>>, vector<1x256x1024xbf16>
    %43 = vector.shape_cast %42 : vector<1x256x1024xbf16> to vector<256x1024xbf16>
    %cst_17 = arith.constant dense<0.000000e+00> : vector<8x1024xf32>
    %44 = tpu.matmul %41, %43, %cst_17 {dimension_numbers = #tpu.dot_dimension_numbers<[1], [0], [0], [1], [0, 0, 1, 1], [], []>} : vector<8x256xbf16>, vector<256x1024xbf16>, vector<8x1024xf32> -> vector<8x1024xf32>
    %c2_18 = arith.constant 2 : index
    %c0_19 = arith.constant 0 : index
    %45 = vector.load %arg3[%c2_18, %c0_19] : memref<6x1024xf32, #tpu.memory_space<vmem>>, vector<1x1024xf32>
    %46 = vector.broadcast %45 : vector<1x1024xf32> to vector<8x1024xf32>
    %47 = arith.addf %44, %46 : vector<8x1024xf32>
    %cst_20 = arith.constant 0.000000e+00 : f32
    %48 = vector.broadcast %cst_20 : f32 to vector<8x1024xf32>
    %49 = arith.maximumf %47, %48 : vector<8x1024xf32>
    %50 = vector.extract_strided_slice %49 {offsets = [0, 0], sizes = [8, 512], strides = [1, 1]} : vector<8x1024xf32> to vector<8x512xf32>
    %51 = vector.extract_strided_slice %49 {offsets = [0, 512], sizes = [8, 512], strides = [1, 1]} : vector<8x1024xf32> to vector<8x512xf32>
    %52 = arith.addf %50, %51 : vector<8x512xf32>
    %53 = vector.extract_strided_slice %52 {offsets = [0, 0], sizes = [8, 256], strides = [1, 1]} : vector<8x512xf32> to vector<8x256xf32>
    %54 = vector.extract_strided_slice %52 {offsets = [0, 256], sizes = [8, 256], strides = [1, 1]} : vector<8x512xf32> to vector<8x256xf32>
    %55 = arith.addf %53, %54 : vector<8x256xf32>
    %56 = vector.extract_strided_slice %55 {offsets = [0, 0], sizes = [8, 128], strides = [1, 1]} : vector<8x256xf32> to vector<8x128xf32>
    %57 = vector.extract_strided_slice %55 {offsets = [0, 128], sizes = [8, 128], strides = [1, 1]} : vector<8x256xf32> to vector<8x128xf32>
    %58 = arith.addf %56, %57 : vector<8x128xf32>
    %59 = arith.truncf %58 : vector<8x128xf32> to vector<8x128xbf16>
    %c0_21 = arith.constant 0 : index
    %c768 = arith.constant 768 : index
    %60 = vector.load %arg1[%c0_21, %c768] : memref<8x1536xf32, #tpu.memory_space<vmem>>, vector<8x256xf32>
    %61 = arith.truncf %60 : vector<8x256xf32> to vector<8x256xbf16>
    %c3 = arith.constant 3 : index
    %c0_22 = arith.constant 0 : index
    %c0_23 = arith.constant 0 : index
    %62 = vector.load %arg2[%c3, %c0_22, %c0_23] : memref<6x256x1024xbf16, #tpu.memory_space<vmem>>, vector<1x256x1024xbf16>
    %63 = vector.shape_cast %62 : vector<1x256x1024xbf16> to vector<256x1024xbf16>
    %cst_24 = arith.constant dense<0.000000e+00> : vector<8x1024xf32>
    %64 = tpu.matmul %61, %63, %cst_24 {dimension_numbers = #tpu.dot_dimension_numbers<[1], [0], [0], [1], [0, 0, 1, 1], [], []>} : vector<8x256xbf16>, vector<256x1024xbf16>, vector<8x1024xf32> -> vector<8x1024xf32>
    %c3_25 = arith.constant 3 : index
    %c0_26 = arith.constant 0 : index
    %65 = vector.load %arg3[%c3_25, %c0_26] : memref<6x1024xf32, #tpu.memory_space<vmem>>, vector<1x1024xf32>
    %66 = vector.broadcast %65 : vector<1x1024xf32> to vector<8x1024xf32>
    %67 = arith.addf %64, %66 : vector<8x1024xf32>
    %cst_27 = arith.constant 0.000000e+00 : f32
    %68 = vector.broadcast %cst_27 : f32 to vector<8x1024xf32>
    %69 = arith.maximumf %67, %68 : vector<8x1024xf32>
    %70 = vector.extract_strided_slice %69 {offsets = [0, 0], sizes = [8, 512], strides = [1, 1]} : vector<8x1024xf32> to vector<8x512xf32>
    %71 = vector.extract_strided_slice %69 {offsets = [0, 512], sizes = [8, 512], strides = [1, 1]} : vector<8x1024xf32> to vector<8x512xf32>
    %72 = arith.addf %70, %71 : vector<8x512xf32>
    %73 = vector.extract_strided_slice %72 {offsets = [0, 0], sizes = [8, 256], strides = [1, 1]} : vector<8x512xf32> to vector<8x256xf32>
    %74 = vector.extract_strided_slice %72 {offsets = [0, 256], sizes = [8, 256], strides = [1, 1]} : vector<8x512xf32> to vector<8x256xf32>
    %75 = arith.addf %73, %74 : vector<8x256xf32>
    %76 = vector.extract_strided_slice %75 {offsets = [0, 0], sizes = [8, 128], strides = [1, 1]} : vector<8x256xf32> to vector<8x128xf32>
    %77 = vector.extract_strided_slice %75 {offsets = [0, 128], sizes = [8, 128], strides = [1, 1]} : vector<8x256xf32> to vector<8x128xf32>
    %78 = arith.addf %76, %77 : vector<8x128xf32>
    %79 = arith.truncf %78 : vector<8x128xf32> to vector<8x128xbf16>
    %c0_28 = arith.constant 0 : index
    %c1024 = arith.constant 1024 : index
    %80 = vector.load %arg1[%c0_28, %c1024] : memref<8x1536xf32, #tpu.memory_space<vmem>>, vector<8x256xf32>
    %81 = arith.truncf %80 : vector<8x256xf32> to vector<8x256xbf16>
    %c4 = arith.constant 4 : index
    %c0_29 = arith.constant 0 : index
    %c0_30 = arith.constant 0 : index
    %82 = vector.load %arg2[%c4, %c0_29, %c0_30] : memref<6x256x1024xbf16, #tpu.memory_space<vmem>>, vector<1x256x1024xbf16>
    %83 = vector.shape_cast %82 : vector<1x256x1024xbf16> to vector<256x1024xbf16>
    %cst_31 = arith.constant dense<0.000000e+00> : vector<8x1024xf32>
    %84 = tpu.matmul %81, %83, %cst_31 {dimension_numbers = #tpu.dot_dimension_numbers<[1], [0], [0], [1], [0, 0, 1, 1], [], []>} : vector<8x256xbf16>, vector<256x1024xbf16>, vector<8x1024xf32> -> vector<8x1024xf32>
    %c4_32 = arith.constant 4 : index
    %c0_33 = arith.constant 0 : index
    %85 = vector.load %arg3[%c4_32, %c0_33] : memref<6x1024xf32, #tpu.memory_space<vmem>>, vector<1x1024xf32>
    %86 = vector.broadcast %85 : vector<1x1024xf32> to vector<8x1024xf32>
    %87 = arith.addf %84, %86 : vector<8x1024xf32>
    %cst_34 = arith.constant 0.000000e+00 : f32
    %88 = vector.broadcast %cst_34 : f32 to vector<8x1024xf32>
    %89 = arith.maximumf %87, %88 : vector<8x1024xf32>
    %90 = vector.extract_strided_slice %89 {offsets = [0, 0], sizes = [8, 512], strides = [1, 1]} : vector<8x1024xf32> to vector<8x512xf32>
    %91 = vector.extract_strided_slice %89 {offsets = [0, 512], sizes = [8, 512], strides = [1, 1]} : vector<8x1024xf32> to vector<8x512xf32>
    %92 = arith.addf %90, %91 : vector<8x512xf32>
    %93 = vector.extract_strided_slice %92 {offsets = [0, 0], sizes = [8, 256], strides = [1, 1]} : vector<8x512xf32> to vector<8x256xf32>
    %94 = vector.extract_strided_slice %92 {offsets = [0, 256], sizes = [8, 256], strides = [1, 1]} : vector<8x512xf32> to vector<8x256xf32>
    %95 = arith.addf %93, %94 : vector<8x256xf32>
    %96 = vector.extract_strided_slice %95 {offsets = [0, 0], sizes = [8, 128], strides = [1, 1]} : vector<8x256xf32> to vector<8x128xf32>
    %97 = vector.extract_strided_slice %95 {offsets = [0, 128], sizes = [8, 128], strides = [1, 1]} : vector<8x256xf32> to vector<8x128xf32>
    %98 = arith.addf %96, %97 : vector<8x128xf32>
    %99 = arith.truncf %98 : vector<8x128xf32> to vector<8x128xbf16>
    %c0_35 = arith.constant 0 : index
    %c1280 = arith.constant 1280 : index
    %100 = vector.load %arg1[%c0_35, %c1280] : memref<8x1536xf32, #tpu.memory_space<vmem>>, vector<8x256xf32>
    %101 = arith.truncf %100 : vector<8x256xf32> to vector<8x256xbf16>
    %c5 = arith.constant 5 : index
    %c0_36 = arith.constant 0 : index
    %c0_37 = arith.constant 0 : index
    %102 = vector.load %arg2[%c5, %c0_36, %c0_37] : memref<6x256x1024xbf16, #tpu.memory_space<vmem>>, vector<1x256x1024xbf16>
    %103 = vector.shape_cast %102 : vector<1x256x1024xbf16> to vector<256x1024xbf16>
    %cst_38 = arith.constant dense<0.000000e+00> : vector<8x1024xf32>
    %104 = tpu.matmul %101, %103, %cst_38 {dimension_numbers = #tpu.dot_dimension_numbers<[1], [0], [0], [1], [0, 0, 1, 1], [], []>} : vector<8x256xbf16>, vector<256x1024xbf16>, vector<8x1024xf32> -> vector<8x1024xf32>
    %c5_39 = arith.constant 5 : index
    %c0_40 = arith.constant 0 : index
    %105 = vector.load %arg3[%c5_39, %c0_40] : memref<6x1024xf32, #tpu.memory_space<vmem>>, vector<1x1024xf32>
    %106 = vector.broadcast %105 : vector<1x1024xf32> to vector<8x1024xf32>
    %107 = arith.addf %104, %106 : vector<8x1024xf32>
    %cst_41 = arith.constant 0.000000e+00 : f32
    %108 = vector.broadcast %cst_41 : f32 to vector<8x1024xf32>
    %109 = arith.maximumf %107, %108 : vector<8x1024xf32>
    %110 = vector.extract_strided_slice %109 {offsets = [0, 0], sizes = [8, 512], strides = [1, 1]} : vector<8x1024xf32> to vector<8x512xf32>
    %111 = vector.extract_strided_slice %109 {offsets = [0, 512], sizes = [8, 512], strides = [1, 1]} : vector<8x1024xf32> to vector<8x512xf32>
    %112 = arith.addf %110, %111 : vector<8x512xf32>
    %113 = vector.extract_strided_slice %112 {offsets = [0, 0], sizes = [8, 256], strides = [1, 1]} : vector<8x512xf32> to vector<8x256xf32>
    %114 = vector.extract_strided_slice %112 {offsets = [0, 256], sizes = [8, 256], strides = [1, 1]} : vector<8x512xf32> to vector<8x256xf32>
    %115 = arith.addf %113, %114 : vector<8x256xf32>
    %116 = vector.extract_strided_slice %115 {offsets = [0, 0], sizes = [8, 128], strides = [1, 1]} : vector<8x256xf32> to vector<8x128xf32>
    %117 = vector.extract_strided_slice %115 {offsets = [0, 128], sizes = [8, 128], strides = [1, 1]} : vector<8x256xf32> to vector<8x128xf32>
    %118 = arith.addf %116, %117 : vector<8x128xf32>
    %119 = arith.truncf %118 : vector<8x128xf32> to vector<8x128xbf16>
    %120 = tpu.concatenate %19, %39, %59, %79, %99, %119 in 1 : vector<8x128xbf16>, vector<8x128xbf16>, vector<8x128xbf16>, vector<8x128xbf16>, vector<8x128xbf16>, vector<8x128xbf16> -> vector<8x768xbf16>
    %c0_42 = arith.constant 0 : index
    %c0_43 = arith.constant 0 : index
    %121 = vector.load %arg4[%c0_42, %c0_43] : memref<768x48xbf16, #tpu.memory_space<vmem>>, vector<768x48xbf16>
    %cst_44 = arith.constant dense<0.000000e+00> : vector<8x48xf32>
    %122 = tpu.matmul %120, %121, %cst_44 {dimension_numbers = #tpu.dot_dimension_numbers<[1], [0], [0], [1], [0, 0, 1, 1], [], []>} : vector<8x768xbf16>, vector<768x48xbf16>, vector<8x48xf32> -> vector<8x48xf32>
    %c0_45 = arith.constant 0 : index
    %c0_46 = arith.constant 0 : index
    %123 = vector.load %arg5[%c0_45, %c0_46] : memref<1x48xf32, #tpu.memory_space<vmem>>, vector<1x48xf32>
    %124 = vector.broadcast %123 : vector<1x48xf32> to vector<8x48xf32>
    %125 = arith.addf %122, %124 : vector<8x48xf32>
    %cst_47 = arith.constant 0.000000e+00 : f32
    %126 = vector.broadcast %cst_47 : f32 to vector<8x48xf32>
    %127 = arith.maximumf %125, %126 : vector<8x48xf32>
    %c0_48 = arith.constant 0 : index
    %c0_49 = arith.constant 0 : index
    %128 = vector.load %arg6[%c0_48, %c0_49] : memref<48x192xf32, #tpu.memory_space<vmem>>, vector<48x192xf32>
    %cst_50 = arith.constant dense<0.000000e+00> : vector<8x192xf32>
    %129 = tpu.matmul %127, %128, %cst_50 {dimension_numbers = #tpu.dot_dimension_numbers<[1], [0], [0], [1], [0, 0, 1, 1], [], []>} : vector<8x48xf32>, vector<48x192xf32>, vector<8x192xf32> -> vector<8x192xf32>
    %c0_51 = arith.constant 0 : index
    %c0_52 = arith.constant 0 : index
    %130 = vector.load %arg7[%c0_51, %c0_52] : memref<1x192xf32, #tpu.memory_space<vmem>>, vector<1x192xf32>
    %131 = vector.broadcast %130 : vector<1x192xf32> to vector<8x192xf32>
    %132 = arith.addf %129, %131 : vector<8x192xf32>
    %c0_53 = arith.constant 0 : index
    %c0_54 = arith.constant 0 : index
    %133 = vector.load %arg8[%c0_53, %c0_54] : memref<8x32xf32, #tpu.memory_space<vmem>>, vector<8x32xf32>
    %134 = vector.extract_strided_slice %132 {offsets = [0, 0], sizes = [8, 32], strides = [1, 1]} : vector<8x192xf32> to vector<8x32xf32>
    %135 = vector.extract_strided_slice %134 {offsets = [0, 0], sizes = [8, 8], strides = [1, 1]} : vector<8x32xf32> to vector<8x8xf32>
    %cst_55 = arith.constant 0.000000e+00 : f32
    %136 = vector.broadcast %cst_55 : f32 to vector<8x8xf32>
    %137 = arith.subf %136, %135 : vector<8x8xf32>
    %138 = math.exp %137 : vector<8x8xf32>
    %cst_56 = arith.constant 1.000000e+00 : f32
    %139 = vector.broadcast %cst_56 : f32 to vector<8x8xf32>
    %140 = arith.addf %139, %138 : vector<8x8xf32>
    %141 = tpu.reciprocal %140 : vector<8x8xf32> -> vector<8x8xf32>
    %142 = vector.extract_strided_slice %134 {offsets = [0, 16], sizes = [8, 8], strides = [1, 1]} : vector<8x32xf32> to vector<8x8xf32>
    %143 = math.tanh %142 : vector<8x8xf32>
    %144 = vector.extract_strided_slice %134 {offsets = [0, 24], sizes = [8, 8], strides = [1, 1]} : vector<8x32xf32> to vector<8x8xf32>
    %cst_57 = arith.constant 0.000000e+00 : f32
    %145 = vector.broadcast %cst_57 : f32 to vector<8x8xf32>
    %146 = arith.subf %145, %144 : vector<8x8xf32>
    %147 = math.exp %146 : vector<8x8xf32>
    %cst_58 = arith.constant 1.000000e+00 : f32
    %148 = vector.broadcast %cst_58 : f32 to vector<8x8xf32>
    %149 = arith.addf %148, %147 : vector<8x8xf32>
    %150 = tpu.reciprocal %149 : vector<8x8xf32> -> vector<8x8xf32>
    %151 = arith.mulf %141, %143 : vector<8x8xf32>
    %152 = math.tanh %151 : vector<8x8xf32>
    %153 = arith.mulf %150, %152 : vector<8x8xf32>
    %154 = vector.extract_strided_slice %132 {offsets = [0, 32], sizes = [8, 32], strides = [1, 1]} : vector<8x192xf32> to vector<8x32xf32>
    %155 = vector.extract_strided_slice %153 {offsets = [0, 0], sizes = [8, 1], strides = [1, 1]} : vector<8x8xf32> to vector<8x1xf32>
    %156 = vector.extract_strided_slice %133 {offsets = [0, 0], sizes = [1, 32], strides = [1, 1]} : vector<8x32xf32> to vector<1x32xf32>
    %157 = vector.broadcast %155 : vector<8x1xf32> to vector<8x32xf32>
    %158 = vector.broadcast %156 : vector<1x32xf32> to vector<8x32xf32>
    %159 = arith.mulf %157, %158 : vector<8x32xf32>
    %160 = arith.addf %154, %159 : vector<8x32xf32>
    %161 = vector.extract_strided_slice %153 {offsets = [0, 1], sizes = [8, 1], strides = [1, 1]} : vector<8x8xf32> to vector<8x1xf32>
    %162 = vector.extract_strided_slice %133 {offsets = [1, 0], sizes = [1, 32], strides = [1, 1]} : vector<8x32xf32> to vector<1x32xf32>
    %163 = vector.broadcast %161 : vector<8x1xf32> to vector<8x32xf32>
    %164 = vector.broadcast %162 : vector<1x32xf32> to vector<8x32xf32>
    %165 = arith.mulf %163, %164 : vector<8x32xf32>
    %166 = arith.addf %160, %165 : vector<8x32xf32>
    %167 = vector.extract_strided_slice %153 {offsets = [0, 2], sizes = [8, 1], strides = [1, 1]} : vector<8x8xf32> to vector<8x1xf32>
    %168 = vector.extract_strided_slice %133 {offsets = [2, 0], sizes = [1, 32], strides = [1, 1]} : vector<8x32xf32> to vector<1x32xf32>
    %169 = vector.broadcast %167 : vector<8x1xf32> to vector<8x32xf32>
    %170 = vector.broadcast %168 : vector<1x32xf32> to vector<8x32xf32>
    %171 = arith.mulf %169, %170 : vector<8x32xf32>
    %172 = arith.addf %166, %171 : vector<8x32xf32>
    %173 = vector.extract_strided_slice %153 {offsets = [0, 3], sizes = [8, 1], strides = [1, 1]} : vector<8x8xf32> to vector<8x1xf32>
    %174 = vector.extract_strided_slice %133 {offsets = [3, 0], sizes = [1, 32], strides = [1, 1]} : vector<8x32xf32> to vector<1x32xf32>
    %175 = vector.broadcast %173 : vector<8x1xf32> to vector<8x32xf32>
    %176 = vector.broadcast %174 : vector<1x32xf32> to vector<8x32xf32>
    %177 = arith.mulf %175, %176 : vector<8x32xf32>
    %178 = arith.addf %172, %177 : vector<8x32xf32>
    %179 = vector.extract_strided_slice %153 {offsets = [0, 4], sizes = [8, 1], strides = [1, 1]} : vector<8x8xf32> to vector<8x1xf32>
    %180 = vector.extract_strided_slice %133 {offsets = [4, 0], sizes = [1, 32], strides = [1, 1]} : vector<8x32xf32> to vector<1x32xf32>
    %181 = vector.broadcast %179 : vector<8x1xf32> to vector<8x32xf32>
    %182 = vector.broadcast %180 : vector<1x32xf32> to vector<8x32xf32>
    %183 = arith.mulf %181, %182 : vector<8x32xf32>
    %184 = arith.addf %178, %183 : vector<8x32xf32>
    %185 = vector.extract_strided_slice %153 {offsets = [0, 5], sizes = [8, 1], strides = [1, 1]} : vector<8x8xf32> to vector<8x1xf32>
    %186 = vector.extract_strided_slice %133 {offsets = [5, 0], sizes = [1, 32], strides = [1, 1]} : vector<8x32xf32> to vector<1x32xf32>
    %187 = vector.broadcast %185 : vector<8x1xf32> to vector<8x32xf32>
    %188 = vector.broadcast %186 : vector<1x32xf32> to vector<8x32xf32>
    %189 = arith.mulf %187, %188 : vector<8x32xf32>
    %190 = arith.addf %184, %189 : vector<8x32xf32>
    %191 = vector.extract_strided_slice %153 {offsets = [0, 6], sizes = [8, 1], strides = [1, 1]} : vector<8x8xf32> to vector<8x1xf32>
    %192 = vector.extract_strided_slice %133 {offsets = [6, 0], sizes = [1, 32], strides = [1, 1]} : vector<8x32xf32> to vector<1x32xf32>
    %193 = vector.broadcast %191 : vector<8x1xf32> to vector<8x32xf32>
    %194 = vector.broadcast %192 : vector<1x32xf32> to vector<8x32xf32>
    %195 = arith.mulf %193, %194 : vector<8x32xf32>
    %196 = arith.addf %190, %195 : vector<8x32xf32>
    %197 = vector.extract_strided_slice %153 {offsets = [0, 7], sizes = [8, 1], strides = [1, 1]} : vector<8x8xf32> to vector<8x1xf32>
    %198 = vector.extract_strided_slice %133 {offsets = [7, 0], sizes = [1, 32], strides = [1, 1]} : vector<8x32xf32> to vector<1x32xf32>
    %199 = vector.broadcast %197 : vector<8x1xf32> to vector<8x32xf32>
    %200 = vector.broadcast %198 : vector<1x32xf32> to vector<8x32xf32>
    %201 = arith.mulf %199, %200 : vector<8x32xf32>
    %202 = arith.addf %196, %201 : vector<8x32xf32>
    %203 = vector.extract_strided_slice %202 {offsets = [0, 0], sizes = [8, 8], strides = [1, 1]} : vector<8x32xf32> to vector<8x8xf32>
    %cst_59 = arith.constant 0.000000e+00 : f32
    %204 = vector.broadcast %cst_59 : f32 to vector<8x8xf32>
    %205 = arith.subf %204, %203 : vector<8x8xf32>
    %206 = math.exp %205 : vector<8x8xf32>
    %cst_60 = arith.constant 1.000000e+00 : f32
    %207 = vector.broadcast %cst_60 : f32 to vector<8x8xf32>
    %208 = arith.addf %207, %206 : vector<8x8xf32>
    %209 = tpu.reciprocal %208 : vector<8x8xf32> -> vector<8x8xf32>
    %210 = vector.extract_strided_slice %202 {offsets = [0, 8], sizes = [8, 8], strides = [1, 1]} : vector<8x32xf32> to vector<8x8xf32>
    %cst_61 = arith.constant 0.000000e+00 : f32
    %211 = vector.broadcast %cst_61 : f32 to vector<8x8xf32>
    %212 = arith.subf %211, %210 : vector<8x8xf32>
    %213 = math.exp %212 : vector<8x8xf32>
    %cst_62 = arith.constant 1.000000e+00 : f32
    %214 = vector.broadcast %cst_62 : f32 to vector<8x8xf32>
    %215 = arith.addf %214, %213 : vector<8x8xf32>
    %216 = tpu.reciprocal %215 : vector<8x8xf32> -> vector<8x8xf32>
    %217 = vector.extract_strided_slice %202 {offsets = [0, 16], sizes = [8, 8], strides = [1, 1]} : vector<8x32xf32> to vector<8x8xf32>
    %218 = math.tanh %217 : vector<8x8xf32>
    %219 = vector.extract_strided_slice %202 {offsets = [0, 24], sizes = [8, 8], strides = [1, 1]} : vector<8x32xf32> to vector<8x8xf32>
    %cst_63 = arith.constant 0.000000e+00 : f32
    %220 = vector.broadcast %cst_63 : f32 to vector<8x8xf32>
    %221 = arith.subf %220, %219 : vector<8x8xf32>
    %222 = math.exp %221 : vector<8x8xf32>
    %cst_64 = arith.constant 1.000000e+00 : f32
    %223 = vector.broadcast %cst_64 : f32 to vector<8x8xf32>
    %224 = arith.addf %223, %222 : vector<8x8xf32>
    %225 = tpu.reciprocal %224 : vector<8x8xf32> -> vector<8x8xf32>
    %226 = arith.mulf %216, %151 : vector<8x8xf32>
    %227 = arith.mulf %209, %218 : vector<8x8xf32>
    %228 = arith.addf %226, %227 : vector<8x8xf32>
    %229 = math.tanh %228 : vector<8x8xf32>
    %230 = arith.mulf %225, %229 : vector<8x8xf32>
    %231 = vector.extract_strided_slice %132 {offsets = [0, 64], sizes = [8, 32], strides = [1, 1]} : vector<8x192xf32> to vector<8x32xf32>
    %232 = vector.extract_strided_slice %230 {offsets = [0, 0], sizes = [8, 1], strides = [1, 1]} : vector<8x8xf32> to vector<8x1xf32>
    %233 = vector.extract_strided_slice %133 {offsets = [0, 0], sizes = [1, 32], strides = [1, 1]} : vector<8x32xf32> to vector<1x32xf32>
    %234 = vector.broadcast %232 : vector<8x1xf32> to vector<8x32xf32>
    %235 = vector.broadcast %233 : vector<1x32xf32> to vector<8x32xf32>
    %236 = arith.mulf %234, %235 : vector<8x32xf32>
    %237 = arith.addf %231, %236 : vector<8x32xf32>
    %238 = vector.extract_strided_slice %230 {offsets = [0, 1], sizes = [8, 1], strides = [1, 1]} : vector<8x8xf32> to vector<8x1xf32>
    %239 = vector.extract_strided_slice %133 {offsets = [1, 0], sizes = [1, 32], strides = [1, 1]} : vector<8x32xf32> to vector<1x32xf32>
    %240 = vector.broadcast %238 : vector<8x1xf32> to vector<8x32xf32>
    %241 = vector.broadcast %239 : vector<1x32xf32> to vector<8x32xf32>
    %242 = arith.mulf %240, %241 : vector<8x32xf32>
    %243 = arith.addf %237, %242 : vector<8x32xf32>
    %244 = vector.extract_strided_slice %230 {offsets = [0, 2], sizes = [8, 1], strides = [1, 1]} : vector<8x8xf32> to vector<8x1xf32>
    %245 = vector.extract_strided_slice %133 {offsets = [2, 0], sizes = [1, 32], strides = [1, 1]} : vector<8x32xf32> to vector<1x32xf32>
    %246 = vector.broadcast %244 : vector<8x1xf32> to vector<8x32xf32>
    %247 = vector.broadcast %245 : vector<1x32xf32> to vector<8x32xf32>
    %248 = arith.mulf %246, %247 : vector<8x32xf32>
    %249 = arith.addf %243, %248 : vector<8x32xf32>
    %250 = vector.extract_strided_slice %230 {offsets = [0, 3], sizes = [8, 1], strides = [1, 1]} : vector<8x8xf32> to vector<8x1xf32>
    %251 = vector.extract_strided_slice %133 {offsets = [3, 0], sizes = [1, 32], strides = [1, 1]} : vector<8x32xf32> to vector<1x32xf32>
    %252 = vector.broadcast %250 : vector<8x1xf32> to vector<8x32xf32>
    %253 = vector.broadcast %251 : vector<1x32xf32> to vector<8x32xf32>
    %254 = arith.mulf %252, %253 : vector<8x32xf32>
    %255 = arith.addf %249, %254 : vector<8x32xf32>
    %256 = vector.extract_strided_slice %230 {offsets = [0, 4], sizes = [8, 1], strides = [1, 1]} : vector<8x8xf32> to vector<8x1xf32>
    %257 = vector.extract_strided_slice %133 {offsets = [4, 0], sizes = [1, 32], strides = [1, 1]} : vector<8x32xf32> to vector<1x32xf32>
    %258 = vector.broadcast %256 : vector<8x1xf32> to vector<8x32xf32>
    %259 = vector.broadcast %257 : vector<1x32xf32> to vector<8x32xf32>
    %260 = arith.mulf %258, %259 : vector<8x32xf32>
    %261 = arith.addf %255, %260 : vector<8x32xf32>
    %262 = vector.extract_strided_slice %230 {offsets = [0, 5], sizes = [8, 1], strides = [1, 1]} : vector<8x8xf32> to vector<8x1xf32>
    %263 = vector.extract_strided_slice %133 {offsets = [5, 0], sizes = [1, 32], strides = [1, 1]} : vector<8x32xf32> to vector<1x32xf32>
    %264 = vector.broadcast %262 : vector<8x1xf32> to vector<8x32xf32>
    %265 = vector.broadcast %263 : vector<1x32xf32> to vector<8x32xf32>
    %266 = arith.mulf %264, %265 : vector<8x32xf32>
    %267 = arith.addf %261, %266 : vector<8x32xf32>
    %268 = vector.extract_strided_slice %230 {offsets = [0, 6], sizes = [8, 1], strides = [1, 1]} : vector<8x8xf32> to vector<8x1xf32>
    %269 = vector.extract_strided_slice %133 {offsets = [6, 0], sizes = [1, 32], strides = [1, 1]} : vector<8x32xf32> to vector<1x32xf32>
    %270 = vector.broadcast %268 : vector<8x1xf32> to vector<8x32xf32>
    %271 = vector.broadcast %269 : vector<1x32xf32> to vector<8x32xf32>
    %272 = arith.mulf %270, %271 : vector<8x32xf32>
    %273 = arith.addf %267, %272 : vector<8x32xf32>
    %274 = vector.extract_strided_slice %230 {offsets = [0, 7], sizes = [8, 1], strides = [1, 1]} : vector<8x8xf32> to vector<8x1xf32>
    %275 = vector.extract_strided_slice %133 {offsets = [7, 0], sizes = [1, 32], strides = [1, 1]} : vector<8x32xf32> to vector<1x32xf32>
    %276 = vector.broadcast %274 : vector<8x1xf32> to vector<8x32xf32>
    %277 = vector.broadcast %275 : vector<1x32xf32> to vector<8x32xf32>
    %278 = arith.mulf %276, %277 : vector<8x32xf32>
    %279 = arith.addf %273, %278 : vector<8x32xf32>
    %280 = vector.extract_strided_slice %279 {offsets = [0, 0], sizes = [8, 8], strides = [1, 1]} : vector<8x32xf32> to vector<8x8xf32>
    %cst_65 = arith.constant 0.000000e+00 : f32
    %281 = vector.broadcast %cst_65 : f32 to vector<8x8xf32>
    %282 = arith.subf %281, %280 : vector<8x8xf32>
    %283 = math.exp %282 : vector<8x8xf32>
    %cst_66 = arith.constant 1.000000e+00 : f32
    %284 = vector.broadcast %cst_66 : f32 to vector<8x8xf32>
    %285 = arith.addf %284, %283 : vector<8x8xf32>
    %286 = tpu.reciprocal %285 : vector<8x8xf32> -> vector<8x8xf32>
    %287 = vector.extract_strided_slice %279 {offsets = [0, 8], sizes = [8, 8], strides = [1, 1]} : vector<8x32xf32> to vector<8x8xf32>
    %cst_67 = arith.constant 0.000000e+00 : f32
    %288 = vector.broadcast %cst_67 : f32 to vector<8x8xf32>
    %289 = arith.subf %288, %287 : vector<8x8xf32>
    %290 = math.exp %289 : vector<8x8xf32>
    %cst_68 = arith.constant 1.000000e+00 : f32
    %291 = vector.broadcast %cst_68 : f32 to vector<8x8xf32>
    %292 = arith.addf %291, %290 : vector<8x8xf32>
    %293 = tpu.reciprocal %292 : vector<8x8xf32> -> vector<8x8xf32>
    %294 = vector.extract_strided_slice %279 {offsets = [0, 16], sizes = [8, 8], strides = [1, 1]} : vector<8x32xf32> to vector<8x8xf32>
    %295 = math.tanh %294 : vector<8x8xf32>
    %296 = vector.extract_strided_slice %279 {offsets = [0, 24], sizes = [8, 8], strides = [1, 1]} : vector<8x32xf32> to vector<8x8xf32>
    %cst_69 = arith.constant 0.000000e+00 : f32
    %297 = vector.broadcast %cst_69 : f32 to vector<8x8xf32>
    %298 = arith.subf %297, %296 : vector<8x8xf32>
    %299 = math.exp %298 : vector<8x8xf32>
    %cst_70 = arith.constant 1.000000e+00 : f32
    %300 = vector.broadcast %cst_70 : f32 to vector<8x8xf32>
    %301 = arith.addf %300, %299 : vector<8x8xf32>
    %302 = tpu.reciprocal %301 : vector<8x8xf32> -> vector<8x8xf32>
    %303 = arith.mulf %293, %228 : vector<8x8xf32>
    %304 = arith.mulf %286, %295 : vector<8x8xf32>
    %305 = arith.addf %303, %304 : vector<8x8xf32>
    %306 = math.tanh %305 : vector<8x8xf32>
    %307 = arith.mulf %302, %306 : vector<8x8xf32>
    %308 = vector.extract_strided_slice %132 {offsets = [0, 96], sizes = [8, 32], strides = [1, 1]} : vector<8x192xf32> to vector<8x32xf32>
    %309 = vector.extract_strided_slice %307 {offsets = [0, 0], sizes = [8, 1], strides = [1, 1]} : vector<8x8xf32> to vector<8x1xf32>
    %310 = vector.extract_strided_slice %133 {offsets = [0, 0], sizes = [1, 32], strides = [1, 1]} : vector<8x32xf32> to vector<1x32xf32>
    %311 = vector.broadcast %309 : vector<8x1xf32> to vector<8x32xf32>
    %312 = vector.broadcast %310 : vector<1x32xf32> to vector<8x32xf32>
    %313 = arith.mulf %311, %312 : vector<8x32xf32>
    %314 = arith.addf %308, %313 : vector<8x32xf32>
    %315 = vector.extract_strided_slice %307 {offsets = [0, 1], sizes = [8, 1], strides = [1, 1]} : vector<8x8xf32> to vector<8x1xf32>
    %316 = vector.extract_strided_slice %133 {offsets = [1, 0], sizes = [1, 32], strides = [1, 1]} : vector<8x32xf32> to vector<1x32xf32>
    %317 = vector.broadcast %315 : vector<8x1xf32> to vector<8x32xf32>
    %318 = vector.broadcast %316 : vector<1x32xf32> to vector<8x32xf32>
    %319 = arith.mulf %317, %318 : vector<8x32xf32>
    %320 = arith.addf %314, %319 : vector<8x32xf32>
    %321 = vector.extract_strided_slice %307 {offsets = [0, 2], sizes = [8, 1], strides = [1, 1]} : vector<8x8xf32> to vector<8x1xf32>
    %322 = vector.extract_strided_slice %133 {offsets = [2, 0], sizes = [1, 32], strides = [1, 1]} : vector<8x32xf32> to vector<1x32xf32>
    %323 = vector.broadcast %321 : vector<8x1xf32> to vector<8x32xf32>
    %324 = vector.broadcast %322 : vector<1x32xf32> to vector<8x32xf32>
    %325 = arith.mulf %323, %324 : vector<8x32xf32>
    %326 = arith.addf %320, %325 : vector<8x32xf32>
    %327 = vector.extract_strided_slice %307 {offsets = [0, 3], sizes = [8, 1], strides = [1, 1]} : vector<8x8xf32> to vector<8x1xf32>
    %328 = vector.extract_strided_slice %133 {offsets = [3, 0], sizes = [1, 32], strides = [1, 1]} : vector<8x32xf32> to vector<1x32xf32>
    %329 = vector.broadcast %327 : vector<8x1xf32> to vector<8x32xf32>
    %330 = vector.broadcast %328 : vector<1x32xf32> to vector<8x32xf32>
    %331 = arith.mulf %329, %330 : vector<8x32xf32>
    %332 = arith.addf %326, %331 : vector<8x32xf32>
    %333 = vector.extract_strided_slice %307 {offsets = [0, 4], sizes = [8, 1], strides = [1, 1]} : vector<8x8xf32> to vector<8x1xf32>
    %334 = vector.extract_strided_slice %133 {offsets = [4, 0], sizes = [1, 32], strides = [1, 1]} : vector<8x32xf32> to vector<1x32xf32>
    %335 = vector.broadcast %333 : vector<8x1xf32> to vector<8x32xf32>
    %336 = vector.broadcast %334 : vector<1x32xf32> to vector<8x32xf32>
    %337 = arith.mulf %335, %336 : vector<8x32xf32>
    %338 = arith.addf %332, %337 : vector<8x32xf32>
    %339 = vector.extract_strided_slice %307 {offsets = [0, 5], sizes = [8, 1], strides = [1, 1]} : vector<8x8xf32> to vector<8x1xf32>
    %340 = vector.extract_strided_slice %133 {offsets = [5, 0], sizes = [1, 32], strides = [1, 1]} : vector<8x32xf32> to vector<1x32xf32>
    %341 = vector.broadcast %339 : vector<8x1xf32> to vector<8x32xf32>
    %342 = vector.broadcast %340 : vector<1x32xf32> to vector<8x32xf32>
    %343 = arith.mulf %341, %342 : vector<8x32xf32>
    %344 = arith.addf %338, %343 : vector<8x32xf32>
    %345 = vector.extract_strided_slice %307 {offsets = [0, 6], sizes = [8, 1], strides = [1, 1]} : vector<8x8xf32> to vector<8x1xf32>
    %346 = vector.extract_strided_slice %133 {offsets = [6, 0], sizes = [1, 32], strides = [1, 1]} : vector<8x32xf32> to vector<1x32xf32>
    %347 = vector.broadcast %345 : vector<8x1xf32> to vector<8x32xf32>
    %348 = vector.broadcast %346 : vector<1x32xf32> to vector<8x32xf32>
    %349 = arith.mulf %347, %348 : vector<8x32xf32>
    %350 = arith.addf %344, %349 : vector<8x32xf32>
    %351 = vector.extract_strided_slice %307 {offsets = [0, 7], sizes = [8, 1], strides = [1, 1]} : vector<8x8xf32> to vector<8x1xf32>
    %352 = vector.extract_strided_slice %133 {offsets = [7, 0], sizes = [1, 32], strides = [1, 1]} : vector<8x32xf32> to vector<1x32xf32>
    %353 = vector.broadcast %351 : vector<8x1xf32> to vector<8x32xf32>
    %354 = vector.broadcast %352 : vector<1x32xf32> to vector<8x32xf32>
    %355 = arith.mulf %353, %354 : vector<8x32xf32>
    %356 = arith.addf %350, %355 : vector<8x32xf32>
    %357 = vector.extract_strided_slice %356 {offsets = [0, 0], sizes = [8, 8], strides = [1, 1]} : vector<8x32xf32> to vector<8x8xf32>
    %cst_71 = arith.constant 0.000000e+00 : f32
    %358 = vector.broadcast %cst_71 : f32 to vector<8x8xf32>
    %359 = arith.subf %358, %357 : vector<8x8xf32>
    %360 = math.exp %359 : vector<8x8xf32>
    %cst_72 = arith.constant 1.000000e+00 : f32
    %361 = vector.broadcast %cst_72 : f32 to vector<8x8xf32>
    %362 = arith.addf %361, %360 : vector<8x8xf32>
    %363 = tpu.reciprocal %362 : vector<8x8xf32> -> vector<8x8xf32>
    %364 = vector.extract_strided_slice %356 {offsets = [0, 8], sizes = [8, 8], strides = [1, 1]} : vector<8x32xf32> to vector<8x8xf32>
    %cst_73 = arith.constant 0.000000e+00 : f32
    %365 = vector.broadcast %cst_73 : f32 to vector<8x8xf32>
    %366 = arith.subf %365, %364 : vector<8x8xf32>
    %367 = math.exp %366 : vector<8x8xf32>
    %cst_74 = arith.constant 1.000000e+00 : f32
    %368 = vector.broadcast %cst_74 : f32 to vector<8x8xf32>
    %369 = arith.addf %368, %367 : vector<8x8xf32>
    %370 = tpu.reciprocal %369 : vector<8x8xf32> -> vector<8x8xf32>
    %371 = vector.extract_strided_slice %356 {offsets = [0, 16], sizes = [8, 8], strides = [1, 1]} : vector<8x32xf32> to vector<8x8xf32>
    %372 = math.tanh %371 : vector<8x8xf32>
    %373 = vector.extract_strided_slice %356 {offsets = [0, 24], sizes = [8, 8], strides = [1, 1]} : vector<8x32xf32> to vector<8x8xf32>
    %cst_75 = arith.constant 0.000000e+00 : f32
    %374 = vector.broadcast %cst_75 : f32 to vector<8x8xf32>
    %375 = arith.subf %374, %373 : vector<8x8xf32>
    %376 = math.exp %375 : vector<8x8xf32>
    %cst_76 = arith.constant 1.000000e+00 : f32
    %377 = vector.broadcast %cst_76 : f32 to vector<8x8xf32>
    %378 = arith.addf %377, %376 : vector<8x8xf32>
    %379 = tpu.reciprocal %378 : vector<8x8xf32> -> vector<8x8xf32>
    %380 = arith.mulf %370, %305 : vector<8x8xf32>
    %381 = arith.mulf %363, %372 : vector<8x8xf32>
    %382 = arith.addf %380, %381 : vector<8x8xf32>
    %383 = math.tanh %382 : vector<8x8xf32>
    %384 = arith.mulf %379, %383 : vector<8x8xf32>
    %385 = vector.extract_strided_slice %132 {offsets = [0, 128], sizes = [8, 32], strides = [1, 1]} : vector<8x192xf32> to vector<8x32xf32>
    %386 = vector.extract_strided_slice %384 {offsets = [0, 0], sizes = [8, 1], strides = [1, 1]} : vector<8x8xf32> to vector<8x1xf32>
    %387 = vector.extract_strided_slice %133 {offsets = [0, 0], sizes = [1, 32], strides = [1, 1]} : vector<8x32xf32> to vector<1x32xf32>
    %388 = vector.broadcast %386 : vector<8x1xf32> to vector<8x32xf32>
    %389 = vector.broadcast %387 : vector<1x32xf32> to vector<8x32xf32>
    %390 = arith.mulf %388, %389 : vector<8x32xf32>
    %391 = arith.addf %385, %390 : vector<8x32xf32>
    %392 = vector.extract_strided_slice %384 {offsets = [0, 1], sizes = [8, 1], strides = [1, 1]} : vector<8x8xf32> to vector<8x1xf32>
    %393 = vector.extract_strided_slice %133 {offsets = [1, 0], sizes = [1, 32], strides = [1, 1]} : vector<8x32xf32> to vector<1x32xf32>
    %394 = vector.broadcast %392 : vector<8x1xf32> to vector<8x32xf32>
    %395 = vector.broadcast %393 : vector<1x32xf32> to vector<8x32xf32>
    %396 = arith.mulf %394, %395 : vector<8x32xf32>
    %397 = arith.addf %391, %396 : vector<8x32xf32>
    %398 = vector.extract_strided_slice %384 {offsets = [0, 2], sizes = [8, 1], strides = [1, 1]} : vector<8x8xf32> to vector<8x1xf32>
    %399 = vector.extract_strided_slice %133 {offsets = [2, 0], sizes = [1, 32], strides = [1, 1]} : vector<8x32xf32> to vector<1x32xf32>
    %400 = vector.broadcast %398 : vector<8x1xf32> to vector<8x32xf32>
    %401 = vector.broadcast %399 : vector<1x32xf32> to vector<8x32xf32>
    %402 = arith.mulf %400, %401 : vector<8x32xf32>
    %403 = arith.addf %397, %402 : vector<8x32xf32>
    %404 = vector.extract_strided_slice %384 {offsets = [0, 3], sizes = [8, 1], strides = [1, 1]} : vector<8x8xf32> to vector<8x1xf32>
    %405 = vector.extract_strided_slice %133 {offsets = [3, 0], sizes = [1, 32], strides = [1, 1]} : vector<8x32xf32> to vector<1x32xf32>
    %406 = vector.broadcast %404 : vector<8x1xf32> to vector<8x32xf32>
    %407 = vector.broadcast %405 : vector<1x32xf32> to vector<8x32xf32>
    %408 = arith.mulf %406, %407 : vector<8x32xf32>
    %409 = arith.addf %403, %408 : vector<8x32xf32>
    %410 = vector.extract_strided_slice %384 {offsets = [0, 4], sizes = [8, 1], strides = [1, 1]} : vector<8x8xf32> to vector<8x1xf32>
    %411 = vector.extract_strided_slice %133 {offsets = [4, 0], sizes = [1, 32], strides = [1, 1]} : vector<8x32xf32> to vector<1x32xf32>
    %412 = vector.broadcast %410 : vector<8x1xf32> to vector<8x32xf32>
    %413 = vector.broadcast %411 : vector<1x32xf32> to vector<8x32xf32>
    %414 = arith.mulf %412, %413 : vector<8x32xf32>
    %415 = arith.addf %409, %414 : vector<8x32xf32>
    %416 = vector.extract_strided_slice %384 {offsets = [0, 5], sizes = [8, 1], strides = [1, 1]} : vector<8x8xf32> to vector<8x1xf32>
    %417 = vector.extract_strided_slice %133 {offsets = [5, 0], sizes = [1, 32], strides = [1, 1]} : vector<8x32xf32> to vector<1x32xf32>
    %418 = vector.broadcast %416 : vector<8x1xf32> to vector<8x32xf32>
    %419 = vector.broadcast %417 : vector<1x32xf32> to vector<8x32xf32>
    %420 = arith.mulf %418, %419 : vector<8x32xf32>
    %421 = arith.addf %415, %420 : vector<8x32xf32>
    %422 = vector.extract_strided_slice %384 {offsets = [0, 6], sizes = [8, 1], strides = [1, 1]} : vector<8x8xf32> to vector<8x1xf32>
    %423 = vector.extract_strided_slice %133 {offsets = [6, 0], sizes = [1, 32], strides = [1, 1]} : vector<8x32xf32> to vector<1x32xf32>
    %424 = vector.broadcast %422 : vector<8x1xf32> to vector<8x32xf32>
    %425 = vector.broadcast %423 : vector<1x32xf32> to vector<8x32xf32>
    %426 = arith.mulf %424, %425 : vector<8x32xf32>
    %427 = arith.addf %421, %426 : vector<8x32xf32>
    %428 = vector.extract_strided_slice %384 {offsets = [0, 7], sizes = [8, 1], strides = [1, 1]} : vector<8x8xf32> to vector<8x1xf32>
    %429 = vector.extract_strided_slice %133 {offsets = [7, 0], sizes = [1, 32], strides = [1, 1]} : vector<8x32xf32> to vector<1x32xf32>
    %430 = vector.broadcast %428 : vector<8x1xf32> to vector<8x32xf32>
    %431 = vector.broadcast %429 : vector<1x32xf32> to vector<8x32xf32>
    %432 = arith.mulf %430, %431 : vector<8x32xf32>
    %433 = arith.addf %427, %432 : vector<8x32xf32>
    %434 = vector.extract_strided_slice %433 {offsets = [0, 0], sizes = [8, 8], strides = [1, 1]} : vector<8x32xf32> to vector<8x8xf32>
    %cst_77 = arith.constant 0.000000e+00 : f32
    %435 = vector.broadcast %cst_77 : f32 to vector<8x8xf32>
    %436 = arith.subf %435, %434 : vector<8x8xf32>
    %437 = math.exp %436 : vector<8x8xf32>
    %cst_78 = arith.constant 1.000000e+00 : f32
    %438 = vector.broadcast %cst_78 : f32 to vector<8x8xf32>
    %439 = arith.addf %438, %437 : vector<8x8xf32>
    %440 = tpu.reciprocal %439 : vector<8x8xf32> -> vector<8x8xf32>
    %441 = vector.extract_strided_slice %433 {offsets = [0, 8], sizes = [8, 8], strides = [1, 1]} : vector<8x32xf32> to vector<8x8xf32>
    %cst_79 = arith.constant 0.000000e+00 : f32
    %442 = vector.broadcast %cst_79 : f32 to vector<8x8xf32>
    %443 = arith.subf %442, %441 : vector<8x8xf32>
    %444 = math.exp %443 : vector<8x8xf32>
    %cst_80 = arith.constant 1.000000e+00 : f32
    %445 = vector.broadcast %cst_80 : f32 to vector<8x8xf32>
    %446 = arith.addf %445, %444 : vector<8x8xf32>
    %447 = tpu.reciprocal %446 : vector<8x8xf32> -> vector<8x8xf32>
    %448 = vector.extract_strided_slice %433 {offsets = [0, 16], sizes = [8, 8], strides = [1, 1]} : vector<8x32xf32> to vector<8x8xf32>
    %449 = math.tanh %448 : vector<8x8xf32>
    %450 = vector.extract_strided_slice %433 {offsets = [0, 24], sizes = [8, 8], strides = [1, 1]} : vector<8x32xf32> to vector<8x8xf32>
    %cst_81 = arith.constant 0.000000e+00 : f32
    %451 = vector.broadcast %cst_81 : f32 to vector<8x8xf32>
    %452 = arith.subf %451, %450 : vector<8x8xf32>
    %453 = math.exp %452 : vector<8x8xf32>
    %cst_82 = arith.constant 1.000000e+00 : f32
    %454 = vector.broadcast %cst_82 : f32 to vector<8x8xf32>
    %455 = arith.addf %454, %453 : vector<8x8xf32>
    %456 = tpu.reciprocal %455 : vector<8x8xf32> -> vector<8x8xf32>
    %457 = arith.mulf %447, %382 : vector<8x8xf32>
    %458 = arith.mulf %440, %449 : vector<8x8xf32>
    %459 = arith.addf %457, %458 : vector<8x8xf32>
    %460 = math.tanh %459 : vector<8x8xf32>
    %461 = arith.mulf %456, %460 : vector<8x8xf32>
    %462 = vector.extract_strided_slice %132 {offsets = [0, 160], sizes = [8, 32], strides = [1, 1]} : vector<8x192xf32> to vector<8x32xf32>
    %463 = vector.extract_strided_slice %461 {offsets = [0, 0], sizes = [8, 1], strides = [1, 1]} : vector<8x8xf32> to vector<8x1xf32>
    %464 = vector.extract_strided_slice %133 {offsets = [0, 0], sizes = [1, 32], strides = [1, 1]} : vector<8x32xf32> to vector<1x32xf32>
    %465 = vector.broadcast %463 : vector<8x1xf32> to vector<8x32xf32>
    %466 = vector.broadcast %464 : vector<1x32xf32> to vector<8x32xf32>
    %467 = arith.mulf %465, %466 : vector<8x32xf32>
    %468 = arith.addf %462, %467 : vector<8x32xf32>
    %469 = vector.extract_strided_slice %461 {offsets = [0, 1], sizes = [8, 1], strides = [1, 1]} : vector<8x8xf32> to vector<8x1xf32>
    %470 = vector.extract_strided_slice %133 {offsets = [1, 0], sizes = [1, 32], strides = [1, 1]} : vector<8x32xf32> to vector<1x32xf32>
    %471 = vector.broadcast %469 : vector<8x1xf32> to vector<8x32xf32>
    %472 = vector.broadcast %470 : vector<1x32xf32> to vector<8x32xf32>
    %473 = arith.mulf %471, %472 : vector<8x32xf32>
    %474 = arith.addf %468, %473 : vector<8x32xf32>
    %475 = vector.extract_strided_slice %461 {offsets = [0, 2], sizes = [8, 1], strides = [1, 1]} : vector<8x8xf32> to vector<8x1xf32>
    %476 = vector.extract_strided_slice %133 {offsets = [2, 0], sizes = [1, 32], strides = [1, 1]} : vector<8x32xf32> to vector<1x32xf32>
    %477 = vector.broadcast %475 : vector<8x1xf32> to vector<8x32xf32>
    %478 = vector.broadcast %476 : vector<1x32xf32> to vector<8x32xf32>
    %479 = arith.mulf %477, %478 : vector<8x32xf32>
    %480 = arith.addf %474, %479 : vector<8x32xf32>
    %481 = vector.extract_strided_slice %461 {offsets = [0, 3], sizes = [8, 1], strides = [1, 1]} : vector<8x8xf32> to vector<8x1xf32>
    %482 = vector.extract_strided_slice %133 {offsets = [3, 0], sizes = [1, 32], strides = [1, 1]} : vector<8x32xf32> to vector<1x32xf32>
    %483 = vector.broadcast %481 : vector<8x1xf32> to vector<8x32xf32>
    %484 = vector.broadcast %482 : vector<1x32xf32> to vector<8x32xf32>
    %485 = arith.mulf %483, %484 : vector<8x32xf32>
    %486 = arith.addf %480, %485 : vector<8x32xf32>
    %487 = vector.extract_strided_slice %461 {offsets = [0, 4], sizes = [8, 1], strides = [1, 1]} : vector<8x8xf32> to vector<8x1xf32>
    %488 = vector.extract_strided_slice %133 {offsets = [4, 0], sizes = [1, 32], strides = [1, 1]} : vector<8x32xf32> to vector<1x32xf32>
    %489 = vector.broadcast %487 : vector<8x1xf32> to vector<8x32xf32>
    %490 = vector.broadcast %488 : vector<1x32xf32> to vector<8x32xf32>
    %491 = arith.mulf %489, %490 : vector<8x32xf32>
    %492 = arith.addf %486, %491 : vector<8x32xf32>
    %493 = vector.extract_strided_slice %461 {offsets = [0, 5], sizes = [8, 1], strides = [1, 1]} : vector<8x8xf32> to vector<8x1xf32>
    %494 = vector.extract_strided_slice %133 {offsets = [5, 0], sizes = [1, 32], strides = [1, 1]} : vector<8x32xf32> to vector<1x32xf32>
    %495 = vector.broadcast %493 : vector<8x1xf32> to vector<8x32xf32>
    %496 = vector.broadcast %494 : vector<1x32xf32> to vector<8x32xf32>
    %497 = arith.mulf %495, %496 : vector<8x32xf32>
    %498 = arith.addf %492, %497 : vector<8x32xf32>
    %499 = vector.extract_strided_slice %461 {offsets = [0, 6], sizes = [8, 1], strides = [1, 1]} : vector<8x8xf32> to vector<8x1xf32>
    %500 = vector.extract_strided_slice %133 {offsets = [6, 0], sizes = [1, 32], strides = [1, 1]} : vector<8x32xf32> to vector<1x32xf32>
    %501 = vector.broadcast %499 : vector<8x1xf32> to vector<8x32xf32>
    %502 = vector.broadcast %500 : vector<1x32xf32> to vector<8x32xf32>
    %503 = arith.mulf %501, %502 : vector<8x32xf32>
    %504 = arith.addf %498, %503 : vector<8x32xf32>
    %505 = vector.extract_strided_slice %461 {offsets = [0, 7], sizes = [8, 1], strides = [1, 1]} : vector<8x8xf32> to vector<8x1xf32>
    %506 = vector.extract_strided_slice %133 {offsets = [7, 0], sizes = [1, 32], strides = [1, 1]} : vector<8x32xf32> to vector<1x32xf32>
    %507 = vector.broadcast %505 : vector<8x1xf32> to vector<8x32xf32>
    %508 = vector.broadcast %506 : vector<1x32xf32> to vector<8x32xf32>
    %509 = arith.mulf %507, %508 : vector<8x32xf32>
    %510 = arith.addf %504, %509 : vector<8x32xf32>
    %511 = vector.extract_strided_slice %510 {offsets = [0, 0], sizes = [8, 8], strides = [1, 1]} : vector<8x32xf32> to vector<8x8xf32>
    %cst_83 = arith.constant 0.000000e+00 : f32
    %512 = vector.broadcast %cst_83 : f32 to vector<8x8xf32>
    %513 = arith.subf %512, %511 : vector<8x8xf32>
    %514 = math.exp %513 : vector<8x8xf32>
    %cst_84 = arith.constant 1.000000e+00 : f32
    %515 = vector.broadcast %cst_84 : f32 to vector<8x8xf32>
    %516 = arith.addf %515, %514 : vector<8x8xf32>
    %517 = tpu.reciprocal %516 : vector<8x8xf32> -> vector<8x8xf32>
    %518 = vector.extract_strided_slice %510 {offsets = [0, 8], sizes = [8, 8], strides = [1, 1]} : vector<8x32xf32> to vector<8x8xf32>
    %cst_85 = arith.constant 0.000000e+00 : f32
    %519 = vector.broadcast %cst_85 : f32 to vector<8x8xf32>
    %520 = arith.subf %519, %518 : vector<8x8xf32>
    %521 = math.exp %520 : vector<8x8xf32>
    %cst_86 = arith.constant 1.000000e+00 : f32
    %522 = vector.broadcast %cst_86 : f32 to vector<8x8xf32>
    %523 = arith.addf %522, %521 : vector<8x8xf32>
    %524 = tpu.reciprocal %523 : vector<8x8xf32> -> vector<8x8xf32>
    %525 = vector.extract_strided_slice %510 {offsets = [0, 16], sizes = [8, 8], strides = [1, 1]} : vector<8x32xf32> to vector<8x8xf32>
    %526 = math.tanh %525 : vector<8x8xf32>
    %527 = vector.extract_strided_slice %510 {offsets = [0, 24], sizes = [8, 8], strides = [1, 1]} : vector<8x32xf32> to vector<8x8xf32>
    %cst_87 = arith.constant 0.000000e+00 : f32
    %528 = vector.broadcast %cst_87 : f32 to vector<8x8xf32>
    %529 = arith.subf %528, %527 : vector<8x8xf32>
    %530 = math.exp %529 : vector<8x8xf32>
    %cst_88 = arith.constant 1.000000e+00 : f32
    %531 = vector.broadcast %cst_88 : f32 to vector<8x8xf32>
    %532 = arith.addf %531, %530 : vector<8x8xf32>
    %533 = tpu.reciprocal %532 : vector<8x8xf32> -> vector<8x8xf32>
    %534 = arith.mulf %524, %459 : vector<8x8xf32>
    %535 = arith.mulf %517, %526 : vector<8x8xf32>
    %536 = arith.addf %534, %535 : vector<8x8xf32>
    %537 = math.tanh %536 : vector<8x8xf32>
    %538 = arith.mulf %533, %537 : vector<8x8xf32>
    %c0_89 = arith.constant 0 : index
    %c0_90 = arith.constant 0 : index
    %539 = vector.load %arg9[%c0_89, %c0_90] : memref<8x20xf32, #tpu.memory_space<vmem>>, vector<8x20xf32>
    %cst_91 = arith.constant dense<0.000000e+00> : vector<8x20xf32>
    %540 = tpu.matmul %538, %539, %cst_91 {dimension_numbers = #tpu.dot_dimension_numbers<[1], [0], [0], [1], [0, 0, 1, 1], [], []>} : vector<8x8xf32>, vector<8x20xf32>, vector<8x20xf32> -> vector<8x20xf32>
    %c0_92 = arith.constant 0 : index
    %c0_93 = arith.constant 0 : index
    %541 = vector.load %arg10[%c0_92, %c0_93] : memref<1x20xf32, #tpu.memory_space<vmem>>, vector<1x20xf32>
    %542 = vector.broadcast %541 : vector<1x20xf32> to vector<8x20xf32>
    %543 = arith.addf %540, %542 : vector<8x20xf32>
    %c0_94 = arith.constant 0 : index
    %c0_95 = arith.constant 0 : index
    %544 = vector.load %arg11[%c0_94, %c0_95] : memref<8x20xf32, #tpu.memory_space<vmem>>, vector<8x20xf32>
    tpu.vector_store %arg11[%c0_94, %c0_95], %543 {strides = array<i32>} : memref<8x20xf32, #tpu.memory_space<vmem>>, vector<8x20xf32>,
    return
  }
  func.func @transform_0(%arg0: i32) -> (i32, i32) {
    %c0_i32 = arith.constant 0 : i32
    %c0_i32_0 = arith.constant 0 : i32
    return %arg0, %c0_i32 : i32, i32
  }
  func.func @transform_1(%arg0: i32) -> (i32, i32, i32) {
    %c0_i32 = arith.constant 0 : i32
    %c0_i32_0 = arith.constant 0 : i32
    %c0_i32_1 = arith.constant 0 : i32
    %c0_i32_2 = arith.constant 0 : i32
    return %c0_i32, %c0_i32_0, %c0_i32_1 : i32, i32, i32
  }
  func.func @transform_2(%arg0: i32) -> (i32, i32) {
    %c0_i32 = arith.constant 0 : i32
    %c0_i32_0 = arith.constant 0 : i32
    %c0_i32_1 = arith.constant 0 : i32
    return %c0_i32, %c0_i32_0 : i32, i32
  }
  func.func @transform_3(%arg0: i32) -> (i32, i32) {
    %c0_i32 = arith.constant 0 : i32
    %c0_i32_0 = arith.constant 0 : i32
    %c0_i32_1 = arith.constant 0 : i32
    return %c0_i32, %c0_i32_0 : i32, i32
  }
  func.func @transform_4(%arg0: i32) -> (i32, i32) {
    %c0_i32 = arith.constant 0 : i32
    %c0_i32_0 = arith.constant 0 : i32
    %c0_i32_1 = arith.constant 0 : i32
    return %c0_i32, %c0_i32_0 : i32, i32
  }
  func.func @transform_5(%arg0: i32) -> (i32, i32) {
    %c0_i32 = arith.constant 0 : i32
    %c0_i32_0 = arith.constant 0 : i32
    %c0_i32_1 = arith.constant 0 : i32
    return %c0_i32, %c0_i32_0 : i32, i32
  }
  func.func @transform_6(%arg0: i32) -> (i32, i32) {
    %c0_i32 = arith.constant 0 : i32
    %c0_i32_0 = arith.constant 0 : i32
    %c0_i32_1 = arith.constant 0 : i32
    return %c0_i32, %c0_i32_0 : i32, i32
  }
  func.func @transform_7(%arg0: i32) -> (i32, i32) {
    %c0_i32 = arith.constant 0 : i32
    %c0_i32_0 = arith.constant 0 : i32
    %c0_i32_1 = arith.constant 0 : i32
    return %c0_i32, %c0_i32_0 : i32, i32
  }
  func.func @transform_8(%arg0: i32) -> (i32, i32) {
    %c0_i32 = arith.constant 0 : i32
    %c0_i32_0 = arith.constant 0 : i32
    %c0_i32_1 = arith.constant 0 : i32
    return %c0_i32, %c0_i32_0 : i32, i32
  }
  func.func @transform_9(%arg0: i32) -> (i32, i32) {
    %c0_i32 = arith.constant 0 : i32
    %c0_i32_0 = arith.constant 0 : i32
    %c0_i32_1 = arith.constant 0 : i32
    return %c0_i32, %c0_i32_0 : i32, i32
  }
  func.func @transform_10(%arg0: i32) -> (i32, i32) {
    %c0_i32 = arith.constant 0 : i32
    %c0_i32_0 = arith.constant 0 : i32
    return %arg0, %c0_i32 : i32, i32
  }
}

</mosaic_0001>

<bundles_post_ra>
// kernel: lstm_cnn_forward.1
= control target key start
LH: loop header
LB: loop body
LE: loop exit
PB: predicated region body
PF: predicated region fallthrough
CT: control target
= control target key end

     0   :  { %15 = vsyncpa [#allocation3], 0  ;;  %s12601_s0 = inlined_call_operand.vmem [shape: f32[8,1536], index: 0, kind: input, shape index: {}]   ;;  %s12602_s1 = inlined_call_operand.hbm [shape: bf16[6,256,1024], index: 1, kind: input, shape index: {}]   ;;  %s12603_s2 = inlined_call_operand.hbm [shape: f32[6,1024], index: 2, kind: input, shape index: {}]   ;;  %s12604_s3 = inlined_call_operand.vmem [shape: bf16[768,48], index: 3, kind: input, shape index: {}]   ;;  %s12605_s4 = inlined_call_operand.hbm [shape: f32[1,48], index: 4, kind: input, shape index: {}]   ;;  %s12606_s5 = inlined_call_operand.hbm [shape: f32[48,192], index: 5, kind: input, shape index: {}]   ;;  %s12607_s6 = inlined_call_operand.hbm [shape: f32[1,192], index: 6, kind: input, shape index: {}]   ;;  %s12608_s7 = inlined_call_operand.hbm [shape: f32[8,32], index: 7, kind: input, shape index: {}]   ;;  %s12609_s8 = inlined_call_operand.hbm [shape: f32[8,20], index: 8, kind: input, shape index: {}]   ;;  %s12610_s9 = inlined_call_operand.hbm [shape: f32[1,20], index: 9, kind: input, shape index: {}]   ;;  %s12611_s10 = inlined_call_operand.vmem [shape: f32[8,20], index: 10, kind: output, shape index: {}]  }
   0x1   :  { %16 = vsyncpa [#allocation5], 0 }
   0x2   :  { %17 = vsyncpa [#allocation8], 0 }
   0x3   :  { %18 = vsyncpa [#allocation11], 0  ;;  %s40_s15 = sshll.u32 %s12603_s2, 4  ;;  %s41_s15 = int_to_ptr.hbm [resolvable:$true] %s40_s15 }
   0x4   :  { %19 = vsyncpa [#allocation14], 0  ;;  %s11864_s16 = smov [#allocation4]   ;;  %s63_s20 = sshll.u32 %s12606_s5, 4  ;;  %s64_s20 = int_to_ptr.hbm [resolvable:$true] %s63_s20 }
   0x5   :  { %s42_s17 = sshll.u32 %s11864_s16, 4  ;;  %s11865_s21 = smov [#allocation7]   ;;  %s43_s17 = int_to_ptr.vmem [resolvable:$true] %s42_s17 }
   0x6   :  { %45 = dma.hbm_to_vmem [thread:$0]  %s41_s15, 1024, %s43_s17, [#allocation5]  }
   0x7   :  { %s65_s22 = sshll.u32 %s11865_s21, 4  ;;  %s11866_s23 = smov 256   ;;  %s66_s22 = int_to_ptr.vmem [resolvable:$true] %s65_s22 }
   0x8   :  { %s11867_s24 = smov 16   ;;  %s88_s26 = sshll.u32 %s12608_s7, 4  ;;  %s89_s26 = int_to_ptr.hbm [resolvable:$true] %s88_s26 }
   0x9   :  { %71 = dma.hbm_to_vmem [thread:$0]  %s64_s20, 1536, %s66_s22, [#allocation8], %s11866_s23, %s11866_s23, %s11867_s24  }
   0xa   :  { %s11868_s27 = smov [#allocation10]   ;;  %s26_s5 = sshll.u32 %s12602_s1, 4  ;;  %s27_s5 = int_to_ptr.hbm [resolvable:$true] %s26_s5 }
   0xb   :  { %s90_s28 = sshll.u32 %s11868_s27, 4  ;;  %s11869_s11 = smov [#allocation2]   ;;  %s91_s28 = int_to_ptr.vmem [resolvable:$true] %s90_s28 }
   0xc   :  { %93 = dma.hbm_to_vmem [thread:$0]  %s89_s26, 128, %s91_s28, [#allocation11]  }
   0xd   :  { %s28_s12 = sshll.u32 %s11869_s11, 4  ;;  %s11870_s13 = smov 512   ;;  %s29_s12 = int_to_ptr.vmem [resolvable:$true] %s28_s12 }
   0xe   :  { %s11871_s14 = smov 32   ;;  %s53_s7 = sshll.u32 %s12605_s4, 4  ;;  %s54_s7 = int_to_ptr.hbm [resolvable:$true] %s53_s7 }
   0xf   :  { %34 = dma.hbm_to_vmem [thread:$0]  %s27_s5, 98304, %s29_s12, [#allocation3], %s11870_s13, %s11870_s13, %s11871_s14  }
  0x10   :  { %s11872_s17 = smov [#allocation6]   ;;  %s77_s1 = sshll.u32 %s12607_s6, 4  ;;  %s78_s1 = int_to_ptr.hbm [resolvable:$true] %s77_s1 }
  0x11   :  { %s55_s18 = sshll.u32 %s11872_s17, 4  ;;  %s11873_s21 = smov [#allocation9]   ;;  %s56_s18 = int_to_ptr.vmem [resolvable:$true] %s55_s18 }
  0x12   :  { %58 = dma.hbm_to_vmem [thread:$0]  %s54_s7, 16, %s56_s18, [#allocation5]  }
  0x13   :  { %s79_s22 = sshll.u32 %s11873_s21, 4  ;;  %s99_s2 = sshll.u32 %s12609_s8, 4  ;;  %s80_s22 = int_to_ptr.vmem [resolvable:$true] %s79_s22  ;;  %s100_s2 = int_to_ptr.hbm [resolvable:$true] %s99_s2 }
  0x14   :  { %82 = dma.hbm_to_vmem [thread:$0]  %s78_s1, 32, %s80_s22, [#allocation8]  }
  0x15   :  { %s110_s27 = sshll.u32 %s12610_s9, 4  ;;  %s11874_s28 = smov [#allocation12]   ;;  %s111_s27 = int_to_ptr.hbm [resolvable:$true] %s110_s27 }
  0x16   :  { %s101_s29 = sshll.u32 %s11874_s28, 4  ;;  %s11875_s6 = smov [#allocation13]   ;;  %s102_s29 = int_to_ptr.vmem [resolvable:$true] %s101_s29 }
  0x17   :  { %104 = dma.hbm_to_vmem [thread:$0]  %s100_s2, 128, %s102_s29, [#allocation11]  }
  0x18   :  { %s112_s30 = sshll.u32 %s11875_s6, 4  ;;  %s113_s30 = int_to_ptr.vmem [resolvable:$true] %s112_s30 }
  0x19   :  { %115 = dma.hbm_to_vmem [thread:$0]  %s111_s27, 16, %s113_s30, [#allocation14]  }
  0x1a   :  { %11854 = dma.done.wait [#allocation3], 98304  }
  0x1b   :  { %11855 = vsyncadd [#allocation3], 4294868992 }
  0x1c   :  { %11856 = dma.done.wait [#allocation5], 1040  }
  0x1d   :  { %11857 = vsyncadd [#allocation5], 4294966256 }
  0x1e   :  { %11858 = dma.done.wait [#allocation8], 1568  }
  0x1f   :  { %11859 = vsyncadd [#allocation8], 4294965728 }
  0x20   :  { %11860 = dma.done.wait [#allocation11], 256  }
  0x21   :  { %11861 = vsyncadd [#allocation11], 4294967040 }
  0x22   :  { %11862 = dma.done.wait [#allocation14], 16  }
  0x23   :  { %11863 = vsyncadd [#allocation14], 4294967280  ;;  %v7663_v0 = vld [vmem:[#allocation2 + $0x1c0] sm:$0xf]  ;;  %v10760_v5 = vld [vmem:[#allocation2 + $0x1c4] sm:$0xf] }
  0x24   :  { %v10764_v1 = vld [vmem:[#allocation2 + $0x1dc] sm:$0xf0]  ;;  %v7665_v6 = vld [vmem:[#allocation2 + $0x1e0] sm:$0xf0]  ;;  %vm6739_vm0 = vcmask 392192   ;;  %s11877_s20 = smov 24  }
  0x25   :  { %v7919_v2 = vld [vmem:[#allocation2 + $0x3c0] sm:$0xf]  ;;  %v7664_v3 = vor.u32 %v10764_v1, %v7663_v0  ;;  %v7668_v8 = vor.u32 %v10760_v5, %v7665_v6  ;;  %v10824_v9 = vld [vmem:[#allocation2 + $0x3c4] sm:$0xf]  ;;  %s11886_s1 = smov 40   ;;  %s11887_s21 = smov 8  }
  0x26   :  { %v10828_v4 = vld [vmem:[#allocation2 + $0x3dc] sm:$0xf0]  ;;  %v7921_v10 = vld [vmem:[#allocation2 + $0x3e0] sm:$0xf0]  ;;  %s11896_s22 = smov 64   ;;  %s11905_s23 = smov 96  }
  0x27   :  { %v7920_v7 = vor.u32 %v10828_v4, %v7919_v2  ;;  %v7631_v11 = vld [vmem:[#allocation2 + $0x180] sm:$0xf]  ;;  %940 = vmatpush.bf16.msra.mxu0 %v7664_v3  ;;  %v7924_v12 = vor.u32 %v10824_v9, %v7921_v10  ;;  %966 = vmatpush.bf16.msra.mxu2 %v7668_v8  ;;  %v10752_v18 = vld [vmem:[#allocation2 + $0x184] sm:$0xf] }
  0x28   :  { %v10756_v13 = vld [vmem:[#allocation2 + $0x19c] sm:$0xf0]  ;;  %v7633_v19 = vld [vmem:[#allocation2 + $0x1a0] sm:$0xf0] }
  0x29   :  { %v7887_v14 = vld [vmem:[#allocation2 + $0x380] sm:$0xf]  ;;  %953 = vmatpush.bf16.msra.mxu1 %v7920_v7  ;;  %v7632_v16 = vor.u32 %v10756_v13, %v7631_v11  ;;  %v10816_v20 = vld [vmem:[#allocation2 + $0x384] sm:$0xf]  ;;  %979 = vmatpush.bf16.msra.mxu3 %v7924_v12  ;;  %v7636_v21 = vor.u32 %v10752_v18, %v7633_v19 }
  0x2a   :  { %v10820_v15 = vld [vmem:[#allocation2 + $0x39c] sm:$0xf0]  ;;  %v7889_v22 = vld [vmem:[#allocation2 + $0x3a0] sm:$0xf0] }
  0x2b   :  { %v7888_v17 = vor.u32 %v10820_v15, %v7887_v14  ;;  %v7599_v23 = vld [vmem:[#allocation2 + $0x140] sm:$0xf]  ;;  %v7892_v25 = vor.u32 %v10816_v20, %v7889_v22  ;;  %v10744_v28 = vld [vmem:[#allocation2 + $0x144] sm:$0xf]  ;;  %941 = vmatpush.bf16.msra.mxu0 %v7632_v16  ;;  %967 = vmatpush.bf16.msra.mxu2 %v7636_v21 }
  0x2c   :  { %v10748_v24 = vld [vmem:[#allocation2 + $0x15c] sm:$0xf0]  ;;  %v7601_v30 = vld [vmem:[#allocation2 + $0x160] sm:$0xf0] }
  0x2d   :  { %v7855_v26 = vld [vmem:[#allocation2 + $0x340] sm:$0xf]  ;;  %v7600_v29 = vor.u32 %v10748_v24, %v7599_v23  ;;  %v10808_v31 = vld [vmem:[#allocation2 + $0x344] sm:$0xf]  ;;  %954 = vmatpush.bf16.msra.mxu1 %v7888_v17  ;;  %v7604_v34 = vor.u32 %v10744_v28, %v7601_v30  ;;  %980 = vmatpush.bf16.msra.mxu3 %v7892_v25  ;;  %v7671_v28 = vld [vmem:[#allocation2 + $0x1c8] sm:$0xf] }
  0x2e   :  { %v10812_v27 = vld [vmem:[#allocation2 + $0x35c] sm:$0xf0]  ;;  %v7857_v32 = vld [vmem:[#allocation2 + $0x360] sm:$0xf0]  ;;  %v7927_v30 = vld [vmem:[#allocation2 + $0x3c8] sm:$0xf] }
  0x2f   :  { %v7856_v33 = vor.u32 %v10812_v27, %v7855_v26  ;;  %v7567_v35 = vld [vmem:[#allocation2 + $0x100] sm:$0xf]  ;;  %v7860_v38 = vor.u32 %v10808_v31, %v7857_v32  ;;  %v10736_v40 = vld [vmem:[#allocation2 + $0x104] sm:$0xf]  ;;  %942 = vmatpush.bf16.msra.mxu0 %v7600_v29  ;;  %968 = vmatpush.bf16.msra.mxu2 %v7604_v34  ;;  %v10765_v29 = vld [vmem:[#allocation2 + $0x1e4] sm:$0xf0] }
  0x30   :  { %v10740_v36 = vld [vmem:[#allocation2 + $0x11c] sm:$0xf0]  ;;  %v7569_v41 = vld [vmem:[#allocation2 + $0x120] sm:$0xf0]  ;;  %v10829_v32 = vld [vmem:[#allocation2 + $0x3e4] sm:$0xf0] }
  0x31   :  { %v7823_v37 = vld [vmem:[#allocation2 + $0x300] sm:$0xf]  ;;  %v10800_v42 = vld [vmem:[#allocation2 + $0x304] sm:$0xf]  ;;  %v7568_v44 = vor.u32 %v10740_v36, %v7567_v35  ;;  %955 = vmatpush.bf16.msra.mxu1 %v7856_v33  ;;  %v7572_v46 = vor.u32 %v10736_v40, %v7569_v41  ;;  %981 = vmatpush.bf16.msra.mxu3 %v7860_v38  ;;  %v10761_v33 = vld [vmem:[#allocation2 + $0x1cc] sm:$0xf]  ;;  %v7672_v40 = vor.u32 %v10765_v29, %v7671_v28 }
  0x32   :  { %v10804_v39 = vld [vmem:[#allocation2 + $0x31c] sm:$0xf0]  ;;  %v7825_v43 = vld [vmem:[#allocation2 + $0x320] sm:$0xf0]  ;;  %v7673_v34 = vld [vmem:[#allocation2 + $0x1e8] sm:$0xf0]  ;;  %v7928_v41 = vor.u32 %v10829_v32, %v7927_v30 }
  0x33   :  { %v7824_v45 = vor.u32 %v10804_v39, %v7823_v37  ;;  %v7535_v47 = vld [vmem:[#allocation2 + $0xc0] sm:$0xf]  ;;  %v7828_v50 = vor.u32 %v10800_v42, %v7825_v43  ;;  %v10728_v52 = vld [vmem:[#allocation2 + $0xc4] sm:$0xf]  ;;  %943 = vmatpush.bf16.msra.mxu0 %v7568_v44  ;;  %969 = vmatpush.bf16.msra.mxu2 %v7572_v46  ;;  %v10825_v37 = vld [vmem:[#allocation2 + $0x3cc] sm:$0xf]  ;;  %v7676_v42 = vor.u32 %v10761_v33, %v7673_v34 }
  0x34   :  { %v10732_v48 = vld [vmem:[#allocation2 + $0xdc] sm:$0xf0]  ;;  %v7537_v53 = vld [vmem:[#allocation2 + $0xe0] sm:$0xf0]  ;;  %v7929_v38 = vld [vmem:[#allocation2 + $0x3e8] sm:$0xf0] }
  0x35   :  { %v7791_v49 = vld [vmem:[#allocation2 + $0x2c0] sm:$0xf]  ;;  %v10792_v54 = vld [vmem:[#allocation2 + $0x2c4] sm:$0xf]  ;;  %v7536_v56 = vor.u32 %v10732_v48, %v7535_v47  ;;  %956 = vmatpush.bf16.msra.mxu1 %v7824_v45  ;;  %v7540_v58 = vor.u32 %v10728_v52, %v7537_v53  ;;  %982 = vmatpush.bf16.msra.mxu3 %v7828_v50  ;;  %v7639_v43 = vld [vmem:[#allocation2 + $0x188] sm:$0xf]  ;;  %v7932_v46 = vor.u32 %v10825_v37, %v7929_v38 }
  0x36   :  { %v10796_v51 = vld [vmem:[#allocation2 + $0x2dc] sm:$0xf0]  ;;  %v7793_v55 = vld [vmem:[#allocation2 + $0x2e0] sm:$0xf0]  ;;  %v10757_v44 = vld [vmem:[#allocation2 + $0x1a4] sm:$0xf0] }
  0x37   :  { %v7792_v57 = vor.u32 %v10796_v51, %v7791_v49  ;;  %v7503_v59 = vld [vmem:[#allocation2 + $0x80] sm:$0xf]  ;;  %v7796_v62 = vor.u32 %v10792_v54, %v7793_v55  ;;  %v10720_v0 = vld [vmem:[#allocation2 + $0x84] sm:$0xf]  ;;  %944 = vmatpush.bf16.msra.mxu0 %v7536_v56  ;;  %970 = vmatpush.bf16.msra.mxu2 %v7540_v58  ;;  %v7895_v45 = vld [vmem:[#allocation2 + $0x388] sm:$0xf]  ;;  %v7640_v52 = vor.u32 %v10757_v44, %v7639_v43 }
  0x38   :  { %v10724_v60 = vld [vmem:[#allocation2 + $0x9c] sm:$0xf0]  ;;  %v7505_v1 = vld [vmem:[#allocation2 + $0xa0] sm:$0xf0]  ;;  %v10821_v47 = vld [vmem:[#allocation2 + $0x3a4] sm:$0xf0] }
  0x39   :  { %v7759_v61 = vld [vmem:[#allocation2 + $0x280] sm:$0xf]  ;;  %v10784_v2 = vld [vmem:[#allocation2 + $0x284] sm:$0xf]  ;;  %v7504_v4 = vor.u32 %v10724_v60, %v7503_v59  ;;  %957 = vmatpush.bf16.msra.mxu1 %v7792_v57  ;;  %v7508_v6 = vor.u32 %v10720_v0, %v7505_v1  ;;  %983 = vmatpush.bf16.msra.mxu3 %v7796_v62  ;;  %v10753_v48 = vld [vmem:[#allocation2 + $0x18c] sm:$0xf]  ;;  %v7896_v54 = vor.u32 %v10821_v47, %v7895_v45 }
  0x3a   :  { %v10788_v63 = vld [vmem:[#allocation2 + $0x29c] sm:$0xf0]  ;;  %v7761_v3 = vld [vmem:[#allocation2 + $0x2a0] sm:$0xf0]  ;;  %v7641_v49 = vld [vmem:[#allocation2 + $0x1a8] sm:$0xf0] }
  0x3b   :  { %v7760_v5 = vor.u32 %v10788_v63, %v7759_v61  ;;  %v7471_v7 = vld [vmem:[#allocation2 + $0x40] sm:$0xf]  ;;  %v7764_v10 = vor.u32 %v10784_v2, %v7761_v3  ;;  %v10712_v12 = vld [vmem:[#allocation2 + $0x44] sm:$0xf]  ;;  %945 = vmatpush.bf16.msra.mxu0 %v7504_v4  ;;  %971 = vmatpush.bf16.msra.mxu2 %v7508_v6  ;;  %v10817_v50 = vld [vmem:[#allocation2 + $0x38c] sm:$0xf]  ;;  %v7644_v55 = vor.u32 %v10753_v48, %v7641_v49 }
  0x3c   :  { %v10716_v8 = vld [vmem:[#allocation2 + $0x5c] sm:$0xf0]  ;;  %v7473_v13 = vld [vmem:[#allocation2 + $0x60] sm:$0xf0]  ;;  %v7897_v51 = vld [vmem:[#allocation2 + $0x3a8] sm:$0xf0] }
  0x3d   :  { %v7727_v9 = vld [vmem:[#allocation2 + $0x240] sm:$0xf]  ;;  %v10776_v14 = vld [vmem:[#allocation2 + $0x244] sm:$0xf]  ;;  %v7472_v16 = vor.u32 %v10716_v8, %v7471_v7  ;;  %958 = vmatpush.bf16.msra.mxu1 %v7760_v5  ;;  %v7476_v20 = vor.u32 %v10712_v12, %v7473_v13  ;;  %984 = vmatpush.bf16.msra.mxu3 %v7764_v10  ;;  %v7607_v53 = vld [vmem:[#allocation2 + $0x148] sm:$0xf]  ;;  %v7900_v59 = vor.u32 %v10817_v50, %v7897_v51 }
  0x3e   :  { %v10780_v11 = vld [vmem:[#allocation2 + $0x25c] sm:$0xf0]  ;;  %v7729_v15 = vld [vmem:[#allocation2 + $0x260] sm:$0xf0]  ;;  %v10749_v56 = vld [vmem:[#allocation2 + $0x164] sm:$0xf0] }
  0x3f   :  { %v7439_v17 = vld [vmem:[#allocation2] sm:$0xf]  ;;  %v7728_v19 = vor.u32 %v10780_v11, %v7727_v9  ;;  %v10704_v23 = vld [vmem:[#allocation2 + $0x4] sm:$0xf]  ;;  %v7732_v24 = vor.u32 %v10776_v14, %v7729_v15  ;;  %946 = vmatpush.bf16.msra.mxu0 %v7472_v16  ;;  %972 = vmatpush.bf16.msra.mxu2 %v7476_v20  ;;  %v7863_v57 = vld [vmem:[#allocation2 + $0x348] sm:$0xf]  ;;  %v7608_v0 = vor.u32 %v10749_v56, %v7607_v53 }
  0x40   :  { %v10708_v18 = vld [vmem:[#allocation2 + $0x1c] sm:$0xf0]  ;;  %v7441_v25 = vld [vmem:[#allocation2 + $0x20] sm:$0xf0]  ;;  %v10813_v58 = vld [vmem:[#allocation2 + $0x364] sm:$0xf0] }
  0x41   :  { %v7695_v21 = vld [vmem:[#allocation2 + $0x200] sm:$0xf]  ;;  %v10768_v26 = vld [vmem:[#allocation2 + $0x204] sm:$0xf]  ;;  %v7440_v31 = vor.u32 %v10708_v18, %v7439_v17  ;;  %959 = vmatpush.bf16.msra.mxu1 %v7728_v19  ;;  %v7444_v36 = vor.u32 %v10704_v23, %v7441_v25  ;;  %985 = vmatpush.bf16.msra.mxu3 %v7732_v24  ;;  %v10745_v60 = vld [vmem:[#allocation2 + $0x14c] sm:$0xf]  ;;  %v7864_v1 = vor.u32 %v10813_v58, %v7863_v57 }
  0x42   :  { %v10772_v22 = vld [vmem:[#allocation2 + $0x21c] sm:$0xf0]  ;;  %v7697_v27 = vld [vmem:[#allocation2 + $0x220] sm:$0xf0]  ;;  %v7609_v61 = vld [vmem:[#allocation2 + $0x168] sm:$0xf0] }
  0x43   :  { %v7696_v35 = vor.u32 %v10772_v22, %v7695_v21  ;;  %v7700_v39 = vor.u32 %v10768_v26, %v7697_v27  ;;  %947 = vmatpush.bf16.msra.mxu0 %v7440_v31  ;;  %973 = vmatpush.bf16.msra.mxu2 %v7444_v36  ;;  %v10809_v62 = vld [vmem:[#allocation2 + $0x34c] sm:$0xf]  ;;  %v148_v2 = vld [vmem:[%s12601_s0] sm:$0xff]  ;;  %v7612_v4 = vor.u32 %v10745_v60, %v7609_v61  ;;  %v7575_v5 = vld [vmem:[#allocation2 + $0x108] sm:$0xf] }
  0x44   :  { %v7865_v63 = vld [vmem:[#allocation2 + $0x368] sm:$0xf0]  ;;  %v10741_v6 = vld [vmem:[#allocation2 + $0x124] sm:$0xf0]  ;;  %v12002_v8 = vpack.c.bf16 %v148_v2, %v148_v2  ;;  %v7935_v2 = vld [vmem:[#allocation2 + $0x3d0] sm:$0xf] }
  0x45   :  { %960 = vmatpush.bf16.msra.mxu1 %v7696_v35  ;;  %986 = vmatpush.bf16.msra.mxu3 %v7700_v39  ;;  %v149_v3 = vld [vmem:[%s12601_s0 + $0x8] sm:$0xff]  ;;  %v7868_v10 = vor.u32 %v10809_v62, %v7865_v63  ;;  %v7576_v16 = vor.u32 %v10741_v6, %v7575_v5  ;;  %v10762_v5 = vld [vmem:[#allocation2 + $0x1d4] sm:$0xf] }
  0x46   :  { %v7831_v7 = vld [vmem:[#allocation2 + $0x308] sm:$0xf]  ;;  %v12004_v9 = vpack.c.bf16 %v149_v3, %v149_v3  ;;  %v10737_v12 = vld [vmem:[#allocation2 + $0x10c] sm:$0xf]  ;;  %974 = vmatmul.bf16.vlgmr.msra.gmra.mxu2 %v12002_v8  ;;  %948 = vmatmul.bf16.vlgmr.msra.gmra.mxu0 %v12002_v8  ;;  %v7681_v6 = vld [vmem:[#allocation2 + $0x1f0] sm:$0xf0] }
  0x47   :  { %992 = vmatpush.bf16.msrb.mxu0 %v7672_v40  ;;  %1018 = vmatpush.bf16.msrb.mxu2 %v7676_v42  ;;  %v10805_v11 = vld [vmem:[#allocation2 + $0x324] sm:$0xf0]  ;;  %v7577_v13 = vld [vmem:[#allocation2 + $0x128] sm:$0xf0] }
  0x48   :  { %v10801_v14 = vld [vmem:[#allocation2 + $0x30c] sm:$0xf]  ;;  %987 = vmatmul.bf16.vlgmr.msra.gmra.mxu3 %v12004_v9  ;;  %961 = vmatmul.bf16.vlgmr.msra.gmra.mxu1 %v12004_v9  ;;  %v7832_v17 = vor.u32 %v10805_v11, %v7831_v7  ;;  %v7580_v18 = vor.u32 %v10737_v12, %v7577_v13  ;;  %v7543_v19 = vld [vmem:[#allocation2 + $0xc8] sm:$0xf]  ;;  %v10826_v11 = vld [vmem:[#allocation2 + $0x3d4] sm:$0xf] }
  0x49   :  { %1005 = vmatpush.bf16.msrb.mxu1 %v7928_v41  ;;  %1031 = vmatpush.bf16.msrb.mxu3 %v7932_v46  ;;  %v7833_v15 = vld [vmem:[#allocation2 + $0x328] sm:$0xf0]  ;;  %v10733_v20 = vld [vmem:[#allocation2 + $0xe4] sm:$0xf0]  ;;  %v7937_v12 = vld [vmem:[#allocation2 + $0x3f0] sm:$0xf0] }
  0x4a   :  { %v7799_v21 = vld [vmem:[#allocation2 + $0x2c8] sm:$0xf]  ;;  %v7836_v22 = vor.u32 %v10801_v14, %v7833_v15  ;;  %v10729_v24 = vld [vmem:[#allocation2 + $0xcc] sm:$0xf]  ;;  %v7544_v28 = vor.u32 %v10733_v20, %v7543_v19  ;;  %v7903_v19 = vld [vmem:[#allocation2 + $0x390] sm:$0xf]  ;;  %v7940_v20 = vor.u32 %v10826_v11, %v7937_v12 }
  0x4b   :  { %993 = vmatpush.bf16.msrb.mxu0 %v7640_v52  ;;  %1019 = vmatpush.bf16.msrb.mxu2 %v7644_v55  ;;  %v10797_v23 = vld [vmem:[#allocation2 + $0x2e4] sm:$0xf0]  ;;  %v7545_v25 = vld [vmem:[#allocation2 + $0xe8] sm:$0xf0]  ;;  %v7777_v11 = vld [vmem:[#allocation2 + $0x2b0] sm:$0xf0] }
  0x4c   :  { %v10793_v26 = vld [vmem:[#allocation2 + $0x2cc] sm:$0xf]  ;;  %v7800_v29 = vor.u32 %v10797_v23, %v7799_v21  ;;  %v7548_v30 = vor.u32 %v10729_v24, %v7545_v25  ;;  %v7511_v31 = vld [vmem:[#allocation2 + $0x88] sm:$0xf]  ;;  %v10822_v21 = vld [vmem:[#allocation2 + $0x3ac] sm:$0xf0] }
  0x4d   :  { %1006 = vmatpush.bf16.msrb.mxu1 %v7896_v54  ;;  %1032 = vmatpush.bf16.msrb.mxu3 %v7900_v59  ;;  %v7801_v27 = vld [vmem:[#allocation2 + $0x2e8] sm:$0xf0]  ;;  %v10725_v32 = vld [vmem:[#allocation2 + $0xa4] sm:$0xf0]  ;;  %v7649_v23 = vld [vmem:[#allocation2 + $0x1b0] sm:$0xf0] }
  0x4e   :  { %v7767_v33 = vld [vmem:[#allocation2 + $0x288] sm:$0xf]  ;;  %v7804_v34 = vor.u32 %v10793_v26, %v7801_v27  ;;  %v10721_v36 = vld [vmem:[#allocation2 + $0x8c] sm:$0xf]  ;;  %v7512_v40 = vor.u32 %v10725_v32, %v7511_v31  ;;  %v10818_v24 = vld [vmem:[#allocation2 + $0x394] sm:$0xf]  ;;  %v7904_v27 = vor.u32 %v10822_v21, %v7903_v19 }
  0x4f   :  { %994 = vmatpush.bf16.msrb.mxu0 %v7608_v0  ;;  %1020 = vmatpush.bf16.msrb.mxu2 %v7612_v4  ;;  %v10789_v35 = vld [vmem:[#allocation2 + $0x2a4] sm:$0xf0]  ;;  %v7513_v37 = vld [vmem:[#allocation2 + $0xa8] sm:$0xf0]  ;;  %v7679_v0 = vld [vmem:[#allocation2 + $0x1d0] sm:$0xf] }
  0x50   :  { %v10785_v38 = vld [vmem:[#allocation2 + $0x28c] sm:$0xf]  ;;  %v7768_v41 = vor.u32 %v10789_v35, %v7767_v33  ;;  %v7516_v42 = vor.u32 %v10721_v36, %v7513_v37  ;;  %v7479_v43 = vld [vmem:[#allocation2 + $0x48] sm:$0xf]  ;;  %v10830_v4 = vld [vmem:[#allocation2 + $0x3ec] sm:$0xf0] }
  0x51   :  { %1007 = vmatpush.bf16.msrb.mxu1 %v7864_v1  ;;  %1033 = vmatpush.bf16.msrb.mxu3 %v7868_v10  ;;  %v7769_v39 = vld [vmem:[#allocation2 + $0x2a8] sm:$0xf0]  ;;  %v10717_v44 = vld [vmem:[#allocation2 + $0x64] sm:$0xf0]  ;;  %v10766_v1 = vld [vmem:[#allocation2 + $0x1ec] sm:$0xf0]  ;;  %v7936_v15 = vor.u32 %v10830_v4, %v7935_v2 }
  0x52   :  { %v7735_v45 = vld [vmem:[#allocation2 + $0x248] sm:$0xf]  ;;  %v7772_v46 = vor.u32 %v10785_v38, %v7769_v39  ;;  %v10713_v48 = vld [vmem:[#allocation2 + $0x4c] sm:$0xf]  ;;  %v7480_v52 = vor.u32 %v10717_v44, %v7479_v43  ;;  %v7680_v14 = vor.u32 %v10766_v1, %v7679_v0  ;;  %v7905_v25 = vld [vmem:[#allocation2 + $0x3b0] sm:$0xf0] }
  0x53   :  { %995 = vmatpush.bf16.msrb.mxu0 %v7576_v16  ;;  %1021 = vmatpush.bf16.msrb.mxu2 %v7580_v18  ;;  %v10781_v47 = vld [vmem:[#allocation2 + $0x264] sm:$0xf0]  ;;  %v7481_v49 = vld [vmem:[#allocation2 + $0x68] sm:$0xf0]  ;;  %v7684_v16 = vor.u32 %v10762_v5, %v7681_v6  ;;  %v10758_v18 = vld [vmem:[#allocation2 + $0x1ac] sm:$0xf0]  ;;  %v7908_v32 = vor.u32 %v10818_v24, %v7905_v25 }
  0x54   :  { %v10777_v50 = vld [vmem:[#allocation2 + $0x24c] sm:$0xf]  ;;  %v7447_v53 = vld [vmem:[#allocation2 + $0x8] sm:$0xf]  ;;  %v7736_v55 = vor.u32 %v10781_v47, %v7735_v45  ;;  %v7484_v56 = vor.u32 %v10713_v48, %v7481_v49  ;;  %v7871_v31 = vld [vmem:[#allocation2 + $0x350] sm:$0xf] }
  0x55   :  { %1008 = vmatpush.bf16.msrb.mxu1 %v7832_v17  ;;  %1034 = vmatpush.bf16.msrb.mxu3 %v7836_v22  ;;  %v7737_v51 = vld [vmem:[#allocation2 + $0x268] sm:$0xf0]  ;;  %v10709_v54 = vld [vmem:[#allocation2 + $0x24] sm:$0xf0]  ;;  %v7647_v17 = vld [vmem:[#allocation2 + $0x190] sm:$0xf] }
  0x56   :  { %v7703_v57 = vld [vmem:[#allocation2 + $0x208] sm:$0xf]  ;;  %v10705_v59 = vld [vmem:[#allocation2 + $0xc] sm:$0xf]  ;;  %v7740_v60 = vor.u32 %v10777_v50, %v7737_v51  ;;  %v7448_v3 = vor.u32 %v10709_v54, %v7447_v53  ;;  %v10754_v22 = vld [vmem:[#allocation2 + $0x194] sm:$0xf]  ;;  %v7648_v26 = vor.u32 %v10758_v18, %v7647_v17 }
  0x57   :  { %996 = vmatpush.bf16.msrb.mxu0 %v7544_v28  ;;  %1022 = vmatpush.bf16.msrb.mxu2 %v7548_v30  ;;  %v10773_v58 = vld [vmem:[#allocation2 + $0x224] sm:$0xf0]  ;;  %v7449_v61 = vld [vmem:[#allocation2 + $0x28] sm:$0xf0]  ;;  %v7652_v28 = vor.u32 %v10754_v22, %v7649_v23  ;;  %v10750_v30 = vld [vmem:[#allocation2 + $0x16c] sm:$0xf0] }
  0x58   :  { %v10769_v62 = vld [vmem:[#allocation2 + $0x20c] sm:$0xf]  ;;  %v7704_v7 = vor.u32 %v10773_v58, %v7703_v57  ;;  %v7452_v10 = vor.u32 %v10705_v59, %v7449_v61  ;;  %v10814_v33 = vld [vmem:[#allocation2 + $0x36c] sm:$0xf0]  ;;  %v7617_v35 = vld [vmem:[#allocation2 + $0x170] sm:$0xf0] }
  0x59   :  { %1009 = vmatpush.bf16.msrb.mxu1 %v7800_v29  ;;  %1035 = vmatpush.bf16.msrb.mxu3 %v7804_v34  ;;  %v7705_v63 = vld [vmem:[#allocation2 + $0x228] sm:$0xf0]  ;;  %v7615_v29 = vld [vmem:[#allocation2 + $0x150] sm:$0xf]  ;;  %v10746_v34 = vld [vmem:[#allocation2 + $0x154] sm:$0xf]  ;;  %v7872_v39 = vor.u32 %v10814_v33, %v7871_v31 }
  0x5a   :  { %v7708_v13 = vor.u32 %v10769_v62, %v7705_v63  ;;  %v10810_v36 = vld [vmem:[#allocation2 + $0x354] sm:$0xf]  ;;  %v7616_v38 = vor.u32 %v10750_v30, %v7615_v29  ;;  %v7839_v43 = vld [vmem:[#allocation2 + $0x310] sm:$0xf] }
  0x5b   :  { %997 = vmatpush.bf16.msrb.mxu0 %v7512_v40  ;;  %1023 = vmatpush.bf16.msrb.mxu2 %v7516_v42  ;;  %v7873_v37 = vld [vmem:[#allocation2 + $0x370] sm:$0xf0]  ;;  %v7620_v40 = vor.u32 %v10746_v34, %v7617_v35  ;;  %v10742_v42 = vld [vmem:[#allocation2 + $0x12c] sm:$0xf0] }
  0x5c   :  { %v7876_v44 = vor.u32 %v10810_v36, %v7873_v37  ;;  %v10806_v45 = vld [vmem:[#allocation2 + $0x32c] sm:$0xf0]  ;;  %v7585_v47 = vld [vmem:[#allocation2 + $0x130] sm:$0xf0]  ;;  %v7687_v36 = vld [vmem:[#allocation2 + $0x1d8] sm:$0xf] }
  0x5d   :  { %1010 = vmatpush.bf16.msrb.mxu1 %v7768_v41  ;;  %1036 = vmatpush.bf16.msrb.mxu3 %v7772_v46  ;;  %v7583_v41 = vld [vmem:[#allocation2 + $0x110] sm:$0xf]  ;;  %v10738_v46 = vld [vmem:[#allocation2 + $0x114] sm:$0xf]  ;;  %v7840_v51 = vor.u32 %v10806_v45, %v7839_v43  ;;  %v10767_v37 = vld [vmem:[#allocation2 + $0x1f4] sm:$0xf0] }
  0x5e   :  { %v10802_v48 = vld [vmem:[#allocation2 + $0x314] sm:$0xf]  ;;  %v7584_v50 = vor.u32 %v10742_v42, %v7583_v41  ;;  %v7551_v53 = vld [vmem:[#allocation2 + $0xd0] sm:$0xf]  ;;  %v10763_v41 = vld [vmem:[#allocation2 + $0x1dc] sm:$0xf] }
  0x5f   :  { %998 = vmatpush.bf16.msrb.mxu0 %v7480_v52  ;;  %1024 = vmatpush.bf16.msrb.mxu2 %v7484_v56  ;;  %v7841_v49 = vld [vmem:[#allocation2 + $0x330] sm:$0xf0]  ;;  %v7588_v52 = vor.u32 %v10738_v46, %v7585_v47  ;;  %v10734_v54 = vld [vmem:[#allocation2 + $0xec] sm:$0xf0]  ;;  %v7689_v42 = vld [vmem:[#allocation2 + $0x1f8] sm:$0xf0] }
  0x60   :  { %v7844_v56 = vor.u32 %v10802_v48, %v7841_v49  ;;  %v10798_v57 = vld [vmem:[#allocation2 + $0x2ec] sm:$0xf0]  ;;  %v10730_v58 = vld [vmem:[#allocation2 + $0xd4] sm:$0xf]  ;;  %v7552_v62 = vor.u32 %v10734_v54, %v7551_v53  ;;  %v10827_v45 = vld [vmem:[#allocation2 + $0x3dc] sm:$0xf]  ;;  %v7688_v48 = vor.u32 %v10767_v37, %v7687_v36 }
  0x61   :  { %1011 = vmatpush.bf16.msrb.mxu1 %v7736_v55  ;;  %1037 = vmatpush.bf16.msrb.mxu3 %v7740_v60  ;;  %v7807_v55 = vld [vmem:[#allocation2 + $0x2d0] sm:$0xf]  ;;  %v7553_v59 = vld [vmem:[#allocation2 + $0xf0] sm:$0xf0]  ;;  %v7945_v46 = vld [vmem:[#allocation2 + $0x3f8] sm:$0xf0] }
  0x62   :  { %v10794_v60 = vld [vmem:[#allocation2 + $0x2d4] sm:$0xf]  ;;  %v7519_v63 = vld [vmem:[#allocation2 + $0x90] sm:$0xf]  ;;  %v7808_v0 = vor.u32 %v10798_v57, %v7807_v55  ;;  %v7556_v1 = vor.u32 %v10730_v58, %v7553_v59  ;;  %v7911_v53 = vld [vmem:[#allocation2 + $0x398] sm:$0xf]  ;;  %v7948_v54 = vor.u32 %v10827_v45, %v7945_v46 }
  0x63   :  { %999 = vmatpush.bf16.msrb.mxu0 %v7448_v3  ;;  %1025 = vmatpush.bf16.msrb.mxu2 %v7452_v10  ;;  %v7809_v61 = vld [vmem:[#allocation2 + $0x2f0] sm:$0xf0]  ;;  %v10726_v2 = vld [vmem:[#allocation2 + $0xac] sm:$0xf0]  ;;  %v10823_v55 = vld [vmem:[#allocation2 + $0x3b4] sm:$0xf0] }
  0x64   :  { %v7775_v3 = vld [vmem:[#allocation2 + $0x290] sm:$0xf]  ;;  %v7812_v5 = vor.u32 %v10794_v60, %v7809_v61  ;;  %v10722_v6 = vld [vmem:[#allocation2 + $0x94] sm:$0xf]  ;;  %v7520_v12 = vor.u32 %v10726_v2, %v7519_v63  ;;  %v7657_v57 = vld [vmem:[#allocation2 + $0x1b8] sm:$0xf0]  ;;  %v7912_v61 = vor.u32 %v10823_v55, %v7911_v53 }
  0x65   :  { %1012 = vmatpush.bf16.msrb.mxu1 %v7704_v7  ;;  %1038 = vmatpush.bf16.msrb.mxu3 %v7708_v13  ;;  %v10790_v4 = vld [vmem:[#allocation2 + $0x2ac] sm:$0xf0]  ;;  %v7521_v7 = vld [vmem:[#allocation2 + $0xb0] sm:$0xf0]  ;;  %v10819_v58 = vld [vmem:[#allocation2 + $0x39c] sm:$0xf] }
  0x66   :  { %1000 = vmatmul.bf16.vlgmr.msrb.gmra.mxu0 %v12002_v8  ;;  %1026 = vmatmul.bf16.vlgmr.msrb.gmra.mxu2 %v12002_v8  ;;  %v10786_v10 = vld [vmem:[#allocation2 + $0x294] sm:$0xf]  ;;  %v7776_v13 = vor.u32 %v10790_v4, %v7775_v3  ;;  %v7743_v17 = vld [vmem:[#allocation2 + $0x250] sm:$0xf]  ;;  %v7913_v59 = vld [vmem:[#allocation2 + $0x3b8] sm:$0xf0] }
  0x67   :  { %1044 = vmatpush.bf16.msra.mxu0 %v7680_v14  ;;  %1070 = vmatpush.bf16.msra.mxu2 %v7684_v16  ;;  %v7524_v14 = vor.u32 %v10722_v6, %v7521_v7  ;;  %v10718_v16 = vld [vmem:[#allocation2 + $0x6c] sm:$0xf0]  ;;  %v7780_v18 = vor.u32 %v10786_v10, %v7777_v11  ;;  %v7489_v21 = vld [vmem:[#allocation2 + $0x70] sm:$0xf0]  ;;  %v7623_v63 = vld [vmem:[#allocation2 + $0x158] sm:$0xf]  ;;  %v7916_v2 = vor.u32 %v10819_v58, %v7913_v59 }
  0x68   :  { %1013 = vmatmul.bf16.vlgmr.msrb.gmra.mxu1 %v12004_v9  ;;  %1039 = vmatmul.bf16.vlgmr.msrb.gmra.mxu3 %v12004_v9  ;;  %v10782_v19 = vld [vmem:[#allocation2 + $0x26c] sm:$0xf0]  ;;  %v10778_v22 = vld [vmem:[#allocation2 + $0x254] sm:$0xf]  ;;  %v10815_v3 = vld [vmem:[#allocation2 + $0x374] sm:$0xf0] }
  0x69   :  { %1057 = vmatpush.bf16.msra.mxu1 %v7936_v15  ;;  %1083 = vmatpush.bf16.msra.mxu3 %v7940_v20  ;;  %v7487_v15 = vld [vmem:[#allocation2 + $0x50] sm:$0xf]  ;;  %v10714_v20 = vld [vmem:[#allocation2 + $0x54] sm:$0xf]  ;;  %v10747_v4 = vld [vmem:[#allocation2 + $0x15c] sm:$0xf] }
  0x6a   :  { %v7745_v23 = vld [vmem:[#allocation2 + $0x270] sm:$0xf0]  ;;  %v7488_v24 = vor.u32 %v10718_v16, %v7487_v15  ;;  %v7455_v25 = vld [vmem:[#allocation2 + $0x10] sm:$0xf]  ;;  %v10811_v6 = vld [vmem:[#allocation2 + $0x35c] sm:$0xf] }
  0x6b   :  { %1045 = vmatpush.bf16.msra.mxu0 %v7648_v26  ;;  %1071 = vmatpush.bf16.msra.mxu2 %v7652_v28  ;;  %v10710_v26 = vld [vmem:[#allocation2 + $0x2c] sm:$0xf0]  ;;  %v7492_v28 = vor.u32 %v10714_v20, %v7489_v21  ;;  %v10706_v31 = vld [vmem:[#allocation2 + $0x14] sm:$0xf]  ;;  %v7881_v7 = vld [vmem:[#allocation2 + $0x378] sm:$0xf0] }
  0x6c   :  { %v7711_v29 = vld [vmem:[#allocation2 + $0x210] sm:$0xf]  ;;  %v7457_v33 = vld [vmem:[#allocation2 + $0x30] sm:$0xf0]  ;;  %v7847_v15 = vld [vmem:[#allocation2 + $0x318] sm:$0xf]  ;;  %v7884_v16 = vor.u32 %v10811_v6, %v7881_v7 }
  0x6d   :  { %1058 = vmatpush.bf16.msra.mxu1 %v7904_v27  ;;  %1084 = vmatpush.bf16.msra.mxu3 %v7908_v32  ;;  %v7744_v27 = vor.u32 %v10782_v19, %v7743_v17  ;;  %v10774_v30 = vld [vmem:[#allocation2 + $0x22c] sm:$0xf0]  ;;  %v7748_v32 = vor.u32 %v10778_v22, %v7745_v23  ;;  %v10770_v34 = vld [vmem:[#allocation2 + $0x214] sm:$0xf]  ;;  %v10807_v17 = vld [vmem:[#allocation2 + $0x334] sm:$0xf0] }
  0x6e   :  { %v7713_v35 = vld [vmem:[#allocation2 + $0x230] sm:$0xf0]  ;;  %v7712_v43 = vor.u32 %v10774_v30, %v7711_v29  ;;  %v7593_v19 = vld [vmem:[#allocation2 + $0x138] sm:$0xf0]  ;;  %v7848_v23 = vor.u32 %v10807_v17, %v7847_v15  ;;  %v10799_v29 = vld [vmem:[#allocation2 + $0x2f4] sm:$0xf0] }
  0x6f   :  { %1046 = vmatpush.bf16.msra.mxu0 %v7616_v38  ;;  %1072 = vmatpush.bf16.msra.mxu2 %v7620_v40  ;;  %v7943_v38 = vld [vmem:[#allocation2 + $0x3d8] sm:$0xf]  ;;  %v7716_v47 = vor.u32 %v10770_v34, %v7713_v35  ;;  %v10803_v20 = vld [vmem:[#allocation2 + $0x31c] sm:$0xf]  ;;  %v8175_v6 = vld [vmem:[#allocation2 + $0x5c0] sm:$0xf] }
  0x70   :  { %v10831_v40 = vld [vmem:[#allocation2 + $0x3f4] sm:$0xf0]  ;;  %v7849_v21 = vld [vmem:[#allocation2 + $0x338] sm:$0xf0]  ;;  %v10892_v7 = vld [vmem:[#allocation2 + $0x5dc] sm:$0xf0] }
  0x71   :  { %1059 = vmatpush.bf16.msra.mxu1 %v7872_v39  ;;  %1085 = vmatpush.bf16.msra.mxu3 %v7876_v44  ;;  %v7456_v39 = vor.u32 %v10710_v26, %v7455_v25  ;;  %v7460_v44 = vor.u32 %v10706_v31, %v7457_v33  ;;  %v7944_v49 = vor.u32 %v10831_v40, %v7943_v38  ;;  %v7559_v25 = vld [vmem:[#allocation2 + $0xd8] sm:$0xf]  ;;  %v10731_v30 = vld [vmem:[#allocation2 + $0xdc] sm:$0xf]  ;;  %v10952_v17 = vld [vmem:[#allocation2 + $0x7c4] sm:$0xf] }
  0x72   :  { %v10735_v26 = vld [vmem:[#allocation2 + $0xf4] sm:$0xf0]  ;;  %v7561_v31 = vld [vmem:[#allocation2 + $0xf8] sm:$0xf0] }
  0x73   :  { %1047 = vmatpush.bf16.msra.mxu0 %v7584_v50  ;;  %1073 = vmatpush.bf16.msra.mxu2 %v7588_v52  ;;  %v7692_v50 = vor.u32 %v10763_v41, %v7689_v42  ;;  %v10759_v52 = vld [vmem:[#allocation2 + $0x1b4] sm:$0xf0]  ;;  %v7817_v33 = vld [vmem:[#allocation2 + $0x2f8] sm:$0xf0]  ;;  %v7560_v34 = vor.u32 %v10735_v26, %v7559_v25  ;;  %v7564_v36 = vor.u32 %v10731_v30, %v7561_v31  ;;  %v8399_v25 = vld [vmem:[#allocation2 + $0x780] sm:$0xf] }
  0x74   :  { %v7527_v37 = vld [vmem:[#allocation2 + $0x98] sm:$0xf]  ;;  %v10723_v42 = vld [vmem:[#allocation2 + $0x9c] sm:$0xf]  ;;  %v10944_v30 = vld [vmem:[#allocation2 + $0x784] sm:$0xf] }
  0x75   :  { %1060 = vmatpush.bf16.msra.mxu1 %v7840_v51  ;;  %1086 = vmatpush.bf16.msra.mxu3 %v7844_v56  ;;  %v7655_v51 = vld [vmem:[#allocation2 + $0x198] sm:$0xf]  ;;  %v10755_v56 = vld [vmem:[#allocation2 + $0x19c] sm:$0xf]  ;;  %v8401_v31 = vld [vmem:[#allocation2 + $0x7a0] sm:$0xf0] }
  0x76   :  { %v7656_v60 = vor.u32 %v10759_v52, %v7655_v51  ;;  %v10727_v38 = vld [vmem:[#allocation2 + $0xb4] sm:$0xf0]  ;;  %v7785_v45 = vld [vmem:[#allocation2 + $0x2b8] sm:$0xf0] }
  0x77   :  { %1048 = vmatpush.bf16.msra.mxu0 %v7552_v62  ;;  %1074 = vmatpush.bf16.msra.mxu2 %v7556_v1  ;;  %v7660_v62 = vor.u32 %v10755_v56, %v7657_v57  ;;  %v7879_v1 = vld [vmem:[#allocation2 + $0x358] sm:$0xf]  ;;  %v7528_v46 = vor.u32 %v10727_v38, %v7527_v37  ;;  %v7497_v55 = vld [vmem:[#allocation2 + $0x78] sm:$0xf0]  ;;  %v8367_v37 = vld [vmem:[#allocation2 + $0x740] sm:$0xf]  ;;  %v8404_v38 = vor.u32 %v10944_v30, %v8401_v31 }
  0x78   :  { %v7880_v11 = vor.u32 %v10815_v3, %v7879_v1  ;;  %v10791_v41 = vld [vmem:[#allocation2 + $0x2b4] sm:$0xf0]  ;;  %v10779_v56 = vld [vmem:[#allocation2 + $0x25c] sm:$0xf]  ;;  %v10836_v30 = vld [vmem:[#allocation2 + $0x41c] sm:$0xf0] }
  0x79   :  { %1061 = vmatpush.bf16.msra.mxu1 %v7808_v0  ;;  %1087 = vmatpush.bf16.msra.mxu3 %v7812_v5  ;;  %v10751_v0 = vld [vmem:[#allocation2 + $0x174] sm:$0xf0]  ;;  %v7625_v5 = vld [vmem:[#allocation2 + $0x178] sm:$0xf0] }
  0x7a   :  { %v7624_v10 = vor.u32 %v10751_v0, %v7623_v63  ;;  %v7751_v51 = vld [vmem:[#allocation2 + $0x258] sm:$0xf]  ;;  %v7753_v57 = vld [vmem:[#allocation2 + $0x278] sm:$0xf0] }
  0x7b   :  { %1049 = vmatpush.bf16.msra.mxu0 %v7520_v12  ;;  %1075 = vmatpush.bf16.msra.mxu2 %v7524_v14  ;;  %v7628_v12 = vor.u32 %v10747_v4, %v7625_v5  ;;  %v10743_v14 = vld [vmem:[#allocation2 + $0x134] sm:$0xf0]  ;;  %v10707_v1 = vld [vmem:[#allocation2 + $0x1c] sm:$0xf] }
  0x7c   :  { %v10783_v53 = vld [vmem:[#allocation2 + $0x274] sm:$0xf0]  ;;  %v7465_v3 = vld [vmem:[#allocation2 + $0x38] sm:$0xf0] }
  0x7d   :  { %1062 = vmatpush.bf16.msra.mxu1 %v7776_v13  ;;  %1088 = vmatpush.bf16.msra.mxu3 %v7780_v18  ;;  %v7591_v13 = vld [vmem:[#allocation2 + $0x118] sm:$0xf]  ;;  %v10739_v18 = vld [vmem:[#allocation2 + $0x11c] sm:$0xf] }
  0x7e   :  { %v7592_v22 = vor.u32 %v10743_v14, %v7591_v13  ;;  %v7463_v59 = vld [vmem:[#allocation2 + $0x18] sm:$0xf]  ;;  %v10771_v4 = vld [vmem:[#allocation2 + $0x21c] sm:$0xf]  ;;  %v10888_v13 = vld [vmem:[#allocation2 + $0x5c4] sm:$0xf] }
  0x7f   :  { %1050 = vmatpush.bf16.msra.mxu0 %v7488_v24  ;;  %1076 = vmatpush.bf16.msra.mxu2 %v7492_v28  ;;  %v7596_v24 = vor.u32 %v10739_v18, %v7593_v19  ;;  %v7852_v28 = vor.u32 %v10803_v20, %v7849_v21  ;;  %v7719_v63 = vld [vmem:[#allocation2 + $0x218] sm:$0xf]  ;;  %v7721_v5 = vld [vmem:[#allocation2 + $0x238] sm:$0xf0]  ;;  %v8177_v14 = vld [vmem:[#allocation2 + $0x5e0] sm:$0xf0]  ;;  %v8176_v20 = vor.u32 %v10892_v7, %v8175_v6 }
  0x80   :  { %v10775_v0 = vld [vmem:[#allocation2 + $0x234] sm:$0xf0]  ;;  %v8433_v18 = vld [vmem:[#allocation2 + $0x7e0] sm:$0xf0]  ;;  %v7724_v19 = vor.u32 %v10771_v4, %v7721_v5  ;;  %v8015_v5 = vld [vmem:[#allocation2 + $0x480] sm:$0xf] }
  0x81   :  { %1063 = vmatpush.bf16.msra.mxu1 %v7744_v27  ;;  %1089 = vmatpush.bf16.msra.mxu3 %v7748_v32  ;;  %v7815_v27 = vld [vmem:[#allocation2 + $0x2d8] sm:$0xf]  ;;  %v10795_v32 = vld [vmem:[#allocation2 + $0x2dc] sm:$0xf]  ;;  %v7720_v15 = vor.u32 %v10775_v0, %v7719_v63  ;;  %v8436_v26 = vor.u32 %v10952_v17, %v8433_v18  ;;  %v8049_v63 = vld [vmem:[#allocation2 + $0x4e0] sm:$0xf0] }
  0x82   :  { %v7816_v35 = vor.u32 %v10799_v29, %v7815_v27  ;;  %v7820_v40 = vor.u32 %v10795_v32, %v7817_v33  ;;  %v10948_v27 = vld [vmem:[#allocation2 + $0x79c] sm:$0xf0]  ;;  %v8145_v29 = vld [vmem:[#allocation2 + $0x5a0] sm:$0xf0] }
  0x83   :  { %1051 = vmatpush.bf16.msra.mxu0 %v7456_v39  ;;  %1077 = vmatpush.bf16.msra.mxu2 %v7460_v44  ;;  %v7783_v39 = vld [vmem:[#allocation2 + $0x298] sm:$0xf]  ;;  %v10787_v44 = vld [vmem:[#allocation2 + $0x29c] sm:$0xf]  ;;  %v8400_v33 = vor.u32 %v10948_v27, %v8399_v25  ;;  %v10920_v0 = vld [vmem:[#allocation2 + $0x6c4] sm:$0xf] }
  0x84   :  { %v7788_v52 = vor.u32 %v10787_v44, %v7785_v45  ;;  %v10852_v6 = vld [vmem:[#allocation2 + $0x49c] sm:$0xf0]  ;;  %v7985_v25 = vld [vmem:[#allocation2 + $0x460] sm:$0xf0] }
  0x85   :  { %1064 = vmatpush.bf16.msra.mxu1 %v7712_v43  ;;  %1090 = vmatpush.bf16.msra.mxu3 %v7716_v47  ;;  %v7529_v43 = vld [vmem:[#allocation2 + $0xb8] sm:$0xf0]  ;;  %v7784_v47 = vor.u32 %v10791_v41, %v7783_v39  ;;  %v10940_v39 = vld [vmem:[#allocation2 + $0x75c] sm:$0xf0]  ;;  %v8113_v41 = vld [vmem:[#allocation2 + $0x560] sm:$0xf0] }
  0x86   :  { %1052 = vmatmul.bf16.vlgmr.msra.gmra.mxu0 %v12002_v8  ;;  %1078 = vmatmul.bf16.vlgmr.msra.gmra.mxu2 %v12002_v8  ;;  %v8368_v45 = vor.u32 %v10940_v39, %v8367_v37  ;;  %v8271_v7 = vld [vmem:[#allocation2 + $0x680] sm:$0xf]  ;;  %v8241_v27 = vld [vmem:[#allocation2 + $0x660] sm:$0xf0] }
  0x87   :  { %1096 = vmatpush.bf16.msrb.mxu0 %v7688_v48  ;;  %1122 = vmatpush.bf16.msrb.mxu2 %v7692_v50  ;;  %v7532_v48 = vor.u32 %v10723_v42, %v7529_v43  ;;  %v10719_v50 = vld [vmem:[#allocation2 + $0x74] sm:$0xf0]  ;;  %v10936_v42 = vld [vmem:[#allocation2 + $0x744] sm:$0xf] }
  0x88   :  { %1065 = vmatmul.bf16.vlgmr.msra.gmra.mxu1 %v12004_v9  ;;  %1091 = vmatmul.bf16.vlgmr.msra.gmra.mxu3 %v12004_v9  ;;  %v8369_v43 = vld [vmem:[#allocation2 + $0x760] sm:$0xf0] }
  0x89   :  { %1109 = vmatpush.bf16.msrb.mxu1 %v7944_v49  ;;  %1135 = vmatpush.bf16.msrb.mxu3 %v7948_v54  ;;  %v7495_v49 = vld [vmem:[#allocation2 + $0x58] sm:$0xf]  ;;  %v10715_v54 = vld [vmem:[#allocation2 + $0x5c] sm:$0xf]  ;;  %v7953_v37 = vld [vmem:[#allocation2 + $0x420] sm:$0xf0] }
  0x8a   :  { %v7496_v58 = vor.u32 %v10719_v50, %v7495_v49  ;;  %v8335_v49 = vld [vmem:[#allocation2 + $0x700] sm:$0xf]  ;;  %v8372_v50 = vor.u32 %v10936_v42, %v8369_v43  ;;  %v8209_v39 = vld [vmem:[#allocation2 + $0x620] sm:$0xf0]  ;;  %v8439_v42 = vld [vmem:[#allocation2 + $0x7c8] sm:$0xf] }
  0x8b   :  { %1097 = vmatpush.bf16.msrb.mxu0 %v7656_v60  ;;  %1123 = vmatpush.bf16.msrb.mxu2 %v7660_v62  ;;  %v10711_v60 = vld [vmem:[#allocation2 + $0x34] sm:$0xf0]  ;;  %v7500_v62 = vor.u32 %v10715_v54, %v7497_v55  ;;  %v8337_v54 = vld [vmem:[#allocation2 + $0x720] sm:$0xf0] }
  0x8d   :  { %1110 = vmatpush.bf16.msrb.mxu1 %v7912_v61  ;;  %1136 = vmatpush.bf16.msrb.mxu3 %v7916_v2  ;;  %v7752_v61 = vor.u32 %v10783_v53, %v7751_v51  ;;  %v7756_v2 = vor.u32 %v10779_v56, %v7753_v57  ;;  %v10932_v51 = vld [vmem:[#allocation2 + $0x71c] sm:$0xf0]  ;;  %v10928_v53 = vld [vmem:[#allocation2 + $0x704] sm:$0xf] }
  0x8e   :  { %v8047_v57 = vld [vmem:[#allocation2 + $0x4c0] sm:$0xf] }
  0x8f   :  { %1098 = vmatpush.bf16.msrb.mxu0 %v7624_v10  ;;  %1124 = vmatpush.bf16.msrb.mxu2 %v7628_v12  ;;  %v8431_v10 = vld [vmem:[#allocation2 + $0x7c0] sm:$0xf] }
  0x90   :  { %v10956_v12 = vld [vmem:[#allocation2 + $0x7dc] sm:$0xf0] }
  0x91   :  { %1111 = vmatpush.bf16.msrb.mxu1 %v7880_v11  ;;  %1137 = vmatpush.bf16.msrb.mxu3 %v7884_v16  ;;  %v7464_v11 = vor.u32 %v10711_v60, %v7463_v59  ;;  %v7468_v16 = vor.u32 %v10707_v1, %v7465_v3  ;;  %v8432_v21 = vor.u32 %v10956_v12, %v8431_v10  ;;  %v8303_v59 = vld [vmem:[#allocation2 + $0x6c0] sm:$0xf]  ;;  %v8305_v1 = vld [vmem:[#allocation2 + $0x6e0] sm:$0xf0] }
  0x92   :  { %v8340_v60 = vor.u32 %v10928_v53, %v8337_v54  ;;  %v8308_v10 = vor.u32 %v10920_v0, %v8305_v1  ;;  %v10848_v12 = vld [vmem:[#allocation2 + $0x484] sm:$0xf]  ;;  %v1165_v53 = vld [vmem:[%s12601_s0 + $0x18] sm:$0xff]  ;;  %v8409_v0 = vld [vmem:[#allocation2 + $0x7a8] sm:$0xf0] }
  0x93   :  { %1099 = vmatpush.bf16.msrb.mxu0 %v7592_v22  ;;  %1125 = vmatpush.bf16.msrb.mxu2 %v7596_v24  ;;  %v8180_v22 = vor.u32 %v10888_v13, %v8177_v14  ;;  %v10884_v24 = vld [vmem:[#allocation2 + $0x59c] sm:$0xf0]  ;;  %v8017_v13 = vld [vmem:[#allocation2 + $0x4a0] sm:$0xf0]  ;;  %v12030_v1 = vpack.c.bf16 %v1165_v53, %v1165_v53  ;;  %v8025_v53 = vld [vmem:[#allocation2 + $0x4a8] sm:$0xf0] }
  0x94   :  { %v10912_v14 = vld [vmem:[#allocation2 + $0x684] sm:$0xf]  ;;  %v8020_v18 = vor.u32 %v10848_v12, %v8017_v13  ;;  %v10873_v12 = vld [vmem:[#allocation2 + $0x54c] sm:$0xf] }
  0x95   :  { %1112 = vmatpush.bf16.msrb.mxu1 %v7848_v23  ;;  %1138 = vmatpush.bf16.msrb.mxu3 %v7852_v28  ;;  %v8143_v23 = vld [vmem:[#allocation2 + $0x580] sm:$0xf]  ;;  %v10880_v28 = vld [vmem:[#allocation2 + $0x584] sm:$0xf]  ;;  %v8121_v13 = vld [vmem:[#allocation2 + $0x568] sm:$0xf0] }
  0x96   :  { %v8144_v32 = vor.u32 %v10884_v24, %v8143_v23  ;;  %v10908_v23 = vld [vmem:[#allocation2 + $0x65c] sm:$0xf0]  ;;  %v10840_v24 = vld [vmem:[#allocation2 + $0x444] sm:$0xf] }
  0x97   :  { %1100 = vmatpush.bf16.msrb.mxu0 %v7560_v34  ;;  %1126 = vmatpush.bf16.msrb.mxu2 %v7564_v36  ;;  %v8148_v34 = vor.u32 %v10880_v28, %v8145_v29  ;;  %v10876_v36 = vld [vmem:[#allocation2 + $0x55c] sm:$0xf0] }
  0x98   :  { %v7951_v29 = vld [vmem:[#allocation2 + $0x400] sm:$0xf] }
  0x99   :  { %1113 = vmatpush.bf16.msrb.mxu1 %v7816_v35  ;;  %1139 = vmatpush.bf16.msrb.mxu3 %v7820_v40  ;;  %v8111_v35 = vld [vmem:[#allocation2 + $0x540] sm:$0xf]  ;;  %v10872_v40 = vld [vmem:[#allocation2 + $0x544] sm:$0xf]  ;;  %v7952_v43 = vor.u32 %v10836_v30, %v7951_v29  ;;  %v8345_v29 = vld [vmem:[#allocation2 + $0x728] sm:$0xf0] }
  0x9a   :  { %v8112_v44 = vor.u32 %v10876_v36, %v8111_v35  ;;  %v10832_v35 = vld [vmem:[#allocation2 + $0x404] sm:$0xf] }
  0x9b   :  { %1101 = vmatpush.bf16.msrb.mxu0 %v7528_v46  ;;  %1127 = vmatpush.bf16.msrb.mxu2 %v7532_v48  ;;  %v8116_v46 = vor.u32 %v10872_v40, %v8113_v41  ;;  %v10868_v48 = vld [vmem:[#allocation2 + $0x51c] sm:$0xf0]  ;;  %v8183_v40 = vld [vmem:[#allocation2 + $0x5c8] sm:$0xf] }
  0x9c   :  { %v10893_v41 = vld [vmem:[#allocation2 + $0x5e4] sm:$0xf0] }
  0x9d   :  { %1114 = vmatpush.bf16.msrb.mxu1 %v7784_v47  ;;  %1140 = vmatpush.bf16.msrb.mxu3 %v7788_v52  ;;  %v8079_v47 = vld [vmem:[#allocation2 + $0x500] sm:$0xf]  ;;  %v10864_v52 = vld [vmem:[#allocation2 + $0x504] sm:$0xf] }
  0x9e   :  { %v8080_v55 = vor.u32 %v10868_v48, %v8079_v47  ;;  %v7956_v48 = vor.u32 %v10832_v35, %v7953_v37  ;;  %v10861_v35 = vld [vmem:[#allocation2 + $0x4e4] sm:$0xf0] }
  0x9f   :  { %1102 = vmatpush.bf16.msrb.mxu0 %v7496_v58  ;;  %1128 = vmatpush.bf16.msrb.mxu2 %v7500_v62  ;;  %v10860_v58 = vld [vmem:[#allocation2 + $0x4dc] sm:$0xf0]  ;;  %v10856_v62 = vld [vmem:[#allocation2 + $0x4c4] sm:$0xf] }
  0xa0   :  { %v8052_v4 = vor.u32 %v10856_v62, %v8049_v63  ;;  %v10945_v63 = vld [vmem:[#allocation2 + $0x78c] sm:$0xf] }
  0xa1   :  { %1115 = vmatpush.bf16.msrb.mxu1 %v7752_v61  ;;  %1141 = vmatpush.bf16.msrb.mxu3 %v7756_v2  ;;  %v10924_v61 = vld [vmem:[#allocation2 + $0x6dc] sm:$0xf0]  ;;  %v8048_v2 = vor.u32 %v10860_v58, %v8047_v57  ;;  %v8407_v57 = vld [vmem:[#allocation2 + $0x788] sm:$0xf] }
  0xa2   :  { %v8304_v3 = vor.u32 %v10924_v61, %v8303_v59  ;;  %v10949_v59 = vld [vmem:[#allocation2 + $0x7a4] sm:$0xf0]  ;;  %v8153_v61 = vld [vmem:[#allocation2 + $0x5a8] sm:$0xf0] }
  0xa3   :  { %1103 = vmatpush.bf16.msrb.mxu0 %v7464_v11  ;;  %1129 = vmatpush.bf16.msrb.mxu2 %v7468_v16  ;;  %v10916_v11 = vld [vmem:[#allocation2 + $0x69c] sm:$0xf0]  ;;  %v8016_v16 = vor.u32 %v10852_v6, %v8015_v5  ;;  %v8119_v5 = vld [vmem:[#allocation2 + $0x548] sm:$0xf] }
  0xa4   :  { %v8272_v17 = vor.u32 %v10916_v11, %v8271_v7  ;;  %v10877_v6 = vld [vmem:[#allocation2 + $0x564] sm:$0xf0] }
  0xa5   :  { %1116 = vmatpush.bf16.msrb.mxu1 %v7720_v15  ;;  %1142 = vmatpush.bf16.msrb.mxu3 %v7724_v19  ;;  %v8273_v15 = vld [vmem:[#allocation2 + $0x6a0] sm:$0xf0]  ;;  %v7983_v19 = vld [vmem:[#allocation2 + $0x440] sm:$0xf]  ;;  %v8375_v7 = vld [vmem:[#allocation2 + $0x748] sm:$0xf] }
  0xa6   :  { %1104 = vmatmul.bf16.vlgmr.msrb.gmra.mxu0 %v12002_v8  ;;  %1130 = vmatmul.bf16.vlgmr.msrb.gmra.mxu2 %v12002_v8  ;;  %v8081_v8 = vld [vmem:[#allocation2 + $0x520] sm:$0xf0]  ;;  %v10941_v11 = vld [vmem:[#allocation2 + $0x764] sm:$0xf0] }
  0xa7   :  { %1958 = vmatpush.bf16.msra.mxu0 %v8176_v20  ;;  %1984 = vmatpush.bf16.msra.mxu2 %v8180_v22  ;;  %v8084_v56 = vor.u32 %v10864_v52, %v8081_v8  ;;  %v10844_v20 = vld [vmem:[#allocation2 + $0x45c] sm:$0xf0]  ;;  %v8276_v22 = vor.u32 %v10912_v14, %v8273_v15  ;;  %v8184_v8 = vor.u32 %v10893_v41, %v8183_v40  ;;  %v10937_v14 = vld [vmem:[#allocation2 + $0x74c] sm:$0xf] }
  0xa8   :  { %1117 = vmatmul.bf16.vlgmr.msrb.gmra.mxu1 %v12004_v9  ;;  %1143 = vmatmul.bf16.vlgmr.msrb.gmra.mxu3 %v12004_v9  ;;  %v8336_v9 = vor.u32 %v10932_v51, %v8335_v49  ;;  %v7984_v28 = vor.u32 %v10844_v20, %v7983_v19  ;;  %v10953_v49 = vld [vmem:[#allocation2 + $0x7cc] sm:$0xf]  ;;  %v1164_v51 = vld [vmem:[%s12601_s0 + $0x10] sm:$0xff]  ;;  %v8343_v19 = vld [vmem:[#allocation2 + $0x708] sm:$0xf]  ;;  %v8376_v20 = vor.u32 %v10941_v11, %v8375_v7 }
  0xa9   :  { %1971 = vmatpush.bf16.msra.mxu1 %v8432_v21  ;;  %1997 = vmatpush.bf16.msra.mxu3 %v8436_v26  ;;  %v8239_v21 = vld [vmem:[#allocation2 + $0x640] sm:$0xf]  ;;  %v10904_v26 = vld [vmem:[#allocation2 + $0x644] sm:$0xf]  ;;  %v12028_v62 = vpack.c.bf16 %v1164_v51, %v1164_v51  ;;  %v8377_v15 = vld [vmem:[#allocation2 + $0x768] sm:$0xf0] }
  0xaa   :  { %v8240_v31 = vor.u32 %v10908_v23, %v8239_v21  ;;  %v8244_v36 = vor.u32 %v10904_v26, %v8241_v27  ;;  %v8124_v21 = vor.u32 %v10873_v12, %v8121_v13  ;;  %v281_v23 = vld [vmem:[#allocation4] ss:$8 sm:$0xf0]  ;;  %v10865_v26 = vld [vmem:[#allocation2 + $0x50c] sm:$0xf] }
  0xab   :  { %1959 = vmatpush.bf16.msra.mxu0 %v8144_v32  ;;  %1985 = vmatpush.bf16.msra.mxu2 %v8148_v34  ;;  %v7988_v32 = vor.u32 %v10840_v24, %v7985_v25  ;;  %v10900_v34 = vld [vmem:[#allocation2 + $0x61c] sm:$0xf0]  ;;  %v8380_v24 = vor.u32 %v10937_v14, %v8377_v15  ;;  %v10933_v25 = vld [vmem:[#allocation2 + $0x724] sm:$0xf0]  ;;  %v8089_v27 = vld [vmem:[#allocation2 + $0x528] sm:$0xf0] }
  0xac   :  { %v8057_v40 = vld [vmem:[#allocation2 + $0x4e8] sm:$0xf0]  ;;  %v7959_v15 = vld [vmem:[#allocation2 + $0x408] sm:$0xf] }
  0xad   :  { %1972 = vmatpush.bf16.msra.mxu1 %v8400_v33  ;;  %1998 = vmatpush.bf16.msra.mxu3 %v8404_v38  ;;  %v8207_v33 = vld [vmem:[#allocation2 + $0x600] sm:$0xf]  ;;  %v10896_v38 = vld [vmem:[#allocation2 + $0x604] sm:$0xf]  ;;  %v10921_v41 = vld [vmem:[#allocation2 + $0x6cc] sm:$0xf] }
  0xae   :  { %v8208_v47 = vor.u32 %v10900_v34, %v8207_v33  ;;  %v8212_v52 = vor.u32 %v10896_v38, %v8209_v39  ;;  %v8092_v33 = vor.u32 %v10865_v26, %v8089_v27  ;;  %v8055_v34 = vld [vmem:[#allocation2 + $0x4c8] sm:$0xf]  ;;  %v10857_v39 = vld [vmem:[#allocation2 + $0x4cc] sm:$0xf] }
  0xaf   :  { %1960 = vmatpush.bf16.msra.mxu0 %v8112_v44  ;;  %1986 = vmatpush.bf16.msra.mxu2 %v8116_v46  ;;  %v10957_v44 = vld [vmem:[#allocation2 + $0x7e4] sm:$0xf0]  ;;  %v8185_v46 = vld [vmem:[#allocation2 + $0x5e8] sm:$0xf0] }
  0xb0   :  { %v8440_v54 = vor.u32 %v10957_v44, %v8439_v42  ;;  %v10925_v38 = vld [vmem:[#allocation2 + $0x6e4] sm:$0xf0]  ;;  %v8313_v42 = vld [vmem:[#allocation2 + $0x6e8] sm:$0xf0] }
  0xb1   :  { %1973 = vmatpush.bf16.msra.mxu1 %v8368_v45  ;;  %1999 = vmatpush.bf16.msra.mxu3 %v8372_v50  ;;  %v10889_v45 = vld [vmem:[#allocation2 + $0x5cc] sm:$0xf]  ;;  %v8316_v51 = vor.u32 %v10921_v41, %v8313_v42 }
  0xb2   :  { %v8441_v50 = vld [vmem:[#allocation2 + $0x7e8] sm:$0xf0] }
  0xb3   :  { %1961 = vmatpush.bf16.msra.mxu0 %v8080_v55  ;;  %1987 = vmatpush.bf16.msra.mxu2 %v8084_v56  ;;  %v8188_v55 = vor.u32 %v10889_v45, %v8185_v46  ;;  %v10885_v56 = vld [vmem:[#allocation2 + $0x5a4] sm:$0xf0]  ;;  %v8444_v58 = vor.u32 %v10953_v49, %v8441_v50  ;;  %v8060_v46 = vor.u32 %v10857_v39, %v8057_v40  ;;  %v10905_v11 = vld [vmem:[#allocation2 + $0x64c] sm:$0xf]  ;;  %v10954_v39 = vld [vmem:[#allocation2 + $0x7d4] sm:$0xf] }
  0xb4   :  { %v8279_v49 = vld [vmem:[#allocation2 + $0x688] sm:$0xf]  ;;  %v8249_v12 = vld [vmem:[#allocation2 + $0x668] sm:$0xf0]  ;;  %v8449_v40 = vld [vmem:[#allocation2 + $0x7f0] sm:$0xf0] }
  0xb5   :  { %1974 = vmatpush.bf16.msra.mxu1 %v8336_v9  ;;  %2000 = vmatpush.bf16.msra.mxu3 %v8340_v60  ;;  %v8151_v9 = vld [vmem:[#allocation2 + $0x588] sm:$0xf]  ;;  %v10881_v60 = vld [vmem:[#allocation2 + $0x58c] sm:$0xf] }
  0xb6   :  { %v10897_v26 = vld [vmem:[#allocation2 + $0x60c] sm:$0xf] }
  0xb7   :  { %1962 = vmatpush.bf16.msra.mxu0 %v8048_v2  ;;  %1988 = vmatpush.bf16.msra.mxu2 %v8052_v4  ;;  %v8152_v2 = vor.u32 %v10885_v56, %v8151_v9  ;;  %v8156_v4 = vor.u32 %v10881_v60, %v8153_v61  ;;  %v7991_v61 = vld [vmem:[#allocation2 + $0x448] sm:$0xf]  ;;  %v8217_v27 = vld [vmem:[#allocation2 + $0x628] sm:$0xf0] }
  0xb8   :  { %v8220_v41 = vor.u32 %v10897_v26, %v8217_v27  ;;  %v8063_v27 = vld [vmem:[#allocation2 + $0x4d0] sm:$0xf] }
  0xb9   :  { %1975 = vmatpush.bf16.msra.mxu1 %v8304_v3  ;;  %2001 = vmatpush.bf16.msra.mxu3 %v8308_v10  ;;  %v8408_v3 = vor.u32 %v10949_v59, %v8407_v57  ;;  %v8412_v10 = vor.u32 %v10945_v63, %v8409_v0  ;;  %v10845_v63 = vld [vmem:[#allocation2 + $0x464] sm:$0xf0] }
  0xba   :  { %v8247_v0 = vld [vmem:[#allocation2 + $0x648] sm:$0xf]  ;;  %v7992_v14 = vor.u32 %v10845_v63, %v7991_v61  ;;  %v10942_v61 = vld [vmem:[#allocation2 + $0x76c] sm:$0xf0]  ;;  %v10874_v63 = vld [vmem:[#allocation2 + $0x554] sm:$0xf] }
  0xbb   :  { %1963 = vmatpush.bf16.msra.mxu0 %v8016_v16  ;;  %1989 = vmatpush.bf16.msra.mxu2 %v8020_v18  ;;  %v8120_v16 = vor.u32 %v10877_v6, %v8119_v5  ;;  %v10869_v18 = vld [vmem:[#allocation2 + $0x524] sm:$0xf0]  ;;  %v7993_v5 = vld [vmem:[#allocation2 + $0x468] sm:$0xf0] }
  0xbd   :  { %1976 = vmatpush.bf16.msra.mxu1 %v8272_v17  ;;  %2002 = vmatpush.bf16.msra.mxu3 %v8276_v22  ;;  %v8087_v17 = vld [vmem:[#allocation2 + $0x508] sm:$0xf] }
  0xbe   :  { %v280_v22 = vld [vmem:[#allocation4] ss:$8 sm:$0xf]  ;;  %v8088_v30 = vor.u32 %v10869_v18, %v8087_v17 }
  0xbf   :  { %1964 = vmatpush.bf16.msra.mxu0 %v7984_v28  ;;  %1990 = vmatpush.bf16.msra.mxu2 %v7988_v32  ;;  %v10929_v28 = vld [vmem:[#allocation2 + $0x70c] sm:$0xf]  ;;  %v8344_v32 = vor.u32 %v10933_v25, %v8343_v19  ;;  %v8215_v19 = vld [vmem:[#allocation2 + $0x608] sm:$0xf] }
  0xc0   :  { %v8348_v37 = vor.u32 %v10929_v28, %v8345_v29  ;;  %v7961_v25 = vld [vmem:[#allocation2 + $0x428] sm:$0xf0]  ;;  %v8191_v28 = vld [vmem:[#allocation2 + $0x5d0] sm:$0xf] }
  0xc1   :  { %1977 = vmatpush.bf16.msra.mxu1 %v8240_v31  ;;  %2003 = vmatpush.bf16.msra.mxu3 %v8244_v36  ;;  %v12036_v31 = vor.u32 %v281_v23, %v280_v22  ;;  %v8311_v36 = vld [vmem:[#allocation2 + $0x6c8] sm:$0xf]  ;;  %v10894_v29 = vld [vmem:[#allocation2 + $0x5ec] sm:$0xf0] }
  0xc2   :  { %v8312_v45 = vor.u32 %v10925_v38, %v8311_v36  ;;  %v8193_v36 = vld [vmem:[#allocation2 + $0x5f0] sm:$0xf0]  ;;  %v8192_v42 = vor.u32 %v10894_v29, %v8191_v28  ;;  %v10862_v28 = vld [vmem:[#allocation2 + $0x4ec] sm:$0xf0] }
  0xc3   :  { %1965 = vmatpush.bf16.msra.mxu0 %v7952_v43  ;;  %1991 = vmatpush.bf16.msra.mxu2 %v7956_v48  ;;  %v8056_v43 = vor.u32 %v10861_v35, %v8055_v34  ;;  %v284_v44 = vperm.slane %v12036_v31, 0  ;;  %v10853_v48 = vld [vmem:[#allocation2 + $0x4a4] sm:$0xf0]  ;;  %v949_v9 = vpop.f32.mrf.mxu0  ;;  %v285_v56 = vperm.slane %v12036_v31, 1  ;;  %v10958_v34 = vld [vmem:[#allocation2 + $0x7ec] sm:$0xf0] }
  0xc4   :  { %v10890_v35 = vld [vmem:[#allocation2 + $0x5d4] sm:$0xf]  ;;  %v8319_v29 = vld [vmem:[#allocation2 + $0x6d0] sm:$0xf] }
  0xc5   :  { %1978 = vmatpush.bf16.msra.mxu1 %v8208_v47  ;;  %2004 = vmatpush.bf16.msra.mxu3 %v8212_v52  ;;  %v8023_v47 = vld [vmem:[#allocation2 + $0x488] sm:$0xf]  ;;  %v962_v50 = vpop.f32.mrf.mxu1 }
  0xc6   :  { %1992 = vmatmul.bf16.vlgmr.msra.gmra.mxu2 %v12028_v62  ;;  %1966 = vmatmul.bf16.vlgmr.msra.gmra.mxu0 %v12028_v62  ;;  %v10917_v52 = vld [vmem:[#allocation2 + $0x6a4] sm:$0xf0]  ;;  %v8024_v57 = vor.u32 %v10853_v48, %v8023_v47  ;;  %v8159_v47 = vld [vmem:[#allocation2 + $0x590] sm:$0xf] }
  0xc7   :  { %2010 = vmatpush.bf16.msrb.mxu0 %v8184_v8  ;;  %2036 = vmatpush.bf16.msrb.mxu2 %v8188_v55  ;;  %v10849_v8 = vld [vmem:[#allocation2 + $0x48c] sm:$0xf]  ;;  %v8280_v59 = vor.u32 %v10917_v52, %v8279_v49  ;;  %v10886_v48 = vld [vmem:[#allocation2 + $0x5ac] sm:$0xf0]  ;;  %v10882_v52 = vld [vmem:[#allocation2 + $0x594] sm:$0xf] }
  0xc8   :  { %2005 = vmatmul.bf16.vlgmr.msra.gmra.mxu3 %v12030_v1  ;;  %1979 = vmatmul.bf16.vlgmr.msra.gmra.mxu1 %v12030_v1  ;;  %v8281_v55 = vld [vmem:[#allocation2 + $0x6a8] sm:$0xf0]  ;;  %v8028_v60 = vor.u32 %v10849_v8, %v8025_v53  ;;  %v8415_v49 = vld [vmem:[#allocation2 + $0x790] sm:$0xf]  ;;  %v8161_v8 = vld [vmem:[#allocation2 + $0x5b0] sm:$0xf0] }
  0xc9   :  { %2023 = vmatpush.bf16.msrb.mxu1 %v8440_v54  ;;  %2049 = vmatpush.bf16.msrb.mxu3 %v8444_v58  ;;  %v10913_v54 = vld [vmem:[#allocation2 + $0x68c] sm:$0xf]  ;;  %v950_v58 = vadd.f32 %v949_v9, %v284_v44  ;;  %v975_v6 = vpop.f32.mrf.mxu2  ;;  %v10946_v53 = vld [vmem:[#allocation2 + $0x794] sm:$0xf] }
  0xca   :  { %v976_v13 = vadd.f32 %v975_v6, %v285_v56  ;;  %v8164_v56 = vor.u32 %v10882_v52, %v8161_v8 }
  0xcb   :  { %2011 = vmatpush.bf16.msrb.mxu0 %v8152_v2  ;;  %2037 = vmatpush.bf16.msrb.mxu2 %v8156_v4  ;;  %v8284_v2 = vor.u32 %v10913_v54, %v8281_v55  ;;  %v10841_v4 = vld [vmem:[#allocation2 + $0x44c] sm:$0xf]  ;;  %v12040_v7 = vadd.f32 %v962_v50, %v950_v58  ;;  %v8452_v50 = vor.u32 %v10954_v39, %v8449_v40  ;;  %v8417_v54 = vld [vmem:[#allocation2 + $0x7b0] sm:$0xf0]  ;;  %v10878_v58 = vld [vmem:[#allocation2 + $0x56c] sm:$0xf0] }
  0xcc   :  { %v7996_v18 = vor.u32 %v10841_v4, %v7993_v5  ;;  %v8160_v55 = vor.u32 %v10886_v48, %v8159_v47  ;;  %v286_v5 = vperm.slane %v12036_v31, 2  ;;  %v8064_v39 = vor.u32 %v10862_v28, %v8063_v27  ;;  %v10850_v47 = vld [vmem:[#allocation2 + $0x494] sm:$0xf]  ;;  %v10959_v27 = vld [vmem:[#allocation2 + $0x7f4] sm:$0xf0] }
  0xcd   :  { %2024 = vmatpush.bf16.msrb.mxu1 %v8408_v3  ;;  %2050 = vmatpush.bf16.msrb.mxu3 %v8412_v10  ;;  %v10909_v3 = vld [vmem:[#allocation2 + $0x664] sm:$0xf0]  ;;  %v988_v10 = vpop.f32.mrf.mxu3  ;;  %v964_v23 = vpop.f32.mrf.mxu1  ;;  %v8033_v48 = vld [vmem:[#allocation2 + $0x4b0] sm:$0xf0]  ;;  %v10891_v28 = vld [vmem:[#allocation2 + $0x5dc] sm:$0xf] }
  0xce   :  { %v8248_v17 = vor.u32 %v10909_v3, %v8247_v0  ;;  %v12042_v22 = vadd.f32 %v988_v10, %v976_v13  ;;  %v8129_v0 = vld [vmem:[#allocation2 + $0x570] sm:$0xf0]  ;;  %v8351_v13 = vld [vmem:[#allocation2 + $0x710] sm:$0xf] }
  0xcf   :  { %2012 = vmatpush.bf16.msrb.mxu0 %v8120_v16  ;;  %2038 = vmatpush.bf16.msrb.mxu2 %v8124_v21  ;;  %v10837_v16 = vld [vmem:[#allocation2 + $0x424] sm:$0xf0]  ;;  %v10833_v21 = vld [vmem:[#allocation2 + $0x40c] sm:$0xf]  ;;  %v8385_v3 = vld [vmem:[#allocation2 + $0x770] sm:$0xf0]  ;;  %v8132_v10 = vor.u32 %v10874_v63, %v8129_v0 }
  0xd0   :  { %v7964_v38 = vor.u32 %v10833_v21, %v7961_v25  ;;  %v10910_v63 = vld [vmem:[#allocation2 + $0x66c] sm:$0xf0]  ;;  %v10842_v0 = vld [vmem:[#allocation2 + $0x454] sm:$0xf] }
  0xd1   :  { %2025 = vmatpush.bf16.msrb.mxu1 %v8376_v20  ;;  %2051 = vmatpush.bf16.msrb.mxu3 %v8380_v24  ;;  %v10901_v20 = vld [vmem:[#allocation2 + $0x624] sm:$0xf0]  ;;  %v8252_v24 = vor.u32 %v10905_v11, %v8249_v12  ;;  %v8095_v11 = vld [vmem:[#allocation2 + $0x510] sm:$0xf] }
  0xd2   :  { %v10870_v12 = vld [vmem:[#allocation2 + $0x52c] sm:$0xf0] }
  0xd3   :  { %2013 = vmatpush.bf16.msrb.mxu0 %v8088_v30  ;;  %2039 = vmatpush.bf16.msrb.mxu2 %v8092_v33  ;;  %v8447_v30 = vld [vmem:[#allocation2 + $0x7d0] sm:$0xf]  ;;  %v7960_v33 = vor.u32 %v10837_v16, %v7959_v15  ;;  %v10866_v16 = vld [vmem:[#allocation2 + $0x514] sm:$0xf]  ;;  %v8096_v21 = vor.u32 %v10870_v12, %v8095_v11 }
  0xd4   :  { %v10934_v15 = vld [vmem:[#allocation2 + $0x72c] sm:$0xf0] }
  0xd5   :  { %2026 = vmatpush.bf16.msrb.mxu1 %v8344_v32  ;;  %2052 = vmatpush.bf16.msrb.mxu3 %v8348_v37  ;;  %v951_v32 = vpop.f32.mrf.mxu0  ;;  %v8216_v37 = vor.u32 %v10901_v20, %v8215_v19  ;;  %v990_v44 = vpop.f32.mrf.mxu3  ;;  %v8353_v19 = vld [vmem:[#allocation2 + $0x730] sm:$0xf0]  ;;  %v8352_v25 = vor.u32 %v10934_v15, %v8351_v13  ;;  %v8223_v13 = vld [vmem:[#allocation2 + $0x610] sm:$0xf] }
  0xd6   :  { %v10926_v32 = vld [vmem:[#allocation2 + $0x6ec] sm:$0xf0]  ;;  %v10834_v15 = vld [vmem:[#allocation2 + $0x414] sm:$0xf] }
  0xd7   :  { %2014 = vmatpush.bf16.msrb.mxu0 %v8056_v43  ;;  %2040 = vmatpush.bf16.msrb.mxu2 %v8060_v46  ;;  %v977_v43 = vpop.f32.mrf.mxu2  ;;  %v8196_v46 = vor.u32 %v10890_v35, %v8193_v36  ;;  %v10922_v36 = vld [vmem:[#allocation2 + $0x6d4] sm:$0xf]  ;;  %v8320_v40 = vor.u32 %v10926_v32, %v8319_v29  ;;  %v8287_v44 = vld [vmem:[#allocation2 + $0x690] sm:$0xf]  ;;  %v8201_v29 = vld [vmem:[#allocation2 + $0x5f8] sm:$0xf0] }
  0xd8   :  { %v10854_v43 = vld [vmem:[#allocation2 + $0x4ac] sm:$0xf0] }
  0xd9   :  { %2027 = vmatpush.bf16.msrb.mxu1 %v8312_v45  ;;  %2053 = vmatpush.bf16.msrb.mxu3 %v8316_v51  ;;  %v8448_v45 = vor.u32 %v10958_v34, %v8447_v30  ;;  %v10950_v51 = vld [vmem:[#allocation2 + $0x7ac] sm:$0xf0]  ;;  %v8065_v34 = vld [vmem:[#allocation2 + $0x4f0] sm:$0xf0] }
  0xda   :  { %v8416_v9 = vor.u32 %v10950_v51, %v8415_v49  ;;  %v8289_v51 = vld [vmem:[#allocation2 + $0x6b0] sm:$0xf0] }
  0xdb   :  { %2015 = vmatpush.bf16.msrb.mxu0 %v8024_v57  ;;  %2041 = vmatpush.bf16.msrb.mxu2 %v8028_v60  ;;  %v8127_v57 = vld [vmem:[#allocation2 + $0x550] sm:$0xf]  ;;  %v8420_v60 = vor.u32 %v10946_v53, %v8417_v54 }
  0xdc   :  { %v8128_v4 = vor.u32 %v10878_v58, %v8127_v57  ;;  %v7999_v57 = vld [vmem:[#allocation2 + $0x450] sm:$0xf] }
  0xdd   :  { %2028 = vmatpush.bf16.msrb.mxu1 %v8280_v59  ;;  %2054 = vmatpush.bf16.msrb.mxu3 %v8284_v2  ;;  %v8383_v59 = vld [vmem:[#allocation2 + $0x750] sm:$0xf]  ;;  %v10938_v2 = vld [vmem:[#allocation2 + $0x754] sm:$0xf] }
  0xde   :  { %v8384_v6 = vor.u32 %v10942_v61, %v8383_v59  ;;  %v10846_v58 = vld [vmem:[#allocation2 + $0x46c] sm:$0xf0] }
  0xdf   :  { %2016 = vmatpush.bf16.msrb.mxu0 %v7992_v14  ;;  %2042 = vmatpush.bf16.msrb.mxu2 %v7996_v18  ;;  %v8388_v14 = vor.u32 %v10938_v2, %v8385_v3  ;;  %v10930_v18 = vld [vmem:[#allocation2 + $0x714] sm:$0xf]  ;;  %v8255_v59 = vld [vmem:[#allocation2 + $0x650] sm:$0xf] }
  0xe0   :  { %v8356_v30 = vor.u32 %v10930_v18, %v8353_v19  ;;  %v8001_v2 = vld [vmem:[#allocation2 + $0x470] sm:$0xf0]  ;;  %v8256_v11 = vor.u32 %v10910_v63, %v8255_v59 }
  0xe1   :  { %2029 = vmatpush.bf16.msrb.mxu1 %v8248_v17  ;;  %2055 = vmatpush.bf16.msrb.mxu3 %v8252_v24  ;;  %v8097_v17 = vld [vmem:[#allocation2 + $0x530] sm:$0xf0]  ;;  %v8004_v12 = vor.u32 %v10842_v0, %v8001_v2  ;;  %v8103_v2 = vld [vmem:[#allocation2 + $0x518] sm:$0xf] }
  0xe2   :  { %v8100_v26 = vor.u32 %v10866_v16, %v8097_v17  ;;  %v10906_v3 = vld [vmem:[#allocation2 + $0x654] sm:$0xf] }
  0xe3   :  { %2017 = vmatpush.bf16.msrb.mxu0 %v7960_v33  ;;  %2043 = vmatpush.bf16.msrb.mxu2 %v7964_v38  ;;  %v1001_v20 = vpop.f32.mrf.mxu0  ;;  %v10858_v33 = vld [vmem:[#allocation2 + $0x4d4] sm:$0xf]  ;;  %v287_v38 = vperm.slane %v12036_v31, 3 }
  0xe4   :  { %v1002_v23 = vadd.f32 %v1001_v20, %v286_v5  ;;  %v8000_v5 = vor.u32 %v10846_v58, %v7999_v57  ;;  %v7969_v17 = vld [vmem:[#allocation2 + $0x430] sm:$0xf0]  ;;  %v10939_v57 = vld [vmem:[#allocation2 + $0x75c] sm:$0xf] }
  0xe5   :  { %2030 = vmatpush.bf16.msrb.mxu1 %v8216_v37  ;;  %2056 = vmatpush.bf16.msrb.mxu3 %v8220_v41  ;;  %v1014_v24 = vpop.f32.mrf.mxu1  ;;  %v8321_v37 = vld [vmem:[#allocation2 + $0x6f0] sm:$0xf0]  ;;  %v8068_v41 = vor.u32 %v10858_v33, %v8065_v34  ;;  %v7972_v32 = vor.u32 %v10834_v15, %v7969_v17  ;;  %v10955_v33 = vld [vmem:[#allocation2 + $0x7dc] sm:$0xf] }
  0xe6   :  { %2018 = vmatmul.bf16.vlgmr.msrb.gmra.mxu0 %v12028_v62  ;;  %2044 = vmatmul.bf16.vlgmr.msrb.gmra.mxu2 %v12028_v62  ;;  %v12049_v35 = vadd.f32 %v1014_v24, %v1002_v23  ;;  %v10898_v18 = vld [vmem:[#allocation2 + $0x614] sm:$0xf]  ;;  %v10895_v23 = vld [vmem:[#allocation2 + $0x5f4] sm:$0xf0]  ;;  %v8457_v34 = vld [vmem:[#allocation2 + $0x7f8] sm:$0xf0] }
  0xe7   :  { %2062 = vmatpush.bf16.msra.mxu0 %v8192_v42  ;;  %2088 = vmatpush.bf16.msra.mxu2 %v8196_v46  ;;  %v8031_v42 = vld [vmem:[#allocation2 + $0x490] sm:$0xf]  ;;  %v8225_v19 = vld [vmem:[#allocation2 + $0x630] sm:$0xf0]  ;;  %v8455_v24 = vld [vmem:[#allocation2 + $0x7d8] sm:$0xf] }
  0xe8   :  { %2031 = vmatmul.bf16.vlgmr.msrb.gmra.mxu1 %v12030_v1  ;;  %2057 = vmatmul.bf16.vlgmr.msrb.gmra.mxu3 %v12030_v1  ;;  %v10918_v46 = vld [vmem:[#allocation2 + $0x6ac] sm:$0xf0]  ;;  %v8032_v54 = vor.u32 %v10854_v43, %v8031_v42  ;;  %v8423_v42 = vld [vmem:[#allocation2 + $0x798] sm:$0xf]  ;;  %v8460_v43 = vor.u32 %v10955_v33, %v8457_v34  ;;  %v8393_v58 = vld [vmem:[#allocation2 + $0x778] sm:$0xf0] }
  0xe9   :  { %2075 = vmatpush.bf16.msra.mxu1 %v8448_v45  ;;  %2101 = vmatpush.bf16.msra.mxu3 %v8452_v50  ;;  %v8324_v45 = vor.u32 %v10922_v36, %v8321_v37  ;;  %v1027_v49 = vpop.f32.mrf.mxu2  ;;  %v10914_v50 = vld [vmem:[#allocation2 + $0x694] sm:$0xf]  ;;  %v8228_v36 = vor.u32 %v10898_v18, %v8225_v19  ;;  %v1148_v33 = vmax.f32 %v12040_v7, 0.0 }
  0xea   :  { %v1028_v52 = vadd.f32 %v1027_v49, %v287_v38  ;;  %v8292_v61 = vor.u32 %v10914_v50, %v8289_v51  ;;  %v8456_v38 = vor.u32 %v10959_v27, %v8455_v24  ;;  %v10859_v27 = vld [vmem:[#allocation2 + $0x4dc] sm:$0xf] }
  0xeb   :  { %2063 = vmatpush.bf16.msra.mxu0 %v8160_v55  ;;  %2089 = vmatpush.bf16.msra.mxu2 %v8164_v56  ;;  %v1003_v8 = vpop.f32.mrf.mxu0  ;;  %v1040_v53 = vpop.f32.mrf.mxu3  ;;  %v8036_v56 = vor.u32 %v10850_v47, %v8033_v48  ;;  %v10947_v47 = vld [vmem:[#allocation2 + $0x79c] sm:$0xf] }
  0xec   :  { %v8425_v48 = vld [vmem:[#allocation2 + $0x7b8] sm:$0xf0]  ;;  %v10879_v8 = vld [vmem:[#allocation2 + $0x574] sm:$0xf0] }
  0xed   :  { %2076 = vmatpush.bf16.msra.mxu1 %v8416_v9  ;;  %2102 = vmatpush.bf16.msra.mxu3 %v8420_v60  ;;  %v1016_v55 = vpop.f32.mrf.mxu1  ;;  %v8288_v9 = vor.u32 %v10918_v46, %v8287_v44  ;;  %v12052_v60 = vadd.f32 %v1040_v53, %v1028_v52  ;;  %v10951_v44 = vld [vmem:[#allocation2 + $0x7b4] sm:$0xf0]  ;;  %v8169_v46 = vld [vmem:[#allocation2 + $0x5b8] sm:$0xf0] }
  0xee   :  { %v8424_v50 = vor.u32 %v10951_v44, %v8423_v42  ;;  %v8135_v52 = vld [vmem:[#allocation2 + $0x558] sm:$0xf] }
  0xef   :  { %2064 = vmatpush.bf16.msra.mxu0 %v8128_v4  ;;  %2090 = vmatpush.bf16.msra.mxu2 %v8132_v10  ;;  %v8257_v4 = vld [vmem:[#allocation2 + $0x670] sm:$0xf0]  ;;  %v10838_v10 = vld [vmem:[#allocation2 + $0x42c] sm:$0xf0]  ;;  %v8391_v53 = vld [vmem:[#allocation2 + $0x758] sm:$0xf]  ;;  %v8136_v59 = vor.u32 %v10879_v8, %v8135_v52 }
  0xf0   :  { %v8260_v16 = vor.u32 %v10906_v3, %v8257_v4  ;;  %v10943_v55 = vld [vmem:[#allocation2 + $0x774] sm:$0xf0] }
  0xf1   :  { %2077 = vmatpush.bf16.msra.mxu1 %v8384_v6  ;;  %2103 = vmatpush.bf16.msra.mxu3 %v8388_v14  ;;  %v7967_v6 = vld [vmem:[#allocation2 + $0x410] sm:$0xf]  ;;  %v1029_v20 = vpop.f32.mrf.mxu2  ;;  %v8392_v63 = vor.u32 %v10943_v55, %v8391_v53  ;;  %v10871_v3 = vld [vmem:[#allocation2 + $0x534] sm:$0xf0] }
  0xf2   :  { %v10902_v14 = vld [vmem:[#allocation2 + $0x62c] sm:$0xf0]  ;;  %v8359_v4 = vld [vmem:[#allocation2 + $0x718] sm:$0xf] }
  0xf3   :  { %2065 = vmatpush.bf16.msra.mxu0 %v8096_v21  ;;  %2091 = vmatpush.bf16.msra.mxu2 %v8100_v26  ;;  %v8199_v21 = vld [vmem:[#allocation2 + $0x5d8] sm:$0xf]  ;;  %v7968_v26 = vor.u32 %v10838_v10, %v7967_v6  ;;  %v10867_v10 = vld [vmem:[#allocation2 + $0x51c] sm:$0xf] }
  0xf4   :  { %v8200_v37 = vor.u32 %v10895_v23, %v8199_v21  ;;  %v10935_v6 = vld [vmem:[#allocation2 + $0x734] sm:$0xf0] }
  0xf5   :  { %2078 = vmatpush.bf16.msra.mxu1 %v8352_v25  ;;  %2104 = vmatpush.bf16.msra.mxu3 %v8356_v30  ;;  %v1042_v25 = vpop.f32.mrf.mxu3  ;;  %v8224_v30 = vor.u32 %v10902_v14, %v8223_v13  ;;  %v10931_v13 = vld [vmem:[#allocation2 + $0x71c] sm:$0xf]  ;;  %v8360_v18 = vor.u32 %v10935_v6, %v8359_v4  ;;  %v8071_v20 = vld [vmem:[#allocation2 + $0x4d8] sm:$0xf] }
  0xf6   :  { %v8361_v14 = vld [vmem:[#allocation2 + $0x738] sm:$0xf0]  ;;  %v10863_v21 = vld [vmem:[#allocation2 + $0x4f4] sm:$0xf0] }
  0xf7   :  { %2066 = vmatpush.bf16.msra.mxu0 %v8064_v39  ;;  %2092 = vmatpush.bf16.msra.mxu2 %v8068_v41  ;;  %v8204_v39 = vor.u32 %v10891_v28, %v8201_v29  ;;  %v10887_v41 = vld [vmem:[#allocation2 + $0x5b4] sm:$0xf0]  ;;  %v8364_v24 = vor.u32 %v10931_v13, %v8361_v14  ;;  %v8073_v28 = vld [vmem:[#allocation2 + $0x4f8] sm:$0xf0] }
  0xf8   :  { %v8327_v23 = vld [vmem:[#allocation2 + $0x6d8] sm:$0xf]  ;;  %v10923_v29 = vld [vmem:[#allocation2 + $0x6dc] sm:$0xf] }
  0xf9   :  { %2079 = vmatpush.bf16.msra.mxu1 %v8320_v40  ;;  %2105 = vmatpush.bf16.msra.mxu3 %v8324_v45  ;;  %v8167_v40 = vld [vmem:[#allocation2 + $0x598] sm:$0xf]  ;;  %v10883_v45 = vld [vmem:[#allocation2 + $0x59c] sm:$0xf] }
  0xfa   :  { %v8168_v49 = vor.u32 %v10887_v41, %v8167_v40  ;;  %v8172_v51 = vor.u32 %v10883_v45, %v8169_v46  ;;  %v10855_v40 = vld [vmem:[#allocation2 + $0x4b4] sm:$0xf0]  ;;  %v10851_v46 = vld [vmem:[#allocation2 + $0x49c] sm:$0xf] }
  0xfb   :  { %2067 = vmatpush.bf16.msra.mxu0 %v8032_v54  ;;  %2093 = vmatpush.bf16.msra.mxu2 %v8036_v56  ;;  %v8428_v54 = vor.u32 %v10947_v47, %v8425_v48  ;;  %v8137_v56 = vld [vmem:[#allocation2 + $0x578] sm:$0xf0]  ;;  %v8295_v41 = vld [vmem:[#allocation2 + $0x698] sm:$0xf] }
  0xfc   :  { %v10919_v45 = vld [vmem:[#allocation2 + $0x6b4] sm:$0xf0]  ;;  %v8041_v47 = vld [vmem:[#allocation2 + $0x4b8] sm:$0xf0] }
  0xfd   :  { %2080 = vmatpush.bf16.msra.mxu1 %v8288_v9  ;;  %2106 = vmatpush.bf16.msra.mxu3 %v8292_v61  ;;  %v10875_v9 = vld [vmem:[#allocation2 + $0x55c] sm:$0xf]  ;;  %v288_v61 = vperm.slane %v12036_v31, 4  ;;  %v8044_v55 = vor.u32 %v10851_v46, %v8041_v47  ;;  %v7975_v6 = vld [vmem:[#allocation2 + $0x418] sm:$0xf] }
  0xfe   :  { %v8140_v0 = vor.u32 %v10875_v9, %v8137_v56  ;;  %v8007_v9 = vld [vmem:[#allocation2 + $0x458] sm:$0xf]  ;;  %v8265_v4 = vld [vmem:[#allocation2 + $0x678] sm:$0xf0]  ;;  %v11008_v46 = vld [vmem:[#allocation2 + $0x984] sm:$0xf] }
  0xff   :  { %2068 = vmatpush.bf16.msra.mxu0 %v8000_v5  ;;  %2094 = vmatpush.bf16.msra.mxu2 %v8004_v12  ;;  %v8396_v5 = vor.u32 %v10939_v57, %v8393_v58  ;;  %v10847_v56 = vld [vmem:[#allocation2 + $0x474] sm:$0xf0]  ;;  %v8657_v47 = vld [vmem:[#allocation2 + $0x9a0] sm:$0xf0] }
 0x100   :  { %v8263_v57 = vld [vmem:[#allocation2 + $0x658] sm:$0xf] }
 0x101   :  { %2081 = vmatpush.bf16.msra.mxu1 %v8256_v11  ;;  %2107 = vmatpush.bf16.msra.mxu3 %v8260_v16  ;;  %v8105_v11 = vld [vmem:[#allocation2 + $0x538] sm:$0xf0]  ;;  %v8104_v16 = vor.u32 %v10871_v3, %v8103_v2  ;;  %v8231_v14 = vld [vmem:[#allocation2 + $0x618] sm:$0xf] }
 0x102   :  { %v8108_v19 = vor.u32 %v10867_v10, %v8105_v11  ;;  %v10907_v3 = vld [vmem:[#allocation2 + $0x65c] sm:$0xf]  ;;  %v10839_v10 = vld [vmem:[#allocation2 + $0x434] sm:$0xf0] }
 0x103   :  { %2069 = vmatpush.bf16.msra.mxu0 %v7968_v26  ;;  %2095 = vmatpush.bf16.msra.mxu2 %v7972_v32  ;;  %v1053_v12 = vpop.f32.mrf.mxu0  ;;  %v10927_v26 = vld [vmem:[#allocation2 + $0x6f4] sm:$0xf0]  ;;  %v289_v32 = vperm.slane %v12036_v31, 5 }
 0x104   :  { %v1054_v15 = vadd.f32 %v1053_v12, %v288_v61  ;;  %v10843_v61 = vld [vmem:[#allocation2 + $0x45c] sm:$0xf] }
 0x105   :  { %2082 = vmatpush.bf16.msra.mxu1 %v8224_v30  ;;  %2108 = vmatpush.bf16.msra.mxu3 %v8228_v36  ;;  %v1066_v17 = vpop.f32.mrf.mxu1  ;;  %v8329_v30 = vld [vmem:[#allocation2 + $0x6f8] sm:$0xf0]  ;;  %v8072_v36 = vor.u32 %v10863_v21, %v8071_v20  ;;  %v8687_v21 = vld [vmem:[#allocation2 + $0x9c0] sm:$0xf] }
 0x106   :  { %2070 = vmatmul.bf16.vlgmr.msra.gmra.mxu0 %v12028_v62  ;;  %2096 = vmatmul.bf16.vlgmr.msra.gmra.mxu2 %v12028_v62  ;;  %v1067_v25 = vadd.f32 %v1066_v17, %v1054_v15  ;;  %v10903_v15 = vld [vmem:[#allocation2 + $0x634] sm:$0xf0]  ;;  %v8268_v17 = vor.u32 %v10907_v3, %v8265_v4  ;;  %v10996_v3 = vld [vmem:[#allocation2 + $0x91c] sm:$0xf0] }
 0x107   :  { %2114 = vmatpush.bf16.msrb.mxu0 %v8200_v37  ;;  %2140 = vmatpush.bf16.msrb.mxu2 %v8204_v39  ;;  %v8328_v37 = vor.u32 %v10927_v26, %v8327_v23  ;;  %v8039_v39 = vld [vmem:[#allocation2 + $0x498] sm:$0xf]  ;;  %v11020_v23 = vld [vmem:[#allocation2 + $0x9dc] sm:$0xf0]  ;;  %v7976_v26 = vor.u32 %v10839_v10, %v7975_v6  ;;  %v10992_v6 = vld [vmem:[#allocation2 + $0x904] sm:$0xf] }
 0x108   :  { %2083 = vmatmul.bf16.vlgmr.msra.gmra.mxu1 %v12030_v1  ;;  %2109 = vmatmul.bf16.vlgmr.msra.gmra.mxu3 %v12030_v1  ;;  %v1152_v34 = vmax.f32 %v1067_v25, 0.0  ;;  %v8040_v52 = vor.u32 %v10855_v40, %v8039_v39  ;;  %v8655_v40 = vld [vmem:[#allocation2 + $0x980] sm:$0xf]  ;;  %v8593_v10 = vld [vmem:[#allocation2 + $0x920] sm:$0xf0] }
 0x109   :  { %2127 = vmatpush.bf16.msrb.mxu1 %v8456_v38  ;;  %2153 = vmatpush.bf16.msrb.mxu3 %v8460_v43  ;;  %v8076_v38 = vor.u32 %v10859_v27, %v8073_v28  ;;  %v8332_v43 = vor.u32 %v10923_v29, %v8329_v30  ;;  %v1079_v44 = vpop.f32.mrf.mxu2  ;;  %v11084_v27 = vld [vmem:[#allocation2 + $0xbdc] sm:$0xf0]  ;;  %v11016_v28 = vld [vmem:[#allocation2 + $0x9c4] sm:$0xf]  ;;  %v8232_v30 = vor.u32 %v10903_v15, %v8231_v14 }
 0x10a   :  { %v12061_v42 = vadd.f32 %v1152_v34, %v1148_v33  ;;  %v1080_v48 = vadd.f32 %v1079_v44, %v289_v32  ;;  %v8689_v29 = vld [vmem:[#allocation2 + $0x9e0] sm:$0xf0]  ;;  %v8847_v4 = vld [vmem:[#allocation2 + $0xb00] sm:$0xf] }
 0x10b   :  { %2115 = vmatpush.bf16.msrb.mxu0 %v8168_v49  ;;  %2141 = vmatpush.bf16.msrb.mxu2 %v8172_v51  ;;  %v1092_v7 = vpop.f32.mrf.mxu3  ;;  %v10915_v49 = vld [vmem:[#allocation2 + $0x69c] sm:$0xf]  ;;  %v1055_v51 = vpop.f32.mrf.mxu0  ;;  %v11080_v33 = vld [vmem:[#allocation2 + $0xbc4] sm:$0xf]  ;;  %v8692_v39 = vor.u32 %v11016_v28, %v8689_v29  ;;  %v291_v29 = vperm.slane %v12036_v31, 7 }
 0x10c   :  { %v1093_v53 = vadd.f32 %v1092_v7, %v1080_v48  ;;  %v8945_v34 = vld [vmem:[#allocation2 + $0xbe0] sm:$0xf0]  ;;  %v8660_v51 = vor.u32 %v11008_v46, %v8657_v47 }
 0x10d   :  { %2128 = vmatpush.bf16.msrb.mxu1 %v8424_v50  ;;  %2154 = vmatpush.bf16.msrb.mxu3 %v8428_v54  ;;  %v8297_v50 = vld [vmem:[#allocation2 + $0x6b8] sm:$0xf0]  ;;  %v1068_v8 = vpop.f32.mrf.mxu1  ;;  %v8296_v54 = vor.u32 %v10919_v45, %v8295_v41  ;;  %v11012_v41 = vld [vmem:[#allocation2 + $0x99c] sm:$0xf0]  ;;  %v8948_v44 = vor.u32 %v11080_v33, %v8945_v34  ;;  %v11072_v48 = vld [vmem:[#allocation2 + $0xb84] sm:$0xf] }
 0x10e   :  { %v8300_v58 = vor.u32 %v10915_v49, %v8297_v50  ;;  %v1153_v2 = vmax.f32 %v1093_v53, 0.0  ;;  %v11076_v45 = vld [vmem:[#allocation2 + $0xb9c] sm:$0xf0]  ;;  %v8913_v7 = vld [vmem:[#allocation2 + $0xba0] sm:$0xf0]  ;;  %v8656_v49 = vor.u32 %v11012_v41, %v8655_v40 }
 0x10f   :  { %2116 = vmatpush.bf16.msrb.mxu0 %v8136_v59  ;;  %2142 = vmatpush.bf16.msrb.mxu2 %v8140_v0  ;;  %v10911_v59 = vld [vmem:[#allocation2 + $0x674] sm:$0xf0]  ;;  %v1149_v0 = vmax.f32 %v12042_v22, 0.0  ;;  %v10899_v22 = vld [vmem:[#allocation2 + $0x61c] sm:$0xf] }
 0x110   :  { %v8264_v12 = vor.u32 %v10911_v59, %v8263_v57  ;;  %v11004_v8 = vld [vmem:[#allocation2 + $0x95c] sm:$0xf0]  ;;  %v11064_v57 = vld [vmem:[#allocation2 + $0xb44] sm:$0xf] }
 0x111   :  { %2129 = vmatpush.bf16.msrb.mxu1 %v8392_v63  ;;  %2155 = vmatpush.bf16.msrb.mxu3 %v8396_v5  ;;  %v8009_v63 = vld [vmem:[#allocation2 + $0x478] sm:$0xf0]  ;;  %v8008_v5 = vor.u32 %v10847_v56, %v8007_v9  ;;  %v12064_v11 = vadd.f32 %v1153_v2, %v1149_v0  ;;  %v1081_v20 = vpop.f32.mrf.mxu2  ;;  %v8879_v53 = vld [vmem:[#allocation2 + $0xb40] sm:$0xf]  ;;  %v11000_v9 = vld [vmem:[#allocation2 + $0x944] sm:$0xf] }
 0x112   :  { %v8012_v13 = vor.u32 %v10843_v61, %v8009_v63  ;;  %v8625_v56 = vld [vmem:[#allocation2 + $0x960] sm:$0xf0]  ;;  %v290_v61 = vperm.slane %v12036_v31, 6  ;;  %v8591_v2 = vld [vmem:[#allocation2 + $0x900] sm:$0xf] }
 0x113   :  { %2117 = vmatpush.bf16.msrb.mxu0 %v8104_v16  ;;  %2143 = vmatpush.bf16.msrb.mxu2 %v8108_v19  ;;  %v10835_v16 = vld [vmem:[#allocation2 + $0x41c] sm:$0xf]  ;;  %v1094_v25 = vpop.f32.mrf.mxu3  ;;  %v8628_v0 = vor.u32 %v11000_v9, %v8625_v56  ;;  %v8849_v14 = vld [vmem:[#allocation2 + $0xb20] sm:$0xf0]  ;;  %v8592_v15 = vor.u32 %v10996_v3, %v8591_v2  ;;  %v8815_v20 = vld [vmem:[#allocation2 + $0xac0] sm:$0xf] }
 0x114   :  { %v8233_v19 = vld [vmem:[#allocation2 + $0x638] sm:$0xf0]  ;;  %v10984_v25 = vld [vmem:[#allocation2 + $0x8c4] sm:$0xf]  ;;  %v8751_v9 = vld [vmem:[#allocation2 + $0xa40] sm:$0xf] }
 0x115   :  { %2130 = vmatpush.bf16.msrb.mxu1 %v8360_v18  ;;  %2156 = vmatpush.bf16.msrb.mxu3 %v8364_v24  ;;  %v7977_v18 = vld [vmem:[#allocation2 + $0x438] sm:$0xf0]  ;;  %v8943_v24 = vld [vmem:[#allocation2 + $0xbc0] sm:$0xf]  ;;  %v8817_v28 = vld [vmem:[#allocation2 + $0xae0] sm:$0xf0] }
 0x116   :  { %v7980_v32 = vor.u32 %v10835_v16, %v7977_v18  ;;  %v8596_v18 = vor.u32 %v10992_v6, %v8593_v10  ;;  %v8529_v46 = vld [vmem:[#allocation2 + $0x8a0] sm:$0xf0]  ;;  %v8463_v3 = vld [vmem:[#allocation2 + $0x800] sm:$0xf] }
 0x117   :  { %2118 = vmatpush.bf16.msrb.mxu0 %v8072_v36  ;;  %2144 = vmatpush.bf16.msrb.mxu2 %v8076_v38  ;;  %v8236_v36 = vor.u32 %v10899_v22, %v8233_v19  ;;  %v8944_v38 = vor.u32 %v11084_v27, %v8943_v24  ;;  %v8559_v22 = vld [vmem:[#allocation2 + $0x8c0] sm:$0xf]  ;;  %v11048_v27 = vld [vmem:[#allocation2 + $0xac4] sm:$0xf] }
 0x118   :  { %v10988_v19 = vld [vmem:[#allocation2 + $0x8dc] sm:$0xf0]  ;;  %v8820_v41 = vor.u32 %v11048_v27, %v8817_v28 }
 0x119   :  { %2131 = vmatpush.bf16.msrb.mxu1 %v8328_v37  ;;  %2157 = vmatpush.bf16.msrb.mxu3 %v8332_v43  ;;  %v8688_v37 = vor.u32 %v11020_v23, %v8687_v21  ;;  %v8911_v43 = vld [vmem:[#allocation2 + $0xb80] sm:$0xf]  ;;  %v8560_v33 = vor.u32 %v10988_v19, %v8559_v22  ;;  %v11021_v22 = vld [vmem:[#allocation2 + $0x9e4] sm:$0xf0] }
 0x11a   :  { %v8912_v50 = vor.u32 %v11076_v45, %v8911_v43  ;;  %v11052_v24 = vld [vmem:[#allocation2 + $0xadc] sm:$0xf0]  ;;  %v10976_v45 = vld [vmem:[#allocation2 + $0x884] sm:$0xf]  ;;  %v8951_v19 = vld [vmem:[#allocation2 + $0xbc8] sm:$0xf] }
 0x11b   :  { %2119 = vmatpush.bf16.msrb.mxu0 %v8040_v52  ;;  %2145 = vmatpush.bf16.msrb.mxu2 %v8044_v55  ;;  %v8623_v52 = vld [vmem:[#allocation2 + $0x940] sm:$0xf]  ;;  %v8816_v34 = vor.u32 %v11052_v24, %v8815_v20  ;;  %v11017_v24 = vld [vmem:[#allocation2 + $0x9cc] sm:$0xf] }
 0x11c   :  { %v11068_v55 = vld [vmem:[#allocation2 + $0xb5c] sm:$0xf0]  ;;  %v8624_v59 = vor.u32 %v11004_v8, %v8623_v52 }
 0x11d   :  { %2132 = vmatpush.bf16.msrb.mxu1 %v8296_v54  ;;  %2158 = vmatpush.bf16.msrb.mxu3 %v8300_v58  ;;  %v8916_v54 = vor.u32 %v11072_v48, %v8913_v7  ;;  %v8881_v58 = vld [vmem:[#allocation2 + $0xb60] sm:$0xf0]  ;;  %v8880_v63 = vor.u32 %v11068_v55, %v8879_v53  ;;  %v8532_v53 = vor.u32 %v10976_v45, %v8529_v46  ;;  %v10972_v55 = vld [vmem:[#allocation2 + $0x85c] sm:$0xf0]  ;;  %v8665_v45 = vld [vmem:[#allocation2 + $0x9a8] sm:$0xf0] }
 0x11e   :  { %v8785_v48 = vld [vmem:[#allocation2 + $0xaa0] sm:$0xf0]  ;;  %v8719_v10 = vld [vmem:[#allocation2 + $0xa00] sm:$0xf] }
 0x11f   :  { %2120 = vmatpush.bf16.msrb.mxu0 %v8008_v5  ;;  %2146 = vmatpush.bf16.msrb.mxu2 %v8012_v13  ;;  %v8884_v5 = vor.u32 %v11064_v57, %v8881_v58  ;;  %v11056_v13 = vld [vmem:[#allocation2 + $0xb04] sm:$0xf]  ;;  %v11036_v57 = vld [vmem:[#allocation2 + $0xa5c] sm:$0xf0] }
 0x120   :  { %v8852_v21 = vor.u32 %v11056_v13, %v8849_v14  ;;  %v10968_v58 = vld [vmem:[#allocation2 + $0x844] sm:$0xf] }
 0x121   :  { %2133 = vmatpush.bf16.msrb.mxu1 %v8264_v12  ;;  %2159 = vmatpush.bf16.msrb.mxu3 %v8268_v17  ;;  %v10960_v13 = vld [vmem:[#allocation2 + $0x804] sm:$0xf] }
 0x123   :  { %2121 = vmatpush.bf16.msrb.mxu0 %v7976_v26  ;;  %2147 = vmatpush.bf16.msrb.mxu2 %v7980_v32  ;;  %v1105_v12 = vpop.f32.mrf.mxu0  ;;  %v8561_v26 = vld [vmem:[#allocation2 + $0x8e0] sm:$0xf0] }
 0x125   :  { %2134 = vmatpush.bf16.msrb.mxu1 %v8232_v30  ;;  %2160 = vmatpush.bf16.msrb.mxu3 %v8236_v36  ;;  %v1118_v16 = vpop.f32.mrf.mxu1  ;;  %v1150_v30 = vmax.f32 %v12049_v35, 0.0  ;;  %v8564_v36 = vor.u32 %v10984_v25, %v8561_v26  ;;  %v11040_v35 = vld [vmem:[#allocation2 + $0xa84] sm:$0xf]  ;;  %v8697_v25 = vld [vmem:[#allocation2 + $0x9e8] sm:$0xf0] }
 0x126   :  { %2122 = vmatmul.bf16.vlgmr.msrb.gmra.mxu0 %v12028_v62  ;;  %2148 = vmatmul.bf16.vlgmr.msrb.gmra.mxu2 %v12028_v62  ;;  %v11060_v62 = vld [vmem:[#allocation2 + $0xb1c] sm:$0xf0]  ;;  %v8788_v56 = vor.u32 %v11040_v35, %v8785_v48 }
 0x127   :  { %2976 = vmatpush.bf16.msra.mxu0 %v8688_v37  ;;  %3002 = vmatpush.bf16.msra.mxu2 %v8692_v39  ;;  %v8848_v17 = vor.u32 %v11060_v62, %v8847_v4  ;;  %v8527_v37 = vld [vmem:[#allocation2 + $0x880] sm:$0xf]  ;;  %v8752_v62 = vor.u32 %v11036_v57, %v8751_v9  ;;  %v11065_v9 = vld [vmem:[#allocation2 + $0xb4c] sm:$0xf] }
 0x128   :  { %2135 = vmatmul.bf16.vlgmr.msrb.gmra.mxu1 %v12030_v1  ;;  %2161 = vmatmul.bf16.vlgmr.msrb.gmra.mxu3 %v12030_v1  ;;  %v1106_v1 = vadd.f32 %v1105_v12, %v290_v61  ;;  %v8783_v39 = vld [vmem:[#allocation2 + $0xa80] sm:$0xf]  ;;  %v1151_v61 = vmax.f32 %v12052_v60, 0.0  ;;  %v8721_v60 = vld [vmem:[#allocation2 + $0xa20] sm:$0xf0] }
 0x129   :  { %2989 = vmatpush.bf16.msra.mxu1 %v8944_v38  ;;  %3015 = vmatpush.bf16.msra.mxu3 %v8948_v44  ;;  %v10980_v38 = vld [vmem:[#allocation2 + $0x89c] sm:$0xf0]  ;;  %v1131_v43 = vpop.f32.mrf.mxu2 }
 0x12a   :  { %v1119_v23 = vadd.f32 %v1118_v16, %v1106_v1  ;;  %v11044_v44 = vld [vmem:[#allocation2 + $0xa9c] sm:$0xf0]  ;;  %v1132_v31 = vadd.f32 %v1131_v43, %v291_v29  ;;  %v8465_v1 = vld [vmem:[#allocation2 + $0x820] sm:$0xf0]  ;;  %v11081_v29 = vld [vmem:[#allocation2 + $0xbcc] sm:$0xf] }
 0x12b   :  { %2977 = vmatpush.bf16.msra.mxu0 %v8656_v49  ;;  %3003 = vmatpush.bf16.msra.mxu2 %v8660_v51  ;;  %v1144_v47 = vpop.f32.mrf.mxu3  ;;  %v1107_v7 = vpop.f32.mrf.mxu0  ;;  %v8784_v8 = vor.u32 %v11044_v44, %v8783_v39  ;;  %v10964_v4 = vld [vmem:[#allocation2 + $0x81c] sm:$0xf0]  ;;  %v8468_v28 = vor.u32 %v10960_v13, %v8465_v1  ;;  %v11013_v39 = vld [vmem:[#allocation2 + $0x9a4] sm:$0xf0]  ;;  %v11009_v44 = vld [vmem:[#allocation2 + $0x98c] sm:$0xf] }
 0x12c   :  { %v1154_v32 = vmax.f32 %v1119_v23, 0.0  ;;  %v1145_v52 = vadd.f32 %v1144_v47, %v1132_v31  ;;  %v11028_v12 = vld [vmem:[#allocation2 + $0xa1c] sm:$0xf0]  ;;  %v11085_v23 = vld [vmem:[#allocation2 + $0xbe4] sm:$0xf0] }
 0x12d   :  { %2990 = vmatpush.bf16.msra.mxu1 %v8912_v50  ;;  %3016 = vmatpush.bf16.msra.mxu3 %v8916_v54  ;;  %v8528_v50 = vor.u32 %v10980_v38, %v8527_v37  ;;  %v1120_v51 = vpop.f32.mrf.mxu1  ;;  %v8495_v54 = vld [vmem:[#allocation2 + $0x840] sm:$0xf]  ;;  %v8720_v27 = vor.u32 %v11028_v12, %v8719_v10  ;;  %v8700_v37 = vor.u32 %v11017_v24, %v8697_v25  ;;  %v8663_v38 = vld [vmem:[#allocation2 + $0x988] sm:$0xf]  ;;  %v11073_v31 = vld [vmem:[#allocation2 + $0xb8c] sm:$0xf] }
 0x12e   :  { %v1158_v40 = vadd.f32 %v1154_v32, %v1150_v30  ;;  %v8496_v2 = vor.u32 %v10972_v55, %v8495_v54  ;;  %v8953_v30 = vld [vmem:[#allocation2 + $0xbe8] sm:$0xf0]  ;;  %v11077_v43 = vld [vmem:[#allocation2 + $0xba4] sm:$0xf0]  ;;  %v8664_v48 = vor.u32 %v11013_v39, %v8663_v38 }
 0x12f   :  { %2978 = vmatpush.bf16.msra.mxu0 %v8624_v59  ;;  %3004 = vmatpush.bf16.msra.mxu2 %v8628_v0  ;;  %v8497_v59 = vld [vmem:[#allocation2 + $0x860] sm:$0xf0]  ;;  %v8921_v47 = vld [vmem:[#allocation2 + $0xba8] sm:$0xf0]  ;;  %v11005_v51 = vld [vmem:[#allocation2 + $0x964] sm:$0xf0] }
 0x130   :  { %v1160_v49 = vadd.f32 %v1158_v40, %v12061_v42  ;;  %v11032_v42 = vld [vmem:[#allocation2 + $0xa44] sm:$0xf]  ;;  %v8500_v6 = vor.u32 %v10968_v58, %v8497_v59  ;;  %v8919_v40 = vld [vmem:[#allocation2 + $0xb88] sm:$0xf]  ;;  %v11001_v54 = vld [vmem:[#allocation2 + $0x94c] sm:$0xf] }
 0x131   :  { %2991 = vmatpush.bf16.msra.mxu1 %v8880_v63  ;;  %3017 = vmatpush.bf16.msra.mxu3 %v8884_v5  ;;  %v1155_v63 = vmax.f32 %v1145_v52, 0.0  ;;  %v8753_v0 = vld [vmem:[#allocation2 + $0xa60] sm:$0xf0]  ;;  %v1133_v16 = vpop.f32.mrf.mxu2  ;;  %v8920_v7 = vor.u32 %v11077_v43, %v8919_v40  ;;  %v8887_v52 = vld [vmem:[#allocation2 + $0xb48] sm:$0xf] }
 0x132   :  { %v8756_v14 = vor.u32 %v11032_v42, %v8753_v0  ;;  %v8633_v55 = vld [vmem:[#allocation2 + $0x968] sm:$0xf0]  ;;  %v1298_v58 = vld [vmem:[#allocation4 + $0x1] ss:$8 sm:$0xf] }
 0x133   :  { %2979 = vmatpush.bf16.msra.mxu0 %v8592_v15  ;;  %3005 = vmatpush.bf16.msra.mxu2 %v8596_v18  ;;  %v1159_v5 = vadd.f32 %v1155_v63, %v1151_v61  ;;  %v11024_v15 = vld [vmem:[#allocation2 + $0xa04] sm:$0xf]  ;;  %v8695_v18 = vld [vmem:[#allocation2 + $0x9c8] sm:$0xf]  ;;  %v1146_v20 = vpop.f32.mrf.mxu3  ;;  %v8636_v63 = vor.u32 %v11001_v54, %v8633_v55  ;;  %v11057_v10 = vld [vmem:[#allocation2 + $0xb0c] sm:$0xf] }
 0x134   :  { %v8724_v32 = vor.u32 %v11024_v15, %v8721_v60  ;;  %v1299_v59 = vld [vmem:[#allocation4 + $0x1] ss:$8 sm:$0xf0]  ;;  %v8857_v12 = vld [vmem:[#allocation2 + $0xb28] sm:$0xf0] }
 0x135   :  { %2992 = vmatpush.bf16.msra.mxu1 %v8848_v17  ;;  %3018 = vmatpush.bf16.msra.mxu3 %v8852_v21  ;;  %v1161_v17 = vadd.f32 %v1159_v5, %v12064_v11  ;;  %v8464_v21 = vor.u32 %v10964_v4, %v8463_v3  ;;  %v2182_v11 = vld [vmem:[%s12601_s0 + $0x20] sm:$0xff]  ;;  %v8599_v42 = vld [vmem:[#allocation2 + $0x908] sm:$0xf]  ;;  %v12092_v3 = vor.u32 %v1299_v59, %v1298_v58  ;;  %v8569_v24 = vld [vmem:[#allocation2 + $0x8e8] sm:$0xf0] }
 0x136   :  { %v12084_v46 = vpack.c.bf16 %v2182_v11, %v2182_v11  ;;  %v10997_v0 = vld [vmem:[#allocation2 + $0x924] sm:$0xf0]  ;;  %v10977_v40 = vld [vmem:[#allocation2 + $0x88c] sm:$0xf] }
 0x137   :  { %2980 = vmatpush.bf16.msra.mxu0 %v8560_v33  ;;  %3006 = vmatpush.bf16.msra.mxu2 %v8564_v36  ;;  %v12076_v26 = vadd.f32 %v1161_v17, %v1160_v49  ;;  %v8696_v33 = vor.u32 %v11021_v22, %v8695_v18  ;;  %v8952_v36 = vor.u32 %v11085_v23, %v8951_v19  ;;  %v11061_v5 = vld [vmem:[#allocation2 + $0xb24] sm:$0xf0]  ;;  %v1302_v13 = vperm.slane %v12092_v3, 0  ;;  %v10985_v23 = vld [vmem:[#allocation2 + $0x8cc] sm:$0xf] }
 0x138   :  { %v8668_v49 = vor.u32 %v11009_v44, %v8665_v45  ;;  %v8567_v1 = vld [vmem:[#allocation2 + $0x8c8] sm:$0xf]  ;;  %v1303_v25 = vperm.slane %v12092_v3, 1  ;;  %v11041_v45 = vld [vmem:[#allocation2 + $0xa8c] sm:$0xf] }
 0x139   :  { %2993 = vmatpush.bf16.msra.mxu1 %v8816_v34  ;;  %3019 = vmatpush.bf16.msra.mxu3 %v8820_v41  ;;  %v2183_v34 = vld [vmem:[%s12601_s0 + $0x28] sm:$0xff]  ;;  %v8956_v41 = vor.u32 %v11081_v29, %v8953_v30 }
 0x13a   :  { %v12086_v35 = vpack.c.bf16 %v2183_v34, %v2183_v34  ;;  %v10989_v17 = vld [vmem:[#allocation2 + $0x8e4] sm:$0xf0]  ;;  %v8761_v58 = vld [vmem:[#allocation2 + $0xa68] sm:$0xf0] }
 0x13b   :  { %2981 = vmatpush.bf16.msra.mxu0 %v8528_v50  ;;  %3007 = vmatpush.bf16.msra.mxu2 %v8532_v53  ;;  %v8631_v50 = vld [vmem:[#allocation2 + $0x948] sm:$0xf]  ;;  %v8568_v30 = vor.u32 %v10989_v17, %v8567_v1  ;;  %v8703_v1 = vld [vmem:[#allocation2 + $0x9d0] sm:$0xf] }
 0x13c   :  { %v11069_v53 = vld [vmem:[#allocation2 + $0xb64] sm:$0xf0]  ;;  %v8632_v57 = vor.u32 %v11005_v51, %v8631_v50  ;;  %v11086_v17 = vld [vmem:[#allocation2 + $0xbec] sm:$0xf0] }
 0x13d   :  { %2994 = vmatpush.bf16.msra.mxu1 %v8784_v8  ;;  %3020 = vmatpush.bf16.msra.mxu3 %v8788_v56  ;;  %v8924_v8 = vor.u32 %v11073_v31, %v8921_v47  ;;  %v8889_v56 = vld [vmem:[#allocation2 + $0xb68] sm:$0xf0]  ;;  %v8888_v61 = vor.u32 %v11069_v53, %v8887_v52  ;;  %v8823_v18 = vld [vmem:[#allocation2 + $0xac8] sm:$0xf] }
 0x13e   :  { %v8892_v4 = vor.u32 %v11065_v9, %v8889_v56  ;;  %v11053_v22 = vld [vmem:[#allocation2 + $0xae4] sm:$0xf0]  ;;  %v8793_v31 = vld [vmem:[#allocation2 + $0xaa8] sm:$0xf0] }
 0x13f   :  { %2982 = vmatpush.bf16.msra.mxu0 %v8496_v2  ;;  %3008 = vmatpush.bf16.msra.mxu2 %v8500_v6  ;;  %v8855_v2 = vld [vmem:[#allocation2 + $0xb08] sm:$0xf]  ;;  %v8601_v6 = vld [vmem:[#allocation2 + $0x928] sm:$0xf0]  ;;  %v8824_v11 = vor.u32 %v11053_v22, %v8823_v18  ;;  %v8796_v54 = vor.u32 %v11041_v45, %v8793_v31  ;;  %v11018_v18 = vld [vmem:[#allocation2 + $0x9d4] sm:$0xf] }
 0x140   :  { %v8856_v60 = vor.u32 %v11061_v5, %v8855_v2  ;;  %v10981_v34 = vld [vmem:[#allocation2 + $0x8a4] sm:$0xf0]  ;;  %v10969_v9 = vld [vmem:[#allocation2 + $0x84c] sm:$0xf]  ;;  %v8705_v22 = vld [vmem:[#allocation2 + $0x9f0] sm:$0xf0] }
 0x141   :  { %2995 = vmatpush.bf16.msra.mxu1 %v8752_v62  ;;  %3021 = vmatpush.bf16.msra.mxu3 %v8756_v14  ;;  %v10993_v62 = vld [vmem:[#allocation2 + $0x90c] sm:$0xf]  ;;  %v8600_v14 = vor.u32 %v10997_v0, %v8599_v42  ;;  %v11045_v39 = vld [vmem:[#allocation2 + $0xaa4] sm:$0xf0]  ;;  %v11006_v45 = vld [vmem:[#allocation2 + $0x96c] sm:$0xf0] }
 0x142   :  { %v8604_v16 = vor.u32 %v10993_v62, %v8601_v6  ;;  %v8503_v51 = vld [vmem:[#allocation2 + $0x848] sm:$0xf]  ;;  %v8505_v56 = vld [vmem:[#allocation2 + $0x868] sm:$0xf0]  ;;  %v8895_v31 = vld [vmem:[#allocation2 + $0xb50] sm:$0xf] }
 0x143   :  { %2983 = vmatpush.bf16.msra.mxu0 %v8464_v21  ;;  %3009 = vmatpush.bf16.msra.mxu2 %v8468_v28  ;;  %v1967_v15 = vpop.f32.mrf.mxu0  ;;  %v8860_v21 = vor.u32 %v11057_v10, %v8857_v12  ;;  %v8825_v28 = vld [vmem:[#allocation2 + $0xae8] sm:$0xf0]  ;;  %v10973_v52 = vld [vmem:[#allocation2 + $0x864] sm:$0xf0]  ;;  %v8508_v0 = vor.u32 %v10969_v9, %v8505_v56  ;;  %v8607_v9 = vld [vmem:[#allocation2 + $0x910] sm:$0xf] }
 0x144   :  { %v1968_v19 = vadd.f32 %v1967_v15, %v1302_v13  ;;  %v11037_v55 = vld [vmem:[#allocation2 + $0xa64] sm:$0xf0]  ;;  %v8504_v59 = vor.u32 %v10973_v52, %v8503_v51  ;;  %v10961_v5 = vld [vmem:[#allocation2 + $0x80c] sm:$0xf]  ;;  %v11022_v15 = vld [vmem:[#allocation2 + $0x9ec] sm:$0xf0] }
 0x145   :  { %2996 = vmatpush.bf16.msra.mxu1 %v8720_v27  ;;  %3022 = vmatpush.bf16.msra.mxu3 %v8724_v32  ;;  %v1980_v20 = vpop.f32.mrf.mxu1  ;;  %v11049_v27 = vld [vmem:[#allocation2 + $0xacc] sm:$0xf]  ;;  %v8572_v32 = vor.u32 %v10985_v23, %v8569_v24  ;;  %v8727_v2 = vld [vmem:[#allocation2 + $0xa08] sm:$0xf]  ;;  %v8961_v23 = vld [vmem:[#allocation2 + $0xbf0] sm:$0xf0] }
 0x146   :  { %3010 = vmatmul.bf16.vlgmr.msra.gmra.mxu2 %v12084_v46  ;;  %2984 = vmatmul.bf16.vlgmr.msra.gmra.mxu0 %v12084_v46  ;;  %v12096_v29 = vadd.f32 %v1980_v20, %v1968_v19  ;;  %v8828_v38 = vor.u32 %v11049_v27, %v8825_v28  ;;  %v8473_v10 = vld [vmem:[#allocation2 + $0x828] sm:$0xf0]  ;;  %v8708_v28 = vor.u32 %v11018_v18, %v8705_v22  ;;  %v11066_v51 = vld [vmem:[#allocation2 + $0xb54] sm:$0xf]  ;;  %v10998_v56 = vld [vmem:[#allocation2 + $0x92c] sm:$0xf0] }
 0x147   :  { %3028 = vmatpush.bf16.msrb.mxu0 %v8696_v33  ;;  %3054 = vmatpush.bf16.msrb.mxu2 %v8700_v37  ;;  %v8535_v33 = vld [vmem:[#allocation2 + $0x888] sm:$0xf]  ;;  %v11025_v12 = vld [vmem:[#allocation2 + $0xa0c] sm:$0xf]  ;;  %v8476_v20 = vor.u32 %v10961_v5, %v8473_v10  ;;  %v8897_v52 = vld [vmem:[#allocation2 + $0xb70] sm:$0xf0] }
 0x148   :  { %3023 = vmatmul.bf16.vlgmr.msra.gmra.mxu3 %v12086_v35  ;;  %2997 = vmatmul.bf16.vlgmr.msra.gmra.mxu1 %v12086_v35  ;;  %v8536_v47 = vor.u32 %v10981_v34, %v8535_v33  ;;  %v8729_v13 = vld [vmem:[#allocation2 + $0xa28] sm:$0xf0]  ;;  %v11078_v34 = vld [vmem:[#allocation2 + $0xbac] sm:$0xf0]  ;;  %v11050_v18 = vld [vmem:[#allocation2 + $0xad4] sm:$0xf] }
 0x149   :  { %3041 = vmatpush.bf16.msrb.mxu1 %v8952_v36  ;;  %3067 = vmatpush.bf16.msrb.mxu3 %v8956_v41  ;;  %v8791_v36 = vld [vmem:[#allocation2 + $0xa88] sm:$0xf]  ;;  %v1993_v37 = vpop.f32.mrf.mxu2  ;;  %v8537_v41 = vld [vmem:[#allocation2 + $0x8a8] sm:$0xf0]  ;;  %v8732_v24 = vor.u32 %v11025_v12, %v8729_v13  ;;  %v8575_v12 = vld [vmem:[#allocation2 + $0x8d0] sm:$0xf] }
 0x14a   :  { %v1994_v43 = vadd.f32 %v1993_v37, %v1303_v25  ;;  %v8540_v50 = vor.u32 %v10977_v40, %v8537_v41  ;;  %v8704_v25 = vor.u32 %v11022_v15, %v8703_v1  ;;  %v8673_v37 = vld [vmem:[#allocation2 + $0x9b0] sm:$0xf0]  ;;  %v10990_v13 = vld [vmem:[#allocation2 + $0x8ec] sm:$0xf0] }
 0x14b   :  { %3029 = vmatpush.bf16.msrb.mxu0 %v8664_v48  ;;  %3055 = vmatpush.bf16.msrb.mxu2 %v8668_v49  ;;  %v2006_v44 = vpop.f32.mrf.mxu3  ;;  %v8792_v49 = vor.u32 %v11045_v39, %v8791_v36  ;;  %v11010_v36 = vld [vmem:[#allocation2 + $0x994] sm:$0xf]  ;;  %v11054_v15 = vld [vmem:[#allocation2 + $0xaec] sm:$0xf0] }
 0x14c   :  { %v12098_v48 = vadd.f32 %v2006_v44, %v1994_v43  ;;  %v8929_v39 = vld [vmem:[#allocation2 + $0xbb0] sm:$0xf0]  ;;  %v8676_v43 = vor.u32 %v11010_v36, %v8673_v37  ;;  %v8639_v44 = vld [vmem:[#allocation2 + $0x950] sm:$0xf] }
 0x14d   :  { %3042 = vmatpush.bf16.msrb.mxu1 %v8920_v7  ;;  %3068 = vmatpush.bf16.msrb.mxu3 %v8924_v8  ;;  %v1969_v7 = vpop.f32.mrf.mxu0  ;;  %v8759_v8 = vld [vmem:[#allocation2 + $0xa48] sm:$0xf]  ;;  %v1982_v53 = vpop.f32.mrf.mxu1  ;;  %v8833_v22 = vld [vmem:[#allocation2 + $0xaf0] sm:$0xf0] }
 0x14e   :  { %v8760_v42 = vor.u32 %v11037_v55, %v8759_v8  ;;  %v11070_v7 = vld [vmem:[#allocation2 + $0xb6c] sm:$0xf0]  ;;  %v8640_v8 = vor.u32 %v11006_v45, %v8639_v44  ;;  %v1304_v53 = vperm.slane %v12092_v3, 2  ;;  %v8801_v36 = vld [vmem:[#allocation2 + $0xab0] sm:$0xf0] }
 0x14f   :  { %3030 = vmatpush.bf16.msrb.mxu0 %v8632_v57  ;;  %3056 = vmatpush.bf16.msrb.mxu2 %v8636_v63  ;;  %v11033_v57 = vld [vmem:[#allocation2 + $0xa4c] sm:$0xf]  ;;  %v10965_v63 = vld [vmem:[#allocation2 + $0x824] sm:$0xf0]  ;;  %v8511_v45 = vld [vmem:[#allocation2 + $0x850] sm:$0xf] }
 0x150   :  { %v8764_v6 = vor.u32 %v11033_v57, %v8761_v58  ;;  %v8863_v57 = vld [vmem:[#allocation2 + $0xb10] sm:$0xf]  ;;  %v8900_v58 = vor.u32 %v11066_v51, %v8897_v52  ;;  %v10970_v51 = vld [vmem:[#allocation2 + $0x854] sm:$0xf] }
 0x151   :  { %3043 = vmatpush.bf16.msrb.mxu1 %v8888_v61  ;;  %3069 = vmatpush.bf16.msrb.mxu3 %v8892_v4  ;;  %v8471_v61 = vld [vmem:[#allocation2 + $0x808] sm:$0xf]  ;;  %v1995_v62 = vpop.f32.mrf.mxu2  ;;  %v8513_v52 = vld [vmem:[#allocation2 + $0x870] sm:$0xf0] }
 0x152   :  { %v11029_v4 = vld [vmem:[#allocation2 + $0xa24] sm:$0xf0] }
 0x153   :  { %3031 = vmatpush.bf16.msrb.mxu0 %v8600_v14  ;;  %3057 = vmatpush.bf16.msrb.mxu2 %v8604_v16  ;;  %v2008_v14 = vpop.f32.mrf.mxu3  ;;  %v8472_v16 = vor.u32 %v10965_v63, %v8471_v61  ;;  %v8728_v19 = vor.u32 %v11029_v4, %v8727_v2  ;;  %v10994_v61 = vld [vmem:[#allocation2 + $0x914] sm:$0xf]  ;;  %v8608_v4 = vor.u32 %v10998_v56, %v8607_v9  ;;  %v10966_v9 = vld [vmem:[#allocation2 + $0x82c] sm:$0xf0] }
 0x154   :  { %v8609_v63 = vld [vmem:[#allocation2 + $0x930] sm:$0xf0]  ;;  %v8831_v14 = vld [vmem:[#allocation2 + $0xad0] sm:$0xf] }
 0x155   :  { %3044 = vmatpush.bf16.msrb.mxu1 %v8856_v60  ;;  %3070 = vmatpush.bf16.msrb.mxu3 %v8860_v21  ;;  %v8959_v60 = vld [vmem:[#allocation2 + $0xbd0] sm:$0xf]  ;;  %v11082_v21 = vld [vmem:[#allocation2 + $0xbd4] sm:$0xf]  ;;  %v8612_v10 = vor.u32 %v10994_v61, %v8609_v63 }
 0x156   :  { %v8960_v27 = vor.u32 %v11086_v17, %v8959_v60  ;;  %v8964_v33 = vor.u32 %v11082_v21, %v8961_v23  ;;  %v10986_v60 = vld [vmem:[#allocation2 + $0x8d4] sm:$0xf]  ;;  %v8832_v21 = vor.u32 %v11054_v15, %v8831_v14  ;;  %v11019_v14 = vld [vmem:[#allocation2 + $0x9dc] sm:$0xf] }
 0x157   :  { %3032 = vmatpush.bf16.msrb.mxu0 %v8568_v30  ;;  %3058 = vmatpush.bf16.msrb.mxu2 %v8572_v32  ;;  %v8671_v30 = vld [vmem:[#allocation2 + $0x990] sm:$0xf]  ;;  %v10962_v61 = vld [vmem:[#allocation2 + $0x814] sm:$0xf] }
 0x158   :  { %v8927_v32 = vld [vmem:[#allocation2 + $0xb90] sm:$0xf] }
 0x159   :  { %3045 = vmatpush.bf16.msrb.mxu1 %v8824_v11  ;;  %3071 = vmatpush.bf16.msrb.mxu3 %v8828_v38  ;;  %v11014_v11 = vld [vmem:[#allocation2 + $0x9ac] sm:$0xf0]  ;;  %v11074_v38 = vld [vmem:[#allocation2 + $0xb94] sm:$0xf]  ;;  %v8928_v41 = vor.u32 %v11078_v34, %v8927_v32 }
 0x15a   :  { %v8672_v40 = vor.u32 %v11014_v11, %v8671_v30  ;;  %v11046_v30 = vld [vmem:[#allocation2 + $0xaac] sm:$0xf0]  ;;  %v10978_v11 = vld [vmem:[#allocation2 + $0x894] sm:$0xf] }
 0x15b   :  { %3033 = vmatpush.bf16.msrb.mxu0 %v8536_v47  ;;  %3059 = vmatpush.bf16.msrb.mxu2 %v8540_v50  ;;  %v8932_v47 = vor.u32 %v11074_v38, %v8929_v39  ;;  %v8641_v50 = vld [vmem:[#allocation2 + $0x970] sm:$0xf0] }
 0x15c   :  { %v8545_v32 = vld [vmem:[#allocation2 + $0x8b0] sm:$0xf0] }
 0x15d   :  { %3046 = vmatpush.bf16.msrb.mxu1 %v8792_v49  ;;  %3072 = vmatpush.bf16.msrb.mxu3 %v8796_v54  ;;  %v11002_v49 = vld [vmem:[#allocation2 + $0x954] sm:$0xf]  ;;  %v8896_v54 = vor.u32 %v11070_v7, %v8895_v31  ;;  %v8548_v44 = vor.u32 %v10978_v11, %v8545_v32  ;;  %v10974_v31 = vld [vmem:[#allocation2 + $0x86c] sm:$0xf0]  ;;  %v8681_v11 = vld [vmem:[#allocation2 + $0x9b8] sm:$0xf0] }
 0x15e   :  { %v8644_v55 = vor.u32 %v11002_v49, %v8641_v50  ;;  %v11042_v34 = vld [vmem:[#allocation2 + $0xa94] sm:$0xf]  ;;  %v11038_v50 = vld [vmem:[#allocation2 + $0xa6c] sm:$0xf0]  ;;  %v11075_v32 = vld [vmem:[#allocation2 + $0xb9c] sm:$0xf] }
 0x15f   :  { %3034 = vmatpush.bf16.msrb.mxu0 %v8504_v59  ;;  %3060 = vmatpush.bf16.msrb.mxu2 %v8508_v0  ;;  %v11062_v59 = vld [vmem:[#allocation2 + $0xb2c] sm:$0xf0]  ;;  %v8865_v0 = vld [vmem:[#allocation2 + $0xb30] sm:$0xf0]  ;;  %v8804_v49 = vor.u32 %v11042_v34, %v8801_v36 }
 0x161   :  { %3047 = vmatpush.bf16.msrb.mxu1 %v8760_v42  ;;  %3073 = vmatpush.bf16.msrb.mxu3 %v8764_v6  ;;  %v11058_v42 = vld [vmem:[#allocation2 + $0xb14] sm:$0xf]  ;;  %v8864_v6 = vor.u32 %v11062_v59, %v8863_v57  ;;  %v8516_v57 = vor.u32 %v10970_v51, %v8513_v52  ;;  %v11030_v59 = vld [vmem:[#allocation2 + $0xa2c] sm:$0xf0] }
 0x162   :  { %v8868_v1 = vor.u32 %v11058_v42, %v8865_v0  ;;  %v8481_v42 = vld [vmem:[#allocation2 + $0x830] sm:$0xf0] }
 0x163   :  { %3035 = vmatpush.bf16.msrb.mxu0 %v8472_v16  ;;  %3061 = vmatpush.bf16.msrb.mxu2 %v8476_v20  ;;  %v2019_v2 = vpop.f32.mrf.mxu0  ;;  %v8577_v16 = vld [vmem:[#allocation2 + $0x8f0] sm:$0xf0]  ;;  %v8576_v20 = vor.u32 %v10990_v13, %v8575_v12  ;;  %v11087_v13 = vld [vmem:[#allocation2 + $0xbf4] sm:$0xf0] }
 0x164   :  { %v2020_v5 = vadd.f32 %v2019_v2, %v1304_v53  ;;  %v8580_v23 = vor.u32 %v10986_v60, %v8577_v16  ;;  %v8769_v53 = vld [vmem:[#allocation2 + $0xa70] sm:$0xf0]  ;;  %v8484_v60 = vor.u32 %v10962_v61, %v8481_v42  ;;  %v11083_v16 = vld [vmem:[#allocation2 + $0xbdc] sm:$0xf] }
 0x165   :  { %3048 = vmatpush.bf16.msrb.mxu1 %v8728_v19  ;;  %3074 = vmatpush.bf16.msrb.mxu3 %v8732_v24  ;;  %v2032_v62 = vpop.f32.mrf.mxu1  ;;  %v1305_v19 = vperm.slane %v12092_v3, 3  ;;  %v8543_v24 = vld [vmem:[#allocation2 + $0x890] sm:$0xf]  ;;  %v11026_v0 = vld [vmem:[#allocation2 + $0xa14] sm:$0xf] }
 0x166   :  { %3036 = vmatmul.bf16.vlgmr.msrb.gmra.mxu0 %v12084_v46  ;;  %3062 = vmatmul.bf16.vlgmr.msrb.gmra.mxu2 %v12084_v46  ;;  %v12105_v17 = vadd.f32 %v2032_v62, %v2020_v5  ;;  %v8737_v2 = vld [vmem:[#allocation2 + $0xa30] sm:$0xf0]  ;;  %v8711_v5 = vld [vmem:[#allocation2 + $0x9d8] sm:$0xf]  ;;  %v8873_v61 = vld [vmem:[#allocation2 + $0xb38] sm:$0xf0] }
 0x167   :  { %3080 = vmatpush.bf16.msra.mxu0 %v8704_v25  ;;  %3106 = vmatpush.bf16.msra.mxu2 %v8708_v28  ;;  %v10982_v25 = vld [vmem:[#allocation2 + $0x8ac] sm:$0xf0]  ;;  %v8836_v28 = vor.u32 %v11050_v18, %v8833_v22  ;;  %v11023_v62 = vld [vmem:[#allocation2 + $0x9f4] sm:$0xf0]  ;;  %v8969_v18 = vld [vmem:[#allocation2 + $0xbf8] sm:$0xf0]  ;;  %v8740_v22 = vor.u32 %v11026_v0, %v8737_v2 }
 0x168   :  { %3049 = vmatmul.bf16.vlgmr.msrb.gmra.mxu1 %v12086_v35  ;;  %3075 = vmatmul.bf16.vlgmr.msrb.gmra.mxu3 %v12086_v35 }
 0x169   :  { %3093 = vmatpush.bf16.msra.mxu1 %v8960_v27  ;;  %3119 = vmatpush.bf16.msra.mxu3 %v8964_v33  ;;  %v8799_v27 = vld [vmem:[#allocation2 + $0xa90] sm:$0xf]  ;;  %v2045_v33 = vpop.f32.mrf.mxu2 }
 0x16a   :  { %v2046_v37 = vadd.f32 %v2045_v33, %v1305_v19  ;;  %v8712_v19 = vor.u32 %v11023_v62, %v8711_v5  ;;  %v8937_v33 = vld [vmem:[#allocation2 + $0xbb8] sm:$0xf0]  ;;  %v8583_v5 = vld [vmem:[#allocation2 + $0x8d8] sm:$0xf] }
 0x16b   :  { %3081 = vmatpush.bf16.msra.mxu0 %v8672_v40  ;;  %3107 = vmatpush.bf16.msra.mxu2 %v8676_v43  ;;  %v2021_v38 = vpop.f32.mrf.mxu0  ;;  %v2058_v39 = vpop.f32.mrf.mxu3  ;;  %v8544_v40 = vor.u32 %v10982_v25, %v8543_v24  ;;  %v8800_v43 = vor.u32 %v11046_v30, %v8799_v27  ;;  %v11015_v24 = vld [vmem:[#allocation2 + $0x9b4] sm:$0xf0]  ;;  %v8972_v27 = vor.u32 %v11083_v16, %v8969_v18  ;;  %v11011_v30 = vld [vmem:[#allocation2 + $0x99c] sm:$0xf]  ;;  %v1307_v16 = vperm.slane %v12092_v3, 5 }
 0x16c   :  { %v12108_v7 = vadd.f32 %v2058_v39, %v2046_v37  ;;  %v8935_v25 = vld [vmem:[#allocation2 + $0xb98] sm:$0xf]  ;;  %v8684_v37 = vor.u32 %v11011_v30, %v8681_v11  ;;  %v2166_v18 = vmax.f32 %v12096_v29, 0.0 }
 0x16d   :  { %3094 = vmatpush.bf16.msra.mxu1 %v8928_v41  ;;  %3120 = vmatpush.bf16.msra.mxu3 %v8932_v47  ;;  %v2034_v41 = vpop.f32.mrf.mxu1  ;;  %v8767_v47 = vld [vmem:[#allocation2 + $0xa50] sm:$0xf]  ;;  %v8647_v38 = vld [vmem:[#allocation2 + $0x958] sm:$0xf] }
 0x16e   :  { %v8768_v56 = vor.u32 %v11038_v50, %v8767_v47  ;;  %v11007_v39 = vld [vmem:[#allocation2 + $0x974] sm:$0xf0]  ;;  %v8940_v41 = vor.u32 %v11075_v32, %v8937_v33  ;;  %v8905_v47 = vld [vmem:[#allocation2 + $0xb78] sm:$0xf0]  ;;  %v1306_v50 = vperm.slane %v12092_v3, 4 }
 0x16f   :  { %3082 = vmatpush.bf16.msra.mxu0 %v8640_v8  ;;  %3108 = vmatpush.bf16.msra.mxu2 %v8644_v55  ;;  %v11034_v8 = vld [vmem:[#allocation2 + $0xa54] sm:$0xf]  ;;  %v8479_v55 = vld [vmem:[#allocation2 + $0x810] sm:$0xf]  ;;  %v10991_v62 = vld [vmem:[#allocation2 + $0x8f4] sm:$0xf0] }
 0x170   :  { %v8772_v63 = vor.u32 %v11034_v8, %v8769_v53  ;;  %v8480_v12 = vor.u32 %v10966_v9, %v8479_v55  ;;  %v8615_v8 = vld [vmem:[#allocation2 + $0x918] sm:$0xf]  ;;  %v10979_v32 = vld [vmem:[#allocation2 + $0x89c] sm:$0xf] }
 0x171   :  { %3095 = vmatpush.bf16.msra.mxu1 %v8896_v54  ;;  %3121 = vmatpush.bf16.msra.mxu3 %v8900_v58  ;;  %v8512_v54 = vor.u32 %v10974_v31, %v8511_v45  ;;  %v8735_v58 = vld [vmem:[#allocation2 + $0xa10] sm:$0xf]  ;;  %v8649_v45 = vld [vmem:[#allocation2 + $0x978] sm:$0xf0]  ;;  %v10999_v53 = vld [vmem:[#allocation2 + $0x934] sm:$0xf0] }
 0x172   :  { %v8736_v15 = vor.u32 %v11030_v59, %v8735_v58  ;;  %v11067_v31 = vld [vmem:[#allocation2 + $0xb5c] sm:$0xf]  ;;  %v11063_v9 = vld [vmem:[#allocation2 + $0xb34] sm:$0xf0]  ;;  %v8616_v42 = vor.u32 %v10999_v53, %v8615_v8  ;;  %v2167_v8 = vmax.f32 %v12098_v48, 0.0 }
 0x173   :  { %3083 = vmatpush.bf16.msra.mxu0 %v8608_v4  ;;  %3109 = vmatpush.bf16.msra.mxu2 %v8612_v10  ;;  %v2047_v4 = vpop.f32.mrf.mxu2  ;;  %v2060_v10 = vpop.f32.mrf.mxu3  ;;  %v8908_v55 = vor.u32 %v11067_v31, %v8905_v47  ;;  %v11059_v59 = vld [vmem:[#allocation2 + $0xb1c] sm:$0xf]  ;;  %v11047_v11 = vld [vmem:[#allocation2 + $0xab4] sm:$0xf0] }
 0x174   :  { %v8876_v10 = vor.u32 %v11059_v59, %v8873_v61  ;;  %v8553_v33 = vld [vmem:[#allocation2 + $0x8b8] sm:$0xf0]  ;;  %v10975_v31 = vld [vmem:[#allocation2 + $0x874] sm:$0xf0] }
 0x175   :  { %3096 = vmatpush.bf16.msra.mxu1 %v8864_v6  ;;  %3122 = vmatpush.bf16.msra.mxu3 %v8868_v1  ;;  %v8967_v6 = vld [vmem:[#allocation2 + $0xbd8] sm:$0xf]  ;;  %v8713_v1 = vld [vmem:[#allocation2 + $0x9f8] sm:$0xf0] }
 0x176   :  { %v8775_v47 = vld [vmem:[#allocation2 + $0xa58] sm:$0xf]  ;;  %v11027_v48 = vld [vmem:[#allocation2 + $0xa1c] sm:$0xf] }
 0x177   :  { %3084 = vmatpush.bf16.msra.mxu0 %v8576_v20  ;;  %3110 = vmatpush.bf16.msra.mxu2 %v8580_v23  ;;  %v8968_v20 = vor.u32 %v11087_v13, %v8967_v6  ;;  %v8679_v23 = vld [vmem:[#allocation2 + $0x998] sm:$0xf] }
 0x178   :  { %v8680_v34 = vor.u32 %v11015_v24, %v8679_v23  ;;  %v8839_v6 = vld [vmem:[#allocation2 + $0xad8] sm:$0xf] }
 0x179   :  { %3097 = vmatpush.bf16.msra.mxu1 %v8832_v21  ;;  %3123 = vmatpush.bf16.msra.mxu3 %v8836_v28  ;;  %v8716_v21 = vor.u32 %v11019_v14, %v8713_v1  ;;  %v11079_v28 = vld [vmem:[#allocation2 + $0xbb4] sm:$0xf0]  ;;  %v10987_v14 = vld [vmem:[#allocation2 + $0x8dc] sm:$0xf] }
 0x17a   :  { %v8936_v36 = vor.u32 %v11079_v28, %v8935_v25  ;;  %v11055_v13 = vld [vmem:[#allocation2 + $0xaf4] sm:$0xf0]  ;;  %v8585_v1 = vld [vmem:[#allocation2 + $0x8f8] sm:$0xf0] }
 0x17b   :  { %3085 = vmatpush.bf16.msra.mxu0 %v8544_v40  ;;  %3111 = vmatpush.bf16.msra.mxu2 %v8548_v44  ;;  %v8903_v40 = vld [vmem:[#allocation2 + $0xb58] sm:$0xf]  ;;  %v11003_v44 = vld [vmem:[#allocation2 + $0x95c] sm:$0xf] }
 0x17c   :  { %v8652_v52 = vor.u32 %v11003_v44, %v8649_v45  ;;  %v8551_v23 = vld [vmem:[#allocation2 + $0x898] sm:$0xf]  ;;  %v8556_v44 = vor.u32 %v10979_v32, %v8553_v33  ;;  %v11204_v32 = vld [vmem:[#allocation2 + $0xf9c] sm:$0xf0]  ;;  %v11136_v33 = vld [vmem:[#allocation2 + $0xd84] sm:$0xf] }
 0x17d   :  { %3098 = vmatpush.bf16.msra.mxu1 %v8800_v43  ;;  %3124 = vmatpush.bf16.msra.mxu3 %v8804_v49  ;;  %v11071_v43 = vld [vmem:[#allocation2 + $0xb74] sm:$0xf0]  ;;  %v8648_v49 = vor.u32 %v11007_v39, %v8647_v38 }
 0x17e   :  { %v8904_v51 = vor.u32 %v11071_v43, %v8903_v40  ;;  %v10983_v24 = vld [vmem:[#allocation2 + $0x8b4] sm:$0xf0] }
 0x17f   :  { %3086 = vmatpush.bf16.msra.mxu0 %v8512_v54  ;;  %3112 = vmatpush.bf16.msra.mxu2 %v8516_v57  ;;  %v8871_v54 = vld [vmem:[#allocation2 + $0xb18] sm:$0xf]  ;;  %v8617_v57 = vld [vmem:[#allocation2 + $0x938] sm:$0xf0]  ;;  %v8552_v39 = vor.u32 %v10983_v24, %v8551_v23 }
 0x180   :  { %v8872_v2 = vor.u32 %v11063_v9, %v8871_v54  ;;  %v8807_v25 = vld [vmem:[#allocation2 + $0xa98] sm:$0xf]  ;;  %v11035_v54 = vld [vmem:[#allocation2 + $0xa5c] sm:$0xf] }
 0x181   :  { %3099 = vmatpush.bf16.msra.mxu1 %v8768_v56  ;;  %3125 = vmatpush.bf16.msra.mxu3 %v8772_v63  ;;  %v10995_v56 = vld [vmem:[#allocation2 + $0x91c] sm:$0xf]  ;;  %v8808_v43 = vor.u32 %v11047_v11, %v8807_v25  ;;  %v8519_v45 = vld [vmem:[#allocation2 + $0x858] sm:$0xf]  ;;  %v9167_v25 = vld [vmem:[#allocation2 + $0xd80] sm:$0xf] }
 0x182   :  { %v8620_v4 = vor.u32 %v10995_v56, %v8617_v57  ;;  %v8520_v9 = vor.u32 %v10975_v31, %v8519_v45  ;;  %v8487_v56 = vld [vmem:[#allocation2 + $0x818] sm:$0xf]  ;;  %v11196_v45 = vld [vmem:[#allocation2 + $0xf5c] sm:$0xf0]  ;;  %v11128_v31 = vld [vmem:[#allocation2 + $0xd44] sm:$0xf] }
 0x183   :  { %3087 = vmatpush.bf16.msra.mxu0 %v8480_v12  ;;  %3113 = vmatpush.bf16.msra.mxu2 %v8484_v60  ;;  %v2071_v58 = vpop.f32.mrf.mxu0  ;;  %v8841_v60 = vld [vmem:[#allocation2 + $0xaf8] sm:$0xf0]  ;;  %v10967_v57 = vld [vmem:[#allocation2 + $0x834] sm:$0xf0] }
 0x184   :  { %v2072_v63 = vadd.f32 %v2071_v58, %v1306_v50  ;;  %v11039_v50 = vld [vmem:[#allocation2 + $0xa74] sm:$0xf0] }
 0x185   :  { %3100 = vmatpush.bf16.msra.mxu1 %v8736_v15  ;;  %3126 = vmatpush.bf16.msra.mxu3 %v8740_v22  ;;  %v2084_v0 = vpop.f32.mrf.mxu1  ;;  %v11051_v15 = vld [vmem:[#allocation2 + $0xadc] sm:$0xf]  ;;  %v8776_v59 = vor.u32 %v11039_v50, %v8775_v47  ;;  %v9137_v47 = vld [vmem:[#allocation2 + $0xd60] sm:$0xf0] }
 0x186   :  { %3088 = vmatmul.bf16.vlgmr.msra.gmra.mxu0 %v12084_v46  ;;  %3114 = vmatmul.bf16.vlgmr.msra.gmra.mxu2 %v12084_v46  ;;  %v2085_v12 = vadd.f32 %v2084_v0, %v2072_v63  ;;  %v8844_v28 = vor.u32 %v11051_v15, %v8841_v60  ;;  %v8743_v63 = vld [vmem:[#allocation2 + $0xa18] sm:$0xf]  ;;  %v10963_v0 = vld [vmem:[#allocation2 + $0x81c] sm:$0xf]  ;;  %v11144_v15 = vld [vmem:[#allocation2 + $0xdc4] sm:$0xf] }
 0x187   :  { %3132 = vmatpush.bf16.msrb.mxu0 %v8712_v19  ;;  %3158 = vmatpush.bf16.msrb.mxu2 %v8716_v21  ;;  %v8584_v19 = vor.u32 %v10991_v62, %v8583_v5  ;;  %v8588_v21 = vor.u32 %v10987_v14, %v8585_v1  ;;  %v8745_v5 = vld [vmem:[#allocation2 + $0xa38] sm:$0xf0]  ;;  %v8488_v14 = vor.u32 %v10967_v57, %v8487_v56  ;;  %v11212_v1 = vld [vmem:[#allocation2 + $0xfdc] sm:$0xf0]  ;;  %v9201_v60 = vld [vmem:[#allocation2 + $0xde0] sm:$0xf0] }
 0x188   :  { %3101 = vmatmul.bf16.vlgmr.msra.gmra.mxu1 %v12086_v35  ;;  %3127 = vmatmul.bf16.vlgmr.msra.gmra.mxu3 %v12086_v35  ;;  %v2170_v22 = vmax.f32 %v2085_v12, 0.0  ;;  %v9455_v12 = vld [vmem:[#allocation2 + $0xfc0] sm:$0xf]  ;;  %v9204_v24 = vor.u32 %v11144_v15, %v9201_v60  ;;  %v9393_v50 = vld [vmem:[#allocation2 + $0xf60] sm:$0xf0] }
 0x189   :  { %3145 = vmatpush.bf16.msrb.mxu1 %v8968_v20  ;;  %3171 = vmatpush.bf16.msrb.mxu3 %v8972_v27  ;;  %v8840_v20 = vor.u32 %v11055_v13, %v8839_v6  ;;  %v2097_v30 = vpop.f32.mrf.mxu2  ;;  %v9199_v6 = vld [vmem:[#allocation2 + $0xdc0] sm:$0xf]  ;;  %v9456_v23 = vor.u32 %v11212_v1, %v9455_v12  ;;  %v11120_v57 = vld [vmem:[#allocation2 + $0xd04] sm:$0xf] }
 0x18a   :  { %v12117_v27 = vadd.f32 %v2170_v22, %v2166_v18  ;;  %v11208_v22 = vld [vmem:[#allocation2 + $0xfc4] sm:$0xf] }
 0x18b   :  { %3133 = vmatpush.bf16.msrb.mxu0 %v8680_v34  ;;  %3159 = vmatpush.bf16.msrb.mxu2 %v8684_v37  ;;  %v2098_v34 = vadd.f32 %v2097_v30, %v1307_v16  ;;  %v2110_v29 = vpop.f32.mrf.mxu3  ;;  %v8809_v37 = vld [vmem:[#allocation2 + $0xab8] sm:$0xf0]  ;;  %v2073_v38 = vpop.f32.mrf.mxu0  ;;  %v9423_v30 = vld [vmem:[#allocation2 + $0xf80] sm:$0xf]  ;;  %v9073_v1 = vld [vmem:[#allocation2 + $0xce0] sm:$0xf0] }
 0x18c   :  { %v9424_v38 = vor.u32 %v11204_v32, %v9423_v30  ;;  %v11176_v15 = vld [vmem:[#allocation2 + $0xec4] sm:$0xf]  ;;  %v11172_v32 = vld [vmem:[#allocation2 + $0xe9c] sm:$0xf0] }
 0x18d   :  { %3146 = vmatpush.bf16.msrb.mxu1 %v8936_v36  ;;  %3172 = vmatpush.bf16.msrb.mxu3 %v8940_v41  ;;  %v11043_v36 = vld [vmem:[#allocation2 + $0xa9c] sm:$0xf]  ;;  %v2086_v40 = vpop.f32.mrf.mxu1  ;;  %v2111_v41 = vadd.f32 %v2110_v29, %v2098_v34  ;;  %v9169_v34 = vld [vmem:[#allocation2 + $0xda0] sm:$0xf0] }
 0x18e   :  { %v11200_v29 = vld [vmem:[#allocation2 + $0xf84] sm:$0xf]  ;;  %v9135_v40 = vld [vmem:[#allocation2 + $0xd40] sm:$0xf] }
 0x18f   :  { %3134 = vmatpush.bf16.msrb.mxu0 %v8648_v49  ;;  %3160 = vmatpush.bf16.msrb.mxu2 %v8652_v52  ;;  %v8812_v49 = vor.u32 %v11043_v36, %v8809_v37  ;;  %v8521_v52 = vld [vmem:[#allocation2 + $0x878] sm:$0xf0]  ;;  %v2171_v53 = vmax.f32 %v2111_v41, 0.0  ;;  %v9425_v36 = vld [vmem:[#allocation2 + $0xfa0] sm:$0xf0] }
 0x190   :  { %v11132_v41 = vld [vmem:[#allocation2 + $0xd5c] sm:$0xf0]  ;;  %v9329_v60 = vld [vmem:[#allocation2 + $0xee0] sm:$0xf0] }
 0x191   :  { %3147 = vmatpush.bf16.msrb.mxu1 %v8904_v51  ;;  %3173 = vmatpush.bf16.msrb.mxu3 %v8908_v55  ;;  %v10971_v51 = vld [vmem:[#allocation2 + $0x85c] sm:$0xf]  ;;  %v12120_v58 = vadd.f32 %v2171_v53, %v2167_v8  ;;  %v2099_v62 = vpop.f32.mrf.mxu2  ;;  %v9140_v53 = vor.u32 %v11128_v31, %v9137_v47  ;;  %v9332_v30 = vor.u32 %v11176_v15, %v9329_v60  ;;  %v11100_v31 = vld [vmem:[#allocation2 + $0xc5c] sm:$0xf0] }
 0x192   :  { %v8777_v55 = vld [vmem:[#allocation2 + $0xa78] sm:$0xf0]  ;;  %v8524_v61 = vor.u32 %v10971_v51, %v8521_v52  ;;  %v9136_v51 = vor.u32 %v11132_v41, %v9135_v40  ;;  %v1308_v52 = vperm.slane %v12092_v3, 6  ;;  %v11116_v62 = vld [vmem:[#allocation2 + $0xcdc] sm:$0xf0] }
 0x193   :  { %3135 = vmatpush.bf16.msrb.mxu0 %v8616_v42  ;;  %3161 = vmatpush.bf16.msrb.mxu2 %v8620_v4  ;;  %v11031_v42 = vld [vmem:[#allocation2 + $0xa34] sm:$0xf0]  ;;  %v8489_v4 = vld [vmem:[#allocation2 + $0x838] sm:$0xf0]  ;;  %v2112_v13 = vpop.f32.mrf.mxu3  ;;  %v9263_v47 = vld [vmem:[#allocation2 + $0xe40] sm:$0xf] }
 0x194   :  { %v8744_v16 = vor.u32 %v11031_v42, %v8743_v63  ;;  %v8492_v18 = vor.u32 %v10963_v0, %v8489_v4  ;;  %v11184_v63 = vld [vmem:[#allocation2 + $0xf04] sm:$0xf]  ;;  %v11180_v13 = vld [vmem:[#allocation2 + $0xedc] sm:$0xf0] }
 0x195   :  { %3148 = vmatpush.bf16.msrb.mxu1 %v8872_v2  ;;  %3174 = vmatpush.bf16.msrb.mxu3 %v8876_v10  ;;  %v8780_v2 = vor.u32 %v11035_v54, %v8777_v55  ;;  %v11148_v10 = vld [vmem:[#allocation2 + $0xddc] sm:$0xf0]  ;;  %v9361_v42 = vld [vmem:[#allocation2 + $0xf20] sm:$0xf0] }
 0x196   :  { %v9103_v54 = vld [vmem:[#allocation2 + $0xd00] sm:$0xf] }
 0x197   :  { %3136 = vmatpush.bf16.msrb.mxu0 %v8584_v19  ;;  %3162 = vmatpush.bf16.msrb.mxu2 %v8588_v21  ;;  %v9457_v19 = vld [vmem:[#allocation2 + $0xfe0] sm:$0xf0]  ;;  %v9200_v21 = vor.u32 %v11148_v10, %v9199_v6  ;;  %v11124_v55 = vld [vmem:[#allocation2 + $0xd1c] sm:$0xf0]  ;;  %v9364_v10 = vor.u32 %v11184_v63, %v9361_v42 }
 0x198   :  { %v9460_v11 = vor.u32 %v11208_v22, %v9457_v19  ;;  %v9104_v0 = vor.u32 %v11124_v55, %v9103_v54  ;;  %v9327_v6 = vld [vmem:[#allocation2 + $0xec0] sm:$0xf]  ;;  %v9265_v54 = vld [vmem:[#allocation2 + $0xe60] sm:$0xf0] }
 0x199   :  { %3149 = vmatpush.bf16.msrb.mxu1 %v8840_v20  ;;  %3175 = vmatpush.bf16.msrb.mxu3 %v8844_v28  ;;  %v8748_v20 = vor.u32 %v11027_v48, %v8745_v5  ;;  %v11140_v28 = vld [vmem:[#allocation2 + $0xd9c] sm:$0xf0]  ;;  %v11088_v42 = vld [vmem:[#allocation2 + $0xc04] sm:$0xf] }
 0x19a   :  { %v9168_v37 = vor.u32 %v11140_v28, %v9167_v25  ;;  %v9071_v5 = vld [vmem:[#allocation2 + $0xcc0] sm:$0xf] }
 0x19b   :  { %3137 = vmatpush.bf16.msrb.mxu0 %v8552_v39  ;;  %3163 = vmatpush.bf16.msrb.mxu2 %v8556_v44  ;;  %v9172_v39 = vor.u32 %v11136_v33, %v9169_v34  ;;  %v9428_v44 = vor.u32 %v11200_v29, %v9425_v36  ;;  %v9072_v19 = vor.u32 %v11116_v62, %v9071_v5  ;;  %v9295_v25 = vld [vmem:[#allocation2 + $0xe80] sm:$0xf]  ;;  %v11104_v33 = vld [vmem:[#allocation2 + $0xc84] sm:$0xf]  ;;  %v9207_v5 = vld [vmem:[#allocation2 + $0xdc8] sm:$0xf] }
 0x19c   :  { %v9041_v34 = vld [vmem:[#allocation2 + $0xca0] sm:$0xf0]  ;;  %v11156_v63 = vld [vmem:[#allocation2 + $0xe1c] sm:$0xf0]  ;;  %v11149_v62 = vld [vmem:[#allocation2 + $0xde4] sm:$0xf0] }
 0x19d   :  { %3150 = vmatpush.bf16.msrb.mxu1 %v8808_v43  ;;  %3176 = vmatpush.bf16.msrb.mxu3 %v8812_v49  ;;  %v9391_v43 = vld [vmem:[#allocation2 + $0xf40] sm:$0xf]  ;;  %v11192_v49 = vld [vmem:[#allocation2 + $0xf44] sm:$0xf] }
 0x19e   :  { %v9392_v8 = vor.u32 %v11196_v45, %v9391_v43  ;;  %v9396_v56 = vor.u32 %v11192_v49, %v9393_v50  ;;  %v9297_v36 = vld [vmem:[#allocation2 + $0xea0] sm:$0xf0]  ;;  %v9296_v43 = vor.u32 %v11172_v32, %v9295_v25  ;;  %v9007_v45 = vld [vmem:[#allocation2 + $0xc40] sm:$0xf]  ;;  %v9175_v25 = vld [vmem:[#allocation2 + $0xd88] sm:$0xf] }
 0x19f   :  { %3138 = vmatpush.bf16.msrb.mxu0 %v8520_v9  ;;  %3164 = vmatpush.bf16.msrb.mxu2 %v8524_v61  ;;  %v9359_v9 = vld [vmem:[#allocation2 + $0xf00] sm:$0xf]  ;;  %v9008_v55 = vor.u32 %v11100_v31, %v9007_v45  ;;  %v11205_v32 = vld [vmem:[#allocation2 + $0xfa4] sm:$0xf0]  ;;  %v11129_v31 = vld [vmem:[#allocation2 + $0xd4c] sm:$0xf] }
 0x1a0   :  { %v11164_v50 = vld [vmem:[#allocation2 + $0xe5c] sm:$0xf0]  ;;  %v11197_v45 = vld [vmem:[#allocation2 + $0xf64] sm:$0xf0] }
 0x1a1   :  { %3151 = vmatpush.bf16.msrb.mxu1 %v8776_v59  ;;  %3177 = vmatpush.bf16.msrb.mxu3 %v8780_v2  ;;  %v9105_v59 = vld [vmem:[#allocation2 + $0xd20] sm:$0xf0] }
 0x1a2   :  { %v9108_v48 = vor.u32 %v11120_v57, %v9105_v59  ;;  %v9264_v57 = vor.u32 %v11164_v50, %v9263_v47  ;;  %v9145_v47 = vld [vmem:[#allocation2 + $0xd68] sm:$0xf0] }
 0x1a3   :  { %3139 = vmatpush.bf16.msrb.mxu0 %v8488_v14  ;;  %3165 = vmatpush.bf16.msrb.mxu2 %v8492_v18  ;;  %v2123_v61 = vpop.f32.mrf.mxu0  ;;  %v11112_v14 = vld [vmem:[#allocation2 + $0xcc4] sm:$0xf]  ;;  %v2168_v18 = vmax.f32 %v12105_v17, 0.0  ;;  %v9401_v50 = vld [vmem:[#allocation2 + $0xf68] sm:$0xf0] }
 0x1a4   :  { %v11168_v17 = vld [vmem:[#allocation2 + $0xe84] sm:$0xf] }
 0x1a5   :  { %3152 = vmatpush.bf16.msrb.mxu1 %v8744_v16  ;;  %3178 = vmatpush.bf16.msrb.mxu3 %v8748_v20  ;;  %v2136_v2 = vpop.f32.mrf.mxu1  ;;  %v1309_v16 = vperm.slane %v12092_v3, 7  ;;  %v9328_v20 = vor.u32 %v11180_v13, %v9327_v6  ;;  %v9300_v49 = vor.u32 %v11168_v17, %v9297_v36  ;;  %v9463_v6 = vld [vmem:[#allocation2 + $0xfc8] sm:$0xf]  ;;  %v9433_v17 = vld [vmem:[#allocation2 + $0xfa8] sm:$0xf0] }
 0x1a6   :  { %3140 = vmatmul.bf16.vlgmr.msrb.gmra.mxu0 %v12084_v46  ;;  %3166 = vmatmul.bf16.vlgmr.msrb.gmra.mxu2 %v12084_v46  ;;  %v11188_v46 = vld [vmem:[#allocation2 + $0xf1c] sm:$0xf0]  ;;  %v11213_v13 = vld [vmem:[#allocation2 + $0xfe4] sm:$0xf0] }
 0x1a7   :  { %3994 = vmatpush.bf16.msra.mxu0 %v9200_v21  ;;  %4020 = vmatpush.bf16.msra.mxu2 %v9204_v24  ;;  %v9360_v4 = vor.u32 %v11188_v46, %v9359_v9  ;;  %v9076_v21 = vor.u32 %v11112_v14, %v9073_v1  ;;  %v11108_v24 = vld [vmem:[#allocation2 + $0xc9c] sm:$0xf0]  ;;  %v11145_v14 = vld [vmem:[#allocation2 + $0xdcc] sm:$0xf] }
 0x1a8   :  { %3153 = vmatmul.bf16.vlgmr.msrb.gmra.mxu1 %v12086_v35  ;;  %3179 = vmatmul.bf16.vlgmr.msrb.gmra.mxu3 %v12086_v35  ;;  %v2124_v35 = vadd.f32 %v2123_v61, %v1308_v52  ;;  %v9009_v52 = vld [vmem:[#allocation2 + $0xc60] sm:$0xf0]  ;;  %v8975_v9 = vld [vmem:[#allocation2 + $0xc00] sm:$0xf]  ;;  %v9209_v1 = vld [vmem:[#allocation2 + $0xde8] sm:$0xf0] }
 0x1a9   :  { %4007 = vmatpush.bf16.msra.mxu1 %v9456_v23  ;;  %4033 = vmatpush.bf16.msra.mxu3 %v9460_v11  ;;  %v9039_v23 = vld [vmem:[#allocation2 + $0xc80] sm:$0xf]  ;;  %v2149_v11 = vpop.f32.mrf.mxu2 }
 0x1aa   :  { %v2137_v12 = vadd.f32 %v2136_v2, %v2124_v35  ;;  %v2150_v3 = vadd.f32 %v2149_v11, %v1309_v16  ;;  %v9231_v61 = vld [vmem:[#allocation2 + $0xe00] sm:$0xf]  ;;  %v11152_v2 = vld [vmem:[#allocation2 + $0xe04] sm:$0xf] }
 0x1ab   :  { %3995 = vmatpush.bf16.msra.mxu0 %v9168_v37  ;;  %4021 = vmatpush.bf16.msra.mxu2 %v9172_v39  ;;  %v2162_v29 = vpop.f32.mrf.mxu3  ;;  %v2125_v37 = vpop.f32.mrf.mxu0  ;;  %v9040_v39 = vor.u32 %v11108_v24, %v9039_v23  ;;  %v9232_v60 = vor.u32 %v11156_v63, %v9231_v61  ;;  %v9464_v23 = vor.u32 %v11213_v13, %v9463_v6  ;;  %v9113_v61 = vld [vmem:[#allocation2 + $0xd28] sm:$0xf0]  ;;  %v11181_v6 = vld [vmem:[#allocation2 + $0xee4] sm:$0xf0] }
 0x1ac   :  { %v2172_v22 = vmax.f32 %v2137_v12, 0.0  ;;  %v2163_v41 = vadd.f32 %v2162_v29, %v2150_v3  ;;  %v9212_v24 = vor.u32 %v11145_v14, %v9209_v1  ;;  %v11201_v29 = vld [vmem:[#allocation2 + $0xf8c] sm:$0xf] }
 0x1ad   :  { %4008 = vmatpush.bf16.msra.mxu1 %v9424_v38  ;;  %4034 = vmatpush.bf16.msra.mxu3 %v9428_v44  ;;  %v2138_v40 = vpop.f32.mrf.mxu1  ;;  %v9044_v44 = vor.u32 %v11104_v33, %v9041_v34  ;;  %v11137_v33 = vld [vmem:[#allocation2 + $0xd8c] sm:$0xf] }
 0x1ae   :  { %v2176_v28 = vadd.f32 %v2172_v22, %v2168_v18  ;;  %v11209_v18 = vld [vmem:[#allocation2 + $0xfcc] sm:$0xf]  ;;  %v9143_v40 = vld [vmem:[#allocation2 + $0xd48] sm:$0xf] }
 0x1af   :  { %3996 = vmatpush.bf16.msra.mxu0 %v9136_v51  ;;  %4022 = vmatpush.bf16.msra.mxu2 %v9140_v53  ;;  %v11096_v51 = vld [vmem:[#allocation2 + $0xc44] sm:$0xf]  ;;  %v2173_v53 = vmax.f32 %v2163_v41, 0.0  ;;  %v9465_v22 = vld [vmem:[#allocation2 + $0xfe8] sm:$0xf0] }
 0x1b0   :  { %v2178_v38 = vadd.f32 %v2176_v28, %v12117_v27  ;;  %v11160_v27 = vld [vmem:[#allocation2 + $0xe44] sm:$0xf]  ;;  %v9012_v59 = vor.u32 %v11096_v51, %v9009_v52  ;;  %v11141_v28 = vld [vmem:[#allocation2 + $0xda4] sm:$0xf0]  ;;  %v9468_v11 = vor.u32 %v11209_v18, %v9465_v22  ;;  %v9177_v34 = vld [vmem:[#allocation2 + $0xda8] sm:$0xf0] }
 0x1b1   :  { %4009 = vmatpush.bf16.msra.mxu1 %v9392_v8  ;;  %4035 = vmatpush.bf16.msra.mxu3 %v9396_v56  ;;  %v2169_v8 = vmax.f32 %v12108_v7, 0.0  ;;  %v11092_v56 = vld [vmem:[#allocation2 + $0xc1c] sm:$0xf0]  ;;  %v9268_v35 = vor.u32 %v11160_v27, %v9265_v54  ;;  %v9233_v7 = vld [vmem:[#allocation2 + $0xe20] sm:$0xf0]  ;;  %v9176_v37 = vor.u32 %v11141_v28, %v9175_v25  ;;  %v9148_v27 = vor.u32 %v11129_v31, %v9145_v47 }
 0x1b2   :  { %v8976_v12 = vor.u32 %v11092_v56, %v8975_v9  ;;  %v11133_v41 = vld [vmem:[#allocation2 + $0xd64] sm:$0xf0]  ;;  %v11185_v63 = vld [vmem:[#allocation2 + $0xf0c] sm:$0xf] }
 0x1b3   :  { %3997 = vmatpush.bf16.msra.mxu0 %v9104_v0  ;;  %4023 = vmatpush.bf16.msra.mxu2 %v9108_v48  ;;  %v2177_v46 = vadd.f32 %v2173_v53, %v2169_v8  ;;  %v8977_v0 = vld [vmem:[#allocation2 + $0xc20] sm:$0xf0]  ;;  %v9144_v51 = vor.u32 %v11133_v41, %v9143_v40  ;;  %v2316_v52 = vld [vmem:[#allocation4 + $0x2] ss:$8 sm:$0xf] }
 0x1b4   :  { %v8980_v16 = vor.u32 %v11088_v42, %v8977_v0  ;;  %v2317_v8 = vld [vmem:[#allocation4 + $0x2] ss:$8 sm:$0xf0]  ;;  %v9369_v42 = vld [vmem:[#allocation2 + $0xf28] sm:$0xf0] }
 0x1b5   :  { %4010 = vmatpush.bf16.msra.mxu1 %v9360_v4  ;;  %4036 = vmatpush.bf16.msra.mxu3 %v9364_v10  ;;  %v2151_v4 = vpop.f32.mrf.mxu2  ;;  %v2179_v48 = vadd.f32 %v2177_v46, %v12120_v58  ;;  %v2164_v10 = vpop.f32.mrf.mxu3  ;;  %v3200_v58 = vld [vmem:[%s12601_s0 + $0x30] sm:$0xff]  ;;  %v9111_v54 = vld [vmem:[#allocation2 + $0xd08] sm:$0xf]  ;;  %v12148_v56 = vor.u32 %v2317_v8, %v2316_v52  ;;  %v9372_v13 = vor.u32 %v11185_v63, %v9369_v42  ;;  %v11113_v14 = vld [vmem:[#allocation2 + $0xccc] sm:$0xf] }
 0x1b6   :  { %v12140_v3 = vpack.c.bf16 %v3200_v58, %v3200_v58  ;;  %v9367_v9 = vld [vmem:[#allocation2 + $0xf08] sm:$0xf]  ;;  %v9081_v1 = vld [vmem:[#allocation2 + $0xce8] sm:$0xf0] }
 0x1b7   :  { %3998 = vmatpush.bf16.msra.mxu0 %v9072_v19  ;;  %4024 = vmatpush.bf16.msra.mxu2 %v9076_v21  ;;  %v12132_v15 = vadd.f32 %v2179_v48, %v2178_v38  ;;  %v9236_v19 = vor.u32 %v11152_v2, %v9233_v7  ;;  %v3201_v21 = vld [vmem:[%s12601_s0 + $0x38] sm:$0xff]  ;;  %v9079_v2 = vld [vmem:[#allocation2 + $0xcc8] sm:$0xf]  ;;  %v9337_v18 = vld [vmem:[#allocation2 + $0xee8] sm:$0xf0] }
 0x1b8   :  { %v12142_v36 = vpack.c.bf16 %v3201_v21, %v3201_v21  ;;  %v9047_v21 = vld [vmem:[#allocation2 + $0xc88] sm:$0xf]  ;;  %v11161_v52 = vld [vmem:[#allocation2 + $0xe4c] sm:$0xf] }
 0x1b9   :  { %4011 = vmatpush.bf16.msra.mxu1 %v9328_v20  ;;  %4037 = vmatpush.bf16.msra.mxu3 %v9332_v30  ;;  %v9208_v20 = vor.u32 %v11149_v62, %v9207_v5  ;;  %v9431_v30 = vld [vmem:[#allocation2 + $0xf88] sm:$0xf]  ;;  %v9273_v8 = vld [vmem:[#allocation2 + $0xe68] sm:$0xf0] }
 0x1ba   :  { %v9432_v38 = vor.u32 %v11205_v32, %v9431_v30  ;;  %v11117_v5 = vld [vmem:[#allocation2 + $0xce4] sm:$0xf0]  ;;  %v9049_v32 = vld [vmem:[#allocation2 + $0xca8] sm:$0xf0]  ;;  %v9276_v63 = vor.u32 %v11161_v52, %v9273_v8  ;;  %v11126_v52 = vld [vmem:[#allocation2 + $0xd2c] sm:$0xf0] }
 0x1bb   :  { %3999 = vmatpush.bf16.msra.mxu0 %v9040_v39  ;;  %4025 = vmatpush.bf16.msra.mxu2 %v9044_v44  ;;  %v9180_v39 = vor.u32 %v11137_v33, %v9177_v34  ;;  %v9436_v44 = vor.u32 %v11201_v29, %v9433_v17  ;;  %v9335_v62 = vld [vmem:[#allocation2 + $0xec8] sm:$0xf]  ;;  %v9080_v58 = vor.u32 %v11117_v5, %v9079_v2  ;;  %v11169_v29 = vld [vmem:[#allocation2 + $0xe8c] sm:$0xf]  ;;  %v9375_v8 = vld [vmem:[#allocation2 + $0xf10] sm:$0xf] }
 0x1bc   :  { %v11173_v30 = vld [vmem:[#allocation2 + $0xea4] sm:$0xf0]  ;;  %v9305_v17 = vld [vmem:[#allocation2 + $0xea8] sm:$0xf0] }
 0x1bd   :  { %4012 = vmatpush.bf16.msra.mxu1 %v9296_v43  ;;  %4038 = vmatpush.bf16.msra.mxu3 %v9300_v49  ;;  %v9399_v43 = vld [vmem:[#allocation2 + $0xf48] sm:$0xf]  ;;  %v11193_v49 = vld [vmem:[#allocation2 + $0xf4c] sm:$0xf]  ;;  %v9308_v47 = vor.u32 %v11169_v29, %v9305_v17  ;;  %v9151_v29 = vld [vmem:[#allocation2 + $0xd50] sm:$0xf] }
 0x1be   :  { %v9400_v53 = vor.u32 %v11197_v45, %v9399_v43  ;;  %v9404_v46 = vor.u32 %v11193_v49, %v9401_v50  ;;  %v9015_v43 = vld [vmem:[#allocation2 + $0xc48] sm:$0xf]  ;;  %v11097_v50 = vld [vmem:[#allocation2 + $0xc4c] sm:$0xf]  ;;  %v11134_v17 = vld [vmem:[#allocation2 + $0xd6c] sm:$0xf0] }
 0x1bf   :  { %4000 = vmatpush.bf16.msra.mxu0 %v9008_v55  ;;  %4026 = vmatpush.bf16.msra.mxu2 %v9012_v59  ;;  %v11125_v55 = vld [vmem:[#allocation2 + $0xd24] sm:$0xf0]  ;;  %v11121_v59 = vld [vmem:[#allocation2 + $0xd0c] sm:$0xf] }
 0x1c0   :  { %v9112_v0 = vor.u32 %v11125_v55, %v9111_v54  ;;  %v9116_v48 = vor.u32 %v11121_v59, %v9113_v61  ;;  %v9271_v45 = vld [vmem:[#allocation2 + $0xe48] sm:$0xf]  ;;  %v11089_v59 = vld [vmem:[#allocation2 + $0xc0c] sm:$0xf] }
 0x1c1   :  { %4013 = vmatpush.bf16.msra.mxu1 %v9264_v57  ;;  %4039 = vmatpush.bf16.msra.mxu3 %v9268_v35  ;;  %v11189_v57 = vld [vmem:[#allocation2 + $0xf24] sm:$0xf0]  ;;  %v2320_v35 = vperm.slane %v12148_v56, 0  ;;  %v8985_v42 = vld [vmem:[#allocation2 + $0xc28] sm:$0xf0] }
 0x1c2   :  { %v9368_v4 = vor.u32 %v11189_v57, %v9367_v9  ;;  %v11165_v49 = vld [vmem:[#allocation2 + $0xe64] sm:$0xf0] }
 0x1c3   :  { %4001 = vmatpush.bf16.msra.mxu0 %v8976_v12  ;;  %4027 = vmatpush.bf16.msra.mxu2 %v8980_v16  ;;  %v2985_v7 = vpop.f32.mrf.mxu0  ;;  %v11177_v16 = vld [vmem:[#allocation2 + $0xecc] sm:$0xf]  ;;  %v11093_v54 = vld [vmem:[#allocation2 + $0xc24] sm:$0xf0]  ;;  %v9272_v55 = vor.u32 %v11165_v49, %v9271_v45  ;;  %v9409_v45 = vld [vmem:[#allocation2 + $0xf70] sm:$0xf0] }
 0x1c4   :  { %v2986_v10 = vadd.f32 %v2985_v7, %v2320_v35  ;;  %v9340_v28 = vor.u32 %v11177_v16, %v9337_v18  ;;  %v11157_v57 = vld [vmem:[#allocation2 + $0xe24] sm:$0xf0]  ;;  %v11153_v35 = vld [vmem:[#allocation2 + $0xe0c] sm:$0xf]  ;;  %v9215_v7 = vld [vmem:[#allocation2 + $0xdd0] sm:$0xf] }
 0x1c5   :  { %4014 = vmatpush.bf16.msra.mxu1 %v9232_v60  ;;  %4040 = vmatpush.bf16.msra.mxu3 %v9236_v19  ;;  %v2998_v12 = vpop.f32.mrf.mxu1  ;;  %v2321_v60 = vperm.slane %v12148_v56, 1  ;;  %v9336_v19 = vor.u32 %v11181_v6, %v9335_v62  ;;  %v11214_v62 = vld [vmem:[#allocation2 + $0xfec] sm:$0xf0]  ;;  %v11146_v6 = vld [vmem:[#allocation2 + $0xdd4] sm:$0xf] }
 0x1c6   :  { %4028 = vmatmul.bf16.vlgmr.msra.gmra.mxu2 %v12140_v3  ;;  %4002 = vmatmul.bf16.vlgmr.msra.gmra.mxu0 %v12140_v3  ;;  %v12152_v22 = vadd.f32 %v2998_v12, %v2986_v10  ;;  %v9217_v10 = vld [vmem:[#allocation2 + $0xdf0] sm:$0xf0] }
 0x1c7   :  { %4046 = vmatpush.bf16.msrb.mxu0 %v9208_v20  ;;  %4072 = vmatpush.bf16.msrb.mxu2 %v9212_v24  ;;  %v9084_v20 = vor.u32 %v11113_v14, %v9081_v1  ;;  %v9303_v24 = vld [vmem:[#allocation2 + $0xe88] sm:$0xf]  ;;  %v11210_v14 = vld [vmem:[#allocation2 + $0xfd4] sm:$0xf] }
 0x1c8   :  { %4041 = vmatmul.bf16.vlgmr.msra.gmra.mxu3 %v12142_v36  ;;  %4015 = vmatmul.bf16.vlgmr.msra.gmra.mxu1 %v12142_v36  ;;  %v9304_v40 = vor.u32 %v11173_v30, %v9303_v24  ;;  %v9473_v1 = vld [vmem:[#allocation2 + $0xff0] sm:$0xf0]  ;;  %v11206_v24 = vld [vmem:[#allocation2 + $0xfac] sm:$0xf0] }
 0x1c9   :  { %4059 = vmatpush.bf16.msrb.mxu1 %v9464_v23  ;;  %4085 = vmatpush.bf16.msrb.mxu3 %v9468_v11  ;;  %v11109_v23 = vld [vmem:[#allocation2 + $0xca4] sm:$0xf0]  ;;  %v3011_v25 = vpop.f32.mrf.mxu2  ;;  %v11105_v11 = vld [vmem:[#allocation2 + $0xc8c] sm:$0xf]  ;;  %v11202_v30 = vld [vmem:[#allocation2 + $0xf94] sm:$0xf] }
 0x1ca   :  { %v3012_v33 = vadd.f32 %v3011_v25, %v2321_v60  ;;  %v9052_v41 = vor.u32 %v11105_v11, %v9049_v32  ;;  %v11138_v25 = vld [vmem:[#allocation2 + $0xd94] sm:$0xf] }
 0x1cb   :  { %4047 = vmatpush.bf16.msrb.mxu0 %v9176_v37  ;;  %4073 = vmatpush.bf16.msrb.mxu2 %v9180_v39  ;;  %v3024_v34 = vpop.f32.mrf.mxu3  ;;  %v9048_v37 = vor.u32 %v11109_v23, %v9047_v21  ;;  %v2987_v39 = vpop.f32.mrf.mxu0  ;;  %v9439_v21 = vld [vmem:[#allocation2 + $0xf90] sm:$0xf]  ;;  %v9476_v23 = vor.u32 %v11210_v14, %v9473_v1  ;;  %v9441_v11 = vld [vmem:[#allocation2 + $0xfb0] sm:$0xf0] }
 0x1cc   :  { %v9444_v39 = vor.u32 %v11202_v30, %v9441_v11 }
 0x1cd   :  { %4060 = vmatpush.bf16.msrb.mxu1 %v9432_v38  ;;  %4086 = vmatpush.bf16.msrb.mxu3 %v9436_v44  ;;  %v12154_v38 = vadd.f32 %v3024_v34, %v3012_v33  ;;  %v11101_v44 = vld [vmem:[#allocation2 + $0xc64] sm:$0xf0]  ;;  %v3000_v31 = vpop.f32.mrf.mxu1  ;;  %v9440_v33 = vor.u32 %v11206_v24, %v9439_v21  ;;  %v11106_v21 = vld [vmem:[#allocation2 + $0xc94] sm:$0xf] }
 0x1ce   :  { %v9152_v31 = vor.u32 %v11134_v17, %v9151_v29 }
 0x1cf   :  { %4048 = vmatpush.bf16.msrb.mxu0 %v9144_v51  ;;  %4074 = vmatpush.bf16.msrb.mxu2 %v9148_v27  ;;  %v9017_v51 = vld [vmem:[#allocation2 + $0xc68] sm:$0xf0]  ;;  %v8983_v27 = vld [vmem:[#allocation2 + $0xc08] sm:$0xf] }
 0x1d0   :  { %v9020_v9 = vor.u32 %v11097_v50, %v9017_v51  ;;  %v8984_v5 = vor.u32 %v11093_v54, %v8983_v27  ;;  %v9119_v51 = vld [vmem:[#allocation2 + $0xd10] sm:$0xf]  ;;  %v11122_v54 = vld [vmem:[#allocation2 + $0xd14] sm:$0xf] }
 0x1d1   :  { %4061 = vmatpush.bf16.msrb.mxu1 %v9400_v53  ;;  %4087 = vmatpush.bf16.msrb.mxu3 %v9404_v46  ;;  %v9016_v53 = vor.u32 %v11101_v44, %v9015_v43  ;;  %v9239_v46 = vld [vmem:[#allocation2 + $0xe08] sm:$0xf]  ;;  %v3013_v61 = vpop.f32.mrf.mxu2  ;;  %v9153_v43 = vld [vmem:[#allocation2 + $0xd70] sm:$0xf0]  ;;  %v11190_v27 = vld [vmem:[#allocation2 + $0xf2c] sm:$0xf0] }
 0x1d2   :  { %v9240_v12 = vor.u32 %v11157_v57, %v9239_v46  ;;  %v11194_v44 = vld [vmem:[#allocation2 + $0xf54] sm:$0xf] }
 0x1d3   :  { %4049 = vmatpush.bf16.msrb.mxu0 %v9112_v0  ;;  %4075 = vmatpush.bf16.msrb.mxu2 %v9116_v48  ;;  %v9241_v0 = vld [vmem:[#allocation2 + $0xe28] sm:$0xf0]  ;;  %v3026_v2 = vpop.f32.mrf.mxu3  ;;  %v9471_v48 = vld [vmem:[#allocation2 + $0xfd0] sm:$0xf]  ;;  %v9377_v46 = vld [vmem:[#allocation2 + $0xf30] sm:$0xf0] }
 0x1d4   :  { %v9244_v60 = vor.u32 %v11153_v35, %v9241_v0  ;;  %v9472_v18 = vor.u32 %v11214_v62, %v9471_v48  ;;  %v9087_v0 = vld [vmem:[#allocation2 + $0xcd0] sm:$0xf]  ;;  %v9089_v62 = vld [vmem:[#allocation2 + $0xcf0] sm:$0xf0] }
 0x1d5   :  { %4062 = vmatpush.bf16.msrb.mxu1 %v9368_v4  ;;  %4088 = vmatpush.bf16.msrb.mxu3 %v9372_v13  ;;  %v11150_v4 = vld [vmem:[#allocation2 + $0xdec] sm:$0xf0]  ;;  %v8988_v13 = vor.u32 %v11089_v59, %v8985_v42  ;;  %v9120_v59 = vor.u32 %v11126_v52, %v9119_v51  ;;  %v9376_v42 = vor.u32 %v11190_v27, %v9375_v8 }
 0x1d6   :  { %v9216_v16 = vor.u32 %v11150_v4, %v9215_v7  ;;  %v11118_v2 = vld [vmem:[#allocation2 + $0xcec] sm:$0xf0] }
 0x1d7   :  { %4050 = vmatpush.bf16.msrb.mxu0 %v9080_v58  ;;  %4076 = vmatpush.bf16.msrb.mxu2 %v9084_v20  ;;  %v9220_v58 = vor.u32 %v11146_v6, %v9217_v10  ;;  %v11142_v20 = vld [vmem:[#allocation2 + $0xdac] sm:$0xf0]  ;;  %v11178_v10 = vld [vmem:[#allocation2 + $0xed4] sm:$0xf]  ;;  %v9088_v14 = vor.u32 %v11118_v2, %v9087_v0 }
 0x1d8   :  { %v9343_v7 = vld [vmem:[#allocation2 + $0xed0] sm:$0xf] }
 0x1d9   :  { %4063 = vmatpush.bf16.msrb.mxu1 %v9336_v19  ;;  %4089 = vmatpush.bf16.msrb.mxu3 %v9340_v28  ;;  %v9183_v19 = vld [vmem:[#allocation2 + $0xd90] sm:$0xf]  ;;  %v9185_v28 = vld [vmem:[#allocation2 + $0xdb0] sm:$0xf0] }
 0x1da   :  { %v9184_v32 = vor.u32 %v11142_v20, %v9183_v19  ;;  %v9188_v34 = vor.u32 %v11138_v25, %v9185_v28  ;;  %v11182_v48 = vld [vmem:[#allocation2 + $0xeec] sm:$0xf0]  ;;  %v11170_v25 = vld [vmem:[#allocation2 + $0xe94] sm:$0xf] }
 0x1db   :  { %4051 = vmatpush.bf16.msrb.mxu0 %v9048_v37  ;;  %4077 = vmatpush.bf16.msrb.mxu2 %v9052_v41  ;;  %v9407_v37 = vld [vmem:[#allocation2 + $0xf50] sm:$0xf]  ;;  %v11130_v41 = vld [vmem:[#allocation2 + $0xd54] sm:$0xf]  ;;  %v9344_v1 = vor.u32 %v11182_v48, %v9343_v7  ;;  %v11215_v7 = vld [vmem:[#allocation2 + $0xff4] sm:$0xf0] }
 0x1dc   :  { %v9156_v50 = vor.u32 %v11130_v41, %v9153_v43  ;;  %v11174_v20 = vld [vmem:[#allocation2 + $0xeac] sm:$0xf0]  ;;  %v9313_v28 = vld [vmem:[#allocation2 + $0xeb0] sm:$0xf0]  ;;  %v9225_v48 = vld [vmem:[#allocation2 + $0xdf8] sm:$0xf0] }
 0x1dd   :  { %4064 = vmatpush.bf16.msrb.mxu1 %v9304_v40  ;;  %4090 = vmatpush.bf16.msrb.mxu3 %v9308_v47  ;;  %v11198_v40 = vld [vmem:[#allocation2 + $0xf6c] sm:$0xf0]  ;;  %v2322_v47 = vperm.slane %v12148_v56, 2  ;;  %v9316_v43 = vor.u32 %v11170_v25, %v9313_v28  ;;  %v9449_v25 = vld [vmem:[#allocation2 + $0xfb8] sm:$0xf0] }
 0x1de   :  { %v9408_v49 = vor.u32 %v11198_v40, %v9407_v37  ;;  %v9023_v37 = vld [vmem:[#allocation2 + $0xc50] sm:$0xf] }
 0x1df   :  { %4052 = vmatpush.bf16.msrb.mxu0 %v9016_v53  ;;  %4078 = vmatpush.bf16.msrb.mxu2 %v9020_v9  ;;  %v9412_v53 = vor.u32 %v11194_v44, %v9409_v45  ;;  %v11186_v9 = vld [vmem:[#allocation2 + $0xf14] sm:$0xf]  ;;  %v9279_v40 = vld [vmem:[#allocation2 + $0xe50] sm:$0xf] }
 0x1e0   :  { %v9380_v4 = vor.u32 %v11186_v9, %v9377_v46  ;;  %v11166_v44 = vld [vmem:[#allocation2 + $0xe6c] sm:$0xf0]  ;;  %v11098_v45 = vld [vmem:[#allocation2 + $0xc54] sm:$0xf] }
 0x1e1   :  { %4065 = vmatpush.bf16.msrb.mxu1 %v9272_v55  ;;  %4091 = vmatpush.bf16.msrb.mxu3 %v9276_v63  ;;  %v9121_v55 = vld [vmem:[#allocation2 + $0xd30] sm:$0xf0]  ;;  %v8991_v51 = vld [vmem:[#allocation2 + $0xc10] sm:$0xf]  ;;  %v9280_v8 = vor.u32 %v11166_v44, %v9279_v40  ;;  %v11195_v40 = vld [vmem:[#allocation2 + $0xf5c] sm:$0xf] }
 0x1e2   :  { %v9124_v35 = vor.u32 %v11122_v54, %v9121_v55  ;;  %v11094_v52 = vld [vmem:[#allocation2 + $0xc2c] sm:$0xf0]  ;;  %v11090_v55 = vld [vmem:[#allocation2 + $0xc14] sm:$0xf] }
 0x1e3   :  { %4053 = vmatpush.bf16.msrb.mxu0 %v8984_v5  ;;  %4079 = vmatpush.bf16.msrb.mxu2 %v8988_v13  ;;  %v3037_v57 = vpop.f32.mrf.mxu0  ;;  %v11114_v5 = vld [vmem:[#allocation2 + $0xcd4] sm:$0xf]  ;;  %v2323_v13 = vperm.slane %v12148_v56, 3  ;;  %v9247_v27 = vld [vmem:[#allocation2 + $0xe10] sm:$0xf]  ;;  %v8992_v2 = vor.u32 %v11094_v52, %v8991_v51 }
 0x1e4   :  { %v3038_v61 = vadd.f32 %v3037_v57, %v2322_v47  ;;  %v11162_v47 = vld [vmem:[#allocation2 + $0xe54] sm:$0xf]  ;;  %v11158_v54 = vld [vmem:[#allocation2 + $0xe2c] sm:$0xf0]  ;;  %v9383_v51 = vld [vmem:[#allocation2 + $0xf18] sm:$0xf] }
 0x1e5   :  { %4066 = vmatpush.bf16.msrb.mxu1 %v9240_v12  ;;  %4092 = vmatpush.bf16.msrb.mxu3 %v9244_v60  ;;  %v3050_v63 = vpop.f32.mrf.mxu1  ;;  %v9345_v12 = vld [vmem:[#allocation2 + $0xef0] sm:$0xf0]  ;;  %v9092_v60 = vor.u32 %v11114_v5, %v9089_v62  ;;  %v9248_v5 = vor.u32 %v11158_v54, %v9247_v27  ;;  %v9129_v27 = vld [vmem:[#allocation2 + $0xd38] sm:$0xf0] }
 0x1e6   :  { %4054 = vmatmul.bf16.vlgmr.msrb.gmra.mxu0 %v12140_v3  ;;  %4080 = vmatmul.bf16.vlgmr.msrb.gmra.mxu2 %v12140_v3  ;;  %v12161_v6 = vadd.f32 %v3050_v63, %v3038_v61  ;;  %v9348_v19 = vor.u32 %v11178_v10, %v9345_v12  ;;  %v8993_v46 = vld [vmem:[#allocation2 + $0xc30] sm:$0xf0]  ;;  %v9223_v63 = vld [vmem:[#allocation2 + $0xdd8] sm:$0xf]  ;;  %v11211_v10 = vld [vmem:[#allocation2 + $0xfdc] sm:$0xf] }
 0x1e7   :  { %4098 = vmatpush.bf16.msra.mxu0 %v9216_v16  ;;  %4124 = vmatpush.bf16.msra.mxu2 %v9220_v58  ;;  %v9055_v16 = vld [vmem:[#allocation2 + $0xc90] sm:$0xf]  ;;  %v11154_v57 = vld [vmem:[#allocation2 + $0xe14] sm:$0xf]  ;;  %v8996_v62 = vor.u32 %v11090_v55, %v8993_v46  ;;  %v9481_v12 = vld [vmem:[#allocation2 + $0xff8] sm:$0xf0] }
 0x1e8   :  { %4067 = vmatmul.bf16.vlgmr.msrb.gmra.mxu1 %v12142_v36  ;;  %4093 = vmatmul.bf16.vlgmr.msrb.gmra.mxu3 %v12142_v36  ;;  %v9311_v58 = vld [vmem:[#allocation2 + $0xe90] sm:$0xf]  ;;  %v11187_v55 = vld [vmem:[#allocation2 + $0xf1c] sm:$0xf] }
 0x1e9   :  { %4111 = vmatpush.bf16.msra.mxu1 %v9472_v18  ;;  %4137 = vmatpush.bf16.msra.mxu3 %v9476_v23  ;;  %v11110_v18 = vld [vmem:[#allocation2 + $0xcac] sm:$0xf0]  ;;  %v9057_v23 = vld [vmem:[#allocation2 + $0xcb0] sm:$0xf0]  ;;  %v3063_v24 = vpop.f32.mrf.mxu2  ;;  %v9312_v29 = vor.u32 %v11174_v20, %v9311_v58  ;;  %v9447_v58 = vld [vmem:[#allocation2 + $0xf98] sm:$0xf] }
 0x1ea   :  { %v3064_v30 = vadd.f32 %v3063_v24, %v2323_v13  ;;  %v9060_v17 = vor.u32 %v11106_v21, %v9057_v23  ;;  %v11207_v20 = vld [vmem:[#allocation2 + $0xfb4] sm:$0xf0]  ;;  %v11139_v21 = vld [vmem:[#allocation2 + $0xd9c] sm:$0xf] }
 0x1eb   :  { %4099 = vmatpush.bf16.msra.mxu0 %v9184_v32  ;;  %4125 = vmatpush.bf16.msra.mxu2 %v9188_v34  ;;  %v3039_v11 = vpop.f32.mrf.mxu0  ;;  %v3076_v32 = vpop.f32.mrf.mxu3  ;;  %v9193_v23 = vld [vmem:[#allocation2 + $0xdb8] sm:$0xf0] }
 0x1ec   :  { %v12164_v41 = vadd.f32 %v3076_v32, %v3064_v30  ;;  %v11203_v24 = vld [vmem:[#allocation2 + $0xf9c] sm:$0xf]  ;;  %v9448_v30 = vor.u32 %v11207_v20, %v9447_v58  ;;  %v9196_v11 = vor.u32 %v11139_v21, %v9193_v23  ;;  %v9159_v32 = vld [vmem:[#allocation2 + $0xd58] sm:$0xf] }
 0x1ed   :  { %4112 = vmatpush.bf16.msra.mxu1 %v9440_v33  ;;  %4138 = vmatpush.bf16.msra.mxu3 %v9444_v39  ;;  %v9056_v33 = vor.u32 %v11110_v18, %v9055_v16  ;;  %v3052_v34 = vpop.f32.mrf.mxu1  ;;  %v11102_v39 = vld [vmem:[#allocation2 + $0xc6c] sm:$0xf0]  ;;  %v9191_v16 = vld [vmem:[#allocation2 + $0xd98] sm:$0xf] }
 0x1ee   :  { %v11143_v18 = vld [vmem:[#allocation2 + $0xdb4] sm:$0xf0] }
 0x1ef   :  { %4100 = vmatpush.bf16.msra.mxu0 %v9152_v31  ;;  %4126 = vmatpush.bf16.msra.mxu2 %v9156_v50  ;;  %v9025_v31 = vld [vmem:[#allocation2 + $0xc70] sm:$0xf0]  ;;  %v9024_v50 = vor.u32 %v11102_v39, %v9023_v37  ;;  %v9192_v28 = vor.u32 %v11143_v18, %v9191_v16  ;;  %v9415_v34 = vld [vmem:[#allocation2 + $0xf58] sm:$0xf]  ;;  %v11131_v37 = vld [vmem:[#allocation2 + $0xd5c] sm:$0xf] }
 0x1f0   :  { %v9161_v39 = vld [vmem:[#allocation2 + $0xd78] sm:$0xf0]  ;;  %v9063_v18 = vld [vmem:[#allocation2 + $0xc98] sm:$0xf] }
 0x1f1   :  { %4113 = vmatpush.bf16.msra.mxu1 %v9408_v49  ;;  %4139 = vmatpush.bf16.msra.mxu3 %v9412_v53  ;;  %v9281_v49 = vld [vmem:[#allocation2 + $0xe70] sm:$0xf0]  ;;  %v9028_v53 = vor.u32 %v11098_v45, %v9025_v31  ;;  %v3065_v61 = vpop.f32.mrf.mxu2  ;;  %v2324_v45 = vperm.slane %v12148_v56, 4  ;;  %v11111_v58 = vld [vmem:[#allocation2 + $0xcb4] sm:$0xf0] }
 0x1f2   :  { %v9284_v9 = vor.u32 %v11162_v47, %v9281_v49  ;;  %v9164_v47 = vor.u32 %v11131_v37, %v9161_v39  ;;  %v9127_v49 = vld [vmem:[#allocation2 + $0xd18] sm:$0xf] }
 0x1f3   :  { %4101 = vmatpush.bf16.msra.mxu0 %v9120_v59  ;;  %4127 = vmatpush.bf16.msra.mxu2 %v9124_v35  ;;  %v9249_v59 = vld [vmem:[#allocation2 + $0xe30] sm:$0xf0]  ;;  %v9479_v35 = vld [vmem:[#allocation2 + $0xfd8] sm:$0xf]  ;;  %v3078_v0 = vpop.f32.mrf.mxu3 }
 0x1f4   :  { %v9252_v13 = vor.u32 %v11154_v57, %v9249_v59  ;;  %v9351_v0 = vld [vmem:[#allocation2 + $0xed8] sm:$0xf] }
 0x1f5   :  { %4114 = vmatpush.bf16.msra.mxu1 %v9376_v42  ;;  %4140 = vmatpush.bf16.msra.mxu3 %v9380_v4  ;;  %v11151_v42 = vld [vmem:[#allocation2 + $0xdf4] sm:$0xf0]  ;;  %v11147_v4 = vld [vmem:[#allocation2 + $0xddc] sm:$0xf] }
 0x1f7   :  { %4102 = vmatpush.bf16.msra.mxu0 %v9088_v14  ;;  %4128 = vmatpush.bf16.msra.mxu2 %v9092_v60  ;;  %v9224_v14 = vor.u32 %v11151_v42, %v9223_v63  ;;  %v9228_v60 = vor.u32 %v11147_v4, %v9225_v48  ;;  %v9095_v42 = vld [vmem:[#allocation2 + $0xcd8] sm:$0xf]  ;;  %v11115_v48 = vld [vmem:[#allocation2 + $0xcdc] sm:$0xf] }
 0x1f8   :  { %v11183_v4 = vld [vmem:[#allocation2 + $0xef4] sm:$0xf0] }
 0x1f9   :  { %4115 = vmatpush.bf16.msra.mxu1 %v9344_v1  ;;  %4141 = vmatpush.bf16.msra.mxu3 %v9348_v19  ;;  %v9480_v1 = vor.u32 %v11215_v7, %v9479_v35  ;;  %v9484_v19 = vor.u32 %v11211_v10, %v9481_v12  ;;  %v11119_v35 = vld [vmem:[#allocation2 + $0xcf4] sm:$0xf0]  ;;  %v9353_v10 = vld [vmem:[#allocation2 + $0xef8] sm:$0xf0]  ;;  %v2325_v12 = vperm.slane %v12148_v56, 5 }
 0x1fb   :  { %4103 = vmatpush.bf16.msra.mxu0 %v9056_v33  ;;  %4129 = vmatpush.bf16.msra.mxu2 %v9060_v17  ;;  %v11135_v33 = vld [vmem:[#allocation2 + $0xd74] sm:$0xf0] }
 0x1fc   :  { %v11199_v17 = vld [vmem:[#allocation2 + $0xf74] sm:$0xf0]  ;;  %v9160_v44 = vor.u32 %v11135_v33, %v9159_v32  ;;  %v9321_v32 = vld [vmem:[#allocation2 + $0xeb8] sm:$0xf0] }
 0x1fd   :  { %4116 = vmatpush.bf16.msra.mxu1 %v9312_v29  ;;  %4142 = vmatpush.bf16.msra.mxu3 %v9316_v43  ;;  %v9452_v29 = vor.u32 %v11203_v24, %v9449_v25  ;;  %v9417_v43 = vld [vmem:[#allocation2 + $0xf78] sm:$0xf0]  ;;  %v9416_v31 = vor.u32 %v11199_v17, %v9415_v34  ;;  %v11175_v24 = vld [vmem:[#allocation2 + $0xeb4] sm:$0xf0]  ;;  %v9064_v34 = vor.u32 %v11111_v58, %v9063_v18 }
 0x1fe   :  { %v9420_v52 = vor.u32 %v11195_v40, %v9417_v43  ;;  %v11107_v25 = vld [vmem:[#allocation2 + $0xc9c] sm:$0xf]  ;;  %v9031_v40 = vld [vmem:[#allocation2 + $0xc58] sm:$0xf] }
 0x1ff   :  { %4104 = vmatpush.bf16.msra.mxu0 %v9024_v50  ;;  %4130 = vmatpush.bf16.msra.mxu2 %v9028_v53  ;;  %v11127_v50 = vld [vmem:[#allocation2 + $0xd34] sm:$0xf0]  ;;  %v11123_v53 = vld [vmem:[#allocation2 + $0xd1c] sm:$0xf] }
 0x200   :  { %v9128_v57 = vor.u32 %v11127_v50, %v9127_v49  ;;  %v9132_v63 = vor.u32 %v11123_v53, %v9129_v27  ;;  %v11103_v43 = vld [vmem:[#allocation2 + $0xc74] sm:$0xf0]  ;;  %v9033_v49 = vld [vmem:[#allocation2 + $0xc78] sm:$0xf0]  ;;  %v3185_v50 = vmax.f32 %v12154_v38, 0.0 }
 0x201   :  { %4117 = vmatpush.bf16.msra.mxu1 %v9280_v8  ;;  %4143 = vmatpush.bf16.msra.mxu3 %v9284_v9  ;;  %v11191_v8 = vld [vmem:[#allocation2 + $0xf34] sm:$0xf0]  ;;  %v9385_v9 = vld [vmem:[#allocation2 + $0xf38] sm:$0xf0]  ;;  %v9032_v53 = vor.u32 %v11103_v43, %v9031_v40  ;;  %v11324_v43 = vld [vmem:[#allocation2 + $0x135c] sm:$0xf0] }
 0x202   :  { %v9384_v61 = vor.u32 %v11191_v8, %v9383_v51  ;;  %v9289_v8 = vld [vmem:[#allocation2 + $0xe78] sm:$0xf0]  ;;  %v8999_v27 = vld [vmem:[#allocation2 + $0xc18] sm:$0xf] }
 0x203   :  { %4105 = vmatpush.bf16.msra.mxu0 %v8992_v2  ;;  %4131 = vmatpush.bf16.msra.mxu2 %v8996_v62  ;;  %v3089_v54 = vpop.f32.mrf.mxu0  ;;  %v9388_v2 = vor.u32 %v11187_v55, %v9385_v9  ;;  %v11179_v62 = vld [vmem:[#allocation2 + $0xedc] sm:$0xf] }
 0x204   :  { %v3090_v46 = vadd.f32 %v3089_v54, %v2324_v45  ;;  %v9356_v21 = vor.u32 %v11179_v62, %v9353_v10  ;;  %v11095_v54 = vld [vmem:[#allocation2 + $0xc34] sm:$0xf0]  ;;  %v11155_v38 = vld [vmem:[#allocation2 + $0xe1c] sm:$0xf]  ;;  %v11340_v62 = vld [vmem:[#allocation2 + $0x13dc] sm:$0xf0] }
 0x205   :  { %4118 = vmatpush.bf16.msra.mxu1 %v9248_v5  ;;  %4144 = vmatpush.bf16.msra.mxu3 %v9252_v13  ;;  %v3102_v59 = vpop.f32.mrf.mxu1  ;;  %v9097_v5 = vld [vmem:[#allocation2 + $0xcf8] sm:$0xf0]  ;;  %v3184_v13 = vmax.f32 %v12152_v22, 0.0  ;;  %v11272_v10 = vld [vmem:[#allocation2 + $0x11c4] sm:$0xf] }
 0x206   :  { %4106 = vmatmul.bf16.vlgmr.msra.gmra.mxu0 %v12140_v3  ;;  %4132 = vmatmul.bf16.vlgmr.msra.gmra.mxu2 %v12140_v3  ;;  %v3103_v7 = vadd.f32 %v3102_v59, %v3090_v46  ;;  %v9100_v16 = vor.u32 %v11115_v48, %v9097_v5  ;;  %v11159_v59 = vld [vmem:[#allocation2 + $0xe34] sm:$0xf0]  ;;  %v9000_v5 = vor.u32 %v11095_v54, %v8999_v27  ;;  %v9871_v27 = vld [vmem:[#allocation2 + $0x1300] sm:$0xf] }
 0x207   :  { %4150 = vmatpush.bf16.msrb.mxu0 %v9224_v14  ;;  %4176 = vmatpush.bf16.msrb.mxu2 %v9228_v60  ;;  %v9352_v60 = vor.u32 %v11183_v4, %v9351_v0  ;;  %v9967_v4 = vld [vmem:[#allocation2 + $0x13c0] sm:$0xf] }
 0x208   :  { %4119 = vmatmul.bf16.vlgmr.msra.gmra.mxu1 %v12142_v36  ;;  %4145 = vmatmul.bf16.vlgmr.msra.gmra.mxu3 %v12142_v36  ;;  %v3188_v14 = vmax.f32 %v3103_v7, 0.0  ;;  %v11276_v7 = vld [vmem:[#allocation2 + $0x11dc] sm:$0xf0]  ;;  %v9968_v58 = vor.u32 %v11340_v62, %v9967_v4  ;;  %v11240_v62 = vld [vmem:[#allocation2 + $0x10c4] sm:$0xf] }
 0x209   :  { %4163 = vmatpush.bf16.msrb.mxu1 %v9480_v1  ;;  %4189 = vmatpush.bf16.msrb.mxu3 %v9484_v19  ;;  %v9096_v1 = vor.u32 %v11119_v35, %v9095_v42  ;;  %v9319_v19 = vld [vmem:[#allocation2 + $0xe98] sm:$0xf]  ;;  %v3115_v23 = vpop.f32.mrf.mxu2  ;;  %v9001_v42 = vld [vmem:[#allocation2 + $0xc38] sm:$0xf0] }
 0x20a   :  { %v12173_v20 = vadd.f32 %v3188_v14, %v3184_v13  ;;  %v9320_v37 = vor.u32 %v11175_v24, %v9319_v19  ;;  %v9257_v35 = vld [vmem:[#allocation2 + $0xe38] sm:$0xf0]  ;;  %v9935_v24 = vld [vmem:[#allocation2 + $0x1380] sm:$0xf] }
 0x20b   :  { %4151 = vmatpush.bf16.msrb.mxu0 %v9192_v28  ;;  %4177 = vmatpush.bf16.msrb.mxu2 %v9196_v11  ;;  %v9065_v28 = vld [vmem:[#allocation2 + $0xcb8] sm:$0xf0]  ;;  %v3128_v22 = vpop.f32.mrf.mxu3  ;;  %v3091_v33 = vpop.f32.mrf.mxu0 }
 0x20c   :  { %v11171_v11 = vld [vmem:[#allocation2 + $0xe9c] sm:$0xf]  ;;  %v9068_v39 = vor.u32 %v11107_v25, %v9065_v28  ;;  %v11332_v28 = vld [vmem:[#allocation2 + $0x139c] sm:$0xf0] }
 0x20d   :  { %4164 = vmatpush.bf16.msrb.mxu1 %v9448_v30  ;;  %4190 = vmatpush.bf16.msrb.mxu3 %v9452_v29  ;;  %v3116_v30 = vadd.f32 %v3115_v23, %v2325_v12  ;;  %v3104_v29 = vpop.f32.mrf.mxu1  ;;  %v9324_v45 = vor.u32 %v11171_v11, %v9321_v32  ;;  %v9713_v12 = vld [vmem:[#allocation2 + $0x11e0] sm:$0xf0]  ;;  %v11268_v23 = vld [vmem:[#allocation2 + $0x119c] sm:$0xf0] }
 0x20e   :  { %v9716_v19 = vor.u32 %v11272_v10, %v9713_v12  ;;  %v11328_v11 = vld [vmem:[#allocation2 + $0x1384] sm:$0xf] }
 0x20f   :  { %4152 = vmatpush.bf16.msrb.mxu0 %v9160_v44  ;;  %4178 = vmatpush.bf16.msrb.mxu2 %v9164_v47  ;;  %v3129_v17 = vadd.f32 %v3128_v22, %v3116_v30  ;;  %v9287_v44 = vld [vmem:[#allocation2 + $0xe58] sm:$0xf]  ;;  %v11099_v47 = vld [vmem:[#allocation2 + $0xc5c] sm:$0xf]  ;;  %v11264_v30 = vld [vmem:[#allocation2 + $0x1184] sm:$0xf] }
 0x210   :  { %v9036_v46 = vor.u32 %v11099_v47, %v9033_v49  ;;  %v9681_v22 = vld [vmem:[#allocation2 + $0x11a0] sm:$0xf0] }
 0x211   :  { %4165 = vmatpush.bf16.msrb.mxu1 %v9416_v31  ;;  %4191 = vmatpush.bf16.msrb.mxu3 %v9420_v52  ;;  %v11167_v31 = vld [vmem:[#allocation2 + $0xe74] sm:$0xf0]  ;;  %v3189_v51 = vmax.f32 %v3129_v17, 0.0  ;;  %v11163_v52 = vld [vmem:[#allocation2 + $0xe5c] sm:$0xf]  ;;  %v3117_v0 = vpop.f32.mrf.mxu2  ;;  %v9684_v29 = vor.u32 %v11264_v30, %v9681_v22 }
 0x212   :  { %v9288_v9 = vor.u32 %v11167_v31, %v9287_v44  ;;  %v9937_v32 = vld [vmem:[#allocation2 + $0x13a0] sm:$0xf0]  ;;  %v9647_v17 = vld [vmem:[#allocation2 + $0x1140] sm:$0xf] }
 0x213   :  { %4153 = vmatpush.bf16.msrb.mxu0 %v9128_v57  ;;  %4179 = vmatpush.bf16.msrb.mxu2 %v9132_v63  ;;  %v12176_v55 = vadd.f32 %v3189_v51, %v3185_v50  ;;  %v9255_v57 = vld [vmem:[#allocation2 + $0xe18] sm:$0xf]  ;;  %v9292_v63 = vor.u32 %v11163_v52, %v9289_v8  ;;  %v3130_v48 = vpop.f32.mrf.mxu3  ;;  %v9940_v40 = vor.u32 %v11328_v11, %v9937_v32  ;;  %v11256_v44 = vld [vmem:[#allocation2 + $0x1144] sm:$0xf]  ;;  %v2326_v50 = vperm.slane %v12148_v56, 6 }
 0x214   :  { %v9256_v13 = vor.u32 %v11159_v59, %v9255_v57  ;;  %v11320_v31 = vld [vmem:[#allocation2 + $0x1344] sm:$0xf]  ;;  %v9615_v8 = vld [vmem:[#allocation2 + $0x1100] sm:$0xf] }
 0x215   :  { %4166 = vmatpush.bf16.msrb.mxu1 %v9384_v61  ;;  %4192 = vmatpush.bf16.msrb.mxu3 %v9388_v2  ;;  %v11091_v61 = vld [vmem:[#allocation2 + $0xc1c] sm:$0xf]  ;;  %v9711_v2 = vld [vmem:[#allocation2 + $0x11c0] sm:$0xf]  ;;  %v9905_v47 = vld [vmem:[#allocation2 + $0x1360] sm:$0xf0] }
 0x216   :  { %v9004_v14 = vor.u32 %v11091_v61, %v9001_v42  ;;  %v9712_v18 = vor.u32 %v11276_v7, %v9711_v2  ;;  %v9908_v54 = vor.u32 %v11320_v31, %v9905_v47  ;;  %v11312_v59 = vld [vmem:[#allocation2 + $0x1304] sm:$0xf]  ;;  %v9583_v0 = vld [vmem:[#allocation2 + $0x10c0] sm:$0xf] }
 0x217   :  { %4154 = vmatpush.bf16.msrb.mxu0 %v9096_v1  ;;  %4180 = vmatpush.bf16.msrb.mxu2 %v9100_v16  ;;  %v11336_v1 = vld [vmem:[#allocation2 + $0x13c4] sm:$0xf]  ;;  %v9260_v16 = vor.u32 %v11155_v38, %v9257_v35  ;;  %v11244_v2 = vld [vmem:[#allocation2 + $0x10dc] sm:$0xf0] }
 0x218   :  { %v9873_v61 = vld [vmem:[#allocation2 + $0x1320] sm:$0xf0]  ;;  %v9839_v7 = vld [vmem:[#allocation2 + $0x12c0] sm:$0xf] }
 0x219   :  { %4167 = vmatpush.bf16.msrb.mxu1 %v9352_v60  ;;  %4193 = vmatpush.bf16.msrb.mxu3 %v9356_v21  ;;  %v9969_v60 = vld [vmem:[#allocation2 + $0x13e0] sm:$0xf0]  ;;  %v9679_v21 = vld [vmem:[#allocation2 + $0x1180] sm:$0xf]  ;;  %v9876_v4 = vor.u32 %v11312_v59, %v9873_v61 }
 0x21a   :  { %v9972_v25 = vor.u32 %v11336_v1, %v9969_v60  ;;  %v9680_v33 = vor.u32 %v11268_v23, %v9679_v21  ;;  %v9585_v10 = vld [vmem:[#allocation2 + $0x10e0] sm:$0xf0]  ;;  %v3186_v1 = vmax.f32 %v12161_v6, 0.0  ;;  %v11236_v21 = vld [vmem:[#allocation2 + $0x109c] sm:$0xf0] }
 0x21b   :  { %4155 = vmatpush.bf16.msrb.mxu0 %v9064_v34  ;;  %4181 = vmatpush.bf16.msrb.mxu2 %v9068_v39  ;;  %v9936_v34 = vor.u32 %v11332_v28, %v9935_v24  ;;  %v9903_v39 = vld [vmem:[#allocation2 + $0x1340] sm:$0xf]  ;;  %v11304_v12 = vld [vmem:[#allocation2 + $0x12c4] sm:$0xf] }
 0x21c   :  { %v9904_v51 = vor.u32 %v11324_v43, %v9903_v39  ;;  %v9807_v23 = vld [vmem:[#allocation2 + $0x1280] sm:$0xf]  ;;  %v11232_v22 = vld [vmem:[#allocation2 + $0x1084] sm:$0xf] }
 0x21d   :  { %4168 = vmatpush.bf16.msrb.mxu1 %v9320_v37  ;;  %4194 = vmatpush.bf16.msrb.mxu3 %v9324_v45  ;;  %v11260_v37 = vld [vmem:[#allocation2 + $0x115c] sm:$0xf0]  ;;  %v9649_v45 = vld [vmem:[#allocation2 + $0x1160] sm:$0xf0] }
 0x21e   :  { %v9648_v49 = vor.u32 %v11260_v37, %v9647_v17  ;;  %v9652_v52 = vor.u32 %v11256_v44, %v9649_v45  ;;  %v11300_v30 = vld [vmem:[#allocation2 + $0x129c] sm:$0xf0]  ;;  %v9553_v11 = vld [vmem:[#allocation2 + $0x10a0] sm:$0xf0] }
 0x21f   :  { %4156 = vmatpush.bf16.msrb.mxu0 %v9032_v53  ;;  %4182 = vmatpush.bf16.msrb.mxu2 %v9036_v46  ;;  %v11252_v53 = vld [vmem:[#allocation2 + $0x111c] sm:$0xf0]  ;;  %v9617_v46 = vld [vmem:[#allocation2 + $0x1120] sm:$0xf0]  ;;  %v9556_v43 = vor.u32 %v11232_v22, %v9553_v11  ;;  %v11333_v22 = vld [vmem:[#allocation2 + $0x13a4] sm:$0xf0] }
 0x220   :  { %v11296_v6 = vld [vmem:[#allocation2 + $0x1284] sm:$0xf]  ;;  %v9519_v44 = vld [vmem:[#allocation2 + $0x1040] sm:$0xf]  ;;  %v11265_v11 = vld [vmem:[#allocation2 + $0x118c] sm:$0xf] }
 0x221   :  { %4169 = vmatpush.bf16.msrb.mxu1 %v9288_v9  ;;  %4195 = vmatpush.bf16.msrb.mxu3 %v9292_v63  ;;  %v11248_v9 = vld [vmem:[#allocation2 + $0x1104] sm:$0xf]  ;;  %v9616_v63 = vor.u32 %v11252_v53, %v9615_v8  ;;  %v11228_v45 = vld [vmem:[#allocation2 + $0x105c] sm:$0xf0] }
 0x222   :  { %v9620_v35 = vor.u32 %v11248_v9, %v9617_v46  ;;  %v9775_v31 = vld [vmem:[#allocation2 + $0x1240] sm:$0xf]  ;;  %v9777_v53 = vld [vmem:[#allocation2 + $0x1260] sm:$0xf0] }
 0x223   :  { %4157 = vmatpush.bf16.msrb.mxu0 %v9000_v5  ;;  %4183 = vmatpush.bf16.msrb.mxu2 %v9004_v14  ;;  %v3141_v57 = vpop.f32.mrf.mxu0  ;;  %v11308_v5 = vld [vmem:[#allocation2 + $0x12dc] sm:$0xf0]  ;;  %v2327_v14 = vperm.slane %v12148_v56, 7 }
 0x224   :  { %v9743_v59 = vld [vmem:[#allocation2 + $0x1200] sm:$0xf] }
 0x225   :  { %4170 = vmatpush.bf16.msrb.mxu1 %v9256_v13  ;;  %4196 = vmatpush.bf16.msrb.mxu3 %v9260_v16  ;;  %v3154_v42 = vpop.f32.mrf.mxu1  ;;  %v9841_v13 = vld [vmem:[#allocation2 + $0x12e0] sm:$0xf0]  ;;  %v9584_v16 = vor.u32 %v11244_v2, %v9583_v0  ;;  %v11284_v61 = vld [vmem:[#allocation2 + $0x121c] sm:$0xf0]  ;;  %v9719_v2 = vld [vmem:[#allocation2 + $0x11c8] sm:$0xf] }
 0x226   :  { %4158 = vmatmul.bf16.vlgmr.msrb.gmra.mxu0 %v12140_v3  ;;  %4184 = vmatmul.bf16.vlgmr.msrb.gmra.mxu2 %v12140_v3  ;;  %v11316_v3 = vld [vmem:[#allocation2 + $0x131c] sm:$0xf0] }
 0x227   :  { %5012 = vmatpush.bf16.msra.mxu0 %v9712_v18  ;;  %5038 = vmatpush.bf16.msra.mxu2 %v9716_v19  ;;  %v9872_v38 = vor.u32 %v11316_v3, %v9871_v27  ;;  %v9840_v18 = vor.u32 %v11308_v5, %v9839_v7  ;;  %v9551_v19 = vld [vmem:[#allocation2 + $0x1080] sm:$0xf]  ;;  %v9520_v27 = vor.u32 %v11228_v45, %v9519_v44  ;;  %v11277_v7 = vld [vmem:[#allocation2 + $0x11e4] sm:$0xf0] }
 0x228   :  { %4171 = vmatmul.bf16.vlgmr.msrb.gmra.mxu1 %v12142_v36  ;;  %4197 = vmatmul.bf16.vlgmr.msrb.gmra.mxu3 %v12142_v36  ;;  %v3142_v36 = vadd.f32 %v3141_v57, %v2326_v50  ;;  %v9552_v17 = vor.u32 %v11236_v21, %v9551_v19  ;;  %v11224_v50 = vld [vmem:[#allocation2 + $0x1044] sm:$0xf]  ;;  %v11220_v3 = vld [vmem:[#allocation2 + $0x101c] sm:$0xf0]  ;;  %v4219_v19 = vld [vmem:[%s12601_s0 + $0x48] sm:$0xff] }
 0x229   :  { %5025 = vmatpush.bf16.msra.mxu1 %v9968_v58  ;;  %5051 = vmatpush.bf16.msra.mxu3 %v9972_v25  ;;  %v9588_v58 = vor.u32 %v11240_v62, %v9585_v10  ;;  %v9844_v25 = vor.u32 %v11304_v12, %v9841_v13  ;;  %v3167_v28 = vpop.f32.mrf.mxu2  ;;  %v11341_v62 = vld [vmem:[#allocation2 + $0x13e4] sm:$0xf0]  ;;  %v11273_v10 = vld [vmem:[#allocation2 + $0x11cc] sm:$0xf] }
 0x22a   :  { %v3155_v48 = vadd.f32 %v3154_v42, %v3142_v36  ;;  %v3168_v56 = vadd.f32 %v3167_v28, %v2327_v14  ;;  %v11216_v36 = vld [vmem:[#allocation2 + $0x1004] sm:$0xf]  ;;  %v9721_v12 = vld [vmem:[#allocation2 + $0x11e8] sm:$0xf0]  ;;  %v9744_v14 = vor.u32 %v11284_v61, %v9743_v59  ;;  %v9943_v28 = vld [vmem:[#allocation2 + $0x1388] sm:$0xf] }
 0x22b   :  { %5013 = vmatpush.bf16.msra.mxu0 %v9680_v33  ;;  %5039 = vmatpush.bf16.msra.mxu2 %v9684_v29  ;;  %v3180_v32 = vpop.f32.mrf.mxu3  ;;  %v9809_v33 = vld [vmem:[#allocation2 + $0x12a0] sm:$0xf0]  ;;  %v11325_v45 = vld [vmem:[#allocation2 + $0x1364] sm:$0xf0]  ;;  %v11249_v59 = vld [vmem:[#allocation2 + $0x110c] sm:$0xf] }
 0x22c   :  { %v3190_v60 = vmax.f32 %v3155_v48, 0.0  ;;  %v3181_v39 = vadd.f32 %v3180_v32, %v3168_v56  ;;  %v9812_v47 = vor.u32 %v11296_v6, %v9809_v33  ;;  %v9489_v42 = vld [vmem:[#allocation2 + $0x1020] sm:$0xf0]  ;;  %v9689_v56 = vld [vmem:[#allocation2 + $0x11a8] sm:$0xf0] }
 0x22d   :  { %5026 = vmatpush.bf16.msra.mxu1 %v9936_v34  ;;  %5052 = vmatpush.bf16.msra.mxu3 %v9940_v40  ;;  %v3143_v34 = vpop.f32.mrf.mxu0  ;;  %v3156_v37 = vpop.f32.mrf.mxu1  ;;  %v9808_v40 = vor.u32 %v11300_v30, %v9807_v23  ;;  %v9724_v23 = vor.u32 %v11273_v10, %v9721_v12  ;;  %v11329_v6 = vld [vmem:[#allocation2 + $0x138c] sm:$0xf] }
 0x22e   :  { %v3194_v24 = vadd.f32 %v3190_v60, %v3186_v1  ;;  %v3191_v8 = vmax.f32 %v3181_v39, 0.0  ;;  %v9492_v1 = vor.u32 %v11216_v36, %v9489_v42  ;;  %v11337_v60 = vld [vmem:[#allocation2 + $0x13cc] sm:$0xf]  ;;  %v12198_v34 = vpack.c.bf16 %v4219_v19, %v4219_v19  ;;  %v9655_v39 = vld [vmem:[#allocation2 + $0x1148] sm:$0xf] }
 0x22f   :  { %5014 = vmatpush.bf16.msra.mxu0 %v9648_v49  ;;  %5040 = vmatpush.bf16.msra.mxu2 %v9652_v52  ;;  %v11292_v49 = vld [vmem:[#allocation2 + $0x125c] sm:$0xf0]  ;;  %v3187_v52 = vmax.f32 %v12164_v41, 0.0  ;;  %v9745_v41 = vld [vmem:[#allocation2 + $0x1220] sm:$0xf0]  ;;  %v9692_v37 = vor.u32 %v11265_v11, %v9689_v56 }
 0x230   :  { %v3196_v29 = vadd.f32 %v3194_v24, %v12173_v20  ;;  %v11288_v20 = vld [vmem:[#allocation2 + $0x1244] sm:$0xf]  ;;  %v9776_v46 = vor.u32 %v11292_v49, %v9775_v31  ;;  %v9687_v24 = vld [vmem:[#allocation2 + $0x1188] sm:$0xf]  ;;  %v9945_v33 = vld [vmem:[#allocation2 + $0x13a8] sm:$0xf0] }
 0x231   :  { %5027 = vmatpush.bf16.msra.mxu1 %v9904_v51  ;;  %5053 = vmatpush.bf16.msra.mxu3 %v9908_v54  ;;  %v9521_v51 = vld [vmem:[#allocation2 + $0x1060] sm:$0xf0]  ;;  %v9487_v54 = vld [vmem:[#allocation2 + $0x1000] sm:$0xf]  ;;  %v3195_v9 = vadd.f32 %v3191_v8, %v3187_v52  ;;  %v9948_v44 = vor.u32 %v11329_v6, %v9945_v33  ;;  %v11257_v31 = vld [vmem:[#allocation2 + $0x114c] sm:$0xf] }
 0x232   :  { %v9524_v57 = vor.u32 %v11224_v50, %v9521_v51  ;;  %v9488_v5 = vor.u32 %v11220_v3, %v9487_v54  ;;  %v11321_v49 = vld [vmem:[#allocation2 + $0x134c] sm:$0xf]  ;;  %v3334_v52 = vld [vmem:[#allocation4 + $0x3] ss:$8 sm:$0xf] }
 0x233   :  { %5015 = vmatpush.bf16.msra.mxu0 %v9616_v63  ;;  %5041 = vmatpush.bf16.msra.mxu2 %v9620_v35  ;;  %v9780_v63 = vor.u32 %v11288_v20, %v9777_v53  ;;  %v3169_v35 = vpop.f32.mrf.mxu2  ;;  %v3197_v0 = vadd.f32 %v3195_v9, %v12176_v55  ;;  %v3182_v48 = vpop.f32.mrf.mxu3  ;;  %v4218_v55 = vld [vmem:[%s12601_s0 + $0x40] sm:$0xff]  ;;  %v9913_v50 = vld [vmem:[#allocation2 + $0x1368] sm:$0xf0]  ;;  %v11253_v54 = vld [vmem:[#allocation2 + $0x1124] sm:$0xf0] }
 0x234   :  { %v12196_v32 = vpack.c.bf16 %v4218_v55, %v4218_v55  ;;  %v3335_v8 = vld [vmem:[#allocation4 + $0x3] ss:$8 sm:$0xf0]  ;;  %v9625_v61 = vld [vmem:[#allocation2 + $0x1128] sm:$0xf0] }
 0x235   :  { %5028 = vmatpush.bf16.msra.mxu1 %v9872_v38  ;;  %5054 = vmatpush.bf16.msra.mxu3 %v9876_v4  ;;  %v11280_v38 = vld [vmem:[#allocation2 + $0x1204] sm:$0xf]  ;;  %v9975_v4 = vld [vmem:[#allocation2 + $0x13c8] sm:$0xf]  ;;  %v12188_v13 = vadd.f32 %v3197_v0, %v3196_v29  ;;  %v12204_v9 = vor.u32 %v3335_v8, %v3334_v52  ;;  %v11313_v36 = vld [vmem:[#allocation2 + $0x130c] sm:$0xf] }
 0x236   :  { %v9976_v21 = vor.u32 %v11341_v62, %v9975_v4  ;;  %v9879_v3 = vld [vmem:[#allocation2 + $0x1308] sm:$0xf]  ;;  %v11241_v12 = vld [vmem:[#allocation2 + $0x10cc] sm:$0xf] }
 0x237   :  { %5016 = vmatpush.bf16.msra.mxu0 %v9584_v16  ;;  %5042 = vmatpush.bf16.msra.mxu2 %v9588_v58  ;;  %v9977_v16 = vld [vmem:[#allocation2 + $0x13e8] sm:$0xf0]  ;;  %v9720_v58 = vor.u32 %v11277_v7, %v9719_v2  ;;  %v3338_v42 = vperm.slane %v12204_v9, 0  ;;  %v9628_v2 = vor.u32 %v11249_v59, %v9625_v61  ;;  %v11245_v7 = vld [vmem:[#allocation2 + $0x10e4] sm:$0xf0] }
 0x238   :  { %v9980_v30 = vor.u32 %v11337_v60, %v9977_v16  ;;  %v9847_v4 = vld [vmem:[#allocation2 + $0x12c8] sm:$0xf]  ;;  %v11305_v60 = vld [vmem:[#allocation2 + $0x12cc] sm:$0xf] }
 0x239   :  { %5029 = vmatpush.bf16.msra.mxu1 %v9840_v18  ;;  %5055 = vmatpush.bf16.msra.mxu3 %v9844_v25  ;;  %v9748_v18 = vor.u32 %v11280_v38, %v9745_v41  ;;  %v11269_v25 = vld [vmem:[#allocation2 + $0x11a4] sm:$0xf0]  ;;  %v9849_v16 = vld [vmem:[#allocation2 + $0x12e8] sm:$0xf0] }
 0x23a   :  { %v9688_v29 = vor.u32 %v11269_v25, %v9687_v24  ;;  %v9591_v41 = vld [vmem:[#allocation2 + $0x10c8] sm:$0xf]  ;;  %v9561_v11 = vld [vmem:[#allocation2 + $0x10a8] sm:$0xf0] }
 0x23b   :  { %5017 = vmatpush.bf16.msra.mxu0 %v9552_v17  ;;  %5043 = vmatpush.bf16.msra.mxu2 %v9556_v43  ;;  %v9944_v17 = vor.u32 %v11333_v22, %v9943_v28  ;;  %v9911_v43 = vld [vmem:[#allocation2 + $0x1348] sm:$0xf]  ;;  %v9852_v28 = vor.u32 %v11305_v60, %v9849_v16  ;;  %v11233_v22 = vld [vmem:[#allocation2 + $0x108c] sm:$0xf] }
 0x23c   :  { %v9912_v20 = vor.u32 %v11325_v45, %v9911_v43  ;;  %v11309_v48 = vld [vmem:[#allocation2 + $0x12e4] sm:$0xf0]  ;;  %v11297_v33 = vld [vmem:[#allocation2 + $0x128c] sm:$0xf]  ;;  %v9564_v43 = vor.u32 %v11233_v22, %v9561_v11  ;;  %v11330_v22 = vld [vmem:[#allocation2 + $0x1394] sm:$0xf] }
 0x23d   :  { %5030 = vmatpush.bf16.msra.mxu1 %v9808_v40  ;;  %5056 = vmatpush.bf16.msra.mxu3 %v9812_v47  ;;  %v11261_v40 = vld [vmem:[#allocation2 + $0x1164] sm:$0xf0]  ;;  %v9657_v47 = vld [vmem:[#allocation2 + $0x1168] sm:$0xf0]  ;;  %v9953_v11 = vld [vmem:[#allocation2 + $0x13b0] sm:$0xf0] }
 0x23e   :  { %v9656_v51 = vor.u32 %v11261_v40, %v9655_v39  ;;  %v9660_v53 = vor.u32 %v11257_v31, %v9657_v47  ;;  %v9815_v24 = vld [vmem:[#allocation2 + $0x1288] sm:$0xf]  ;;  %v9529_v52 = vld [vmem:[#allocation2 + $0x1068] sm:$0xf0] }
 0x23f   :  { %5018 = vmatpush.bf16.msra.mxu0 %v9520_v27  ;;  %5044 = vmatpush.bf16.msra.mxu2 %v9524_v57  ;;  %v9623_v27 = vld [vmem:[#allocation2 + $0x1108] sm:$0xf]  ;;  %v11289_v8 = vld [vmem:[#allocation2 + $0x124c] sm:$0xf] }
 0x240   :  { %v11317_v57 = vld [vmem:[#allocation2 + $0x1324] sm:$0xf0]  ;;  %v9624_v38 = vor.u32 %v11253_v54, %v9623_v27  ;;  %v11217_v61 = vld [vmem:[#allocation2 + $0x100c] sm:$0xf] }
 0x241   :  { %5031 = vmatpush.bf16.msra.mxu1 %v9776_v46  ;;  %5057 = vmatpush.bf16.msra.mxu3 %v9780_v63  ;;  %v9916_v46 = vor.u32 %v11321_v49, %v9913_v50  ;;  %v9881_v63 = vld [vmem:[#allocation2 + $0x1328] sm:$0xf0]  ;;  %v9880_v0 = vor.u32 %v11317_v57, %v9879_v3  ;;  %v11229_v45 = vld [vmem:[#allocation2 + $0x1064] sm:$0xf0] }
 0x242   :  { %v9884_v10 = vor.u32 %v11313_v36, %v9881_v63  ;;  %v9783_v31 = vld [vmem:[#allocation2 + $0x1248] sm:$0xf] }
 0x243   :  { %5019 = vmatpush.bf16.msra.mxu0 %v9488_v5  ;;  %5045 = vmatpush.bf16.msra.mxu2 %v9492_v1  ;;  %v4003_v35 = vpop.f32.mrf.mxu0  ;;  %v3339_v1 = vperm.slane %v12204_v9, 1  ;;  %v11293_v50 = vld [vmem:[#allocation2 + $0x1264] sm:$0xf0] }
 0x244   :  { %v4004_v5 = vadd.f32 %v4003_v35, %v3338_v42  ;;  %v9495_v27 = vld [vmem:[#allocation2 + $0x1008] sm:$0xf]  ;;  %v9784_v3 = vor.u32 %v11293_v50, %v9783_v31  ;;  %v9497_v42 = vld [vmem:[#allocation2 + $0x1028] sm:$0xf0]  ;;  %v11322_v31 = vld [vmem:[#allocation2 + $0x1354] sm:$0xf] }
 0x245   :  { %5032 = vmatpush.bf16.msra.mxu1 %v9744_v14  ;;  %5058 = vmatpush.bf16.msra.mxu3 %v9748_v18  ;;  %v4016_v62 = vpop.f32.mrf.mxu1  ;;  %v9593_v14 = vld [vmem:[#allocation2 + $0x10e8] sm:$0xf0]  ;;  %v9592_v18 = vor.u32 %v11245_v7, %v9591_v41  ;;  %v11221_v54 = vld [vmem:[#allocation2 + $0x1024] sm:$0xf0]  ;;  %v9983_v7 = vld [vmem:[#allocation2 + $0x13d0] sm:$0xf] }
 0x246   :  { %5046 = vmatmul.bf16.vlgmr.msra.gmra.mxu2 %v12196_v32  ;;  %5020 = vmatmul.bf16.vlgmr.msra.gmra.mxu0 %v12196_v32  ;;  %v12208_v55 = vadd.f32 %v4016_v62, %v4004_v5  ;;  %v9596_v19 = vor.u32 %v11241_v12, %v9593_v14  ;;  %v9751_v57 = vld [vmem:[#allocation2 + $0x1208] sm:$0xf]  ;;  %v9753_v41 = vld [vmem:[#allocation2 + $0x1228] sm:$0xf0]  ;;  %v11274_v5 = vld [vmem:[#allocation2 + $0x11d4] sm:$0xf]  ;;  %v9500_v12 = vor.u32 %v11217_v61, %v9497_v42 }
 0x247   :  { %5064 = vmatpush.bf16.msrb.mxu0 %v9720_v58  ;;  %5090 = vmatpush.bf16.msrb.mxu2 %v9724_v23  ;;  %v9848_v58 = vor.u32 %v11309_v48, %v9847_v4  ;;  %v11237_v23 = vld [vmem:[#allocation2 + $0x10a4] sm:$0xf0]  ;;  %v9496_v4 = vor.u32 %v11221_v54, %v9495_v27  ;;  %v11342_v48 = vld [vmem:[#allocation2 + $0x13ec] sm:$0xf0]  ;;  %v9729_v62 = vld [vmem:[#allocation2 + $0x11f0] sm:$0xf0] }
 0x248   :  { %5059 = vmatmul.bf16.vlgmr.msra.gmra.mxu3 %v12198_v34  ;;  %5033 = vmatmul.bf16.vlgmr.msra.gmra.mxu1 %v12198_v34  ;;  %v11285_v59 = vld [vmem:[#allocation2 + $0x1224] sm:$0xf0]  ;;  %v11338_v14 = vld [vmem:[#allocation2 + $0x13d4] sm:$0xf]  ;;  %v3340_v50 = vperm.slane %v12204_v9, 2 }
 0x249   :  { %5077 = vmatpush.bf16.msrb.mxu1 %v9976_v21  ;;  %5103 = vmatpush.bf16.msrb.mxu3 %v9980_v30  ;;  %v9559_v21 = vld [vmem:[#allocation2 + $0x1088] sm:$0xf]  ;;  %v4029_v25 = vpop.f32.mrf.mxu2  ;;  %v11318_v54 = vld [vmem:[#allocation2 + $0x132c] sm:$0xf0] }
 0x24a   :  { %v11301_v30 = vld [vmem:[#allocation2 + $0x12a4] sm:$0xf0]  ;;  %v4030_v56 = vadd.f32 %v4029_v25, %v3339_v1  ;;  %v9985_v1 = vld [vmem:[#allocation2 + $0x13f0] sm:$0xf0]  ;;  %v11334_v25 = vld [vmem:[#allocation2 + $0x13ac] sm:$0xf0] }
 0x24b   :  { %5065 = vmatpush.bf16.msrb.mxu0 %v9688_v29  ;;  %5091 = vmatpush.bf16.msrb.mxu2 %v9692_v37  ;;  %v4042_v6 = vpop.f32.mrf.mxu3  ;;  %v9817_v29 = vld [vmem:[#allocation2 + $0x12a8] sm:$0xf0]  ;;  %v4005_v39 = vpop.f32.mrf.mxu0  ;;  %v9816_v40 = vor.u32 %v11301_v30, %v9815_v24  ;;  %v9988_v24 = vor.u32 %v11338_v14, %v9985_v1  ;;  %v9697_v30 = vld [vmem:[#allocation2 + $0x11b0] sm:$0xf0] }
 0x24c   :  { %v12210_v37 = vadd.f32 %v4042_v6, %v4030_v56  ;;  %v9820_v49 = vor.u32 %v11297_v33, %v9817_v29  ;;  %v9663_v29 = vld [vmem:[#allocation2 + $0x1150] sm:$0xf] }
 0x24d   :  { %5078 = vmatpush.bf16.msrb.mxu1 %v9944_v17  ;;  %5104 = vmatpush.bf16.msrb.mxu3 %v9948_v44  ;;  %v9560_v17 = vor.u32 %v11237_v23, %v9559_v21  ;;  %v9527_v44 = vld [vmem:[#allocation2 + $0x1048] sm:$0xf]  ;;  %v4018_v47 = vpop.f32.mrf.mxu1  ;;  %v11270_v21 = vld [vmem:[#allocation2 + $0x11ac] sm:$0xf0] }
 0x24e   :  { %v9951_v23 = vld [vmem:[#allocation2 + $0x1390] sm:$0xf]  ;;  %v9921_v47 = vld [vmem:[#allocation2 + $0x1370] sm:$0xf0] }
 0x24f   :  { %5066 = vmatpush.bf16.msrb.mxu0 %v9656_v51  ;;  %5092 = vmatpush.bf16.msrb.mxu2 %v9660_v53  ;;  %v11225_v51 = vld [vmem:[#allocation2 + $0x104c] sm:$0xf]  ;;  %v9528_v53 = vor.u32 %v11229_v45, %v9527_v44  ;;  %v9952_v6 = vor.u32 %v11334_v25, %v9951_v23  ;;  %v9919_v39 = vld [vmem:[#allocation2 + $0x1350] sm:$0xf]  ;;  %v11258_v44 = vld [vmem:[#allocation2 + $0x1154] sm:$0xf]  ;;  %v9924_v27 = vor.u32 %v11322_v31, %v9921_v47 }
 0x250   :  { %v9665_v45 = vld [vmem:[#allocation2 + $0x1170] sm:$0xf0] }
 0x251   :  { %5079 = vmatpush.bf16.msrb.mxu1 %v9912_v20  ;;  %5105 = vmatpush.bf16.msrb.mxu3 %v9916_v46  ;;  %v9785_v20 = vld [vmem:[#allocation2 + $0x1268] sm:$0xf0]  ;;  %v9532_v46 = vor.u32 %v11225_v51, %v9529_v52  ;;  %v4031_v36 = vpop.f32.mrf.mxu2  ;;  %v9668_v52 = vor.u32 %v11258_v44, %v9665_v45  ;;  %v11234_v23 = vld [vmem:[#allocation2 + $0x1094] sm:$0xf]  ;;  %v11294_v44 = vld [vmem:[#allocation2 + $0x126c] sm:$0xf0] }
 0x252   :  { %v9788_v63 = vor.u32 %v11289_v8, %v9785_v20  ;;  %v9631_v8 = vld [vmem:[#allocation2 + $0x1110] sm:$0xf]  ;;  %v11226_v45 = vld [vmem:[#allocation2 + $0x1054] sm:$0xf] }
 0x253   :  { %5067 = vmatpush.bf16.msrb.mxu0 %v9624_v38  ;;  %5093 = vmatpush.bf16.msrb.mxu2 %v9628_v2  ;;  %v11281_v38 = vld [vmem:[#allocation2 + $0x120c] sm:$0xf]  ;;  %v4044_v35 = vpop.f32.mrf.mxu3  ;;  %v11278_v2 = vld [vmem:[#allocation2 + $0x11ec] sm:$0xf0]  ;;  %v9537_v31 = vld [vmem:[#allocation2 + $0x1070] sm:$0xf0] }
 0x254   :  { %v9756_v60 = vor.u32 %v11281_v38, %v9753_v41  ;;  %v11254_v20 = vld [vmem:[#allocation2 + $0x112c] sm:$0xf0]  ;;  %v11290_v47 = vld [vmem:[#allocation2 + $0x1254] sm:$0xf] }
 0x255   :  { %5080 = vmatpush.bf16.msrb.mxu1 %v9880_v0  ;;  %5106 = vmatpush.bf16.msrb.mxu3 %v9884_v10  ;;  %v9727_v0 = vld [vmem:[#allocation2 + $0x11d0] sm:$0xf]  ;;  %v9752_v10 = vor.u32 %v11285_v59, %v9751_v57  ;;  %v11314_v57 = vld [vmem:[#allocation2 + $0x1314] sm:$0xf]  ;;  %v9632_v36 = vor.u32 %v11254_v20, %v9631_v8  ;;  %v9540_v20 = vor.u32 %v11226_v45, %v9537_v31  ;;  %v9929_v45 = vld [vmem:[#allocation2 + $0x1378] sm:$0xf0] }
 0x256   :  { %v9728_v16 = vor.u32 %v11278_v2, %v9727_v0  ;;  %v9889_v59 = vld [vmem:[#allocation2 + $0x1330] sm:$0xf0]  ;;  %v9599_v35 = vld [vmem:[#allocation2 + $0x10d0] sm:$0xf] }
 0x257   :  { %5068 = vmatpush.bf16.msrb.mxu0 %v9592_v18  ;;  %5094 = vmatpush.bf16.msrb.mxu2 %v9596_v19  ;;  %v9984_v18 = vor.u32 %v11342_v48, %v9983_v7  ;;  %v9695_v19 = vld [vmem:[#allocation2 + $0x1190] sm:$0xf]  ;;  %v9892_v7 = vor.u32 %v11314_v57, %v9889_v59  ;;  %v11242_v48 = vld [vmem:[#allocation2 + $0x10d4] sm:$0xf] }
 0x258   :  { %v9696_v56 = vor.u32 %v11270_v21, %v9695_v19  ;;  %v11246_v0 = vld [vmem:[#allocation2 + $0x10ec] sm:$0xf0]  ;;  %v11282_v57 = vld [vmem:[#allocation2 + $0x1214] sm:$0xf] }
 0x259   :  { %5081 = vmatpush.bf16.msrb.mxu1 %v9848_v58  ;;  %5107 = vmatpush.bf16.msrb.mxu3 %v9852_v28  ;;  %v9732_v58 = vor.u32 %v11274_v5, %v9729_v62  ;;  %v11266_v28 = vld [vmem:[#allocation2 + $0x1194] sm:$0xf]  ;;  %v9855_v2 = vld [vmem:[#allocation2 + $0x12d0] sm:$0xf]  ;;  %v9600_v14 = vor.u32 %v11246_v0, %v9599_v35  ;;  %v11343_v35 = vld [vmem:[#allocation2 + $0x13f4] sm:$0xf0] }
 0x25a   :  { %v9700_v33 = vor.u32 %v11266_v28, %v9697_v30  ;;  %v9601_v5 = vld [vmem:[#allocation2 + $0x10f0] sm:$0xf0]  ;;  %v11302_v21 = vld [vmem:[#allocation2 + $0x12ac] sm:$0xf0]  ;;  %v11275_v0 = vld [vmem:[#allocation2 + $0x11dc] sm:$0xf] }
 0x25b   :  { %5069 = vmatpush.bf16.msrb.mxu0 %v9560_v17  ;;  %5095 = vmatpush.bf16.msrb.mxu2 %v9564_v43  ;;  %v11262_v17 = vld [vmem:[#allocation2 + $0x116c] sm:$0xf0]  ;;  %v11298_v28 = vld [vmem:[#allocation2 + $0x1294] sm:$0xf] }
 0x25c   :  { %v11326_v43 = vld [vmem:[#allocation2 + $0x136c] sm:$0xf0]  ;;  %v9825_v30 = vld [vmem:[#allocation2 + $0x12b0] sm:$0xf0] }
 0x25d   :  { %5082 = vmatpush.bf16.msrb.mxu1 %v9816_v40  ;;  %5108 = vmatpush.bf16.msrb.mxu3 %v9820_v49  ;;  %v9956_v40 = vor.u32 %v11330_v22, %v9953_v11  ;;  %v9664_v49 = vor.u32 %v11262_v17, %v9663_v29  ;;  %v9920_v51 = vor.u32 %v11326_v43, %v9919_v39  ;;  %v9535_v17 = vld [vmem:[#allocation2 + $0x1050] sm:$0xf]  ;;  %v9761_v59 = vld [vmem:[#allocation2 + $0x1230] sm:$0xf0] }
 0x25e   :  { %v11230_v39 = vld [vmem:[#allocation2 + $0x106c] sm:$0xf0]  ;;  %v9828_v43 = vor.u32 %v11298_v28, %v9825_v30  ;;  %v9961_v28 = vld [vmem:[#allocation2 + $0x13b8] sm:$0xf0] }
 0x25f   :  { %5070 = vmatpush.bf16.msrb.mxu0 %v9528_v53  ;;  %5096 = vmatpush.bf16.msrb.mxu2 %v9532_v46  ;;  %v9887_v53 = vld [vmem:[#allocation2 + $0x1310] sm:$0xf]  ;;  %v9633_v46 = vld [vmem:[#allocation2 + $0x1130] sm:$0xf0] }
 0x260   :  { %v9888_v38 = vor.u32 %v11318_v54, %v9887_v53  ;;  %v9759_v53 = vld [vmem:[#allocation2 + $0x1210] sm:$0xf]  ;;  %v11218_v54 = vld [vmem:[#allocation2 + $0x1014] sm:$0xf] }
 0x261   :  { %5083 = vmatpush.bf16.msrb.mxu1 %v9784_v3  ;;  %5109 = vmatpush.bf16.msrb.mxu3 %v9788_v63  ;;  %v11250_v3 = vld [vmem:[#allocation2 + $0x1114] sm:$0xf] }
 0x262   :  { %v9636_v41 = vor.u32 %v11250_v3, %v9633_v46  ;;  %v9505_v46 = vld [vmem:[#allocation2 + $0x1030] sm:$0xf0] }
 0x263   :  { %5071 = vmatpush.bf16.msrb.mxu0 %v9496_v4  ;;  %5097 = vmatpush.bf16.msrb.mxu2 %v9500_v12  ;;  %v4055_v61 = vpop.f32.mrf.mxu0  ;;  %v11310_v4 = vld [vmem:[#allocation2 + $0x12ec] sm:$0xf0]  ;;  %v9857_v12 = vld [vmem:[#allocation2 + $0x12f0] sm:$0xf0] }
 0x264   :  { %v4056_v63 = vadd.f32 %v4055_v61, %v3340_v50  ;;  %v9856_v1 = vor.u32 %v11310_v4, %v9855_v2  ;;  %v9536_v50 = vor.u32 %v11230_v39, %v9535_v17  ;;  %v9737_v2 = vld [vmem:[#allocation2 + $0x11f8] sm:$0xf0]  ;;  %v9508_v4 = vor.u32 %v11218_v54, %v9505_v46  ;;  %v11327_v39 = vld [vmem:[#allocation2 + $0x1374] sm:$0xf0] }
 0x265   :  { %5084 = vmatpush.bf16.msrb.mxu1 %v9752_v10  ;;  %5110 = vmatpush.bf16.msrb.mxu3 %v9756_v60  ;;  %v4068_v42 = vpop.f32.mrf.mxu1  ;;  %v11306_v10 = vld [vmem:[#allocation2 + $0x12d4] sm:$0xf]  ;;  %v9604_v60 = vor.u32 %v11242_v48, %v9601_v5  ;;  %v11339_v48 = vld [vmem:[#allocation2 + $0x13dc] sm:$0xf] }
 0x266   :  { %5072 = vmatmul.bf16.vlgmr.msrb.gmra.mxu0 %v12196_v32  ;;  %5098 = vmatmul.bf16.vlgmr.msrb.gmra.mxu2 %v12196_v32  ;;  %v12217_v62 = vadd.f32 %v4068_v42, %v4056_v63  ;;  %v9860_v19 = vor.u32 %v11306_v10, %v9857_v12  ;;  %v11279_v63 = vld [vmem:[#allocation2 + $0x11f4] sm:$0xf0]  ;;  %v9993_v5 = vld [vmem:[#allocation2 + $0x13f8] sm:$0xf0]  ;;  %v9764_v10 = vor.u32 %v11282_v57, %v9761_v59 }
 0x267   :  { %5116 = vmatpush.bf16.msra.mxu0 %v9728_v16  ;;  %5142 = vmatpush.bf16.msra.mxu2 %v9732_v58  ;;  %v9567_v16 = vld [vmem:[#allocation2 + $0x1090] sm:$0xf]  ;;  %v9991_v42 = vld [vmem:[#allocation2 + $0x13d8] sm:$0xf]  ;;  %v9641_v54 = vld [vmem:[#allocation2 + $0x1138] sm:$0xf0] }
 0x268   :  { %5085 = vmatmul.bf16.vlgmr.msrb.gmra.mxu1 %v12198_v34  ;;  %5111 = vmatmul.bf16.vlgmr.msrb.gmra.mxu3 %v12198_v34  ;;  %v9823_v58 = vld [vmem:[#allocation2 + $0x1290] sm:$0xf]  ;;  %v11315_v46 = vld [vmem:[#allocation2 + $0x131c] sm:$0xf] }
 0x269   :  { %5129 = vmatpush.bf16.msra.mxu1 %v9984_v18  ;;  %5155 = vmatpush.bf16.msra.mxu3 %v9988_v24  ;;  %v11238_v18 = vld [vmem:[#allocation2 + $0x10ac] sm:$0xf0]  ;;  %v9569_v24 = vld [vmem:[#allocation2 + $0x10b0] sm:$0xf0]  ;;  %v12219_v25 = vpop.f32.mrf.mxu2  ;;  %v9897_v57 = vld [vmem:[#allocation2 + $0x1338] sm:$0xf0] }
 0x26a   :  { %v9572_v29 = vor.u32 %v11234_v23, %v9569_v24  ;;  %v9705_v23 = vld [vmem:[#allocation2 + $0x11b8] sm:$0xf0] }
 0x26b   :  { %5117 = vmatpush.bf16.msra.mxu0 %v9696_v56  ;;  %5143 = vmatpush.bf16.msra.mxu2 %v9700_v33  ;;  %v4057_v22 = vpop.f32.mrf.mxu0  ;;  %v12221_v11 = vpop.f32.mrf.mxu3  ;;  %v9568_v56 = vor.u32 %v11238_v18, %v9567_v16  ;;  %v9824_v33 = vor.u32 %v11302_v21, %v9823_v58  ;;  %v11271_v16 = vld [vmem:[#allocation2 + $0x11b4] sm:$0xf0]  ;;  %v9996_v58 = vor.u32 %v11339_v48, %v9993_v5  ;;  %v11267_v21 = vld [vmem:[#allocation2 + $0x119c] sm:$0xf] }
 0x26c   :  { %v9959_v18 = vld [vmem:[#allocation2 + $0x1398] sm:$0xf]  ;;  %v11331_v24 = vld [vmem:[#allocation2 + $0x139c] sm:$0xf] }
 0x26d   :  { %5130 = vmatpush.bf16.msra.mxu1 %v9952_v6  ;;  %5156 = vmatpush.bf16.msra.mxu3 %v9956_v40  ;;  %v4070_v6 = vpop.f32.mrf.mxu1  ;;  %v9791_v40 = vld [vmem:[#allocation2 + $0x1250] sm:$0xf]  ;;  %v9964_v17 = vor.u32 %v11331_v24, %v9961_v28  ;;  %v9609_v48 = vld [vmem:[#allocation2 + $0x10f8] sm:$0xf0] }
 0x26e   :  { %v9792_v8 = vor.u32 %v11294_v44, %v9791_v40  ;;  %v9671_v6 = vld [vmem:[#allocation2 + $0x1158] sm:$0xf]  ;;  %v11259_v40 = vld [vmem:[#allocation2 + $0x115c] sm:$0xf] }
 0x26f   :  { %5118 = vmatpush.bf16.msra.mxu0 %v9664_v49  ;;  %5144 = vmatpush.bf16.msra.mxu2 %v9668_v52  ;;  %v9793_v49 = vld [vmem:[#allocation2 + $0x1270] sm:$0xf0]  ;;  %v11222_v52 = vld [vmem:[#allocation2 + $0x102c] sm:$0xf0]  ;;  %v11323_v44 = vld [vmem:[#allocation2 + $0x135c] sm:$0xf] }
 0x270   :  { %v9796_v3 = vor.u32 %v11290_v47, %v9793_v49  ;;  %v3342_v47 = vperm.slane %v12204_v9, 4  ;;  %v11307_v5 = vld [vmem:[#allocation2 + $0x12dc] sm:$0xf] }
 0x271   :  { %5131 = vmatpush.bf16.msra.mxu1 %v9920_v51  ;;  %5157 = vmatpush.bf16.msra.mxu3 %v9924_v27  ;;  %v9503_v51 = vld [vmem:[#allocation2 + $0x1010] sm:$0xf]  ;;  %v4083_v61 = vpop.f32.mrf.mxu2 }
 0x272   :  { %v11286_v27 = vld [vmem:[#allocation2 + $0x122c] sm:$0xf0] }
 0x273   :  { %5119 = vmatpush.bf16.msra.mxu0 %v9632_v36  ;;  %5145 = vmatpush.bf16.msra.mxu2 %v9636_v41  ;;  %v9735_v36 = vld [vmem:[#allocation2 + $0x11d8] sm:$0xf]  ;;  %v9504_v41 = vor.u32 %v11222_v52, %v9503_v51 }
 0x274   :  { %v9736_v12 = vor.u32 %v11279_v63, %v9735_v36  ;;  %v9639_v51 = vld [vmem:[#allocation2 + $0x1118] sm:$0xf] }
 0x275   :  { %5132 = vmatpush.bf16.msra.mxu1 %v9888_v38  ;;  %5158 = vmatpush.bf16.msra.mxu3 %v9892_v7  ;;  %v4096_v38 = vpop.f32.mrf.mxu3  ;;  %v9760_v7 = vor.u32 %v11286_v27, %v9759_v53  ;;  %v11255_v52 = vld [vmem:[#allocation2 + $0x1134] sm:$0xf0]  ;;  %v11251_v27 = vld [vmem:[#allocation2 + $0x111c] sm:$0xf] }
 0x276   :  { %v11319_v53 = vld [vmem:[#allocation2 + $0x1334] sm:$0xf0]  ;;  %v9640_v61 = vor.u32 %v11255_v52, %v9639_v51  ;;  %v11227_v52 = vld [vmem:[#allocation2 + $0x105c] sm:$0xf] }
 0x277   :  { %5120 = vmatpush.bf16.msra.mxu0 %v9600_v14  ;;  %5146 = vmatpush.bf16.msra.mxu2 %v9604_v60  ;;  %v9992_v14 = vor.u32 %v11343_v35, %v9991_v42  ;;  %v9703_v60 = vld [vmem:[#allocation2 + $0x1198] sm:$0xf]  ;;  %v9644_v42 = vor.u32 %v11251_v27, %v9641_v54  ;;  %v11291_v27 = vld [vmem:[#allocation2 + $0x125c] sm:$0xf] }
 0x278   :  { %v9704_v30 = vor.u32 %v11271_v16, %v9703_v60  ;;  %v9607_v38 = vld [vmem:[#allocation2 + $0x10d8] sm:$0xf]  ;;  %v9801_v54 = vld [vmem:[#allocation2 + $0x1278] sm:$0xf0] }
 0x279   :  { %5133 = vmatpush.bf16.msra.mxu1 %v9856_v1  ;;  %5159 = vmatpush.bf16.msra.mxu3 %v9860_v19  ;;  %v9740_v1 = vor.u32 %v11275_v0, %v9737_v2  ;;  %v11335_v19 = vld [vmem:[#allocation2 + $0x13b4] sm:$0xf0]  ;;  %v9900_v0 = vor.u32 %v11315_v46, %v9897_v57 }
 0x27a   :  { %v9960_v22 = vor.u32 %v11335_v19, %v9959_v18  ;;  %v9863_v35 = vld [vmem:[#allocation2 + $0x12d8] sm:$0xf] }
 0x27b   :  { %5121 = vmatpush.bf16.msra.mxu0 %v9568_v56  ;;  %5147 = vmatpush.bf16.msra.mxu2 %v9572_v29  ;;  %v9708_v56 = vor.u32 %v11267_v21, %v9705_v23  ;;  %v9927_v29 = vld [vmem:[#allocation2 + $0x1358] sm:$0xf] }
 0x27c   :  { %v9928_v49 = vor.u32 %v11327_v39, %v9927_v29  ;;  %v11239_v19 = vld [vmem:[#allocation2 + $0x10b4] sm:$0xf0]  ;;  %v9833_v29 = vld [vmem:[#allocation2 + $0x12b8] sm:$0xf0] }
 0x27d   :  { %5134 = vmatpush.bf16.msra.mxu1 %v9824_v33  ;;  %5160 = vmatpush.bf16.msra.mxu3 %v9828_v43  ;;  %v11263_v33 = vld [vmem:[#allocation2 + $0x1174] sm:$0xf0]  ;;  %v9673_v43 = vld [vmem:[#allocation2 + $0x1178] sm:$0xf0] }
 0x27e   :  { %v9672_v31 = vor.u32 %v11263_v33, %v9671_v6  ;;  %v9831_v21 = vld [vmem:[#allocation2 + $0x1298] sm:$0xf]  ;;  %v11299_v33 = vld [vmem:[#allocation2 + $0x129c] sm:$0xf] }
 0x27f   :  { %5122 = vmatpush.bf16.msra.mxu0 %v9536_v50  ;;  %5148 = vmatpush.bf16.msra.mxu2 %v9540_v20  ;;  %v9676_v50 = vor.u32 %v11259_v40, %v9673_v43  ;;  %v9932_v20 = vor.u32 %v11323_v44, %v9929_v45  ;;  %v11295_v51 = vld [vmem:[#allocation2 + $0x1274] sm:$0xf0] }
 0x280   :  { %v9511_v46 = vld [vmem:[#allocation2 + $0x1018] sm:$0xf] }
 0x281   :  { %5135 = vmatpush.bf16.msra.mxu1 %v9792_v8  ;;  %5161 = vmatpush.bf16.msra.mxu3 %v9796_v3  ;;  %v9895_v8 = vld [vmem:[#allocation2 + $0x1318] sm:$0xf] }
 0x282   :  { %v9896_v63 = vor.u32 %v11319_v53, %v9895_v8  ;;  %v9545_v8 = vld [vmem:[#allocation2 + $0x1078] sm:$0xf0]  ;;  %v11223_v57 = vld [vmem:[#allocation2 + $0x1034] sm:$0xf0] }
 0x283   :  { %5123 = vmatpush.bf16.msra.mxu0 %v9504_v41  ;;  %5149 = vmatpush.bf16.msra.mxu2 %v9508_v4  ;;  %v4107_v3 = vpop.f32.mrf.mxu0  ;;  %v11247_v41 = vld [vmem:[#allocation2 + $0x10f4] sm:$0xf0]  ;;  %v11243_v4 = vld [vmem:[#allocation2 + $0x10dc] sm:$0xf] }
 0x284   :  { %v4108_v59 = vadd.f32 %v4107_v3, %v3342_v47  ;;  %v9608_v60 = vor.u32 %v11247_v41, %v9607_v38  ;;  %v9612_v18 = vor.u32 %v11243_v4, %v9609_v48  ;;  %v11231_v47 = vld [vmem:[#allocation2 + $0x1074] sm:$0xf0]  ;;  %v11219_v38 = vld [vmem:[#allocation2 + $0x101c] sm:$0xf]  ;;  %v9804_v41 = vor.u32 %v11291_v27, %v9801_v54  ;;  %v11404_v4 = vld [vmem:[#allocation2 + $0x15dc] sm:$0xf0] }
 0x285   :  { %5136 = vmatpush.bf16.msra.mxu1 %v9760_v7  ;;  %5162 = vmatpush.bf16.msra.mxu3 %v9764_v10  ;;  %v4120_v36 = vpop.f32.mrf.mxu1  ;;  %v11311_v7 = vld [vmem:[#allocation2 + $0x12f4] sm:$0xf0]  ;;  %v9865_v10 = vld [vmem:[#allocation2 + $0x12f8] sm:$0xf0]  ;;  %v10479_v48 = vld [vmem:[#allocation2 + $0x17c0] sm:$0xf] }
 0x286   :  { %5124 = vmatmul.bf16.vlgmr.msra.gmra.mxu0 %v12196_v32  ;;  %5150 = vmatmul.bf16.vlgmr.msra.gmra.mxu2 %v12196_v32  ;;  %v4121_v2 = vadd.f32 %v4120_v36, %v4108_v59  ;;  %v9864_v16 = vor.u32 %v11311_v7, %v9863_v35  ;;  %v9868_v24 = vor.u32 %v11307_v5, %v9865_v10  ;;  %v9513_v35 = vld [vmem:[#allocation2 + $0x1038] sm:$0xf0]  ;;  %v10223_v7 = vld [vmem:[#allocation2 + $0x15c0] sm:$0xf]  ;;  %v3344_v27 = vperm.slane %v12204_v9, 6 }
 0x287   :  { %5168 = vmatpush.bf16.msrb.mxu0 %v9736_v12  ;;  %5194 = vmatpush.bf16.msrb.mxu2 %v9740_v1  ;;  %v3343_v12 = vperm.slane %v12204_v9, 5  ;;  %v9548_v36 = vor.u32 %v11227_v52, %v9545_v8  ;;  %v9512_v10 = vor.u32 %v11223_v57, %v9511_v46  ;;  %v10161_v52 = vld [vmem:[#allocation2 + $0x1560] sm:$0xf0]  ;;  %v10127_v46 = vld [vmem:[#allocation2 + $0x1500] sm:$0xf] }
 0x288   :  { %5137 = vmatmul.bf16.vlgmr.msra.gmra.mxu1 %v12198_v34  ;;  %5163 = vmatmul.bf16.vlgmr.msra.gmra.mxu3 %v12198_v34  ;;  %v4206_v1 = vmax.f32 %v4121_v2, 0.0  ;;  %v11448_v8 = vld [vmem:[#allocation2 + $0x1744] sm:$0xf]  ;;  %v11380_v57 = vld [vmem:[#allocation2 + $0x151c] sm:$0xf0] }
 0x289   :  { %5181 = vmatpush.bf16.msrb.mxu1 %v9992_v14  ;;  %5207 = vmatpush.bf16.msrb.mxu3 %v9996_v58  ;;  %v4202_v14 = vmax.f32 %v12208_v55, 0.0  ;;  %v9575_v58 = vld [vmem:[#allocation2 + $0x1098] sm:$0xf]  ;;  %v4133_v28 = vpop.f32.mrf.mxu2 }
 0x28a   :  { %v4134_v6 = vadd.f32 %v4133_v28, %v3343_v12  ;;  %v9576_v39 = vor.u32 %v11239_v19, %v9575_v58  ;;  %v11468_v12 = vld [vmem:[#allocation2 + $0x17dc] sm:$0xf0]  ;;  %v10481_v58 = vld [vmem:[#allocation2 + $0x17e0] sm:$0xf0] }
 0x28b   :  { %5169 = vmatpush.bf16.msrb.mxu0 %v9704_v30  ;;  %5195 = vmatpush.bf16.msrb.mxu2 %v9708_v56  ;;  %v12230_v23 = vadd.f32 %v4206_v1, %v4202_v14  ;;  %v11303_v30 = vld [vmem:[#allocation2 + $0x12b4] sm:$0xf0]  ;;  %v9577_v56 = vld [vmem:[#allocation2 + $0x10b8] sm:$0xf0]  ;;  %v4146_v55 = vpop.f32.mrf.mxu3  ;;  %v11400_v14 = vld [vmem:[#allocation2 + $0x15c4] sm:$0xf] }
 0x28c   :  { %v4147_v43 = vadd.f32 %v4146_v55, %v4134_v6  ;;  %v9832_v44 = vor.u32 %v11303_v30, %v9831_v21  ;;  %v10225_v1 = vld [vmem:[#allocation2 + $0x15e0] sm:$0xf0]  ;;  %v10224_v21 = vor.u32 %v11404_v4, %v10223_v7  ;;  %v10191_v30 = vld [vmem:[#allocation2 + $0x1580] sm:$0xf] }
 0x28d   :  { %5182 = vmatpush.bf16.msrb.mxu1 %v9960_v22  ;;  %5208 = vmatpush.bf16.msrb.mxu3 %v9964_v17  ;;  %v11235_v22 = vld [vmem:[#allocation2 + $0x109c] sm:$0xf]  ;;  %v4109_v17 = vpop.f32.mrf.mxu0  ;;  %v4122_v40 = vpop.f32.mrf.mxu1  ;;  %v10228_v28 = vor.u32 %v11400_v14, %v10225_v1  ;;  %v11460_v55 = vld [vmem:[#allocation2 + $0x179c] sm:$0xf0] }
 0x28e   :  { %v9580_v45 = vor.u32 %v11235_v22, %v9577_v56  ;;  %v4207_v53 = vmax.f32 %v4147_v43, 0.0  ;;  %v11396_v22 = vld [vmem:[#allocation2 + $0x159c] sm:$0xf0]  ;;  %v11456_v17 = vld [vmem:[#allocation2 + $0x1784] sm:$0xf] }
 0x28f   :  { %5170 = vmatpush.bf16.msrb.mxu0 %v9672_v31  ;;  %5196 = vmatpush.bf16.msrb.mxu2 %v9676_v50  ;;  %v9543_v31 = vld [vmem:[#allocation2 + $0x1058] sm:$0xf]  ;;  %v9836_v50 = vor.u32 %v11299_v33, %v9833_v29  ;;  %v10447_v56 = vld [vmem:[#allocation2 + $0x1780] sm:$0xf]  ;;  %v11392_v33 = vld [vmem:[#allocation2 + $0x1584] sm:$0xf]  ;;  %v10192_v40 = vor.u32 %v11396_v22, %v10191_v30 }
 0x290   :  { %v9544_v3 = vor.u32 %v11231_v47, %v9543_v31  ;;  %v10193_v29 = vld [vmem:[#allocation2 + $0x15a0] sm:$0xf0]  ;;  %v10448_v43 = vor.u32 %v11460_v55, %v10447_v56  ;;  %v11388_v31 = vld [vmem:[#allocation2 + $0x155c] sm:$0xf0] }
 0x291   :  { %5183 = vmatpush.bf16.msrb.mxu1 %v9928_v49  ;;  %5209 = vmatpush.bf16.msrb.mxu3 %v9932_v20  ;;  %v9799_v49 = vld [vmem:[#allocation2 + $0x1258] sm:$0xf]  ;;  %v4203_v20 = vmax.f32 %v12210_v37, 0.0  ;;  %v11283_v37 = vld [vmem:[#allocation2 + $0x121c] sm:$0xf]  ;;  %v4135_v2 = vpop.f32.mrf.mxu2 }
 0x292   :  { %v10415_v47 = vld [vmem:[#allocation2 + $0x1740] sm:$0xf] }
 0x293   :  { %5171 = vmatpush.bf16.msrb.mxu0 %v9640_v61  ;;  %5197 = vmatpush.bf16.msrb.mxu2 %v9644_v42  ;;  %v12233_v59 = vadd.f32 %v4207_v53, %v4203_v20  ;;  %v9800_v61 = vor.u32 %v11295_v51, %v9799_v49  ;;  %v11287_v42 = vld [vmem:[#allocation2 + $0x1234] sm:$0xf0]  ;;  %v4148_v5 = vpop.f32.mrf.mxu3  ;;  %v11384_v51 = vld [vmem:[#allocation2 + $0x1544] sm:$0xf]  ;;  %v11436_v1 = vld [vmem:[#allocation2 + $0x16dc] sm:$0xf0] }
 0x294   :  { %v10417_v20 = vld [vmem:[#allocation2 + $0x1760] sm:$0xf0]  ;;  %v11372_v5 = vld [vmem:[#allocation2 + $0x14dc] sm:$0xf0] }
 0x295   :  { %5184 = vmatpush.bf16.msrb.mxu1 %v9896_v63  ;;  %5210 = vmatpush.bf16.msrb.mxu3 %v9900_v0  ;;  %v9767_v63 = vld [vmem:[#allocation2 + $0x1218] sm:$0xf]  ;;  %v9769_v0 = vld [vmem:[#allocation2 + $0x1238] sm:$0xf0]  ;;  %v11364_v55 = vld [vmem:[#allocation2 + $0x149c] sm:$0xf0] }
 0x296   :  { %v9772_v19 = vor.u32 %v11283_v37, %v9769_v0  ;;  %v10128_v0 = vor.u32 %v11380_v57, %v10127_v46  ;;  %v11352_v46 = vld [vmem:[#allocation2 + $0x1444] sm:$0xf] }
 0x297   :  { %5172 = vmatpush.bf16.msrb.mxu0 %v9608_v60  ;;  %5198 = vmatpush.bf16.msrb.mxu2 %v9612_v18  ;;  %v9768_v60 = vor.u32 %v11287_v42, %v9767_v63  ;;  %v11464_v18 = vld [vmem:[#allocation2 + $0x17c4] sm:$0xf] }
 0x298   :  { %v10484_v6 = vor.u32 %v11464_v18, %v10481_v58  ;;  %v11376_v63 = vld [vmem:[#allocation2 + $0x1504] sm:$0xf] }
 0x299   :  { %5185 = vmatpush.bf16.msrb.mxu1 %v9864_v16  ;;  %5211 = vmatpush.bf16.msrb.mxu3 %v9868_v24  ;;  %v9516_v16 = vor.u32 %v11219_v38, %v9513_v35  ;;  %v10480_v24 = vor.u32 %v11468_v12, %v10479_v48  ;;  %v10129_v42 = vld [vmem:[#allocation2 + $0x1520] sm:$0xf0]  ;;  %v3341_v38 = vperm.slane %v12204_v9, 3  ;;  %v10095_v48 = vld [vmem:[#allocation2 + $0x14c0] sm:$0xf] }
 0x29a   :  { %v10385_v35 = vld [vmem:[#allocation2 + $0x1720] sm:$0xf0]  ;;  %v10132_v4 = vor.u32 %v11376_v63, %v10129_v42  ;;  %v10096_v30 = vor.u32 %v11372_v5, %v10095_v48  ;;  %v9999_v42 = vld [vmem:[#allocation2 + $0x1400] sm:$0xf] }
 0x29b   :  { %5173 = vmatpush.bf16.msrb.mxu0 %v9576_v39  ;;  %5199 = vmatpush.bf16.msrb.mxu2 %v9580_v45  ;;  %v10449_v39 = vld [vmem:[#allocation2 + $0x17a0] sm:$0xf0]  ;;  %v10159_v45 = vld [vmem:[#allocation2 + $0x1540] sm:$0xf]  ;;  %v4082_v18 = vadd.f32 %v12219_v25, %v3341_v38 }
 0x29c   :  { %v10452_v49 = vor.u32 %v11456_v17, %v10449_v39  ;;  %v10160_v53 = vor.u32 %v11388_v31, %v10159_v45  ;;  %v11432_v58 = vld [vmem:[#allocation2 + $0x16c4] sm:$0xf]  ;;  %v11428_v39 = vld [vmem:[#allocation2 + $0x169c] sm:$0xf0] }
 0x29d   :  { %5186 = vmatpush.bf16.msrb.mxu1 %v9832_v44  ;;  %5212 = vmatpush.bf16.msrb.mxu3 %v9836_v50  ;;  %v10196_v44 = vor.u32 %v11392_v33, %v10193_v29  ;;  %v11452_v50 = vld [vmem:[#allocation2 + $0x175c] sm:$0xf0]  ;;  %v11424_v45 = vld [vmem:[#allocation2 + $0x1684] sm:$0xf] }
 0x29e   :  { %v10416_v54 = vor.u32 %v11452_v50, %v10415_v47  ;;  %v10319_v33 = vld [vmem:[#allocation2 + $0x1680] sm:$0xf]  ;;  %v10321_v31 = vld [vmem:[#allocation2 + $0x16a0] sm:$0xf0] }
 0x29f   :  { %5174 = vmatpush.bf16.msrb.mxu0 %v9544_v3  ;;  %5200 = vmatpush.bf16.msrb.mxu2 %v9548_v36  ;;  %v10164_v3 = vor.u32 %v11384_v51, %v10161_v52  ;;  %v10420_v36 = vor.u32 %v11448_v8, %v10417_v20  ;;  %v10320_v8 = vor.u32 %v11428_v39, %v10319_v33  ;;  %v10033_v57 = vld [vmem:[#allocation2 + $0x1460] sm:$0xf0]  ;;  %v11348_v38 = vld [vmem:[#allocation2 + $0x141c] sm:$0xf0]  ;;  %v5237_v33 = vld [vmem:[%s12601_s0 + $0x58] sm:$0xff] }
 0x2a0   :  { %v11408_v48 = vld [vmem:[#allocation2 + $0x1604] sm:$0xf]  ;;  %v11397_v39 = vld [vmem:[#allocation2 + $0x15a4] sm:$0xf0] }
 0x2a1   :  { %5187 = vmatpush.bf16.msrb.mxu1 %v9800_v61  ;;  %5213 = vmatpush.bf16.msrb.mxu3 %v9804_v41  ;;  %v10383_v61 = vld [vmem:[#allocation2 + $0x1700] sm:$0xf]  ;;  %v10257_v5 = vld [vmem:[#allocation2 + $0x1620] sm:$0xf0] }
 0x2a3   :  { %5175 = vmatpush.bf16.msrb.mxu0 %v9512_v10  ;;  %5201 = vmatpush.bf16.msrb.mxu2 %v9516_v16  ;;  %v4159_v41 = vpop.f32.mrf.mxu0  ;;  %v10351_v10 = vld [vmem:[#allocation2 + $0x16c0] sm:$0xf]  ;;  %v10097_v16 = vld [vmem:[#allocation2 + $0x14e0] sm:$0xf0] }
 0x2a4   :  { %v4160_v37 = vadd.f32 %v4159_v41, %v3344_v27  ;;  %v10352_v22 = vor.u32 %v11436_v1, %v10351_v10  ;;  %v11356_v27 = vld [vmem:[#allocation2 + $0x145c] sm:$0xf0]  ;;  %v11405_v1 = vld [vmem:[#allocation2 + $0x15e4] sm:$0xf0] }
 0x2a5   :  { %5188 = vmatpush.bf16.msrb.mxu1 %v9768_v60  ;;  %5214 = vmatpush.bf16.msrb.mxu3 %v9772_v19  ;;  %v4172_v2 = vpop.f32.mrf.mxu1  ;;  %v11368_v60 = vld [vmem:[#allocation2 + $0x14c4] sm:$0xf] }
 0x2a6   :  { %5176 = vmatmul.bf16.vlgmr.msrb.gmra.mxu0 %v12196_v32  ;;  %5202 = vmatmul.bf16.vlgmr.msrb.gmra.mxu2 %v12196_v32  ;;  %v11444_v32 = vld [vmem:[#allocation2 + $0x171c] sm:$0xf0]  ;;  %v4173_v14 = vadd.f32 %v4172_v2, %v4160_v37  ;;  %v10353_v19 = vld [vmem:[#allocation2 + $0x16e0] sm:$0xf0]  ;;  %v10100_v56 = vor.u32 %v11368_v60, %v10097_v16  ;;  %v10487_v60 = vld [vmem:[#allocation2 + $0x17c8] sm:$0xf] }
 0x2a7   :  { %6030 = vmatpush.bf16.msra.mxu0 %v10224_v21  ;;  %6056 = vmatpush.bf16.msra.mxu2 %v10228_v28  ;;  %v10384_v7 = vor.u32 %v11444_v32, %v10383_v61  ;;  %v3345_v21 = vperm.slane %v12204_v9, 7  ;;  %v10356_v17 = vor.u32 %v11432_v58, %v10353_v19  ;;  %v4095_v9 = vadd.f32 %v12221_v11, %v4082_v18  ;;  %v11416_v32 = vld [vmem:[#allocation2 + $0x1644] sm:$0xf]  ;;  %v10255_v37 = vld [vmem:[#allocation2 + $0x1600] sm:$0xf] }
 0x2a8   :  { %5189 = vmatmul.bf16.vlgmr.msrb.gmra.mxu1 %v12198_v34  ;;  %5215 = vmatmul.bf16.vlgmr.msrb.gmra.mxu3 %v12198_v34  ;;  %v11440_v34 = vld [vmem:[#allocation2 + $0x1704] sm:$0xf]  ;;  %v4208_v28 = vmax.f32 %v4173_v14, 0.0  ;;  %v10324_v11 = vor.u32 %v11424_v45, %v10321_v31  ;;  %v10231_v14 = vld [vmem:[#allocation2 + $0x15c8] sm:$0xf]  ;;  %v10000_v18 = vor.u32 %v11348_v38, %v9999_v42 }
 0x2a9   :  { %6043 = vmatpush.bf16.msra.mxu1 %v10480_v24  ;;  %6069 = vmatpush.bf16.msra.mxu3 %v10484_v6  ;;  %v10388_v12 = vor.u32 %v11440_v34, %v10385_v35  ;;  %v4204_v24 = vmax.f32 %v12217_v62, 0.0  ;;  %v10063_v6 = vld [vmem:[#allocation2 + $0x1480] sm:$0xf]  ;;  %v4185_v25 = vpop.f32.mrf.mxu2  ;;  %v4205_v61 = vmax.f32 %v4095_v9, 0.0  ;;  %v10036_v35 = vor.u32 %v11352_v46, %v10033_v57  ;;  %v11344_v2 = vld [vmem:[#allocation2 + $0x1404] sm:$0xf] }
 0x2aa   :  { %v4186_v62 = vadd.f32 %v4185_v25, %v3345_v21  ;;  %v10064_v50 = vor.u32 %v11364_v55, %v10063_v6  ;;  %v11469_v58 = vld [vmem:[#allocation2 + $0x17e4] sm:$0xf0]  ;;  %v11401_v19 = vld [vmem:[#allocation2 + $0x15cc] sm:$0xf]  ;;  %v10260_v6 = vor.u32 %v11408_v48, %v10257_v5  ;;  %v10232_v55 = vor.u32 %v11405_v1, %v10231_v14 }
 0x2ab   :  { %6031 = vmatpush.bf16.msra.mxu0 %v10192_v40  ;;  %6057 = vmatpush.bf16.msra.mxu2 %v10196_v44  ;;  %v4212_v29 = vadd.f32 %v4208_v28, %v4204_v24  ;;  %v11360_v40 = vld [vmem:[#allocation2 + $0x1484] sm:$0xf]  ;;  %v4198_v44 = vpop.f32.mrf.mxu3  ;;  %v4161_v47 = vpop.f32.mrf.mxu0  ;;  %v10233_v21 = vld [vmem:[#allocation2 + $0x15e8] sm:$0xf0]  ;;  %v10199_v25 = vld [vmem:[#allocation2 + $0x1588] sm:$0xf] }
 0x2ac   :  { %v4199_v52 = vadd.f32 %v4198_v44, %v4186_v62  ;;  %v11461_v9 = vld [vmem:[#allocation2 + $0x17a4] sm:$0xf0]  ;;  %v11393_v62 = vld [vmem:[#allocation2 + $0x158c] sm:$0xf] }
 0x2ad   :  { %6044 = vmatpush.bf16.msra.mxu1 %v10448_v43  ;;  %6070 = vmatpush.bf16.msra.mxu3 %v10452_v49  ;;  %v10065_v43 = vld [vmem:[#allocation2 + $0x14a0] sm:$0xf0]  ;;  %v4214_v49 = vadd.f32 %v4212_v29, %v12230_v23  ;;  %v4174_v51 = vpop.f32.mrf.mxu1  ;;  %v10488_v29 = vor.u32 %v11469_v58, %v10487_v60  ;;  %v10201_v44 = vld [vmem:[#allocation2 + $0x15a8] sm:$0xf0]  ;;  %v10135_v42 = vld [vmem:[#allocation2 + $0x1508] sm:$0xf] }
 0x2ae   :  { %v10068_v20 = vor.u32 %v11360_v40, %v10065_v43  ;;  %v10289_v23 = vld [vmem:[#allocation2 + $0x1660] sm:$0xf0]  ;;  %v10455_v40 = vld [vmem:[#allocation2 + $0x1788] sm:$0xf]  ;;  %v11457_v31 = vld [vmem:[#allocation2 + $0x178c] sm:$0xf] }
 0x2af   :  { %6032 = vmatpush.bf16.msra.mxu0 %v10160_v53  ;;  %6058 = vmatpush.bf16.msra.mxu2 %v10164_v3  ;;  %v10031_v53 = vld [vmem:[#allocation2 + $0x1440] sm:$0xf]  ;;  %v10457_v47 = vld [vmem:[#allocation2 + $0x17a8] sm:$0xf0]  ;;  %v10456_v51 = vor.u32 %v11461_v9, %v10455_v40  ;;  %v11381_v38 = vld [vmem:[#allocation2 + $0x1524] sm:$0xf0] }
 0x2b0   :  { %v11420_v3 = vld [vmem:[#allocation2 + $0x165c] sm:$0xf0]  ;;  %v10032_v63 = vor.u32 %v11356_v27, %v10031_v53  ;;  %v10423_v53 = vld [vmem:[#allocation2 + $0x1748] sm:$0xf]  ;;  %v10460_v27 = vor.u32 %v11457_v31, %v10457_v47  ;;  %v11449_v46 = vld [vmem:[#allocation2 + $0x174c] sm:$0xf]  ;;  %v10136_v5 = vor.u32 %v11381_v38, %v10135_v42 }
 0x2b1   :  { %6045 = vmatpush.bf16.msra.mxu1 %v10416_v54  ;;  %6071 = vmatpush.bf16.msra.mxu3 %v10420_v36  ;;  %v10287_v54 = vld [vmem:[#allocation2 + $0x1640] sm:$0xf]  ;;  %v4209_v36 = vmax.f32 %v4199_v52, 0.0  ;;  %v4187_v10 = vpop.f32.mrf.mxu2  ;;  %v10204_v52 = vor.u32 %v11393_v62, %v10201_v44  ;;  %v10425_v57 = vld [vmem:[#allocation2 + $0x1768] sm:$0xf0] }
 0x2b2   :  { %v10288_v34 = vor.u32 %v11420_v3, %v10287_v54  ;;  %v11453_v54 = vld [vmem:[#allocation2 + $0x1764] sm:$0xf0]  ;;  %v10169_v3 = vld [vmem:[#allocation2 + $0x1568] sm:$0xf0] }
 0x2b3   :  { %6033 = vmatpush.bf16.msra.mxu0 %v10128_v0  ;;  %6059 = vmatpush.bf16.msra.mxu2 %v10132_v4  ;;  %v4213_v41 = vadd.f32 %v4209_v36, %v4205_v61  ;;  %v11412_v0 = vld [vmem:[#allocation2 + $0x161c] sm:$0xf0]  ;;  %v10001_v4 = vld [vmem:[#allocation2 + $0x1420] sm:$0xf0]  ;;  %v4200_v16 = vpop.f32.mrf.mxu3  ;;  %v10103_v10 = vld [vmem:[#allocation2 + $0x14c8] sm:$0xf] }
 0x2b4   :  { %v10256_v28 = vor.u32 %v11412_v0, %v10255_v37  ;;  %v4352_v36 = vld [vmem:[#allocation4 + $0x4] ss:$8 sm:$0xf]  ;;  %v11445_v37 = vld [vmem:[#allocation2 + $0x1724] sm:$0xf0] }
 0x2b5   :  { %6046 = vmatpush.bf16.msra.mxu1 %v10384_v7  ;;  %6072 = vmatpush.bf16.msra.mxu3 %v10388_v12  ;;  %v10292_v7 = vor.u32 %v11416_v32, %v10289_v23  ;;  %v4215_v12 = vadd.f32 %v4213_v41, %v12233_v59  ;;  %v5236_v59 = vld [vmem:[%s12601_s0 + $0x50] sm:$0xff]  ;;  %v10424_v23 = vor.u32 %v11453_v54, %v10423_v53  ;;  %v10391_v41 = vld [vmem:[#allocation2 + $0x1708] sm:$0xf]  ;;  %v11377_v0 = vld [vmem:[#allocation2 + $0x150c] sm:$0xf] }
 0x2b6   :  { %v12255_v45 = vpack.c.bf16 %v5236_v59, %v5236_v59  ;;  %v4353_v32 = vld [vmem:[#allocation4 + $0x4] ss:$8 sm:$0xf0]  ;;  %v10392_v14 = vor.u32 %v11445_v37, %v10391_v41  ;;  %v11373_v60 = vld [vmem:[#allocation2 + $0x14e4] sm:$0xf0] }
 0x2b7   :  { %6034 = vmatpush.bf16.msra.mxu0 %v10096_v30  ;;  %6060 = vmatpush.bf16.msra.mxu2 %v10100_v56  ;;  %v12247_v24 = vadd.f32 %v4215_v12, %v4214_v49  ;;  %v10004_v30 = vor.u32 %v11344_v2, %v10001_v4  ;;  %v10489_v56 = vld [vmem:[#allocation2 + $0x17e8] sm:$0xf0]  ;;  %v12257_v49 = vpack.c.bf16 %v5237_v33, %v5237_v33  ;;  %v10359_v16 = vld [vmem:[#allocation2 + $0x16c8] sm:$0xf] }
 0x2b8   :  { %v10137_v2 = vld [vmem:[#allocation2 + $0x1528] sm:$0xf0]  ;;  %v11429_v9 = vld [vmem:[#allocation2 + $0x16a4] sm:$0xf0] }
 0x2b9   :  { %6047 = vmatpush.bf16.msra.mxu1 %v10352_v22  ;;  %6073 = vmatpush.bf16.msra.mxu3 %v10356_v17  ;;  %v11465_v22 = vld [vmem:[#allocation2 + $0x17cc] sm:$0xf]  ;;  %v10236_v17 = vor.u32 %v11401_v19, %v10233_v21  ;;  %v10140_v1 = vor.u32 %v11377_v0, %v10137_v2  ;;  %v10039_v54 = vld [vmem:[#allocation2 + $0x1448] sm:$0xf] }
 0x2ba   :  { %v10492_v43 = vor.u32 %v11465_v22, %v10489_v56  ;;  %v10393_v4 = vld [vmem:[#allocation2 + $0x1728] sm:$0xf0]  ;;  %v10007_v38 = vld [vmem:[#allocation2 + $0x1408] sm:$0xf] }
 0x2bb   :  { %6035 = vmatpush.bf16.msra.mxu0 %v10064_v50  ;;  %6061 = vmatpush.bf16.msra.mxu2 %v10068_v20  ;;  %v10200_v50 = vor.u32 %v11397_v39, %v10199_v25  ;;  %v11389_v20 = vld [vmem:[#allocation2 + $0x1564] sm:$0xf0]  ;;  %v11433_v56 = vld [vmem:[#allocation2 + $0x16cc] sm:$0xf] }
 0x2bc   :  { %v10361_v59 = vld [vmem:[#allocation2 + $0x16e8] sm:$0xf0]  ;;  %v11365_v25 = vld [vmem:[#allocation2 + $0x14a4] sm:$0xf0] }
 0x2bd   :  { %6048 = vmatpush.bf16.msra.mxu1 %v10320_v8  ;;  %6074 = vmatpush.bf16.msra.mxu3 %v10324_v11  ;;  %v10167_v8 = vld [vmem:[#allocation2 + $0x1548] sm:$0xf]  ;;  %v11385_v11 = vld [vmem:[#allocation2 + $0x154c] sm:$0xf] }
 0x2be   :  { %v10168_v61 = vor.u32 %v11389_v20, %v10167_v8  ;;  %v10327_v39 = vld [vmem:[#allocation2 + $0x1688] sm:$0xf]  ;;  %v11361_v62 = vld [vmem:[#allocation2 + $0x148c] sm:$0xf] }
 0x2bf   :  { %6036 = vmatpush.bf16.msra.mxu0 %v10032_v63  ;;  %6062 = vmatpush.bf16.msra.mxu2 %v10036_v35  ;;  %v10172_v63 = vor.u32 %v11385_v11, %v10169_v3  ;;  %v10428_v35 = vor.u32 %v11449_v46, %v10425_v57  ;;  %v10073_v44 = vld [vmem:[#allocation2 + $0x14a8] sm:$0xf0]  ;;  %v10328_v53 = vor.u32 %v11429_v9, %v10327_v39  ;;  %v11357_v11 = vld [vmem:[#allocation2 + $0x1464] sm:$0xf0]  ;;  %v10463_v39 = vld [vmem:[#allocation2 + $0x1790] sm:$0xf] }
 0x2c0   :  { %v10295_v3 = vld [vmem:[#allocation2 + $0x1648] sm:$0xf]  ;;  %v10040_v42 = vor.u32 %v11357_v11, %v10039_v54  ;;  %v11394_v9 = vld [vmem:[#allocation2 + $0x1594] sm:$0xf]  ;;  %v11454_v54 = vld [vmem:[#allocation2 + $0x176c] sm:$0xf0] }
 0x2c1   :  { %6049 = vmatpush.bf16.msra.mxu1 %v10288_v34  ;;  %6075 = vmatpush.bf16.msra.mxu3 %v10292_v7  ;;  %v12263_v34 = vor.u32 %v4353_v32, %v4352_v36  ;;  %v11441_v7 = vld [vmem:[#allocation2 + $0x170c] sm:$0xf]  ;;  %v11349_v41 = vld [vmem:[#allocation2 + $0x1424] sm:$0xf0]  ;;  %v11386_v11 = vld [vmem:[#allocation2 + $0x1554] sm:$0xf] }
 0x2c2   :  { %v10396_v21 = vor.u32 %v11441_v7, %v10393_v4  ;;  %v11353_v36 = vld [vmem:[#allocation2 + $0x144c] sm:$0xf]  ;;  %v10263_v0 = vld [vmem:[#allocation2 + $0x1608] sm:$0xf] }
 0x2c3   :  { %6037 = vmatpush.bf16.msra.mxu0 %v10000_v18  ;;  %6063 = vmatpush.bf16.msra.mxu2 %v10004_v30  ;;  %v4356_v48 = vperm.slane %v12263_v34, 0  ;;  %v5021_v12 = vpop.f32.mrf.mxu0  ;;  %v11437_v18 = vld [vmem:[#allocation2 + $0x16e4] sm:$0xf0]  ;;  %v10105_v30 = vld [vmem:[#allocation2 + $0x14e8] sm:$0xf0]  ;;  %v4357_v22 = vperm.slane %v12263_v34, 1 }
 0x2c4   :  { %v10360_v33 = vor.u32 %v11437_v18, %v10359_v16  ;;  %v10041_v32 = vld [vmem:[#allocation2 + $0x1468] sm:$0xf0]  ;;  %v11413_v2 = vld [vmem:[#allocation2 + $0x1624] sm:$0xf0]  ;;  %v10495_v16 = vld [vmem:[#allocation2 + $0x17d0] sm:$0xf]  ;;  %v10008_v18 = vor.u32 %v11349_v41, %v10007_v38 }
 0x2c5   :  { %6050 = vmatpush.bf16.msra.mxu1 %v10256_v28  ;;  %6076 = vmatpush.bf16.msra.mxu3 %v10260_v6  ;;  %v5022_v58 = vadd.f32 %v5021_v12, %v4356_v48  ;;  %v5034_v19 = vpop.f32.mrf.mxu1  ;;  %v11369_v28 = vld [vmem:[#allocation2 + $0x14cc] sm:$0xf]  ;;  %v10044_v37 = vor.u32 %v11353_v36, %v10041_v32  ;;  %v4358_v36 = vperm.slane %v12263_v34, 2  ;;  %v10399_v38 = vld [vmem:[#allocation2 + $0x1710] sm:$0xf] }
 0x2c6   :  { %6064 = vmatmul.bf16.vlgmr.msra.gmra.mxu2 %v12255_v45  ;;  %6038 = vmatmul.bf16.vlgmr.msra.gmra.mxu0 %v12255_v45  ;;  %v11345_v7 = vld [vmem:[#allocation2 + $0x140c] sm:$0xf] }
 0x2c7   :  { %6082 = vmatpush.bf16.msrb.mxu0 %v10232_v55  ;;  %6108 = vmatpush.bf16.msrb.mxu2 %v10236_v17  ;;  %v12267_v6 = vadd.f32 %v5034_v19, %v5022_v58  ;;  %v10104_v55 = vor.u32 %v11373_v60, %v10103_v10  ;;  %v10071_v17 = vld [vmem:[#allocation2 + $0x1488] sm:$0xf]  ;;  %v11409_v10 = vld [vmem:[#allocation2 + $0x160c] sm:$0xf]  ;;  %v11406_v60 = vld [vmem:[#allocation2 + $0x15ec] sm:$0xf0] }
 0x2c8   :  { %6077 = vmatmul.bf16.vlgmr.msra.gmra.mxu3 %v12257_v49  ;;  %6051 = vmatmul.bf16.vlgmr.msra.gmra.mxu1 %v12257_v49  ;;  %v10265_v12 = vld [vmem:[#allocation2 + $0x1628] sm:$0xf0]  ;;  %v11470_v58 = vld [vmem:[#allocation2 + $0x17ec] sm:$0xf0]  ;;  %v11402_v19 = vld [vmem:[#allocation2 + $0x15d4] sm:$0xf] }
 0x2c9   :  { %6095 = vmatpush.bf16.msrb.mxu1 %v10488_v29  ;;  %6121 = vmatpush.bf16.msrb.mxu3 %v10492_v43  ;;  %v10108_v29 = vor.u32 %v11369_v28, %v10105_v30  ;;  %v5047_v40 = vpop.f32.mrf.mxu2  ;;  %v10364_v43 = vor.u32 %v11433_v56, %v10361_v59  ;;  %v10264_v28 = vor.u32 %v11413_v2, %v10263_v0  ;;  %v10497_v56 = vld [vmem:[#allocation2 + $0x17f0] sm:$0xf0] }
 0x2ca   :  { %v5048_v31 = vadd.f32 %v5047_v40, %v4357_v22  ;;  %v11466_v22 = vld [vmem:[#allocation2 + $0x17d4] sm:$0xf]  ;;  %v10268_v59 = vor.u32 %v11409_v10, %v10265_v12 }
 0x2cb   :  { %6083 = vmatpush.bf16.msrb.mxu0 %v10200_v50  ;;  %6109 = vmatpush.bf16.msrb.mxu2 %v10204_v52  ;;  %v5060_v47 = vpop.f32.mrf.mxu3  ;;  %v11425_v50 = vld [vmem:[#allocation2 + $0x168c] sm:$0xf]  ;;  %v10072_v52 = vor.u32 %v11365_v25, %v10071_v17  ;;  %v5023_v20 = vpop.f32.mrf.mxu0  ;;  %v10207_v17 = vld [vmem:[#allocation2 + $0x1590] sm:$0xf]  ;;  %v10500_v40 = vor.u32 %v11466_v22, %v10497_v56  ;;  %v10145_v0 = vld [vmem:[#allocation2 + $0x1530] sm:$0xf0] }
 0x2cc   :  { %v12269_v8 = vadd.f32 %v5060_v47, %v5048_v31  ;;  %v11398_v25 = vld [vmem:[#allocation2 + $0x15ac] sm:$0xf0]  ;;  %v10465_v31 = vld [vmem:[#allocation2 + $0x17b0] sm:$0xf0]  ;;  %v4359_v56 = vperm.slane %v12263_v34, 3 }
 0x2cd   :  { %6096 = vmatpush.bf16.msrb.mxu1 %v10456_v51  ;;  %6122 = vmatpush.bf16.msrb.mxu3 %v10460_v27  ;;  %v10329_v51 = vld [vmem:[#allocation2 + $0x16a8] sm:$0xf0]  ;;  %v10076_v27 = vor.u32 %v11361_v62, %v10073_v44  ;;  %v5036_v46 = vpop.f32.mrf.mxu1  ;;  %v10209_v62 = vld [vmem:[#allocation2 + $0x15b0] sm:$0xf0]  ;;  %v10208_v47 = vor.u32 %v11398_v25, %v10207_v17  ;;  %v11390_v20 = vld [vmem:[#allocation2 + $0x156c] sm:$0xf0] }
 0x2ce   :  { %v10332_v57 = vor.u32 %v11425_v50, %v10329_v51  ;;  %v11458_v44 = vld [vmem:[#allocation2 + $0x1794] sm:$0xf]  ;;  %v10212_v51 = vor.u32 %v11394_v9, %v10209_v62  ;;  %v11366_v17 = vld [vmem:[#allocation2 + $0x14ac] sm:$0xf0] }
 0x2cf   :  { %6084 = vmatpush.bf16.msrb.mxu0 %v10168_v61  ;;  %6110 = vmatpush.bf16.msrb.mxu2 %v10172_v63  ;;  %v11421_v61 = vld [vmem:[#allocation2 + $0x1664] sm:$0xf0]  ;;  %v10297_v63 = vld [vmem:[#allocation2 + $0x1668] sm:$0xf0]  ;;  %v11450_v46 = vld [vmem:[#allocation2 + $0x1754] sm:$0xf] }
 0x2d0   :  { %v11442_v2 = vld [vmem:[#allocation2 + $0x1714] sm:$0xf]  ;;  %v10335_v25 = vld [vmem:[#allocation2 + $0x1690] sm:$0xf] }
 0x2d1   :  { %6097 = vmatpush.bf16.msrb.mxu1 %v10424_v23  ;;  %6123 = vmatpush.bf16.msrb.mxu3 %v10428_v35  ;;  %v11417_v23 = vld [vmem:[#allocation2 + $0x164c] sm:$0xf]  ;;  %v10296_v35 = vor.u32 %v11421_v61, %v10295_v3  ;;  %v5049_v4 = vpop.f32.mrf.mxu2  ;;  %v10177_v3 = vld [vmem:[#allocation2 + $0x1570] sm:$0xf0] }
 0x2d2   :  { %v10300_v48 = vor.u32 %v11417_v23, %v10297_v63  ;;  %v10180_v23 = vor.u32 %v11386_v11, %v10177_v3  ;;  %v10143_v63 = vld [vmem:[#allocation2 + $0x1510] sm:$0xf]  ;;  %v10369_v22 = vld [vmem:[#allocation2 + $0x16f0] sm:$0xf0] }
 0x2d3   :  { %6085 = vmatpush.bf16.msrb.mxu0 %v10136_v5  ;;  %6111 = vmatpush.bf16.msrb.mxu2 %v10140_v1  ;;  %v10009_v5 = vld [vmem:[#allocation2 + $0x1428] sm:$0xf0]  ;;  %v10239_v1 = vld [vmem:[#allocation2 + $0x15d0] sm:$0xf]  ;;  %v10081_v9 = vld [vmem:[#allocation2 + $0x14b0] sm:$0xf0] }
 0x2d4   :  { %v10012_v30 = vor.u32 %v11345_v7, %v10009_v5  ;;  %v10401_v7 = vld [vmem:[#allocation2 + $0x1730] sm:$0xf0]  ;;  %v11358_v11 = vld [vmem:[#allocation2 + $0x146c] sm:$0xf0] }
 0x2d5   :  { %6098 = vmatpush.bf16.msrb.mxu1 %v10392_v14  ;;  %6124 = vmatpush.bf16.msrb.mxu3 %v10396_v21  ;;  %v5062_v14 = vpop.f32.mrf.mxu3  ;;  %v10241_v21 = vld [vmem:[#allocation2 + $0x15f0] sm:$0xf0]  ;;  %v10303_v3 = vld [vmem:[#allocation2 + $0x1650] sm:$0xf] }
 0x2d7   :  { %6086 = vmatpush.bf16.msrb.mxu0 %v10104_v55  ;;  %6112 = vmatpush.bf16.msrb.mxu2 %v10108_v29  ;;  %v10240_v55 = vor.u32 %v11406_v60, %v10239_v1  ;;  %v10244_v29 = vor.u32 %v11402_v19, %v10241_v21  ;;  %v10111_v1 = vld [vmem:[#allocation2 + $0x14d0] sm:$0xf]  ;;  %v11370_v19 = vld [vmem:[#allocation2 + $0x14d4] sm:$0xf] }
 0x2d8   :  { %v11374_v60 = vld [vmem:[#allocation2 + $0x14ec] sm:$0xf0]  ;;  %v10113_v21 = vld [vmem:[#allocation2 + $0x14f0] sm:$0xf0] }
 0x2d9   :  { %6099 = vmatpush.bf16.msrb.mxu1 %v10360_v33  ;;  %6125 = vmatpush.bf16.msrb.mxu3 %v10364_v43  ;;  %v10496_v33 = vor.u32 %v11470_v58, %v10495_v16  ;;  %v11462_v43 = vld [vmem:[#allocation2 + $0x17ac] sm:$0xf0] }
 0x2da   :  { %v10464_v50 = vor.u32 %v11462_v43, %v10463_v39  ;;  %v10367_v16 = vld [vmem:[#allocation2 + $0x16d0] sm:$0xf]  ;;  %v11362_v43 = vld [vmem:[#allocation2 + $0x1494] sm:$0xf] }
 0x2db   :  { %6087 = vmatpush.bf16.msrb.mxu0 %v10072_v52  ;;  %6113 = vmatpush.bf16.msrb.mxu2 %v10076_v27  ;;  %v10175_v52 = vld [vmem:[#allocation2 + $0x1550] sm:$0xf]  ;;  %v10468_v27 = vor.u32 %v11458_v44, %v10465_v31  ;;  %v11426_v44 = vld [vmem:[#allocation2 + $0x1694] sm:$0xf] }
 0x2dc   :  { %v10176_v61 = vor.u32 %v11390_v20, %v10175_v52  ;;  %v11438_v58 = vld [vmem:[#allocation2 + $0x16ec] sm:$0xf0]  ;;  %v10337_v31 = vld [vmem:[#allocation2 + $0x16b0] sm:$0xf0] }
 0x2dd   :  { %6100 = vmatpush.bf16.msrb.mxu1 %v10328_v53  ;;  %6126 = vmatpush.bf16.msrb.mxu3 %v10332_v57  ;;  %v10431_v53 = vld [vmem:[#allocation2 + $0x1750] sm:$0xf]  ;;  %v10433_v57 = vld [vmem:[#allocation2 + $0x1770] sm:$0xf0] }
 0x2de   :  { %v10432_v32 = vor.u32 %v11454_v54, %v10431_v53  ;;  %v10436_v41 = vor.u32 %v11450_v46, %v10433_v57  ;;  %v10047_v54 = vld [vmem:[#allocation2 + $0x1450] sm:$0xf]  ;;  %v10340_v57 = vor.u32 %v11426_v44, %v10337_v31  ;;  %v10217_v44 = vld [vmem:[#allocation2 + $0x15b8] sm:$0xf0] }
 0x2df   :  { %6088 = vmatpush.bf16.msrb.mxu0 %v10040_v42  ;;  %6114 = vmatpush.bf16.msrb.mxu2 %v10044_v37  ;;  %v11382_v42 = vld [vmem:[#allocation2 + $0x152c] sm:$0xf0]  ;;  %v11378_v37 = vld [vmem:[#allocation2 + $0x1514] sm:$0xf]  ;;  %v11459_v31 = vld [vmem:[#allocation2 + $0x179c] sm:$0xf] }
 0x2e0   :  { %v10148_v14 = vor.u32 %v11378_v37, %v10145_v0  ;;  %v10271_v0 = vld [vmem:[#allocation2 + $0x1610] sm:$0xf] }
 0x2e1   :  { %6101 = vmatpush.bf16.msrb.mxu1 %v10296_v35  ;;  %6127 = vmatpush.bf16.msrb.mxu3 %v10300_v48  ;;  %v11446_v35 = vld [vmem:[#allocation2 + $0x172c] sm:$0xf0]  ;;  %v10144_v48 = vor.u32 %v11382_v42, %v10143_v63  ;;  %v10305_v63 = vld [vmem:[#allocation2 + $0x1670] sm:$0xf0]  ;;  %v10048_v42 = vor.u32 %v11358_v11, %v10047_v54  ;;  %v11455_v11 = vld [vmem:[#allocation2 + $0x1774] sm:$0xf0] }
 0x2e2   :  { %v10400_v12 = vor.u32 %v11446_v35, %v10399_v38  ;;  %v10015_v38 = vld [vmem:[#allocation2 + $0x1410] sm:$0xf] }
 0x2e3   :  { %6089 = vmatpush.bf16.msrb.mxu0 %v10008_v18  ;;  %6115 = vmatpush.bf16.msrb.mxu2 %v10012_v30  ;;  %v5073_v4 = vpop.f32.mrf.mxu0  ;;  %v10404_v18 = vor.u32 %v11442_v2, %v10401_v7  ;;  %v11434_v30 = vld [vmem:[#allocation2 + $0x16d4] sm:$0xf]  ;;  %v11414_v2 = vld [vmem:[#allocation2 + $0x162c] sm:$0xf0] }
 0x2e4   :  { %v5074_v5 = vadd.f32 %v5073_v4, %v4358_v36  ;;  %v10372_v39 = vor.u32 %v11434_v30, %v10369_v22  ;;  %v11354_v36 = vld [vmem:[#allocation2 + $0x1454] sm:$0xf]  ;;  %v10272_v30 = vor.u32 %v11414_v2, %v10271_v0  ;;  %v11447_v0 = vld [vmem:[#allocation2 + $0x1734] sm:$0xf0]  ;;  %v11379_v2 = vld [vmem:[#allocation2 + $0x151c] sm:$0xf] }
 0x2e5   :  { %6102 = vmatpush.bf16.msrb.mxu1 %v10264_v28  ;;  %6128 = vmatpush.bf16.msrb.mxu3 %v10268_v59  ;;  %v5086_v10 = vpop.f32.mrf.mxu1  ;;  %v10112_v59 = vor.u32 %v11374_v60, %v10111_v1  ;;  %v11346_v7 = vld [vmem:[#allocation2 + $0x1414] sm:$0xf]  ;;  %v11407_v1 = vld [vmem:[#allocation2 + $0x15f4] sm:$0xf0] }
 0x2e6   :  { %6090 = vmatmul.bf16.vlgmr.msrb.gmra.mxu0 %v12255_v45  ;;  %6116 = vmatmul.bf16.vlgmr.msrb.gmra.mxu2 %v12255_v45  ;;  %v12276_v28 = vadd.f32 %v5086_v10, %v5074_v5  ;;  %v11410_v5 = vld [vmem:[#allocation2 + $0x1614] sm:$0xf]  ;;  %v10503_v60 = vld [vmem:[#allocation2 + $0x17d8] sm:$0xf] }
 0x2e7   :  { %6134 = vmatpush.bf16.msra.mxu0 %v10240_v55  ;;  %6160 = vmatpush.bf16.msra.mxu2 %v10244_v29  ;;  %v10368_v55 = vor.u32 %v11438_v58, %v10367_v16  ;;  %v10079_v29 = vld [vmem:[#allocation2 + $0x1490] sm:$0xf]  ;;  %v10273_v10 = vld [vmem:[#allocation2 + $0x1630] sm:$0xf0]  ;;  %v11471_v58 = vld [vmem:[#allocation2 + $0x17f4] sm:$0xf0] }
 0x2e8   :  { %6103 = vmatmul.bf16.vlgmr.msrb.gmra.mxu1 %v12257_v49  ;;  %6129 = vmatmul.bf16.vlgmr.msrb.gmra.mxu3 %v12257_v49  ;;  %v10080_v52 = vor.u32 %v11366_v17, %v10079_v29  ;;  %v10504_v29 = vor.u32 %v11471_v58, %v10503_v60  ;;  %v10375_v58 = vld [vmem:[#allocation2 + $0x16d8] sm:$0xf] }
 0x2e9   :  { %6147 = vmatpush.bf16.msra.mxu1 %v10496_v33  ;;  %6173 = vmatpush.bf16.msra.mxu3 %v10500_v40  ;;  %v10116_v33 = vor.u32 %v11370_v19, %v10113_v21  ;;  %v11430_v40 = vld [vmem:[#allocation2 + $0x16ac] sm:$0xf0]  ;;  %v5099_v62 = vpop.f32.mrf.mxu2  ;;  %v11403_v19 = vld [vmem:[#allocation2 + $0x15dc] sm:$0xf] }
 0x2ea   :  { %v10336_v53 = vor.u32 %v11430_v40, %v10335_v25  ;;  %v10249_v21 = vld [vmem:[#allocation2 + $0x15f8] sm:$0xf0]  ;;  %v10215_v25 = vld [vmem:[#allocation2 + $0x1598] sm:$0xf] }
 0x2eb   :  { %6135 = vmatpush.bf16.msra.mxu0 %v10208_v47  ;;  %6161 = vmatpush.bf16.msra.mxu2 %v10212_v51  ;;  %v5100_v47 = vadd.f32 %v5099_v62, %v4359_v56  ;;  %v5112_v51 = vpop.f32.mrf.mxu3  ;;  %v11467_v56 = vld [vmem:[#allocation2 + $0x17dc] sm:$0xf]  ;;  %v10252_v17 = vor.u32 %v11403_v19, %v10249_v21  ;;  %v10471_v40 = vld [vmem:[#allocation2 + $0x1798] sm:$0xf] }
 0x2ec   :  { %v11395_v62 = vld [vmem:[#allocation2 + $0x159c] sm:$0xf] }
 0x2ed   :  { %6148 = vmatpush.bf16.msra.mxu1 %v10464_v50  ;;  %6174 = vmatpush.bf16.msra.mxu3 %v10468_v27  ;;  %v5075_v50 = vpop.f32.mrf.mxu0  ;;  %v5088_v20 = vpop.f32.mrf.mxu1  ;;  %v10084_v27 = vor.u32 %v11362_v43, %v10081_v9  ;;  %v12279_v46 = vadd.f32 %v5112_v51, %v5100_v47  ;;  %v11463_v9 = vld [vmem:[#allocation2 + $0x17b4] sm:$0xf0]  ;;  %v10473_v47 = vld [vmem:[#allocation2 + $0x17b8] sm:$0xf0] }
 0x2ee   :  { %v10472_v51 = vor.u32 %v11463_v9, %v10471_v40  ;;  %v10183_v20 = vld [vmem:[#allocation2 + $0x1558] sm:$0xf]  ;;  %v10476_v54 = vor.u32 %v11459_v31, %v10473_v47 }
 0x2ef   :  { %6136 = vmatpush.bf16.msra.mxu0 %v10176_v61  ;;  %6162 = vmatpush.bf16.msra.mxu2 %v10180_v23  ;;  %v11422_v61 = vld [vmem:[#allocation2 + $0x166c] sm:$0xf0]  ;;  %v11418_v23 = vld [vmem:[#allocation2 + $0x1654] sm:$0xf]  ;;  %v10087_v40 = vld [vmem:[#allocation2 + $0x1498] sm:$0xf] }
 0x2f0   :  { %v10304_v35 = vor.u32 %v11422_v61, %v10303_v3  ;;  %v10308_v4 = vor.u32 %v11418_v23, %v10305_v63  ;;  %v11387_v3 = vld [vmem:[#allocation2 + $0x155c] sm:$0xf]  ;;  %v4360_v23 = vperm.slane %v12263_v34, 4  ;;  %v10343_v9 = vld [vmem:[#allocation2 + $0x1698] sm:$0xf] }
 0x2f1   :  { %6149 = vmatpush.bf16.msra.mxu1 %v10432_v32  ;;  %6175 = vmatpush.bf16.msra.mxu3 %v10436_v41  ;;  %v10049_v32 = vld [vmem:[#allocation2 + $0x1470] sm:$0xf0]  ;;  %v11350_v41 = vld [vmem:[#allocation2 + $0x142c] sm:$0xf0]  ;;  %v11451_v61 = vld [vmem:[#allocation2 + $0x175c] sm:$0xf] }
 0x2f2   :  { %v10052_v37 = vor.u32 %v11354_v36, %v10049_v32  ;;  %v10441_v36 = vld [vmem:[#allocation2 + $0x1778] sm:$0xf0]  ;;  %v11431_v47 = vld [vmem:[#allocation2 + $0x16b4] sm:$0xf0] }
 0x2f3   :  { %6137 = vmatpush.bf16.msra.mxu0 %v10144_v48  ;;  %6163 = vmatpush.bf16.msra.mxu2 %v10148_v14  ;;  %v10017_v48 = vld [vmem:[#allocation2 + $0x1430] sm:$0xf0]  ;;  %v10247_v14 = vld [vmem:[#allocation2 + $0x15d8] sm:$0xf]  ;;  %v5114_v16 = vpop.f32.mrf.mxu3 }
 0x2f4   :  { %v10020_v22 = vor.u32 %v11346_v7, %v10017_v48  ;;  %v10153_v7 = vld [vmem:[#allocation2 + $0x1538] sm:$0xf0]  ;;  %v10119_v16 = vld [vmem:[#allocation2 + $0x14d8] sm:$0xf] }
 0x2f5   :  { %6150 = vmatpush.bf16.msra.mxu1 %v10400_v12  ;;  %6176 = vmatpush.bf16.msra.mxu3 %v10404_v18  ;;  %v5101_v12 = vpop.f32.mrf.mxu2  ;;  %v10016_v18 = vor.u32 %v11350_v41, %v10015_v38  ;;  %v10151_v38 = vld [vmem:[#allocation2 + $0x1518] sm:$0xf]  ;;  %v11443_v48 = vld [vmem:[#allocation2 + $0x171c] sm:$0xf]  ;;  %v10156_v60 = vor.u32 %v11379_v2, %v10153_v7 }
 0x2f6   :  { %v11383_v41 = vld [vmem:[#allocation2 + $0x1534] sm:$0xf0] }
 0x2f7   :  { %6138 = vmatpush.bf16.msra.mxu0 %v10112_v59  ;;  %6164 = vmatpush.bf16.msra.mxu2 %v10116_v33  ;;  %v10505_v59 = vld [vmem:[#allocation2 + $0x17f8] sm:$0xf0]  ;;  %v10248_v33 = vor.u32 %v11407_v1, %v10247_v14  ;;  %v10152_v12 = vor.u32 %v11383_v41, %v10151_v38  ;;  %v10023_v2 = vld [vmem:[#allocation2 + $0x1418] sm:$0xf] }
 0x2f8   :  { %v10508_v43 = vor.u32 %v11467_v56, %v10505_v59  ;;  %v10121_v56 = vld [vmem:[#allocation2 + $0x14f8] sm:$0xf0]  ;;  %v11351_v7 = vld [vmem:[#allocation2 + $0x1434] sm:$0xf0] }
 0x2f9   :  { %6151 = vmatpush.bf16.msra.mxu1 %v10368_v55  ;;  %6177 = vmatpush.bf16.msra.mxu3 %v10372_v39  ;;  %v10276_v55 = vor.u32 %v11410_v5, %v10273_v10  ;;  %v11399_v39 = vld [vmem:[#allocation2 + $0x15b4] sm:$0xf0]  ;;  %v10409_v5 = vld [vmem:[#allocation2 + $0x1738] sm:$0xf0] }
 0x2fa   :  { %v10216_v50 = vor.u32 %v11399_v39, %v10215_v25  ;;  %v10412_v19 = vor.u32 %v11443_v48, %v10409_v5  ;;  %v11435_v59 = vld [vmem:[#allocation2 + $0x16dc] sm:$0xf]  ;;  %v11415_v5 = vld [vmem:[#allocation2 + $0x1634] sm:$0xf0] }
 0x2fb   :  { %6139 = vmatpush.bf16.msra.mxu0 %v10080_v52  ;;  %6165 = vmatpush.bf16.msra.mxu2 %v10084_v27  ;;  %v10220_v52 = vor.u32 %v11395_v62, %v10217_v44  ;;  %v10439_v27 = vld [vmem:[#allocation2 + $0x1758] sm:$0xf]  ;;  %v11419_v38 = vld [vmem:[#allocation2 + $0x165c] sm:$0xf] }
 0x2fc   :  { %v10440_v63 = vor.u32 %v11455_v11, %v10439_v27  ;;  %v10344_v11 = vor.u32 %v11431_v47, %v10343_v9  ;;  %v10313_v41 = vld [vmem:[#allocation2 + $0x1678] sm:$0xf0]  ;;  %v11476_v47 = vld [vmem:[%s12604_s3 + $0x20] sm:$0xff] }
 0x2fd   :  { %6152 = vmatpush.bf16.msra.mxu1 %v10336_v53  ;;  %6178 = vmatpush.bf16.msra.mxu3 %v10340_v57  ;;  %v11391_v53 = vld [vmem:[#allocation2 + $0x1574] sm:$0xf0]  ;;  %v10185_v57 = vld [vmem:[#allocation2 + $0x1578] sm:$0xf0]  ;;  %v10316_v48 = vor.u32 %v11419_v38, %v10313_v41  ;;  %v11474_v38 = vld [vmem:[%s12604_s3 + $0x10] sm:$0xff] }
 0x2fe   :  { %v10184_v32 = vor.u32 %v11391_v53, %v10183_v20  ;;  %v10345_v20 = vld [vmem:[#allocation2 + $0x16b8] sm:$0xf0] }
 0x2ff   :  { %6140 = vmatpush.bf16.msra.mxu0 %v10048_v42  ;;  %6166 = vmatpush.bf16.msra.mxu2 %v10052_v37  ;;  %v10188_v42 = vor.u32 %v11387_v3, %v10185_v57  ;;  %v10444_v37 = vor.u32 %v11451_v61, %v10441_v36  ;;  %v10055_v57 = vld [vmem:[#allocation2 + $0x1458] sm:$0xf] }
 0x300   :  { %v11359_v61 = vld [vmem:[#allocation2 + $0x1474] sm:$0xf0] }
 0x301   :  { %6153 = vmatpush.bf16.msra.mxu1 %v10304_v35  ;;  %6179 = vmatpush.bf16.msra.mxu3 %v10308_v4  ;;  %v10407_v35 = vld [vmem:[#allocation2 + $0x1718] sm:$0xf] }
 0x302   :  { %v10408_v1 = vor.u32 %v11447_v0, %v10407_v35  ;;  %v10311_v36 = vld [vmem:[#allocation2 + $0x1658] sm:$0xf]  ;;  %v10056_v35 = vor.u32 %v11359_v61, %v10055_v57 }
 0x303   :  { %6141 = vmatpush.bf16.msra.mxu0 %v10016_v18  ;;  %6167 = vmatpush.bf16.msra.mxu2 %v10020_v22  ;;  %v5125_v4 = vpop.f32.mrf.mxu0  ;;  %v11375_v18 = vld [vmem:[#allocation2 + $0x14f4] sm:$0xf0]  ;;  %v11371_v22 = vld [vmem:[#allocation2 + $0x14dc] sm:$0xf] }
 0x304   :  { %v5126_v10 = vadd.f32 %v5125_v4, %v4360_v23  ;;  %v10124_v39 = vor.u32 %v11371_v22, %v10121_v56  ;;  %v11423_v23 = vld [vmem:[#allocation2 + $0x1674] sm:$0xf0] }
 0x305   :  { %6154 = vmatpush.bf16.msra.mxu1 %v10272_v30  ;;  %6180 = vmatpush.bf16.msra.mxu3 %v10276_v55  ;;  %v5138_v14 = vpop.f32.mrf.mxu1  ;;  %v11439_v30 = vld [vmem:[#allocation2 + $0x16f4] sm:$0xf0]  ;;  %v10377_v55 = vld [vmem:[#allocation2 + $0x16f8] sm:$0xf0] }
 0x306   :  { %6142 = vmatmul.bf16.vlgmr.msra.gmra.mxu0 %v12255_v45  ;;  %6168 = vmatmul.bf16.vlgmr.msra.gmra.mxu2 %v12255_v45  ;;  %v5139_v21 = vadd.f32 %v5138_v14, %v5126_v10  ;;  %v10376_v25 = vor.u32 %v11439_v30, %v10375_v58  ;;  %v10380_v44 = vor.u32 %v11435_v59, %v10377_v55  ;;  %v10279_v4 = vld [vmem:[#allocation2 + $0x1618] sm:$0xf]  ;;  %v11347_v10 = vld [vmem:[#allocation2 + $0x141c] sm:$0xf]  ;;  %v11478_v55 = vld [vmem:[%s12604_s3 + $0x30] sm:$0xff] }
 0x307   :  { %6186 = vmatpush.bf16.msrb.mxu0 %v10248_v33  ;;  %6212 = vmatpush.bf16.msrb.mxu2 %v10252_v17  ;;  %v5220_v33 = vmax.f32 %v12267_v6, 0.0  ;;  %v10120_v17 = vor.u32 %v11375_v18, %v10119_v16  ;;  %v10024_v18 = vor.u32 %v11351_v7, %v10023_v2  ;;  %v10280_v58 = vor.u32 %v11415_v5, %v10279_v4  ;;  %v11479_v30 = vld [vmem:[%s12604_s3 + $0x38] sm:$0xff]  ;;  %v11490_v2 = vld [vmem:[%s12604_s3 + $0x90] sm:$0xff]  ;;  %v11473_v5 = vld [vmem:[%s12604_s3 + $0x8] sm:$0xff] }
 0x308   :  { %6155 = vmatmul.bf16.vlgmr.msra.gmra.mxu1 %v12257_v49  ;;  %6181 = vmatmul.bf16.vlgmr.msra.gmra.mxu3 %v12257_v49  ;;  %v11487_v22 = vld [vmem:[%s12604_s3 + $0x78] sm:$0xff]  ;;  %v5221_v7 = vmax.f32 %v12269_v8, 0.0  ;;  %v5223_v4 = vmax.f32 %v12279_v46, 0.0  ;;  %v11489_v8 = vld [vmem:[%s12604_s3 + $0x88] sm:$0xff] }
 0x309   :  { %6199 = vmatpush.bf16.msrb.mxu1 %v10504_v29  ;;  %6225 = vmatpush.bf16.msrb.mxu3 %v10508_v43  ;;  %v5224_v29 = vmax.f32 %v5139_v21, 0.0  ;;  %v11367_v43 = vld [vmem:[#allocation2 + $0x14b4] sm:$0xf0]  ;;  %v12289_v31 = vpop.f32.mrf.mxu2  ;;  %v11497_v46 = vld [vmem:[%s12604_s3 + $0xc8] sm:$0xff] }
 0x30a   :  { %v10088_v27 = vor.u32 %v11367_v43, %v10087_v40  ;;  %v11495_v56 = vld [vmem:[%s12604_s3 + $0xb8] sm:$0xff]  ;;  %v4361_v40 = vperm.slane %v12263_v34, 5  ;;  %v11485_v43 = vld [vmem:[%s12604_s3 + $0x68] sm:$0xff] }
 0x30b   :  { %6187 = vmatpush.bf16.msrb.mxu0 %v10216_v50  ;;  %6213 = vmatpush.bf16.msrb.mxu2 %v10220_v52  ;;  %v12287_v62 = vadd.f32 %v5224_v29, %v5220_v33  ;;  %v11363_v50 = vld [vmem:[#allocation2 + $0x149c] sm:$0xf]  ;;  %v12291_v6 = vpop.f32.mrf.mxu3  ;;  %v5127_v53 = vpop.f32.mrf.mxu0  ;;  %v11486_v33 = vld [vmem:[%s12604_s3 + $0x70] sm:$0xff] }
 0x30c   :  { %v11427_v52 = vld [vmem:[#allocation2 + $0x169c] sm:$0xf]  ;;  %v11494_v29 = vld [vmem:[%s12604_s3 + $0xb0] sm:$0xff]  ;;  %v11500_v53 = vld [vmem:[%s12604_s3 + $0xe0] sm:$0xff] }
 0x30d   :  { %6200 = vmatpush.bf16.msrb.mxu1 %v10472_v51  ;;  %6226 = vmatpush.bf16.msrb.mxu3 %v10476_v54  ;;  %v10089_v51 = vld [vmem:[#allocation2 + $0x14b8] sm:$0xf0]  ;;  %v5140_v54 = vpop.f32.mrf.mxu1 }
 0x30e   :  { %v10092_v3 = vor.u32 %v11363_v50, %v10089_v51  ;;  %v11503_v59 = vld [vmem:[%s12604_s3 + $0xf8] sm:$0xff]  ;;  %v5152_v51 = vadd.f32 %v12289_v31, %v4361_v40  ;;  %v4363_v54 = vperm.slane %v12263_v34, 7  ;;  %v5222_v31 = vmax.f32 %v12276_v28, 0.0 }
 0x30f   :  { %6188 = vmatpush.bf16.msrb.mxu0 %v10184_v32  ;;  %6214 = vmatpush.bf16.msrb.mxu2 %v10188_v42  ;;  %v10348_v32 = vor.u32 %v11427_v52, %v10345_v20  ;;  %v10057_v42 = vld [vmem:[#allocation2 + $0x1478] sm:$0xf0]  ;;  %v11484_v52 = vld [vmem:[%s12604_s3 + $0x60] sm:$0xff] }
 0x310   :  { %v11492_v20 = vld [vmem:[%s12604_s3 + $0xa0] sm:$0xff]  ;;  %v5165_v57 = vadd.f32 %v12291_v6, %v5152_v51  ;;  %v11483_v61 = vld [vmem:[%s12604_s3 + $0x58] sm:$0xff]  ;;  %v11506_v51 = vld [vmem:[%s12604_s3 + $0x110] sm:$0xff] }
 0x311   :  { %6201 = vmatpush.bf16.msrb.mxu1 %v10440_v63  ;;  %6227 = vmatpush.bf16.msrb.mxu3 %v10444_v37  ;;  %v11355_v63 = vld [vmem:[#allocation2 + $0x145c] sm:$0xf]  ;;  %v10312_v37 = vor.u32 %v11423_v23, %v10311_v36  ;;  %v5153_v14 = vpop.f32.mrf.mxu2 }
 0x312   :  { %v10060_v0 = vor.u32 %v11355_v63, %v10057_v42  ;;  %v11499_v36 = vld [vmem:[%s12604_s3 + $0xd8] sm:$0xff]  ;;  %v11481_v14 = vld [vmem:[%s12604_s3 + $0x48] sm:$0xff] }
 0x313   :  { %6189 = vmatpush.bf16.msrb.mxu0 %v10152_v12  ;;  %6215 = vmatpush.bf16.msrb.mxu2 %v10156_v60  ;;  %v10025_v12 = vld [vmem:[#allocation2 + $0x1438] sm:$0xf0]  ;;  %v5166_v16 = vpop.f32.mrf.mxu3 }
 0x314   :  { %v10281_v60 = vld [vmem:[#allocation2 + $0x1638] sm:$0xf0] }
 0x315   :  { %6202 = vmatpush.bf16.msrb.mxu1 %v10408_v1  ;;  %6228 = vmatpush.bf16.msrb.mxu3 %v10412_v19  ;;  %v11411_v1 = vld [vmem:[#allocation2 + $0x161c] sm:$0xf]  ;;  %v10028_v19 = vor.u32 %v11347_v10, %v10025_v12 }
 0x316   :  { %v10284_v21 = vor.u32 %v11411_v1, %v10281_v60 }
 0x317   :  { %6190 = vmatpush.bf16.msrb.mxu0 %v10120_v17  ;;  %6216 = vmatpush.bf16.msrb.mxu2 %v10124_v39  ;;  %v11502_v17 = vld [vmem:[%s12604_s3 + $0xf0] sm:$0xff]  ;;  %v4362_v39 = vperm.slane %v12263_v34, 6  ;;  %v11491_v34 = vld [vmem:[%s12604_s3 + $0x98] sm:$0xff] }
 0x319   :  { %6203 = vmatpush.bf16.msrb.mxu1 %v10376_v25  ;;  %6229 = vmatpush.bf16.msrb.mxu3 %v10380_v44  ;;  %v11477_v25 = vld [vmem:[%s12604_s3 + $0x28] sm:$0xff] }
 0x31b   :  { %6191 = vmatpush.bf16.msrb.mxu0 %v10088_v27  ;;  %6217 = vmatpush.bf16.msrb.mxu2 %v10092_v3  ;;  %v11475_v3 = vld [vmem:[%s12604_s3 + $0x18] sm:$0xff] }
 0x31d   :  { %6204 = vmatpush.bf16.msrb.mxu1 %v10344_v11  ;;  %6230 = vmatpush.bf16.msrb.mxu3 %v10348_v32 }
 0x31f   :  { %6192 = vmatpush.bf16.msrb.mxu0 %v10056_v35  ;;  %6218 = vmatpush.bf16.msrb.mxu2 %v10060_v0  ;;  %v5225_v35 = vmax.f32 %v5165_v57, 0.0  ;;  %v11482_v0 = vld [vmem:[%s12604_s3 + $0x50] sm:$0xff] }
 0x321   :  { %6205 = vmatpush.bf16.msrb.mxu1 %v10312_v37  ;;  %6231 = vmatpush.bf16.msrb.mxu3 %v10316_v48  ;;  %v5229_v10 = vadd.f32 %v5225_v35, %v5221_v7  ;;  %v11515_v7 = vld [vmem:[%s12604_s3 + $0x158] sm:$0xff] }
 0x323   :  { %6193 = vmatpush.bf16.msrb.mxu0 %v10024_v18  ;;  %6219 = vmatpush.bf16.msrb.mxu2 %v10028_v19  ;;  %v5177_v9 = vpop.f32.mrf.mxu0  ;;  %v11472_v18 = vld [vmem:[%s12604_s3] sm:$0xff] }
 0x324   :  { %v5178_v44 = vadd.f32 %v5177_v9, %v4362_v39  ;;  %v11480_v19 = vld [vmem:[%s12604_s3 + $0x40] sm:$0xff]  ;;  %v11507_v9 = vld [vmem:[%s12604_s3 + $0x118] sm:$0xff] }
 0x325   :  { %6206 = vmatpush.bf16.msrb.mxu1 %v10280_v58  ;;  %6232 = vmatpush.bf16.msrb.mxu3 %v10284_v21  ;;  %v5190_v50 = vpop.f32.mrf.mxu1  ;;  %v11488_v21 = vld [vmem:[%s12604_s3 + $0x80] sm:$0xff] }
 0x326   :  { %6194 = vmatmul.bf16.vlgmr.msrb.gmra.mxu0 %v12255_v45  ;;  %6220 = vmatmul.bf16.vlgmr.msrb.gmra.mxu2 %v12255_v45  ;;  %v11493_v45 = vld [vmem:[%s12604_s3 + $0xa8] sm:$0xff]  ;;  %v5191_v27 = vadd.f32 %v5190_v50, %v5178_v44  ;;  %v11508_v39 = vld [vmem:[%s12604_s3 + $0x120] sm:$0xff] }
 0x327   :  { %6642 = vmatpush.bf16.msra.mxu0 %v11479_v30  ;;  %6668 = vmatpush.bf16.msra.mxu2 %v11495_v56  ;;  %v11496_v30 = vld [vmem:[%s12604_s3 + $0xc0] sm:$0xff]  ;;  %v1163_v56 = vpack.c.bf16 %v12076_v26, %v12076_v26 }
 0x328   :  { %6207 = vmatmul.bf16.vlgmr.msrb.gmra.mxu1 %v12257_v49  ;;  %6233 = vmatmul.bf16.vlgmr.msrb.gmra.mxu3 %v12257_v49  ;;  %v11501_v49 = vld [vmem:[%s12604_s3 + $0xe8] sm:$0xff]  ;;  %v5226_v11 = vmax.f32 %v5191_v27, 0.0 }
 0x329   :  { %6655 = vmatpush.bf16.msra.mxu1 %v11487_v22  ;;  %6681 = vmatpush.bf16.msra.mxu3 %v11503_v59  ;;  %v5203_v32 = vpop.f32.mrf.mxu2  ;;  %v11511_v22 = vld [vmem:[%s12604_s3 + $0x138] sm:$0xff]  ;;  %v11505_v27 = vld [vmem:[%s12604_s3 + $0x108] sm:$0xff] }
 0x32a   :  { %v5230_v28 = vadd.f32 %v5226_v11, %v5222_v31  ;;  %v5204_v23 = vadd.f32 %v5203_v32, %v4363_v54  ;;  %v5370_v59 = vld [vmem:[#allocation4 + $0x5] ss:$8 sm:$0xf] }
 0x32b   :  { %6643 = vmatpush.bf16.msra.mxu0 %v11478_v55  ;;  %6669 = vmatpush.bf16.msra.mxu2 %v11494_v29  ;;  %v5216_v63 = vpop.f32.mrf.mxu3  ;;  %v5179_v6 = vpop.f32.mrf.mxu0  ;;  %v5371_v55 = vld [vmem:[#allocation4 + $0x5] ss:$8 sm:$0xf0]  ;;  %v3199_v29 = vpack.c.bf16 %v12188_v13, %v12188_v13 }
 0x32c   :  { %v5232_v42 = vadd.f32 %v5230_v28, %v12287_v62  ;;  %v5217_v37 = vadd.f32 %v5216_v63, %v5204_v23  ;;  %v11498_v62 = vld [vmem:[%s12604_s3 + $0xd0] sm:$0xff]  ;;  %v12416_v26 = vor.u32 %v5371_v55, %v5370_v59  ;;  %v11504_v11 = vld [vmem:[%s12604_s3 + $0x100] sm:$0xff] }
 0x32d   :  { %6656 = vmatpush.bf16.msra.mxu1 %v11486_v33  ;;  %6682 = vmatpush.bf16.msra.mxu3 %v11502_v17  ;;  %v5192_v41 = vpop.f32.mrf.mxu1  ;;  %v2181_v33 = vpack.c.bf16 %v12132_v15, %v12132_v15  ;;  %v11510_v17 = vld [vmem:[%s12604_s3 + $0x130] sm:$0xff]  ;;  %v11509_v15 = vld [vmem:[%s12604_s3 + $0x128] sm:$0xff] }
 0x32e   :  { %v5227_v48 = vmax.f32 %v5217_v37, 0.0  ;;  %v5374_v13 = vperm.slane %v12416_v26, 0  ;;  %v5376_v57 = vperm.slane %v12416_v26, 2  ;;  %v11518_v41 = vld [vmem:[%s12604_s3 + $0x170] sm:$0xff]  ;;  %v11517_v37 = vld [vmem:[%s12604_s3 + $0x168] sm:$0xff] }
 0x32f   :  { %6644 = vmatpush.bf16.msra.mxu0 %v11477_v25  ;;  %6670 = vmatpush.bf16.msra.mxu2 %v11493_v45  ;;  %v4217_v25 = vpack.c.bf16 %v12247_v24, %v12247_v24  ;;  %v5375_v45 = vperm.slane %v12416_v26, 1 }
 0x330   :  { %v5231_v12 = vadd.f32 %v5227_v48, %v5223_v4 }
 0x331   :  { %6657 = vmatpush.bf16.msra.mxu1 %v11485_v43  ;;  %6683 = vmatpush.bf16.msra.mxu3 %v11501_v49  ;;  %v5205_v1 = vpop.f32.mrf.mxu2 }
 0x332   :  { %v5233_v60 = vadd.f32 %v5231_v12, %v5229_v10  ;;  %v11514_v10 = vld [vmem:[%s12604_s3 + $0x150] sm:$0xff]  ;;  %v11512_v1 = vld [vmem:[%s12604_s3 + $0x140] sm:$0xff] }
 0x333   :  { %6645 = vmatpush.bf16.msra.mxu0 %v11476_v47  ;;  %6671 = vmatpush.bf16.msra.mxu2 %v11492_v20  ;;  %v5218_v16 = vpop.f32.mrf.mxu3 }
 0x334   :  { %v5234_v58 = vadd.f32 %v5233_v60, %v5232_v42  ;;  %v11519_v42 = vld [vmem:[%s12604_s3 + $0x178] sm:$0xff]  ;;  %v5378_v60 = vperm.slane %v12416_v26, 4 }
 0x335   :  { %6658 = vmatpush.bf16.msra.mxu1 %v11484_v52  ;;  %6684 = vmatpush.bf16.msra.mxu3 %v11500_v53 }
 0x337   :  { %6646 = vmatpush.bf16.msra.mxu0 %v11475_v3  ;;  %6672 = vmatpush.bf16.msra.mxu2 %v11491_v34  ;;  %v5235_v3 = vpack.c.bf16 %v5234_v58, %v5234_v58  ;;  %v5379_v58 = vperm.slane %v12416_v26, 5 }
 0x339   :  { %6659 = vmatpush.bf16.msra.mxu1 %v11483_v61  ;;  %6685 = vmatpush.bf16.msra.mxu3 %v11499_v36 }
 0x33b   :  { %6647 = vmatpush.bf16.msra.mxu0 %v11474_v38  ;;  %6673 = vmatpush.bf16.msra.mxu2 %v11490_v2  ;;  %v11516_v2 = vld [vmem:[%s12604_s3 + $0x160] sm:$0xff] }
 0x33d   :  { %6660 = vmatpush.bf16.msra.mxu1 %v11482_v0  ;;  %6686 = vmatpush.bf16.msra.mxu3 %v11498_v62 }
 0x33f   :  { %6648 = vmatpush.bf16.msra.mxu0 %v11473_v5  ;;  %6674 = vmatpush.bf16.msra.mxu2 %v11489_v8 }
 0x341   :  { %6661 = vmatpush.bf16.msra.mxu1 %v11481_v14  ;;  %6687 = vmatpush.bf16.msra.mxu3 %v11497_v46  ;;  %v11513_v14 = vld [vmem:[%s12604_s3 + $0x148] sm:$0xff]  ;;  %s11876_s3 = smov 112  }
 0x343   :  { %6649 = vmatpush.bf16.msra.mxu0 %v11472_v18  ;;  %6675 = vmatpush.bf16.msra.mxu2 %v11488_v21  ;;  %v6039_v40 = vpop.f32.mrf.mxu0  ;;  %v5380_v18 = vperm.slane %v12416_v26, 6  ;;  %v5377_v21 = vperm.slane %v12416_v26, 3 }
 0x344   :  { %v6040_v24 = vadd.f32 %v6039_v40, %v5374_v13 }
 0x345   :  { %6662 = vmatpush.bf16.msra.mxu1 %v11480_v19  ;;  %6688 = vmatpush.bf16.msra.mxu3 %v11496_v30  ;;  %v6052_v43 = vpop.f32.mrf.mxu1 }
 0x346   :  { %6650 = vmatmul.bf16.vlgmr.msra.gmra.mxu0 %v1163_v56  ;;  %6676 = vmatmul.bf16.vlgmr.msra.gmra.mxu2 %v3199_v29  ;;  %v12426_v49 = vadd.f32 %v6052_v43, %v6040_v24 }
 0x347   :  { %6694 = vmatpush.bf16.msrb.mxu0 %v11511_v22 }
 0x348   :  { %6663 = vmatmul.bf16.vlgmr.msra.gmra.mxu1 %v2181_v33  ;;  %6689 = vmatmul.bf16.vlgmr.msra.gmra.mxu3 %v4217_v25  ;;  %v6238_v25 = vmax.f32 %v12426_v49, 0.0 }
 0x349   :  { %v6065_v44 = vpop.f32.mrf.mxu2  ;;  %6707 = vmatpush.bf16.msrb.mxu1 %v11519_v42  ;;  %v6729_v42 = vld [vmem:[#allocation7 + $0x40] sm:$0xff] }
 0x34a   :  { %v6066_v47 = vadd.f32 %v6065_v44, %v5375_v45 }
 0x34b   :  { %6695 = vmatpush.bf16.msrb.mxu0 %v11510_v17  ;;  %v6078_v50 = vpop.f32.mrf.mxu3  ;;  %v6041_v20 = vpop.f32.mrf.mxu0  ;;  %v5381_v17 = vperm.slane %v12416_v26, 7 }
 0x34c   :  { %v12434_v52 = vadd.f32 %v6078_v50, %v6066_v47 }
 0x34d   :  { %v6054_v53 = vpop.f32.mrf.mxu1  ;;  %6708 = vmatpush.bf16.msrb.mxu1 %v11518_v41 }
 0x34f   :  { %6696 = vmatpush.bf16.msrb.mxu0 %v11509_v15 }
 0x351   :  { %v6067_v54 = vpop.f32.mrf.mxu2  ;;  %6709 = vmatpush.bf16.msrb.mxu1 %v11517_v37 }
 0x353   :  { %6697 = vmatpush.bf16.msrb.mxu0 %v11508_v39  ;;  %v6080_v31 = vpop.f32.mrf.mxu3 }
 0x355   :  { %6710 = vmatpush.bf16.msrb.mxu1 %v11516_v2  ;;  %v6727_v2 = vld [vmem:[#allocation7 + $0x30] sm:$0xff] }
 0x357   :  { %6698 = vmatpush.bf16.msrb.mxu0 %v11507_v9 }
 0x359   :  { %6711 = vmatpush.bf16.msrb.mxu1 %v11515_v7 }
 0x35b   :  { %6699 = vmatpush.bf16.msrb.mxu0 %v11506_v51 }
 0x35d   :  { %6712 = vmatpush.bf16.msrb.mxu1 %v11514_v10 }
 0x35f   :  { %6700 = vmatpush.bf16.msrb.mxu0 %v11505_v27  ;;  %v6239_v27 = vmax.f32 %v12434_v52, 0.0  ;;  %v6730_v52 = vld [vmem:[#allocation7 + $0x48] sm:$0xff] }
 0x361   :  { %6713 = vmatpush.bf16.msrb.mxu1 %v11513_v14 }
 0x363   :  { %6701 = vmatpush.bf16.msrb.mxu0 %v11504_v11  ;;  %v6091_v61 = vpop.f32.mrf.mxu0 }
 0x364   :  { %v6092_v34 = vadd.f32 %v6091_v61, %v5376_v57 }
 0x365   :  { %v6104_v28 = vpop.f32.mrf.mxu1  ;;  %6714 = vmatpush.bf16.msrb.mxu1 %v11512_v1  ;;  %v6723_v1 = vld [vmem:[#allocation7 + $0x10] sm:$0xff] }
 0x366   :  { %6702 = vmatmul.bf16.vlgmr.msrb.gmra.mxu0 %v5235_v3  ;;  %v6105_v36 = vadd.f32 %v6104_v28, %v6092_v34  ;;  %v11612_v28 = vld [vmem:[#allocation6] ss:$0 sm:$0xff] }
 0x368   :  { %v6240_v15 = vmax.f32 %v6105_v36, 0.0 }
 0x369   :  { %v6117_v32 = vpop.f32.mrf.mxu2 }
 0x36a   :  { %v6118_v29 = vadd.f32 %v6117_v32, %v5377_v21 }
 0x36b   :  { %v6093_v23 = vpop.f32.mrf.mxu0  ;;  %v6130_v63 = vpop.f32.mrf.mxu3 }
 0x36c   :  { %v6131_v45 = vadd.f32 %v6130_v63, %v6118_v29 }
 0x36d   :  { %v6106_v6 = vpop.f32.mrf.mxu1 }
 0x36e   :  { %v6241_v54 = vmax.f32 %v6131_v45, 0.0  ;;  %v6731_v6 = vld [vmem:[#allocation7 + $0x50] sm:$0xff] }
 0x36f   :  { %6753 = vmatpush.msrb.mxu2 %v6731_v6 }
 0x371   :  { %v6119_v38 = vpop.f32.mrf.mxu2  ;;  %6754 = vmatpush.msrb.mxu2 %v6729_v42 }
 0x372   :  { %v6732_v38 = vld [vmem:[#allocation7 + $0x58] sm:$0xff] }
 0x373   :  { %v6132_v35 = vpop.f32.mrf.mxu3  ;;  %6773 = vmatpush.msrb.mxu3 %v6732_v38  ;;  %6755 = vmatpush.msrb.mxu2 %v6727_v2 }
 0x375   :  { %6774 = vmatpush.msrb.mxu3 %v6730_v52 }
 0x383   :  { %v6143_v0 = vpop.f32.mrf.mxu0 }
 0x384   :  { %v6144_v16 = vadd.f32 %v6143_v0, %v5378_v60  ;;  %v6724_v60 = vld [vmem:[#allocation7 + $0x18] sm:$0xff] }
 0x385   :  { %v6156_v62 = vpop.f32.mrf.mxu1 }
 0x386   :  { %v6157_v19 = vadd.f32 %v6156_v62, %v6144_v16  ;;  %v6728_v62 = vld [vmem:[#allocation7 + $0x38] sm:$0xff]  ;;  %v6721_v16 = vld [vmem:[#allocation7] sm:$0xff] }
 0x387   :  { %6775 = vmatpush.msrb.mxu3 %v6728_v62 }
 0x388   :  { %v6242_v55 = vmax.f32 %v6157_v19, 0.0 }
 0x389   :  { %v6169_v4 = vpop.f32.mrf.mxu2 }
 0x38a   :  { %v6170_v59 = vadd.f32 %v6169_v4, %v5379_v58  ;;  %v6246_v40 = vadd.f32 %v6242_v55, %v6238_v25 }
 0x38b   :  { %v6182_v48 = vpop.f32.mrf.mxu3  ;;  %v6145_v5 = vpop.f32.mrf.mxu0 }
 0x38c   :  { %v6183_v39 = vadd.f32 %v6182_v48, %v6170_v59  ;;  %v6725_v48 = vld [vmem:[#allocation7 + $0x20] sm:$0xff] }
 0x38d   :  { %v6158_v12 = vpop.f32.mrf.mxu1  ;;  %6756 = vmatpush.msrb.mxu2 %v6725_v48 }
 0x38e   :  { %v6243_v20 = vmax.f32 %v6183_v39, 0.0 }
 0x38f   :  { %6757 = vmatpush.msrb.mxu2 %v6723_v1 }
 0x390   :  { %v6247_v31 = vadd.f32 %v6243_v20, %v6239_v27  ;;  %v11878_v27 = vmov 28  }
 0x391   :  { %v6171_v8 = vpop.f32.mrf.mxu2  ;;  %6758 = vmatpush.msrb.mxu2 %v6721_v16  ;;  %11575 = vset.pattern.permute.xlu0 %v11878_v27 }
 0x393   :  { %v6184_v46 = vpop.f32.mrf.mxu3 }
 0x394   :  { %v6726_v46 = vld [vmem:[#allocation7 + $0x28] sm:$0xff] }
 0x395   :  { %6776 = vmatpush.msrb.mxu3 %v6726_v46 }
 0x397   :  { %6777 = vmatpush.msrb.mxu3 %v6724_v60 }
 0x3a3   :  { %v6195_v30 = vpop.f32.mrf.mxu0 }
 0x3a4   :  { %v6196_v22 = vadd.f32 %v6195_v30, %v5380_v18  ;;  %v6722_v18 = vld [vmem:[#allocation7 + $0x8] sm:$0xff] }
 0x3a5   :  { %v6208_v56 = vpop.f32.mrf.mxu1  ;;  %6778 = vmatpush.msrb.mxu3 %v6722_v18 }
 0x3a6   :  { %v6209_v33 = vadd.f32 %v6208_v56, %v6196_v22  ;;  %v12474_v22 = vld [vmem:[#allocation9] sm:$0x3] }
 0x3a7   :  { %v6735_v56 = vperm.slane %v12474_v22, 0 }
 0x3a8   :  { %v6244_v13 = vmax.f32 %v6209_v33, 0.0 }
 0x3a9   :  { %v6221_v43 = vpop.f32.mrf.mxu2 }
 0x3aa   :  { %v6248_v24 = vadd.f32 %v6244_v13, %v6240_v15  ;;  %v6222_v9 = vadd.f32 %v6221_v43, %v5381_v17 }
 0x3ab   :  { %v6234_v44 = vpop.f32.mrf.mxu3  ;;  %v6197_v47 = vpop.f32.mrf.mxu0 }
 0x3ac   :  { %v6250_v50 = vadd.f32 %v6248_v24, %v6246_v40  ;;  %v6235_v53 = vadd.f32 %v6234_v44, %v6222_v9 }
 0x3ad   :  { %v6210_v51 = vpop.f32.mrf.mxu1 }
 0x3ae   :  { %v6245_v26 = vmax.f32 %v6235_v53, 0.0 }
 0x3b0   :  { %v6249_v49 = vadd.f32 %v6245_v26, %v6241_v54  ;;  %v11879_v54 = vmov 26   ;;  %v11880_v26 = vmov 24  }
 0x3b1   :  { %v6223_v11 = vpop.f32.mrf.mxu2  ;;  %11573 = vset.pattern.permute.xlu2 %v11879_v54  ;;  %11571 = vset.pattern.permute.xlu1 %v11880_v26 }
 0x3b2   :  { %v6251_v3 = vadd.f32 %v6249_v49, %v6247_v31  ;;  %v11881_v11 = vmov 27  }
 0x3b3   :  { %v6236_v57 = vpop.f32.mrf.mxu3 }
 0x3b4   :  { %v6252_v61 = vadd.f32 %v6251_v3, %v6250_v50  ;;  %v11882_v3 = vmov 25   ;;  %v11883_v57 = vmov 30  }
 0x3b6   :  { %v6253_v34 = vpack.c.bf16 %v6252_v61, %v6252_v61  ;;  %v11884_v61 = vmov 29  }
 0x3b8   :  { %6715 = vmatmul.bf16.vlgmr.msrb.gmra.mxu1 %v6253_v34  ;;  %v11885_v34 = vmov 31  }
 0x3c3   :  { %v6651_v36 = vpop.f32.mrf.mxu0 }
 0x3c4   :  { %v6652_v32 = vadd.f32 %v11612_v28, %v6651_v36  ;;  %v6783_v28 = vld [vmem:[#allocation10] sm:$0xff] }
 0x3c5   :  { %v6664_v23 = vpop.f32.mrf.mxu1  ;;  %v12490_v36 = vperm.slane %v6783_v28, 2  ;;  %v12500_v52 = vperm.slane %v6783_v28, 1  ;;  %v12506_v2 = vperm.slane %v6783_v28, 6  ;;  %v12510_v48 = vperm.slane %v6783_v28, 5 }
 0x3c6   :  { %v6665_v63 = vadd.f32 %v6664_v23, %v6652_v32 }
 0x3c9   :  { %v6677_v41 = vpop.f32.mrf.mxu2 }
 0x3ca   :  { %v6678_v35 = vadd.f32 %v6677_v41, %v6665_v63  ;;  %v12494_v63 = vperm.slane %v6783_v28, 0  ;;  %v12498_v41 = vperm.slane %v6783_v28, 3 }
 0x3cb   :  { %v6690_v37 = vpop.f32.mrf.mxu3  ;;  %v6653_v0 = vpop.f32.mrf.mxu0 }
 0x3cc   :  { %v6691_v4 = vadd.f32 %v6690_v37, %v6678_v35 }
 0x3cd   :  { %v6666_v7 = vpop.f32.mrf.mxu1 }
 0x3ce   :  { %v12508_v7 = vperm.slane %v6783_v28, 4 }
 0x3d1   :  { %v6679_v5 = vpop.f32.mrf.mxu2 }
 0x3d3   :  { %v6692_v10 = vpop.f32.mrf.mxu3 }
 0x3e3   :  { %v6703_v12 = vpop.f32.mrf.mxu0 }
 0x3e4   :  { %v6704_v14 = vadd.f32 %v6703_v12, %v6691_v4 }
 0x3eb   :  { %v6705_v8 = vpop.f32.mrf.mxu0 }
 0x3ec   :  { %v12518_v8 = vperm.slane %v6783_v28, 7 }
 0x435   :  { %v6716_v58 = vpop.f32.mrf.mxu1 }
 0x436   :  { %v6717_v19 = vadd.f32 %v6716_v58, %v6704_v14 }
 0x438   :  { %v6720_v21 = vmax.f32 %v6717_v19, 0.0 }
 0x43a   :  { %10701 = vmatmul.msk.f32.vlgmr.msrb.gmra.mxu2 %vm6739_vm0, %v6720_v21  ;;  %10702 = vmatmul.msk.f32.vlgmr.msrb.gmra.mxu3 %vm6739_vm0, %v6720_v21 }
 0x43d   :  { %v6718_v30 = vpop.f32.mrf.mxu1 }
 0x4bd   :  { %v6760_v59 = vpop.f32.mrf.mxu2 }
 0x4be   :  { %v12477_v55 = vadd.f32 %v6760_v59, %v6735_v56 }
 0x4c0   :  { %11614 = vtanh.f32 %v12477_v55  ;;  %v6784_v29 = vsub.f32 0.0, %v12477_v55 }
 0x4c2   :  { %v6785_v17 = vmul.f32 1.442695, %v6784_v29 }
 0x4c4   :  { %11616 = vpow2.f32 %v6785_v17 }
 0x4c6   :  { %v11615_v33 = vpop.eup %11614 }
 0x4c7   :  { %6804 = vrot.lane.b32.xlu0 %v11615_v33, %s11876_s3 }
 0x4ca   :  { %v11617_v25 = vpop.eup %11616 }
 0x4cb   :  { %v6787_v15 = vadd.f32 1.0, %v11617_v25 }
 0x4cd   :  { %11618 = vrcp.f32 %v6787_v15  ;;  %v6799_v45 = vand.u32 2147483648, %v6787_v15  ;;  %vm6793_vm2 = vweird.f32 %v6787_v15  ;;  %v6797_v9 = vand.u32 2147483647, %v6787_v15 }
 0x4cf   :  { %v6800_v47 = vor.u32 1.1754944e-38, %v6799_v45  ;;  %vm6798_vm4 = vcmp.eq.f32.partialorder %v6797_v9, 8.507059e+37 }
 0x4d3   :  { %v11619_v13 = vpop.eup %11618 }
 0x4d4   :  { %v6789_v39 = vmul.f32 %v11619_v13, %v6787_v15  ;;  %vm6794_vm1 = vweird.f32 %v11619_v13 }
 0x4d5   :  { %vm6795_vm3 = vmor %vm6793_vm2, %vm6794_vm1 }
 0x4d6   :  { %v6790_v40 = vsub.f32 1.0, %v6789_v39 }
 0x4d8   :  { %v6791_v24 = vmul.f32 %v11619_v13, %v6790_v40 }
 0x4da   :  { %v6792_v43 = vadd.f32 %v11619_v13, %v6791_v24 }
 0x4dc   :  { %v6796_v44 = vsel %vm6795_vm3, %v11619_v13, %v6792_v43 }
 0x4dd   :  { %v6801_v51 = vsel %vm6798_vm4, %v6800_v47, %v6796_v44 }
 0x539   :  { %v6805_v50 = vpop.permute.xlu0 %6804 }
 0x53a   :  { %v6807_v20 = vmul.f32 %v6805_v50, %v6801_v51 }
 0x53c   :  { %11620 = vtanh.f32 %v6807_v20 }
 0x542   :  { %v11621_v53 = vpop.eup %11620 }
 0x543   :  { %6810 = vrot.lane.b32.xlu0 %v11621_v53, %s11877_s20 }
 0x5b5   :  { %v6811_v31 = vpop.permute.xlu0 %6810 }
 0x5b6   :  { %v6813_v49 = vmul.f32 %v6811_v31, %v6801_v51 }
 0x5b8   :  { %6860 = vperm.xlu0 %11575, %v6813_v49   ;;  %6838 = vperm.xlu2 %11573, %v6813_v49  }
 0x5b9   :  { %6816 = vperm.xlu1 %11571, %v6813_v49  }
 0x5c0   :  { %11574 = vset.pattern.permute.xlu2 %v11881_v11 }
 0x5c1   :  { %11572 = vset.pattern.permute.xlu1 %v11882_v3  ;;  %6849 = vperm.xlu2 %11574, %v6813_v49  }
 0x5c2   :  { %6827 = vperm.xlu1 %11572, %v6813_v49  }
 0x5c9   :  { %11577 = vset.pattern.permute.xlu2 %v11883_v57 }
 0x5ca   :  { %11576 = vset.pattern.permute.xlu1 %v11884_v61  ;;  %6882 = vperm.xlu2 %11577, %v6813_v49  }
 0x5cb   :  { %6871 = vperm.xlu1 %11576, %v6813_v49  }
 0x5d3   :  { %11578 = vset.pattern.permute.xlu1 %v11885_v34 }
 0x5d4   :  { %6893 = vperm.xlu1 %11578, %v6813_v49  }
 0x612   :  { %v6839_v32 = vpop.permute.xlu2 %6838 }
 0x613   :  { %v6842_v23 = vmul.f32 %v12490_v36, %v6839_v32 }
 0x615   :  { %6844 = vrot.lane.b32.xlu1 %v6842_v23, %s11871_s14 }
 0x61b   :  { %v6850_v38 = vpop.permute.xlu2 %6849 }
 0x61c   :  { %v6853_v35 = vmul.f32 %v12498_v41, %v6850_v38 }
 0x624   :  { %v6883_v62 = vpop.permute.xlu2 %6882 }
 0x625   :  { %v6886_v5 = vmul.f32 %v12506_v2, %v6883_v62  ;;  %v11888_v62 = vmov 57  }
 0x626   :  { %11580 = vset.pattern.permute.xlu0 %v11888_v62 }
 0x62a   :  { %v6861_v4 = vpop.permute.xlu0 %6860 }
 0x62b   :  { %v6817_v6 = vpop.permute.xlu1 %6816  ;;  %v6864_v10 = vmul.f32 %v12508_v7, %v6861_v4  ;;  %v11889_v4 = vmov 56  }
 0x62c   :  { %v6820_v42 = vmul.f32 %v12494_v63, %v6817_v6  ;;  %11579 = vset.pattern.permute.xlu2 %v11889_v4 }
 0x62e   :  { %6822 = vrot.lane.b32.xlu2 %v6820_v42, %s11871_s14 }
 0x634   :  { %v6828_v37 = vpop.permute.xlu1 %6827 }
 0x635   :  { %v6831_v0 = vmul.f32 %v12500_v52, %v6828_v37 }
 0x636   :  { %6855 = vrot.lane.b32.xlu2 %v6853_v35, %s11871_s14 }
 0x637   :  { %6833 = vrot.lane.b32.xlu0 %v6831_v0, %s11871_s14 }
 0x63d   :  { %v6872_v12 = vpop.permute.xlu1 %6871 }
 0x63e   :  { %v6875_v14 = vmul.f32 %v12510_v48, %v6872_v12  ;;  %6888 = vrot.lane.b32.xlu2 %v6886_v5, %s11871_s14  ;;  %v11890_v5 = vmov 58  }
 0x63f   :  { %6866 = vrot.lane.b32.xlu0 %v6864_v10, %s11871_s14  ;;  %11581 = vset.pattern.permute.xlu1 %v11890_v5 }
 0x640   :  { %6877 = vrot.lane.b32.xlu1 %v6875_v14, %s11871_s14  ;;  %v11891_v14 = vmov 60  }
 0x646   :  { %6923 = vrot.lane.b32.xlu2 %v6807_v20, %s11886_s1  ;;  %v6894_v46 = vpop.permute.xlu1 %6893 }
 0x647   :  { %v6897_v1 = vmul.f32 %v12518_v8, %v6894_v46  ;;  %v11892_v46 = vmov 62  }
 0x649   :  { %6899 = vrot.lane.b32.xlu0 %v6897_v1, %s11871_s14  ;;  %v11893_v1 = vmov 59  }
 0x687   :  { %v6845_v19 = vpop.permute.xlu1 %6844 }
 0x688   :  { %v6823_v60 = vpop.permute.xlu2 %6822 }
 0x689   :  { %v6825_v16 = vadd.f32 %v6823_v60, %v12477_v55  ;;  %v11894_v60 = vmov 63  }
 0x690   :  { %v6856_v30 = vpop.permute.xlu2 %6855 }
 0x698   :  { %v6889_v25 = vpop.permute.xlu2 %6888 }
 0x6a0   :  { %v6924_v42 = vpop.permute.xlu2 %6923 }
 0x6a9   :  { %v6834_v18 = vpop.permute.xlu0 %6833 }
 0x6aa   :  { %v6836_v58 = vadd.f32 %v6834_v18, %v6825_v16  ;;  %v11895_v16 = vmov 61  }
 0x6ac   :  { %v6847_v21 = vadd.f32 %v6845_v19, %v6836_v58 }
 0x6ae   :  { %v6858_v56 = vadd.f32 %v6856_v30, %v6847_v21 }
 0x6b1   :  { %v6867_v59 = vpop.permute.xlu0 %6866 }
 0x6b2   :  { %v6869_v33 = vadd.f32 %v6867_v59, %v6858_v56  ;;  %v6878_v29 = vpop.permute.xlu1 %6877 }
 0x6b4   :  { %v6880_v17 = vadd.f32 %v6878_v29, %v6869_v33 }
 0x6b6   :  { %v6891_v15 = vadd.f32 %v6889_v25, %v6880_v17 }
 0x6bb   :  { %v6900_v13 = vpop.permute.xlu0 %6899 }
 0x6bc   :  { %v6902_v39 = vadd.f32 %v6900_v13, %v6891_v15 }
 0x6be   :  { %11622 = vtanh.f32 %v6902_v39  ;;  %v6903_v24 = vsub.f32 0.0, %v6902_v39 }
 0x6c0   :  { %v6904_v43 = vmul.f32 1.442695, %v6903_v24 }
 0x6c2   :  { %11624 = vpow2.f32 %v6904_v43 }
 0x6c4   :  { %v11623_v40 = vpop.eup %11622 }
 0x6c5   :  { %6928 = vrot.lane.b32.xlu1 %v11623_v40, %s11876_s3 }
 0x6c8   :  { %v11625_v45 = vpop.eup %11624 }
 0x6c9   :  { %v6906_v9 = vadd.f32 1.0, %v11625_v45 }
 0x6cb   :  { %11626 = vrcp.f32 %v6906_v9  ;;  %v6918_v53 = vand.u32 2147483648, %v6906_v9  ;;  %vm6912_vm6 = vweird.f32 %v6906_v9  ;;  %v6916_v31 = vand.u32 2147483647, %v6906_v9 }
 0x6cd   :  { %v6919_v28 = vor.u32 1.1754944e-38, %v6918_v53  ;;  %vm6917_vm8 = vcmp.eq.f32.partialorder %v6916_v31, 8.507059e+37 }
 0x6d1   :  { %v11627_v44 = vpop.eup %11626 }
 0x6d2   :  { %v6908_v47 = vmul.f32 %v11627_v44, %v6906_v9  ;;  %vm6913_vm5 = vweird.f32 %v11627_v44 }
 0x6d3   :  { %vm6914_vm7 = vmor %vm6912_vm6, %vm6913_vm5 }
 0x6d4   :  { %v6909_v50 = vsub.f32 1.0, %v6908_v47 }
 0x6d6   :  { %v6910_v51 = vmul.f32 %v11627_v44, %v6909_v50 }
 0x6d8   :  { %v6911_v20 = vadd.f32 %v11627_v44, %v6910_v51 }
 0x6da   :  { %v6915_v49 = vsel %vm6914_vm7, %v11627_v44, %v6911_v20 }
 0x6db   :  { %v6920_v23 = vsel %vm6917_vm8, %v6919_v28, %v6915_v49 }
 0x6dc   :  { %v6926_v38 = vmul.f32 %v6924_v42, %v6920_v23 }
 0x737   :  { %v6929_v32 = vpop.permute.xlu1 %6928 }
 0x738   :  { %v6931_v6 = vmul.f32 %v6929_v32, %v6920_v23 }
 0x73a   :  { %6933 = vrot.lane.b32.xlu0 %v6931_v6, %s11887_s21 }
 0x7ac   :  { %v6934_v35 = vpop.permute.xlu0 %6933 }
 0x7ad   :  { %v6936_v37 = vadd.f32 %v6934_v35, %v6926_v38 }
 0x7af   :  { %11628 = vtanh.f32 %v6936_v37 }
 0x7b5   :  { %v11629_v0 = vpop.eup %11628 }
 0x7b6   :  { %6939 = vrot.lane.b32.xlu1 %v11629_v0, %s11867_s24 }
 0x828   :  { %v6940_v10 = vpop.permute.xlu1 %6939 }
 0x829   :  { %v6942_v12 = vmul.f32 %v6940_v10, %v6920_v23 }
 0x82b   :  { %6965 = vperm.xlu1 %11581, %v6942_v12   ;;  %6955 = vperm.xlu0 %11580, %v6942_v12  }
 0x82c   :  { %6945 = vperm.xlu2 %11579, %v6942_v12  }
 0x833   :  { %11583 = vset.pattern.permute.xlu1 %v11891_v14  ;;  %11585 = vset.pattern.permute.xlu0 %v11892_v46 }
 0x834   :  { %11582 = vset.pattern.permute.xlu2 %v11893_v1  ;;  %6985 = vperm.xlu1 %11583, %v6942_v12  }
 0x835   :  { %7005 = vperm.xlu0 %11585, %v6942_v12   ;;  %6975 = vperm.xlu2 %11582, %v6942_v12  }
 0x83c   :  { %11586 = vset.pattern.permute.xlu1 %v11894_v60 }
 0x83d   :  { %11584 = vset.pattern.permute.xlu2 %v11895_v16  ;;  %7015 = vperm.xlu1 %11586, %v6942_v12  }
 0x83e   :  { %6995 = vperm.xlu2 %11584, %v6942_v12  }
 0x886   :  { %v6946_v18 = vpop.permute.xlu2 %6945 }
 0x887   :  { %v6948_v58 = vmul.f32 %v6946_v18, %v12494_v63 }
 0x889   :  { %6950 = vrot.lane.b32.xlu2 %v6948_v58, %s11896_s22 }
 0x88f   :  { %v6976_v19 = vpop.permute.xlu2 %6975 }
 0x890   :  { %v6978_v21 = vmul.f32 %v6976_v19, %v12498_v41 }
 0x892   :  { %6980 = vrot.lane.b32.xlu0 %v6978_v21, %s11896_s22 }
 0x898   :  { %v6996_v29 = vpop.permute.xlu2 %6995 }
 0x899   :  { %v6998_v17 = vmul.f32 %v6996_v29, %v12510_v48  ;;  %v11897_v29 = vmov 89  }
 0x89a   :  { %11588 = vset.pattern.permute.xlu1 %v11897_v29 }
 0x89d   :  { %v6966_v30 = vpop.permute.xlu1 %6965  ;;  %v6956_v56 = vpop.permute.xlu0 %6955 }
 0x89e   :  { %v6968_v59 = vmul.f32 %v6966_v30, %v12490_v36  ;;  %v6958_v33 = vmul.f32 %v6956_v56, %v12500_v52 }
 0x8a0   :  { %6960 = vrot.lane.b32.xlu1 %v6958_v33, %s11896_s22  ;;  %6970 = vrot.lane.b32.xlu2 %v6968_v59, %s11896_s22 }
 0x8a6   :  { %v6986_v25 = vpop.permute.xlu1 %6985 }
 0x8a7   :  { %v6988_v15 = vmul.f32 %v6986_v25, %v12508_v7  ;;  %v7006_v13 = vpop.permute.xlu0 %7005  ;;  %v11899_v25 = vmov 90  }
 0x8a8   :  { %v7008_v39 = vmul.f32 %v7006_v13, %v12506_v2  ;;  %7000 = vrot.lane.b32.xlu2 %v6998_v17, %s11896_s22  ;;  %v11898_v17 = vmov 88  }
 0x8a9   :  { %6990 = vrot.lane.b32.xlu1 %v6988_v15, %s11896_s22  ;;  %11587 = vset.pattern.permute.xlu0 %v11898_v17 }
 0x8aa   :  { %7010 = vrot.lane.b32.xlu0 %v7008_v39, %s11896_s22  ;;  %11589 = vset.pattern.permute.xlu2 %v11899_v25  ;;  %v11900_v39 = vmov 92  }
 0x8af   :  { %v7016_v40 = vpop.permute.xlu1 %7015 }
 0x8b0   :  { %v7018_v24 = vmul.f32 %v7016_v40, %v12518_v8  ;;  %v11901_v40 = vmov 91  }
 0x8b2   :  { %7044 = vrot.lane.b32.xlu0 %v6936_v37, %s11871_s14  ;;  %7020 = vrot.lane.b32.xlu1 %v7018_v24, %s11896_s22  ;;  %v11902_v24 = vmov 93  }
 0x8e3   :  { %v6951_v43 = vpop.permute.xlu2 %6950 }
 0x8e4   :  { %v6953_v45 = vadd.f32 %v6951_v43, %v12477_v55  ;;  %v11903_v43 = vmov 95  }
 0x8fa   :  { %v6971_v47 = vpop.permute.xlu2 %6970 }
 0x902   :  { %v7001_v49 = vpop.permute.xlu2 %7000 }
 0x904   :  { %v6981_v51 = vpop.permute.xlu0 %6980 }
 0x912   :  { %v6961_v9 = vpop.permute.xlu1 %6960 }
 0x913   :  { %v6963_v44 = vadd.f32 %v6961_v9, %v6953_v45  ;;  %v11904_v45 = vmov 94  }
 0x915   :  { %v6973_v50 = vadd.f32 %v6971_v47, %v6963_v44 }
 0x917   :  { %v6983_v20 = vadd.f32 %v6981_v51, %v6973_v50 }
 0x91b   :  { %v6991_v53 = vpop.permute.xlu1 %6990 }
 0x91c   :  { %v6993_v31 = vadd.f32 %v6991_v53, %v6983_v20  ;;  %v7011_v32 = vpop.permute.xlu0 %7010 }
 0x91e   :  { %v7003_v28 = vadd.f32 %v7001_v49, %v6993_v31 }
 0x920   :  { %v7013_v23 = vadd.f32 %v7011_v32, %v7003_v28 }
 0x924   :  { %v7021_v6 = vpop.permute.xlu1 %7020  ;;  %v7045_v21 = vpop.permute.xlu0 %7044 }
 0x925   :  { %v7023_v42 = vadd.f32 %v7021_v6, %v7013_v23 }
 0x927   :  { %11630 = vtanh.f32 %v7023_v42  ;;  %v7024_v35 = vsub.f32 0.0, %v7023_v42 }
 0x929   :  { %v7025_v37 = vmul.f32 1.442695, %v7024_v35 }
 0x92b   :  { %11632 = vpow2.f32 %v7025_v37 }
 0x92d   :  { %v11631_v38 = vpop.eup %11630 }
 0x92e   :  { %7049 = vrot.lane.b32.xlu2 %v11631_v38, %s11876_s3 }
 0x931   :  { %v11633_v0 = vpop.eup %11632 }
 0x932   :  { %v7027_v62 = vadd.f32 1.0, %v11633_v0 }
 0x934   :  { %11634 = vrcp.f32 %v7027_v62  ;;  %v7039_v46 = vand.u32 2147483648, %v7027_v62  ;;  %vm7033_vm10 = vweird.f32 %v7027_v62  ;;  %v7037_v1 = vand.u32 2147483647, %v7027_v62 }
 0x936   :  { %v7040_v16 = vor.u32 1.1754944e-38, %v7039_v46  ;;  %vm7038_vm12 = vcmp.eq.f32.partialorder %v7037_v1, 8.507059e+37 }
 0x93a   :  { %v11635_v4 = vpop.eup %11634 }
 0x93b   :  { %v7029_v5 = vmul.f32 %v11635_v4, %v7027_v62  ;;  %vm7034_vm9 = vweird.f32 %v11635_v4 }
 0x93c   :  { %vm7035_vm11 = vmor %vm7033_vm10, %vm7034_vm9  ;;  %vm7403_vm9 = vcmask 64512   ;;  %vm7426_vm10 = vcmask 162816  }
 0x93d   :  { %v7030_v10 = vsub.f32 1.0, %v7029_v5 }
 0x93f   :  { %v7031_v12 = vmul.f32 %v11635_v4, %v7030_v10 }
 0x941   :  { %v7032_v14 = vadd.f32 %v11635_v4, %v7031_v12 }
 0x943   :  { %v7036_v60 = vsel %vm7035_vm11, %v11635_v4, %v7032_v14 }
 0x944   :  { %v7041_v58 = vsel %vm7038_vm12, %v7040_v16, %v7036_v60 }
 0x945   :  { %v7047_v30 = vmul.f32 %v7045_v21, %v7041_v58 }
 0x988   :  { %v7050_v18 = vpop.permute.xlu2 %7049 }
 0x989   :  { %v7052_v19 = vmul.f32 %v7050_v18, %v7041_v58 }
 0x98b   :  { %7054 = vrot.lane.b32.xlu1 %v7052_v19, %s11887_s21 }
 0x9fd   :  { %v7055_v56 = vpop.permute.xlu1 %7054 }
 0x9fe   :  { %v7057_v59 = vadd.f32 %v7055_v56, %v7047_v30 }
 0xa00   :  { %11636 = vtanh.f32 %v7057_v59 }
 0xa06   :  { %v11637_v33 = vpop.eup %11636 }
 0xa07   :  { %7060 = vrot.lane.b32.xlu2 %v11637_v33, %s11867_s24 }
 0xa61   :  { %v7061_v15 = vpop.permute.xlu2 %7060 }
 0xa62   :  { %v7063_v13 = vmul.f32 %v7061_v15, %v7041_v58 }
 0xa64   :  { %7086 = vperm.xlu2 %11589, %v7063_v13   ;;  %7076 = vperm.xlu1 %11588, %v7063_v13  }
 0xa65   :  { %7066 = vperm.xlu0 %11587, %v7063_v13  }
 0xa6c   :  { %11591 = vset.pattern.permute.xlu2 %v11900_v39  ;;  %11590 = vset.pattern.permute.xlu1 %v11901_v40 }
 0xa6d   :  { %11592 = vset.pattern.permute.xlu0 %v11902_v24  ;;  %7106 = vperm.xlu2 %11591, %v7063_v13  }
 0xa6e   :  { %7096 = vperm.xlu1 %11590, %v7063_v13   ;;  %7116 = vperm.xlu0 %11592, %v7063_v13  }
 0xa75   :  { %11594 = vset.pattern.permute.xlu2 %v11903_v43 }
 0xa76   :  { %11593 = vset.pattern.permute.xlu1 %v11904_v45  ;;  %7136 = vperm.xlu2 %11594, %v7063_v13  }
 0xa77   :  { %7126 = vperm.xlu1 %11593, %v7063_v13  }
 0xabe   :  { %v7087_v9 = vpop.permute.xlu2 %7086 }
 0xabf   :  { %v7089_v44 = vmul.f32 %v7087_v9, %v12490_v36 }
 0xac1   :  { %7091 = vrot.lane.b32.xlu0 %v7089_v44, %s11905_s23 }
 0xac7   :  { %v7107_v53 = vpop.permute.xlu2 %7106 }
 0xac8   :  { %v7109_v31 = vmul.f32 %v7107_v53, %v12508_v7 }
 0xad0   :  { %v7137_v6 = vpop.permute.xlu2 %7136 }
 0xad1   :  { %v7139_v42 = vmul.f32 %v7137_v6, %v12518_v8  ;;  %v11909_v6 = vmov 127  }
 0xad6   :  { %v7077_v47 = vpop.permute.xlu1 %7076 }
 0xad7   :  { %v7079_v50 = vmul.f32 %v7077_v47, %v12500_v52  ;;  %v7067_v51 = vpop.permute.xlu0 %7066 }
 0xad8   :  { %v7069_v20 = vmul.f32 %v7067_v51, %v12494_v63 }
 0xad9   :  { %7081 = vrot.lane.b32.xlu2 %v7079_v50, %s11905_s23 }
 0xada   :  { %7071 = vrot.lane.b32.xlu1 %v7069_v20, %s11905_s23 }
 0xae0   :  { %v7097_v49 = vpop.permute.xlu1 %7096  ;;  %v7117_v28 = vpop.permute.xlu0 %7116 }
 0xae1   :  { %v7099_v32 = vmul.f32 %v7097_v49, %v12498_v41  ;;  %v7119_v23 = vmul.f32 %v7117_v28, %v12510_v48  ;;  %7111 = vrot.lane.b32.xlu2 %v7109_v31, %s11905_s23  ;;  %v11906_v31 = vmov 121   ;;  %v11907_v49 = vmov 120  }
 0xae2   :  { %11596 = vset.pattern.permute.xlu2 %v11906_v31  ;;  %11595 = vset.pattern.permute.xlu1 %v11907_v49  ;;  %v11908_v28 = vmov 122  }
 0xae3   :  { %7101 = vrot.lane.b32.xlu1 %v7099_v32, %s11905_s23  ;;  %7121 = vrot.lane.b32.xlu0 %v7119_v23, %s11905_s23 }
 0xae4   :  { %11597 = vset.pattern.permute.xlu0 %v11908_v28 }
 0xae9   :  { %v7127_v38 = vpop.permute.xlu1 %7126  ;;  %7141 = vrot.lane.b32.xlu2 %v7139_v42, %s11905_s23  ;;  %v11910_v42 = vmov 124  }
 0xaea   :  { %v7129_v35 = vmul.f32 %v7127_v38, %v12506_v2  ;;  %v11911_v38 = vmov 123  }
 0xaec   :  { %7131 = vrot.lane.b32.xlu1 %v7129_v35, %s11905_s23  ;;  %v11912_v35 = vmov 126  }
 0xaf4   :  { %7165 = vrot.lane.b32.xlu1 %v7057_v59, %s11871_s14 }
 0xb33   :  { %v7082_v37 = vpop.permute.xlu2 %7081  ;;  %v7092_v5 = vpop.permute.xlu0 %7091 }
 0xb3b   :  { %v7112_v14 = vpop.permute.xlu2 %7111 }
 0xb43   :  { %v7142_v19 = vpop.permute.xlu2 %7141 }
 0xb4c   :  { %v7072_v0 = vpop.permute.xlu1 %7071 }
 0xb4d   :  { %v7074_v62 = vadd.f32 %v7072_v0, %v12477_v55 }
 0xb4f   :  { %v7084_v4 = vadd.f32 %v7082_v37, %v7074_v62  ;;  %v11913_v37 = vmov 125   ;;  %v6736_v62 = vperm.slane %v12474_v22, 1 }
 0xb51   :  { %v7094_v10 = vadd.f32 %v7092_v5, %v7084_v4  ;;  %v6780_v4 = vpop.f32.mrf.mxu3 }
 0xb55   :  { %v7102_v12 = vpop.permute.xlu1 %7101  ;;  %v7122_v60 = vpop.permute.xlu0 %7121 }
 0xb56   :  { %v7104_v46 = vadd.f32 %v7102_v12, %v7094_v10 }
 0xb58   :  { %v7114_v1 = vadd.f32 %v7112_v14, %v7104_v46 }
 0xb5a   :  { %v7124_v16 = vadd.f32 %v7122_v60, %v7114_v1 }
 0xb5e   :  { %v7132_v18 = vpop.permute.xlu1 %7131 }
 0xb5f   :  { %v7134_v58 = vadd.f32 %v7132_v18, %v7124_v16 }
 0xb61   :  { %v7144_v21 = vadd.f32 %v7142_v19, %v7134_v58 }
 0xb63   :  { %11638 = vtanh.f32 %v7144_v21  ;;  %v7145_v56 = vsub.f32 0.0, %v7144_v21 }
 0xb65   :  { %v7146_v59 = vmul.f32 1.442695, %v7145_v56 }
 0xb66   :  { %v7166_v47 = vpop.permute.xlu1 %7165 }
 0xb67   :  { %11640 = vpow2.f32 %v7146_v59 }
 0xb69   :  { %v11639_v30 = vpop.eup %11638 }
 0xb6a   :  { %7170 = vrot.lane.b32.xlu0 %v11639_v30, %s11876_s3 }
 0xb6d   :  { %v11641_v55 = vpop.eup %11640 }
 0xb6e   :  { %v7148_v33 = vadd.f32 1.0, %v11641_v55 }
 0xb70   :  { %11642 = vrcp.f32 %v7148_v33  ;;  %v7160_v39 = vand.u32 2147483648, %v7148_v33  ;;  %vm7154_vm14 = vweird.f32 %v7148_v33  ;;  %v7158_v40 = vand.u32 2147483647, %v7148_v33 }
 0xb72   :  { %v7161_v43 = vor.u32 1.1754944e-38, %v7160_v39  ;;  %vm7159_vm0 = vcmp.eq.f32.partialorder %v7158_v40, 8.507059e+37 }
 0xb76   :  { %v11643_v29 = vpop.eup %11642 }
 0xb77   :  { %v7150_v17 = vmul.f32 %v11643_v29, %v7148_v33  ;;  %vm7155_vm13 = vweird.f32 %v11643_v29 }
 0xb78   :  { %vm7156_vm15 = vmor %vm7154_vm14, %vm7155_vm13 }
 0xb79   :  { %v7151_v25 = vsub.f32 1.0, %v7150_v17 }
 0xb7b   :  { %v7152_v15 = vmul.f32 %v11643_v29, %v7151_v25 }
 0xb7d   :  { %v7153_v13 = vadd.f32 %v11643_v29, %v7152_v15 }
 0xb7f   :  { %v7157_v24 = vsel %vm7156_vm15, %v11643_v29, %v7153_v13 }
 0xb80   :  { %v7162_v45 = vsel %vm7159_vm0, %v7161_v43, %v7157_v24 }
 0xb81   :  { %v7168_v50 = vmul.f32 %v7166_v47, %v7162_v45 }
 0xbdc   :  { %v7171_v9 = vpop.permute.xlu0 %7170 }
 0xbdd   :  { %v7173_v44 = vmul.f32 %v7171_v9, %v7162_v45 }
 0xbdf   :  { %7175 = vrot.lane.b32.xlu2 %v7173_v44, %s11887_s21 }
 0xc39   :  { %v7176_v51 = vpop.permute.xlu2 %7175 }
 0xc3a   :  { %v7178_v20 = vadd.f32 %v7176_v51, %v7168_v50 }
 0xc3c   :  { %11644 = vtanh.f32 %v7178_v20 }
 0xc42   :  { %v11645_v53 = vpop.eup %11644 }
 0xc43   :  { %7181 = vrot.lane.b32.xlu0 %v11645_v53, %s11867_s24 }
 0xcb5   :  { %v7182_v32 = vpop.permute.xlu0 %7181 }
 0xcb6   :  { %v7184_v23 = vmul.f32 %v7182_v32, %v7162_v45 }
 0xcb8   :  { %7199 = vperm.xlu0 %11597, %v7184_v23   ;;  %7193 = vperm.xlu2 %11596, %v7184_v23  }
 0xcb9   :  { %7187 = vperm.xlu1 %11595, %v7184_v23  }
 0xcc0   :  { %11602 = vset.pattern.permute.xlu0 %v11909_v6  ;;  %11599 = vset.pattern.permute.xlu2 %v11910_v42 }
 0xcc1   :  { %11598 = vset.pattern.permute.xlu1 %v11911_v38  ;;  %7229 = vperm.xlu0 %11602, %v7184_v23  }
 0xcc2   :  { %7211 = vperm.xlu2 %11599, %v7184_v23   ;;  %7205 = vperm.xlu1 %11598, %v7184_v23  }
 0xcc9   :  { %11603 = vset.pattern.permute.xlu0 %v11880_v26  ;;  %v12558_v26 = vadd.f32 %v6780_v4, %v6736_v62 }
 0xcca   :  { %11601 = vset.pattern.permute.xlu2 %v11912_v35  ;;  %11600 = vset.pattern.permute.xlu1 %v11913_v37 }
 0xccb   :  { %7223 = vperm.xlu2 %11601, %v7184_v23   ;;  %7217 = vperm.xlu1 %11600, %v7184_v23  }
 0xcd3   :  { %7254 = vrot.lane.b32.xlu2 %v7178_v20, %s11871_s14  ;;  %11604 = vset.pattern.permute.xlu1 %v11882_v3 }
 0xcd4   :  { %11605 = vset.pattern.permute.xlu2 %v11879_v54 }
 0xd12   :  { %v7194_v0 = vpop.permute.xlu2 %7193 }
 0xd13   :  { %v7196_v14 = vmul.f32 %v7194_v0, %v12500_v52 }
 0xd1c   :  { %v7212_v46 = vpop.permute.xlu2 %7211 }
 0xd1d   :  { %v7214_v58 = vmul.f32 %v7212_v46, %v12508_v7 }
 0xd25   :  { %v7224_v19 = vpop.permute.xlu2 %7223 }
 0xd26   :  { %v7226_v55 = vmul.f32 %v7224_v19, %v12506_v2 }
 0xd2a   :  { %v7200_v1 = vpop.permute.xlu0 %7199 }
 0xd2b   :  { %v7188_v5 = vpop.permute.xlu1 %7187  ;;  %v7202_v3 = vmul.f32 %v7200_v1, %v12490_v36 }
 0xd2c   :  { %v7190_v10 = vmul.f32 %v7188_v5, %v12494_v63 }
 0xd2d   :  { %v7255_v32 = vpop.permute.xlu2 %7254 }
 0xd2e   :  { %v7191_v12 = vadd.f32 %v7190_v10, %v12558_v26 }
 0xd30   :  { %v7197_v60 = vadd.f32 %v7196_v14, %v7191_v12 }
 0xd32   :  { %v7203_v18 = vadd.f32 %v7202_v3, %v7197_v60 }
 0xd33   :  { %v7230_v59 = vpop.permute.xlu0 %7229 }
 0xd34   :  { %v7206_v16 = vpop.permute.xlu1 %7205  ;;  %v7232_v29 = vmul.f32 %v7230_v59, %v12518_v8 }
 0xd35   :  { %v7208_v54 = vmul.f32 %v7206_v16, %v12498_v41 }
 0xd37   :  { %v7209_v22 = vadd.f32 %v7208_v54, %v7203_v18 }
 0xd39   :  { %v7215_v30 = vadd.f32 %v7214_v58, %v7209_v22 }
 0xd3d   :  { %v7218_v21 = vpop.permute.xlu1 %7217 }
 0xd3e   :  { %v7220_v56 = vmul.f32 %v7218_v21, %v12510_v48 }
 0xd40   :  { %v7221_v33 = vadd.f32 %v7220_v56, %v7215_v30 }
 0xd42   :  { %v7227_v17 = vadd.f32 %v7226_v55, %v7221_v33 }
 0xd44   :  { %v7233_v25 = vadd.f32 %v7232_v29, %v7227_v17 }
 0xd46   :  { %11646 = vtanh.f32 %v7233_v25  ;;  %v7234_v13 = vsub.f32 0.0, %v7233_v25 }
 0xd48   :  { %v7235_v39 = vmul.f32 1.442695, %v7234_v13 }
 0xd4a   :  { %11648 = vpow2.f32 %v7235_v39 }
 0xd4c   :  { %v11647_v15 = vpop.eup %11646 }
 0xd4d   :  { %7259 = vrot.lane.b32.xlu1 %v11647_v15, %s11876_s3 }
 0xd50   :  { %v11649_v40 = vpop.eup %11648 }
 0xd51   :  { %v7237_v24 = vadd.f32 1.0, %v11649_v40 }
 0xd53   :  { %11650 = vrcp.f32 %v7237_v24  ;;  %v7249_v50 = vand.u32 2147483648, %v7237_v24  ;;  %vm7243_vm2 = vweird.f32 %v7237_v24  ;;  %v7247_v51 = vand.u32 2147483647, %v7237_v24 }
 0xd55   :  { %v7250_v53 = vor.u32 1.1754944e-38, %v7249_v50  ;;  %vm7248_vm4 = vcmp.eq.f32.partialorder %v7247_v51, 8.507059e+37 }
 0xd59   :  { %v11651_v43 = vpop.eup %11650 }
 0xd5a   :  { %v7239_v45 = vmul.f32 %v11651_v43, %v7237_v24  ;;  %vm7244_vm1 = vweird.f32 %v11651_v43 }
 0xd5b   :  { %vm7245_vm3 = vmor %vm7243_vm2, %vm7244_vm1 }
 0xd5c   :  { %v7240_v9 = vsub.f32 1.0, %v7239_v45 }
 0xd5e   :  { %v7241_v44 = vmul.f32 %v11651_v43, %v7240_v9 }
 0xd60   :  { %v7242_v47 = vadd.f32 %v11651_v43, %v7241_v44 }
 0xd62   :  { %v7246_v20 = vsel %vm7245_vm3, %v11651_v43, %v7242_v47 }
 0xd63   :  { %v7251_v49 = vsel %vm7248_vm4, %v7250_v53, %v7246_v20 }
 0xd64   :  { %v7257_v23 = vmul.f32 %v7255_v32, %v7251_v49 }
 0xdbf   :  { %v7260_v31 = vpop.permute.xlu1 %7259 }
 0xdc0   :  { %v7262_v28 = vmul.f32 %v7260_v31, %v7251_v49  ;;  %v7395_v31 = vld [vmem:[#allocation12] sm:$0xff] }
 0xdc1   :  { %7421 = vmatpush.msra.mxu2 %v7395_v31 }
 0xdc2   :  { %7264 = vrot.lane.b32.xlu1 %v7262_v28, %s11887_s21 }
 0xe34   :  { %v7265_v6 = vpop.permute.xlu1 %7264 }
 0xe35   :  { %v7267_v42 = vadd.f32 %v7265_v6, %v7257_v23  ;;  %v11613_v23 = vld [vmem:[#allocation13] ss:$0 sm:$0xff] }
 0xe37   :  { %11652 = vtanh.f32 %v7267_v42 }
 0xe3d   :  { %v11653_v38 = vpop.eup %11652 }
 0xe3e   :  { %7270 = vrot.lane.b32.xlu2 %v11653_v38, %s11867_s24 }
 0xe98   :  { %v7271_v35 = vpop.permute.xlu2 %7270 }
 0xe99   :  { %v7273_v37 = vmul.f32 %v7271_v35, %v7251_v49 }
 0xe9b   :  { %7296 = vperm.xlu2 %11605, %v7273_v37   ;;  %7286 = vperm.xlu1 %11604, %v7273_v37  }
 0xe9c   :  { %7276 = vperm.xlu0 %11603, %v7273_v37  }
 0xea3   :  { %11607 = vset.pattern.permute.xlu2 %v11878_v27  ;;  %11606 = vset.pattern.permute.xlu1 %v11881_v11 }
 0xea4   :  { %11608 = vset.pattern.permute.xlu0 %v11884_v61  ;;  %7316 = vperm.xlu2 %11607, %v7273_v37  }
 0xea5   :  { %7306 = vperm.xlu1 %11606, %v7273_v37   ;;  %7326 = vperm.xlu0 %11608, %v7273_v37  }
 0xeac   :  { %11610 = vset.pattern.permute.xlu2 %v11885_v34 }
 0xead   :  { %11609 = vset.pattern.permute.xlu1 %v11883_v57  ;;  %7346 = vperm.xlu2 %11610, %v7273_v37  }
 0xeae   :  { %7336 = vperm.xlu1 %11609, %v7273_v37   ;;  %11611 = vset.pattern.permute.xlu0 %v11885_v34 }
 0xef5   :  { %v7297_v0 = vpop.permute.xlu2 %7296 }
 0xef6   :  { %v7299_v62 = vmul.f32 %v7297_v0, %v12490_v36 }
 0xef8   :  { %7301 = vrot.lane.b32.xlu0 %v7299_v62, %s11871_s14 }
 0xefe   :  { %v7317_v5 = vpop.permute.xlu2 %7316 }
 0xeff   :  { %v7319_v57 = vmul.f32 %v7317_v5, %v12508_v7 }
 0xf0d   :  { %v7287_v27 = vpop.permute.xlu1 %7286 }
 0xf0e   :  { %v7289_v11 = vmul.f32 %v7287_v27, %v12500_v52  ;;  %v7277_v61 = vpop.permute.xlu0 %7276 }
 0xf0f   :  { %v7279_v4 = vmul.f32 %v7277_v61, %v12494_v63  ;;  %v7347_v63 = vpop.permute.xlu2 %7346 }
 0xf10   :  { %7291 = vrot.lane.b32.xlu2 %v7289_v11, %s11871_s14  ;;  %v7349_v52 = vmul.f32 %v7347_v63, %v12518_v8 }
 0xf11   :  { %7281 = vrot.lane.b32.xlu1 %v7279_v4, %s11871_s14 }
 0xf17   :  { %v7307_v10 = vpop.permute.xlu1 %7306  ;;  %v7327_v34 = vpop.permute.xlu0 %7326 }
 0xf18   :  { %v7309_v12 = vmul.f32 %v7307_v10, %v12498_v41  ;;  %v7329_v36 = vmul.f32 %v7327_v34, %v12510_v48  ;;  %7321 = vrot.lane.b32.xlu2 %v7319_v57, %s11871_s14 }
 0xf1a   :  { %7311 = vrot.lane.b32.xlu1 %v7309_v12, %s11871_s14  ;;  %7331 = vrot.lane.b32.xlu0 %v7329_v36, %s11871_s14 }
 0xf20   :  { %v7337_v14 = vpop.permute.xlu1 %7336  ;;  %7351 = vrot.lane.b32.xlu2 %v7349_v52, %s11871_s14 }
 0xf21   :  { %v7339_v7 = vmul.f32 %v7337_v14, %v12506_v2 }
 0xf23   :  { %7341 = vrot.lane.b32.xlu1 %v7339_v7, %s11871_s14 }
 0xf2b   :  { %7375 = vrot.lane.b32.xlu1 %v7267_v42, %s11871_s14  ;;  %s11914_s14 = smov 72  }
 0xf6a   :  { %v7292_v41 = vpop.permute.xlu2 %7291  ;;  %v7302_v60 = vpop.permute.xlu0 %7301 }
 0xf72   :  { %v7322_v54 = vpop.permute.xlu2 %7321 }
 0xf7a   :  { %v7352_v2 = vpop.permute.xlu2 %7351 }
 0xf83   :  { %v7282_v48 = vpop.permute.xlu1 %7281 }
 0xf84   :  { %v7284_v46 = vadd.f32 %v7282_v48, %v12558_v26 }
 0xf86   :  { %v7294_v1 = vadd.f32 %v7292_v41, %v7284_v46 }
 0xf88   :  { %v7304_v16 = vadd.f32 %v7302_v60, %v7294_v1 }
 0xf8c   :  { %v7312_v3 = vpop.permute.xlu1 %7311  ;;  %v7332_v22 = vpop.permute.xlu0 %7331 }
 0xf8d   :  { %v7314_v18 = vadd.f32 %v7312_v3, %v7304_v16 }
 0xf8f   :  { %v7324_v8 = vadd.f32 %v7322_v54, %v7314_v18 }
 0xf91   :  { %v7334_v58 = vadd.f32 %v7332_v22, %v7324_v8 }
 0xf95   :  { %v7342_v19 = vpop.permute.xlu1 %7341 }
 0xf96   :  { %v7344_v21 = vadd.f32 %v7342_v19, %v7334_v58 }
 0xf98   :  { %v7354_v30 = vadd.f32 %v7352_v2, %v7344_v21 }
 0xf9a   :  { %11654 = vtanh.f32 %v7354_v30  ;;  %v7355_v59 = vsub.f32 0.0, %v7354_v30 }
 0xf9c   :  { %v7356_v55 = vmul.f32 1.442695, %v7355_v59 }
 0xf9d   :  { %v7376_v47 = vpop.permute.xlu1 %7375 }
 0xf9e   :  { %11656 = vpow2.f32 %v7356_v55 }
 0xfa0   :  { %v11655_v56 = vpop.eup %11654 }
 0xfa1   :  { %7380 = vrot.lane.b32.xlu0 %v11655_v56, %s11876_s3 }
 0xfa4   :  { %v11657_v26 = vpop.eup %11656 }
 0xfa5   :  { %v7358_v33 = vadd.f32 1.0, %v11657_v26 }
 0xfa7   :  { %11658 = vrcp.f32 %v7358_v33  ;;  %v7370_v39 = vand.u32 2147483648, %v7358_v33  ;;  %vm7364_vm6 = vweird.f32 %v7358_v33  ;;  %v7368_v40 = vand.u32 2147483647, %v7358_v33 }
 0xfa9   :  { %v7371_v43 = vor.u32 1.1754944e-38, %v7370_v39  ;;  %vm7369_vm8 = vcmp.eq.f32.partialorder %v7368_v40, 8.507059e+37 }
 0xfad   :  { %v11659_v29 = vpop.eup %11658 }
 0xfae   :  { %v7360_v17 = vmul.f32 %v11659_v29, %v7358_v33  ;;  %vm7365_vm5 = vweird.f32 %v11659_v29 }
 0xfaf   :  { %vm7366_vm7 = vmor %vm7364_vm6, %vm7365_vm5 }
 0xfb0   :  { %v7361_v25 = vsub.f32 1.0, %v7360_v17 }
 0xfb2   :  { %v7362_v15 = vmul.f32 %v11659_v29, %v7361_v25 }
 0xfb4   :  { %v7363_v13 = vadd.f32 %v11659_v29, %v7362_v15 }
 0xfb6   :  { %v7367_v24 = vsel %vm7366_vm7, %v11659_v29, %v7363_v13 }
 0xfb7   :  { %v7372_v45 = vsel %vm7369_vm8, %v7371_v43, %v7367_v24 }
 0xfb8   :  { %v7378_v50 = vmul.f32 %v7376_v47, %v7372_v45 }
0x1013   :  { %v7381_v9 = vpop.permute.xlu0 %7380 }
0x1014   :  { %v7383_v44 = vmul.f32 %v7381_v9, %v7372_v45 }
0x1016   :  { %7385 = vrot.lane.b32.xlu2 %v7383_v44, %s11887_s21 }
0x1070   :  { %v7386_v51 = vpop.permute.xlu2 %7385 }
0x1071   :  { %v7388_v20 = vadd.f32 %v7386_v51, %v7378_v50 }
0x1073   :  { %11660 = vtanh.f32 %v7388_v20 }
0x1079   :  { %v11661_v53 = vpop.eup %11660 }
0x107a   :  { %7391 = vrot.lane.b32.xlu0 %v11661_v53, %s11867_s24 }
0x10ec   :  { %v7392_v49 = vpop.permute.xlu0 %7391 }
0x10ed   :  { %v7394_v28 = vmul.f32 %v7392_v49, %v7372_v45 }
0x10ef   :  { %7401 = vrot.lane.b32.xlu1 %v7394_v28, %s11914_s14 }
0x1161   :  { %v7402_v32 = vpop.permute.xlu1 %7401 }
0x1162   :  { %10703 = vmatmul.msk.f32.vlgmr.msra.gmra.mxu2 %vm7403_vm9, %v7402_v32 }
0x11e5   :  { %v7423_v6 = vpop.f32.mrf.mxu2 }
0x11e6   :  { %v7424_v42 = vadd.f32 %v11613_v23, %v7423_v6 }
0x11e8   :  { %7427 = vst.msk [vmem:[%s12611_s10] sm:$0xff] %vm7426_vm10, %v7424_v42 }
0x11e9   :  { %7432 = vsyncpa [#allocation3], 1 }
0x11ea   :  { %7433 = vsyncpa [#allocation5], 1 }
0x11eb   :  { %7434 = vsyncpa [#allocation8], 1 }
0x11ec   :  { %7435 = vsyncpa [#allocation11], 1 }
0x11ed   :  { %7436 = vsyncpa [#allocation14], 1 }

</bundles_post_ra>
